<compile_context>
chip_gen: v7x
topology: tpu7x:2x2x1
jax: 0.10.0
libtpu: 0.0.40
codegen_flags: <defaults>
</compile_context>

<pallas_src>
import math

import jax
import jax.numpy as jnp
from jax.experimental import pallas as pl
from jax.experimental.pallas import tpu as pltpu

# ----------------------------- model config ---------------------------------
EMB = 32            # emb_size (d_model)
NHEAD = 8
HEAD_DIM = EMB // NHEAD
FFN = 64            # dim_feedforward
NUM_ENC = 2
NUM_DEC = 2
SRC_VOCAB = 50
TGT_VOCAB = 60
VOCAB_PAD = 128     # generator output padded to a lane-dense 128 columns
LN_EPS = 1e-5
NEG_INF = -1e9      # additive mask value (instead of -inf)

# ------------------------- packed parameter layout ---------------------------
# Attention modules (index `am`): 0..1 encoder self, 2..3 decoder self,
# 4..5 decoder cross.  attn_w row = 4*am + role (0=q,1=k,2=v,3=o).
N_ATTN_MODS = NUM_ENC + 2 * NUM_DEC                 # 6
N_LN = 2 * NUM_ENC + 3 * NUM_DEC                    # 10
N_FFN = NUM_ENC + NUM_DEC                           # 4

# One [VEC_ROWS, 128] f32 slab holds every bias / LayerNorm vector.
VEC_WIDTH = 128
VEC_ATTN_B = 0                                      # 4*N_ATTN_MODS rows
VEC_LN_G = VEC_ATTN_B + 4 * N_ATTN_MODS             # 24
VEC_LN_B = VEC_LN_G + N_LN                          # 34
VEC_FFN_B1 = VEC_LN_B + N_LN                        # 44
VEC_FFN_B2 = VEC_FFN_B1 + N_FFN                     # 48
VEC_GEN_B = VEC_FFN_B2 + N_FFN                      # 52
VEC_ROWS = ((VEC_GEN_B + 1 + 7) // 8) * 8           # 56


# ----------------------------- fused Pallas kernel ---------------------------
def fused_transformer_kernel(src_x_ref, tgt_x_ref, enc_mask_ref,
                             dself_mask_ref, dcross_mask_ref,
                             attn_w_ref, ffn_w1_ref, ffn_w2_ref,
                             gen_w_ref, vecs_ref, out_ref):

    def vec(row, width):
        # [1, width] f32 slice out of the single bias/LN slab.
        return vecs_ref[row:row + 1, 0:width]

    def linear(x, w, bias):
        # bf16 MXU operands, f32 accumulate; bias add in f32.
        y = jnp.dot(x.astype(w.dtype), w, preferred_element_type=jnp.float32)
        return y + bias

    def layer_norm(x, ln_idx):
        g = vec(VEC_LN_G + ln_idx, EMB)
        b = vec(VEC_LN_B + ln_idx, EMB)
        mu = jnp.mean(x, axis=-1, keepdims=True)
        c = x - mu
        var = jnp.mean(c * c, axis=-1, keepdims=True)   # biased var (PyTorch LN)
        return c * jax.lax.rsqrt(var + LN_EPS) * g + b

    def mha(x_q, x_kv, mask, am):
        """Multi-head attention on full [R_q, EMB] / [R_k, EMB] slabs.

        Projections and the output projection are single full-width matmuls;
        only the scores (QK^T) and PV matmuls run per head.  `mask` is the
        block-diagonal additive mask [R_q, R_k] (cross-batch entries = -1e9).
        The 1/sqrt(head_dim) scale is folded into wq / bq.
        """
        base = 4 * am
        q = linear(x_q, attn_w_ref[base + 0], vec(VEC_ATTN_B + base + 0, EMB))
        k = linear(x_kv, attn_w_ref[base + 1], vec(VEC_ATTN_B + base + 1, EMB))
        v = linear(x_kv, attn_w_ref[base + 2], vec(VEC_ATTN_B + base + 2, EMB))
        heads = []
        for h in range(NHEAD):
            sl = slice(h * HEAD_DIM, (h + 1) * HEAD_DIM)
            qh = q[:, sl].astype(jnp.bfloat16)
            kh = k[:, sl].astype(jnp.bfloat16)
            vh = v[:, sl].astype(jnp.bfloat16)
            # scores: contract last dims directly (no K transpose)
            s = jax.lax.dot_general(qh, kh, (((1,), (1,)), ((), ())),
                                    preferred_element_type=jnp.float32)
            s = s + mask
            s = s - jnp.max(s, axis=-1, keepdims=True)
            p = jnp.exp(s)
            p = p * pl.reciprocal(jnp.sum(p, axis=-1, keepdims=True),
                                  approx=True)
            heads.append(jnp.dot(p.astype(jnp.bfloat16), vh,
                                 preferred_element_type=jnp.float32))
        o = jnp.concatenate(heads, axis=-1)              # [R_q, EMB] f32
        return linear(o, attn_w_ref[base + 3], vec(VEC_ATTN_B + base + 3, EMB))

    def ffn(x, fi):
        h = linear(x, ffn_w1_ref[fi], vec(VEC_FFN_B1 + fi, FFN))
        h = jnp.maximum(h, 0.0)
        return linear(h, ffn_w2_ref[fi], vec(VEC_FFN_B2 + fi, EMB))

    # ------------------------------ encoder ----------------------------------
    x = src_x_ref[...]                                   # [N*S, EMB] f32
    enc_mask = enc_mask_ref[...]                         # [N*S, N*S]
    for l in range(NUM_ENC):
        x = layer_norm(x + mha(x, x, enc_mask, l), 2 * l)
        x = layer_norm(x + ffn(x, l), 2 * l + 1)
    memory = x

    # ------------------------------ decoder ----------------------------------
    y = tgt_x_ref[...]                                   # [N*T, EMB] f32
    dself_mask = dself_mask_ref[...]                     # [N*T, N*T]
    dcross_mask = dcross_mask_ref[...]                   # [N*T, N*S]
    for l in range(NUM_DEC):
        lb = 2 * NUM_ENC + 3 * l
        y = layer_norm(y + mha(y, y, dself_mask, NUM_ENC + l), lb)
        y = layer_norm(
            y + mha(y, memory, dcross_mask, NUM_ENC + NUM_DEC + l), lb + 1)
        y = layer_norm(y + ffn(y, NUM_ENC + l), lb + 2)

    # -------------- generator: one matmul, one lane-dense full store ---------
    logits = (jnp.dot(y.astype(jnp.bfloat16), gen_w_ref[...],
                      preferred_element_type=jnp.float32)
              + vec(VEC_GEN_B, VOCAB_PAD))
    out_ref[...] = logits.astype(out_ref.dtype)


# ----------------------------- wrapper (plain JAX) ---------------------------
def build_block_diag_mask(attn_mask, key_padding_mask, n, tq, tk):
    """Per-batch additive mask embedded into a block-diagonal [n*tq, n*tk].

    Diagonal blocks = attn_mask + key-padding mask; off-diagonal (cross-batch)
    blocks = NEG_INF, which underflows to exactly 0 after softmax.
    """
    if attn_mask is None:
        m = jnp.zeros((tq, tk), jnp.float32)
    else:
        m = attn_mask.astype(jnp.float32)
    per = jnp.broadcast_to(m[None], (n, tq, tk))
    if key_padding_mask is not None:
        per = per + jnp.where(key_padding_mask, NEG_INF, 0.0)[:, None, :]
    full = jnp.full((n, tq, n, tk), NEG_INF, dtype=jnp.float32)
    idx = jnp.arange(n)
    full = full.at[idx, :, idx, :].set(per)
    return full.reshape(n * tq, n * tk)


@jax.jit
def seq2seq_forward(packed, src, trg, src_mask, tgt_mask,
                    src_padding_mask, tgt_padding_mask,
                    memory_key_padding_mask):
    S, N = src.shape
    T = trg.shape[0]
    pe = packed["pos"]

    # token embedding * sqrt(E) + positional encoding (dropout = identity)
    src_emb = jnp.take(packed["src_emb"], src, axis=0) * math.sqrt(EMB) + pe[:S]
    tgt_emb = jnp.take(packed["tgt_emb"], trg, axis=0) * math.sqrt(EMB) + pe[:T]
    # kernel consumes batch-major flat slabs: row = n * seq + t
    src_x = src_emb.transpose(1, 0, 2).reshape(N * S, EMB)
    tgt_x = tgt_emb.transpose(1, 0, 2).reshape(N * T, EMB)

    enc_mask = build_block_diag_mask(src_mask, src_padding_mask, N, S, S)
    dself_mask = build_block_diag_mask(tgt_mask, tgt_padding_mask, N, T, T)
    dcross_mask = build_block_diag_mask(None, memory_key_padding_mask, N, T, S)

    args = (src_x, tgt_x, enc_mask, dself_mask, dcross_mask,
            packed["attn_w"], packed["ffn_w1"], packed["ffn_w2"],
            packed["gen_w"], packed["vecs"])

    out = pl.pallas_call(
        fused_transformer_kernel,
        out_shape=jax.ShapeDtypeStruct((N * T, VOCAB_PAD), jnp.float32),
        in_specs=[pl.BlockSpec(memory_space=pltpu.MemorySpace.VMEM)] * len(args),
        out_specs=pl.BlockSpec(memory_space=pltpu.MemorySpace.VMEM),
    )(*args)

    logits = out[:, :TGT_VOCAB].reshape(N, T, TGT_VOCAB).transpose(1, 0, 2)
    return logits                                          # [T, N, TGT_VOCAB]


# ----------------------------- parameter handling ----------------------------
def make_pos_embedding(maxlen=5000):
    den = jnp.exp(-jnp.arange(0, EMB, 2, dtype=jnp.float32)
                  * math.log(10000.0) / EMB)
    pos = jnp.arange(maxlen, dtype=jnp.float32)[:, None]
    pe = jnp.zeros((maxlen, EMB), jnp.float32)
    pe = pe.at[:, 0::2].set(jnp.sin(pos * den))
    pe = pe.at[:, 1::2].set(jnp.cos(pos * den))
    return pe[:, None, :]                                  # [maxlen, 1, E]


def init_params(key):
    """PyTorch-layout parameters (in_proj [3E,E], out_proj [E,E], ...)."""
    keys = iter(jax.random.split(key, 64))

    def nrm(shape):
        return jax.random.normal(next(keys), shape, jnp.float32) * 0.02

    def attn_p():
        return dict(in_w=nrm((3 * EMB, EMB)),
                    in_b=jnp.zeros((3 * EMB,), jnp.float32),
                    out_w=nrm((EMB, EMB)),
                    out_b=jnp.zeros((EMB,), jnp.float32))

    def ln():
        return jnp.ones((EMB,), jnp.float32), jnp.zeros((EMB,), jnp.float32)

    enc = []
    for _ in range(NUM_ENC):
        g1, b1 = ln(); g2, b2 = ln()
        enc.append(dict(self_attn=attn_p(),
                        lin1_w=nrm((FFN, EMB)), lin1_b=jnp.zeros((FFN,), jnp.float32),
                        lin2_w=nrm((EMB, FFN)), lin2_b=jnp.zeros((EMB,), jnp.float32),
                        norm1_g=g1, norm1_b=b1, norm2_g=g2, norm2_b=b2))
    dec = []
    for _ in range(NUM_DEC):
        g1, b1 = ln(); g2, b2 = ln(); g3, b3 = ln()
        dec.append(dict(self_attn=attn_p(), cross_attn=attn_p(),
                        lin1_w=nrm((FFN, EMB)), lin1_b=jnp.zeros((FFN,), jnp.float32),
                        lin2_w=nrm((EMB, FFN)), lin2_b=jnp.zeros((EMB,), jnp.float32),
                        norm1_g=g1, norm1_b=b1, norm2_g=g2, norm2_b=b2,
                        norm3_g=g3, norm3_b=b3))
    return dict(
        enc=enc, dec=dec,
        gen_w=nrm((TGT_VOCAB, EMB)), gen_b=jnp.zeros((TGT_VOCAB,), jnp.float32),
        src_emb=nrm((SRC_VOCAB, EMB)), tgt_emb=nrm((TGT_VOCAB, EMB)),
        pos=make_pos_embedding(),
    )


def pack_params(raw):
    """Re-layout weights into the 5 slabs the fused kernel consumes (once)."""
    scale = 1.0 / math.sqrt(HEAD_DIM)
    WDT = jnp.bfloat16            # MXU-operand dtype (f32 accumulate in-kernel)

    attn_w, attn_b = [], []

    def add_attn(p):
        in_w, in_b = p["in_w"], p["in_b"]
        attn_w.append(in_w[0:EMB].T * scale)               # wq (scale folded)
        attn_w.append(in_w[EMB:2 * EMB].T)                 # wk
        attn_w.append(in_w[2 * EMB:3 * EMB].T)             # wv
        attn_w.append(p["out_w"].T)                        # wo
        attn_b.append(in_b[0:EMB] * scale)
        attn_b.append(in_b[EMB:2 * EMB])
        attn_b.append(in_b[2 * EMB:3 * EMB])
        attn_b.append(p["out_b"])

    for l in raw["enc"]:
        add_attn(l["self_attn"])
    for l in raw["dec"]:
        add_attn(l["self_attn"])
    for l in raw["dec"]:
        add_attn(l["cross_attn"])

    ln_g, ln_b = [], []
    for l in raw["enc"]:
        ln_g += [l["norm1_g"], l["norm2_g"]]
        ln_b += [l["norm1_b"], l["norm2_b"]]
    for l in raw["dec"]:
        ln_g += [l["norm1_g"], l["norm2_g"], l["norm3_g"]]
        ln_b += [l["norm1_b"], l["norm2_b"], l["norm3_b"]]

    ffn_layers = list(raw["enc"]) + list(raw["dec"])
    ffn_w1 = [l["lin1_w"].T for l in ffn_layers]
    ffn_w2 = [l["lin2_w"].T for l in ffn_layers]
    ffn_b1 = [l["lin1_b"] for l in ffn_layers]
    ffn_b2 = [l["lin2_b"] for l in ffn_layers]

    gen_w = jnp.pad(raw["gen_w"].T, ((0, 0), (0, VOCAB_PAD - TGT_VOCAB)))
    gen_b = jnp.pad(raw["gen_b"], (0, VOCAB_PAD - TGT_VOCAB))

    def row(v):
        v = jnp.asarray(v, jnp.float32)
        return jnp.pad(v, (0, VEC_WIDTH - v.shape[0]))

    rows = [jnp.zeros((VEC_WIDTH,), jnp.float32)] * VEC_ROWS
    for i, b in enumerate(attn_b):
        rows[VEC_ATTN_B + i] = row(b)
    for i, g in enumerate(ln_g):
        rows[VEC_LN_G + i] = row(g)
    for i, b in enumerate(ln_b):
        rows[VEC_LN_B + i] = row(b)
    for i, b in enumerate(ffn_b1):
        rows[VEC_FFN_B1 + i] = row(b)
    for i, b in enumerate(ffn_b2):
        rows[VEC_FFN_B2 + i] = row(b)
    rows[VEC_GEN_B] = row(gen_b)

    return dict(
        attn_w=jnp.stack(attn_w).astype(WDT),      # [24, EMB, EMB]
        ffn_w1=jnp.stack(ffn_w1).astype(WDT),      # [4, EMB, FFN]
        ffn_w2=jnp.stack(ffn_w2).astype(WDT),      # [4, FFN, EMB]
        gen_w=gen_w.astype(WDT),                   # [EMB, VOCAB_PAD]
        vecs=jnp.stack(rows),                      # [VEC_ROWS, 128] f32
        pos=raw["pos"], src_emb=raw["src_emb"], tgt_emb=raw["tgt_emb"],
    )


# ----------------------------------- main ------------------------------------
if __name__ == "__main__":
    key = jax.random.PRNGKey(0)
    pkey, skey, tkey = jax.random.split(key, 3)
    packed = pack_params(init_params(pkey))

    S, T, N = 8, 8, 2                                      # src len, tgt len, batch
    src = jax.random.randint(skey, (S, N), 0, SRC_VOCAB, dtype=jnp.int32)
    trg = jax.random.randint(tkey, (T, N), 0, TGT_VOCAB, dtype=jnp.int32)

    src_mask = jnp.zeros((S, S), jnp.float32)
    tgt_mask = jnp.where(jnp.triu(jnp.ones((T, T), jnp.bool_), k=1), NEG_INF, 0.0)

    src_padding_mask = jnp.zeros((N, S), jnp.bool_).at[0, -2:].set(True)
    tgt_padding_mask = jnp.zeros((N, T), jnp.bool_).at[1, -1:].set(True)
    memory_key_padding_mask = src_padding_mask

    logits = seq2seq_forward(packed, src, trg, src_mask, tgt_mask,
                             src_padding_mask, tgt_padding_mask,
                             memory_key_padding_mask)
    logits = jax.block_until_ready(logits)

    assert logits.shape == (T, N, TGT_VOCAB), logits.shape
    assert bool(jnp.all(jnp.isfinite(logits)))
    print("KERNEL_OK")
</pallas_src>

<mosaic_0001>
module attributes {stable_mosaic.version = 11 : i64} {
  func.func @fused_transformer_kernel(%arg0: memref<16x32xf32, #tpu.memory_space<vmem>>, %arg1: memref<16x32xf32, #tpu.memory_space<vmem>>, %arg2: memref<16x16xf32, #tpu.memory_space<vmem>>, %arg3: memref<16x16xf32, #tpu.memory_space<vmem>>, %arg4: memref<16x16xf32, #tpu.memory_space<vmem>>, %arg5: memref<24x32x32xbf16, #tpu.memory_space<vmem>>, %arg6: memref<4x32x64xbf16, #tpu.memory_space<vmem>>, %arg7: memref<4x64x32xbf16, #tpu.memory_space<vmem>>, %arg8: memref<32x128xbf16, #tpu.memory_space<vmem>>, %arg9: memref<56x128xf32, #tpu.memory_space<vmem>>, %arg10: memref<16x128xf32, #tpu.memory_space<vmem>>) attributes {dimension_semantics = [], scalar_prefetch = 0 : i64, scratch_operands = 0 : i64, tpu.core_type = #tpu.core_type<tc>} {
    %c0 = arith.constant 0 : index
    %c0_0 = arith.constant 0 : index
    %0 = vector.load %arg0[%c0, %c0_0] : memref<16x32xf32, #tpu.memory_space<vmem>>, vector<16x32xf32>
    %c0_1 = arith.constant 0 : index
    %c0_2 = arith.constant 0 : index
    %1 = vector.load %arg2[%c0_1, %c0_2] : memref<16x16xf32, #tpu.memory_space<vmem>>, vector<16x16xf32>
    %c0_3 = arith.constant 0 : index
    %c0_4 = arith.constant 0 : index
    %c0_5 = arith.constant 0 : index
    %2 = vector.load %arg5[%c0_3, %c0_4, %c0_5] : memref<24x32x32xbf16, #tpu.memory_space<vmem>>, vector<1x32x32xbf16>
    %3 = vector.shape_cast %2 : vector<1x32x32xbf16> to vector<32x32xbf16>
    %c0_6 = arith.constant 0 : index
    %c0_7 = arith.constant 0 : index
    %4 = vector.load %arg9[%c0_6, %c0_7] : memref<56x128xf32, #tpu.memory_space<vmem>>, vector<1x32xf32>
    %5 = arith.truncf %0 : vector<16x32xf32> to vector<16x32xbf16>
    %cst = arith.constant dense<0.000000e+00> : vector<16x32xf32>
    %6 = tpu.matmul %5, %3, %cst {dimension_numbers = #tpu.dot_dimension_numbers<[1], [0], [0], [1], [0, 0, 1, 1], [], []>} : vector<16x32xbf16>, vector<32x32xbf16>, vector<16x32xf32> -> vector<16x32xf32>
    %7 = vector.broadcast %4 : vector<1x32xf32> to vector<16x32xf32>
    %8 = arith.addf %6, %7 : vector<16x32xf32>
    %c1 = arith.constant 1 : index
    %c0_8 = arith.constant 0 : index
    %c0_9 = arith.constant 0 : index
    %9 = vector.load %arg5[%c1, %c0_8, %c0_9] : memref<24x32x32xbf16, #tpu.memory_space<vmem>>, vector<1x32x32xbf16>
    %10 = vector.shape_cast %9 : vector<1x32x32xbf16> to vector<32x32xbf16>
    %c1_10 = arith.constant 1 : index
    %c0_11 = arith.constant 0 : index
    %11 = vector.load %arg9[%c1_10, %c0_11] : memref<56x128xf32, #tpu.memory_space<vmem>>, vector<1x32xf32>
    %12 = arith.truncf %0 : vector<16x32xf32> to vector<16x32xbf16>
    %cst_12 = arith.constant dense<0.000000e+00> : vector<16x32xf32>
    %13 = tpu.matmul %12, %10, %cst_12 {dimension_numbers = #tpu.dot_dimension_numbers<[1], [0], [0], [1], [0, 0, 1, 1], [], []>} : vector<16x32xbf16>, vector<32x32xbf16>, vector<16x32xf32> -> vector<16x32xf32>
    %14 = vector.broadcast %11 : vector<1x32xf32> to vector<16x32xf32>
    %15 = arith.addf %13, %14 : vector<16x32xf32>
    %c2 = arith.constant 2 : index
    %c0_13 = arith.constant 0 : index
    %c0_14 = arith.constant 0 : index
    %16 = vector.load %arg5[%c2, %c0_13, %c0_14] : memref<24x32x32xbf16, #tpu.memory_space<vmem>>, vector<1x32x32xbf16>
    %17 = vector.shape_cast %16 : vector<1x32x32xbf16> to vector<32x32xbf16>
    %c2_15 = arith.constant 2 : index
    %c0_16 = arith.constant 0 : index
    %18 = vector.load %arg9[%c2_15, %c0_16] : memref<56x128xf32, #tpu.memory_space<vmem>>, vector<1x32xf32>
    %19 = arith.truncf %0 : vector<16x32xf32> to vector<16x32xbf16>
    %cst_17 = arith.constant dense<0.000000e+00> : vector<16x32xf32>
    %20 = tpu.matmul %19, %17, %cst_17 {dimension_numbers = #tpu.dot_dimension_numbers<[1], [0], [0], [1], [0, 0, 1, 1], [], []>} : vector<16x32xbf16>, vector<32x32xbf16>, vector<16x32xf32> -> vector<16x32xf32>
    %21 = vector.broadcast %18 : vector<1x32xf32> to vector<16x32xf32>
    %22 = arith.addf %20, %21 : vector<16x32xf32>
    %23 = vector.extract_strided_slice %8 {offsets = [0, 0], sizes = [16, 4], strides = [1, 1]} : vector<16x32xf32> to vector<16x4xf32>
    %24 = arith.truncf %23 : vector<16x4xf32> to vector<16x4xbf16>
    %25 = vector.extract_strided_slice %15 {offsets = [0, 0], sizes = [16, 4], strides = [1, 1]} : vector<16x32xf32> to vector<16x4xf32>
    %26 = arith.truncf %25 : vector<16x4xf32> to vector<16x4xbf16>
    %27 = vector.extract_strided_slice %22 {offsets = [0, 0], sizes = [16, 4], strides = [1, 1]} : vector<16x32xf32> to vector<16x4xf32>
    %28 = arith.truncf %27 : vector<16x4xf32> to vector<16x4xbf16>
    %cst_18 = arith.constant dense<0.000000e+00> : vector<16x16xf32>
    %29 = tpu.matmul %24, %26, %cst_18 {dimension_numbers = #tpu.dot_dimension_numbers<[1], [1], [0], [0], [0, 0, 1, 0], [], []>} : vector<16x4xbf16>, vector<16x4xbf16>, vector<16x16xf32> -> vector<16x16xf32>
    %30 = arith.addf %29, %1 : vector<16x16xf32>
    %cst_19 = arith.constant dense<0xFF800000> : vector<16xf32>
    %31 = vector.multi_reduction <maximumf>, %30, %cst_19 [1] : vector<16x16xf32> to vector<16xf32>
    %32 = vector.shape_cast %31 : vector<16xf32> to vector<16x1xf32>
    %33 = vector.broadcast %32 : vector<16x1xf32> to vector<16x16xf32>
    %34 = arith.subf %30, %33 : vector<16x16xf32>
    %35 = math.exp %34 : vector<16x16xf32>
    %cst_20 = arith.constant dense<0.000000e+00> : vector<16xf32>
    %36 = vector.multi_reduction <add>, %35, %cst_20 [1] : vector<16x16xf32> to vector<16xf32>
    %37 = vector.shape_cast %36 : vector<16xf32> to vector<16x1xf32>
    %38 = tpu.reciprocal %37 {approx = true} : vector<16x1xf32> -> vector<16x1xf32>
    %39 = vector.broadcast %38 : vector<16x1xf32> to vector<16x16xf32>
    %40 = arith.mulf %35, %39 : vector<16x16xf32>
    %41 = arith.truncf %40 : vector<16x16xf32> to vector<16x16xbf16>
    %cst_21 = arith.constant dense<0.000000e+00> : vector<16x4xf32>
    %42 = tpu.matmul %41, %28, %cst_21 {dimension_numbers = #tpu.dot_dimension_numbers<[1], [0], [0], [1], [0, 0, 1, 1], [], []>} : vector<16x16xbf16>, vector<16x4xbf16>, vector<16x4xf32> -> vector<16x4xf32>
    %43 = vector.extract_strided_slice %8 {offsets = [0, 4], sizes = [16, 4], strides = [1, 1]} : vector<16x32xf32> to vector<16x4xf32>
    %44 = arith.truncf %43 : vector<16x4xf32> to vector<16x4xbf16>
    %45 = vector.extract_strided_slice %15 {offsets = [0, 4], sizes = [16, 4], strides = [1, 1]} : vector<16x32xf32> to vector<16x4xf32>
    %46 = arith.truncf %45 : vector<16x4xf32> to vector<16x4xbf16>
    %47 = vector.extract_strided_slice %22 {offsets = [0, 4], sizes = [16, 4], strides = [1, 1]} : vector<16x32xf32> to vector<16x4xf32>
    %48 = arith.truncf %47 : vector<16x4xf32> to vector<16x4xbf16>
    %cst_22 = arith.constant dense<0.000000e+00> : vector<16x16xf32>
    %49 = tpu.matmul %44, %46, %cst_22 {dimension_numbers = #tpu.dot_dimension_numbers<[1], [1], [0], [0], [0, 0, 1, 0], [], []>} : vector<16x4xbf16>, vector<16x4xbf16>, vector<16x16xf32> -> vector<16x16xf32>
    %50 = arith.addf %49, %1 : vector<16x16xf32>
    %cst_23 = arith.constant dense<0xFF800000> : vector<16xf32>
    %51 = vector.multi_reduction <maximumf>, %50, %cst_23 [1] : vector<16x16xf32> to vector<16xf32>
    %52 = vector.shape_cast %51 : vector<16xf32> to vector<16x1xf32>
    %53 = vector.broadcast %52 : vector<16x1xf32> to vector<16x16xf32>
    %54 = arith.subf %50, %53 : vector<16x16xf32>
    %55 = math.exp %54 : vector<16x16xf32>
    %cst_24 = arith.constant dense<0.000000e+00> : vector<16xf32>
    %56 = vector.multi_reduction <add>, %55, %cst_24 [1] : vector<16x16xf32> to vector<16xf32>
    %57 = vector.shape_cast %56 : vector<16xf32> to vector<16x1xf32>
    %58 = tpu.reciprocal %57 {approx = true} : vector<16x1xf32> -> vector<16x1xf32>
    %59 = vector.broadcast %58 : vector<16x1xf32> to vector<16x16xf32>
    %60 = arith.mulf %55, %59 : vector<16x16xf32>
    %61 = arith.truncf %60 : vector<16x16xf32> to vector<16x16xbf16>
    %cst_25 = arith.constant dense<0.000000e+00> : vector<16x4xf32>
    %62 = tpu.matmul %61, %48, %cst_25 {dimension_numbers = #tpu.dot_dimension_numbers<[1], [0], [0], [1], [0, 0, 1, 1], [], []>} : vector<16x16xbf16>, vector<16x4xbf16>, vector<16x4xf32> -> vector<16x4xf32>
    %63 = vector.extract_strided_slice %8 {offsets = [0, 8], sizes = [16, 4], strides = [1, 1]} : vector<16x32xf32> to vector<16x4xf32>
    %64 = arith.truncf %63 : vector<16x4xf32> to vector<16x4xbf16>
    %65 = vector.extract_strided_slice %15 {offsets = [0, 8], sizes = [16, 4], strides = [1, 1]} : vector<16x32xf32> to vector<16x4xf32>
    %66 = arith.truncf %65 : vector<16x4xf32> to vector<16x4xbf16>
    %67 = vector.extract_strided_slice %22 {offsets = [0, 8], sizes = [16, 4], strides = [1, 1]} : vector<16x32xf32> to vector<16x4xf32>
    %68 = arith.truncf %67 : vector<16x4xf32> to vector<16x4xbf16>
    %cst_26 = arith.constant dense<0.000000e+00> : vector<16x16xf32>
    %69 = tpu.matmul %64, %66, %cst_26 {dimension_numbers = #tpu.dot_dimension_numbers<[1], [1], [0], [0], [0, 0, 1, 0], [], []>} : vector<16x4xbf16>, vector<16x4xbf16>, vector<16x16xf32> -> vector<16x16xf32>
    %70 = arith.addf %69, %1 : vector<16x16xf32>
    %cst_27 = arith.constant dense<0xFF800000> : vector<16xf32>
    %71 = vector.multi_reduction <maximumf>, %70, %cst_27 [1] : vector<16x16xf32> to vector<16xf32>
    %72 = vector.shape_cast %71 : vector<16xf32> to vector<16x1xf32>
    %73 = vector.broadcast %72 : vector<16x1xf32> to vector<16x16xf32>
    %74 = arith.subf %70, %73 : vector<16x16xf32>
    %75 = math.exp %74 : vector<16x16xf32>
    %cst_28 = arith.constant dense<0.000000e+00> : vector<16xf32>
    %76 = vector.multi_reduction <add>, %75, %cst_28 [1] : vector<16x16xf32> to vector<16xf32>
    %77 = vector.shape_cast %76 : vector<16xf32> to vector<16x1xf32>
    %78 = tpu.reciprocal %77 {approx = true} : vector<16x1xf32> -> vector<16x1xf32>
    %79 = vector.broadcast %78 : vector<16x1xf32> to vector<16x16xf32>
    %80 = arith.mulf %75, %79 : vector<16x16xf32>
    %81 = arith.truncf %80 : vector<16x16xf32> to vector<16x16xbf16>
    %cst_29 = arith.constant dense<0.000000e+00> : vector<16x4xf32>
    %82 = tpu.matmul %81, %68, %cst_29 {dimension_numbers = #tpu.dot_dimension_numbers<[1], [0], [0], [1], [0, 0, 1, 1], [], []>} : vector<16x16xbf16>, vector<16x4xbf16>, vector<16x4xf32> -> vector<16x4xf32>
    %83 = vector.extract_strided_slice %8 {offsets = [0, 12], sizes = [16, 4], strides = [1, 1]} : vector<16x32xf32> to vector<16x4xf32>
    %84 = arith.truncf %83 : vector<16x4xf32> to vector<16x4xbf16>
    %85 = vector.extract_strided_slice %15 {offsets = [0, 12], sizes = [16, 4], strides = [1, 1]} : vector<16x32xf32> to vector<16x4xf32>
    %86 = arith.truncf %85 : vector<16x4xf32> to vector<16x4xbf16>
    %87 = vector.extract_strided_slice %22 {offsets = [0, 12], sizes = [16, 4], strides = [1, 1]} : vector<16x32xf32> to vector<16x4xf32>
    %88 = arith.truncf %87 : vector<16x4xf32> to vector<16x4xbf16>
    %cst_30 = arith.constant dense<0.000000e+00> : vector<16x16xf32>
    %89 = tpu.matmul %84, %86, %cst_30 {dimension_numbers = #tpu.dot_dimension_numbers<[1], [1], [0], [0], [0, 0, 1, 0], [], []>} : vector<16x4xbf16>, vector<16x4xbf16>, vector<16x16xf32> -> vector<16x16xf32>
    %90 = arith.addf %89, %1 : vector<16x16xf32>
    %cst_31 = arith.constant dense<0xFF800000> : vector<16xf32>
    %91 = vector.multi_reduction <maximumf>, %90, %cst_31 [1] : vector<16x16xf32> to vector<16xf32>
    %92 = vector.shape_cast %91 : vector<16xf32> to vector<16x1xf32>
    %93 = vector.broadcast %92 : vector<16x1xf32> to vector<16x16xf32>
    %94 = arith.subf %90, %93 : vector<16x16xf32>
    %95 = math.exp %94 : vector<16x16xf32>
    %cst_32 = arith.constant dense<0.000000e+00> : vector<16xf32>
    %96 = vector.multi_reduction <add>, %95, %cst_32 [1] : vector<16x16xf32> to vector<16xf32>
    %97 = vector.shape_cast %96 : vector<16xf32> to vector<16x1xf32>
    %98 = tpu.reciprocal %97 {approx = true} : vector<16x1xf32> -> vector<16x1xf32>
    %99 = vector.broadcast %98 : vector<16x1xf32> to vector<16x16xf32>
    %100 = arith.mulf %95, %99 : vector<16x16xf32>
    %101 = arith.truncf %100 : vector<16x16xf32> to vector<16x16xbf16>
    %cst_33 = arith.constant dense<0.000000e+00> : vector<16x4xf32>
    %102 = tpu.matmul %101, %88, %cst_33 {dimension_numbers = #tpu.dot_dimension_numbers<[1], [0], [0], [1], [0, 0, 1, 1], [], []>} : vector<16x16xbf16>, vector<16x4xbf16>, vector<16x4xf32> -> vector<16x4xf32>
    %103 = vector.extract_strided_slice %8 {offsets = [0, 16], sizes = [16, 4], strides = [1, 1]} : vector<16x32xf32> to vector<16x4xf32>
    %104 = arith.truncf %103 : vector<16x4xf32> to vector<16x4xbf16>
    %105 = vector.extract_strided_slice %15 {offsets = [0, 16], sizes = [16, 4], strides = [1, 1]} : vector<16x32xf32> to vector<16x4xf32>
    %106 = arith.truncf %105 : vector<16x4xf32> to vector<16x4xbf16>
    %107 = vector.extract_strided_slice %22 {offsets = [0, 16], sizes = [16, 4], strides = [1, 1]} : vector<16x32xf32> to vector<16x4xf32>
    %108 = arith.truncf %107 : vector<16x4xf32> to vector<16x4xbf16>
    %cst_34 = arith.constant dense<0.000000e+00> : vector<16x16xf32>
    %109 = tpu.matmul %104, %106, %cst_34 {dimension_numbers = #tpu.dot_dimension_numbers<[1], [1], [0], [0], [0, 0, 1, 0], [], []>} : vector<16x4xbf16>, vector<16x4xbf16>, vector<16x16xf32> -> vector<16x16xf32>
    %110 = arith.addf %109, %1 : vector<16x16xf32>
    %cst_35 = arith.constant dense<0xFF800000> : vector<16xf32>
    %111 = vector.multi_reduction <maximumf>, %110, %cst_35 [1] : vector<16x16xf32> to vector<16xf32>
    %112 = vector.shape_cast %111 : vector<16xf32> to vector<16x1xf32>
    %113 = vector.broadcast %112 : vector<16x1xf32> to vector<16x16xf32>
    %114 = arith.subf %110, %113 : vector<16x16xf32>
    %115 = math.exp %114 : vector<16x16xf32>
    %cst_36 = arith.constant dense<0.000000e+00> : vector<16xf32>
    %116 = vector.multi_reduction <add>, %115, %cst_36 [1] : vector<16x16xf32> to vector<16xf32>
    %117 = vector.shape_cast %116 : vector<16xf32> to vector<16x1xf32>
    %118 = tpu.reciprocal %117 {approx = true} : vector<16x1xf32> -> vector<16x1xf32>
    %119 = vector.broadcast %118 : vector<16x1xf32> to vector<16x16xf32>
    %120 = arith.mulf %115, %119 : vector<16x16xf32>
    %121 = arith.truncf %120 : vector<16x16xf32> to vector<16x16xbf16>
    %cst_37 = arith.constant dense<0.000000e+00> : vector<16x4xf32>
    %122 = tpu.matmul %121, %108, %cst_37 {dimension_numbers = #tpu.dot_dimension_numbers<[1], [0], [0], [1], [0, 0, 1, 1], [], []>} : vector<16x16xbf16>, vector<16x4xbf16>, vector<16x4xf32> -> vector<16x4xf32>
    %123 = vector.extract_strided_slice %8 {offsets = [0, 20], sizes = [16, 4], strides = [1, 1]} : vector<16x32xf32> to vector<16x4xf32>
    %124 = arith.truncf %123 : vector<16x4xf32> to vector<16x4xbf16>
    %125 = vector.extract_strided_slice %15 {offsets = [0, 20], sizes = [16, 4], strides = [1, 1]} : vector<16x32xf32> to vector<16x4xf32>
    %126 = arith.truncf %125 : vector<16x4xf32> to vector<16x4xbf16>
    %127 = vector.extract_strided_slice %22 {offsets = [0, 20], sizes = [16, 4], strides = [1, 1]} : vector<16x32xf32> to vector<16x4xf32>
    %128 = arith.truncf %127 : vector<16x4xf32> to vector<16x4xbf16>
    %cst_38 = arith.constant dense<0.000000e+00> : vector<16x16xf32>
    %129 = tpu.matmul %124, %126, %cst_38 {dimension_numbers = #tpu.dot_dimension_numbers<[1], [1], [0], [0], [0, 0, 1, 0], [], []>} : vector<16x4xbf16>, vector<16x4xbf16>, vector<16x16xf32> -> vector<16x16xf32>
    %130 = arith.addf %129, %1 : vector<16x16xf32>
    %cst_39 = arith.constant dense<0xFF800000> : vector<16xf32>
    %131 = vector.multi_reduction <maximumf>, %130, %cst_39 [1] : vector<16x16xf32> to vector<16xf32>
    %132 = vector.shape_cast %131 : vector<16xf32> to vector<16x1xf32>
    %133 = vector.broadcast %132 : vector<16x1xf32> to vector<16x16xf32>
    %134 = arith.subf %130, %133 : vector<16x16xf32>
    %135 = math.exp %134 : vector<16x16xf32>
    %cst_40 = arith.constant dense<0.000000e+00> : vector<16xf32>
    %136 = vector.multi_reduction <add>, %135, %cst_40 [1] : vector<16x16xf32> to vector<16xf32>
    %137 = vector.shape_cast %136 : vector<16xf32> to vector<16x1xf32>
    %138 = tpu.reciprocal %137 {approx = true} : vector<16x1xf32> -> vector<16x1xf32>
    %139 = vector.broadcast %138 : vector<16x1xf32> to vector<16x16xf32>
    %140 = arith.mulf %135, %139 : vector<16x16xf32>
    %141 = arith.truncf %140 : vector<16x16xf32> to vector<16x16xbf16>
    %cst_41 = arith.constant dense<0.000000e+00> : vector<16x4xf32>
    %142 = tpu.matmul %141, %128, %cst_41 {dimension_numbers = #tpu.dot_dimension_numbers<[1], [0], [0], [1], [0, 0, 1, 1], [], []>} : vector<16x16xbf16>, vector<16x4xbf16>, vector<16x4xf32> -> vector<16x4xf32>
    %143 = vector.extract_strided_slice %8 {offsets = [0, 24], sizes = [16, 4], strides = [1, 1]} : vector<16x32xf32> to vector<16x4xf32>
    %144 = arith.truncf %143 : vector<16x4xf32> to vector<16x4xbf16>
    %145 = vector.extract_strided_slice %15 {offsets = [0, 24], sizes = [16, 4], strides = [1, 1]} : vector<16x32xf32> to vector<16x4xf32>
    %146 = arith.truncf %145 : vector<16x4xf32> to vector<16x4xbf16>
    %147 = vector.extract_strided_slice %22 {offsets = [0, 24], sizes = [16, 4], strides = [1, 1]} : vector<16x32xf32> to vector<16x4xf32>
    %148 = arith.truncf %147 : vector<16x4xf32> to vector<16x4xbf16>
    %cst_42 = arith.constant dense<0.000000e+00> : vector<16x16xf32>
    %149 = tpu.matmul %144, %146, %cst_42 {dimension_numbers = #tpu.dot_dimension_numbers<[1], [1], [0], [0], [0, 0, 1, 0], [], []>} : vector<16x4xbf16>, vector<16x4xbf16>, vector<16x16xf32> -> vector<16x16xf32>
    %150 = arith.addf %149, %1 : vector<16x16xf32>
    %cst_43 = arith.constant dense<0xFF800000> : vector<16xf32>
    %151 = vector.multi_reduction <maximumf>, %150, %cst_43 [1] : vector<16x16xf32> to vector<16xf32>
    %152 = vector.shape_cast %151 : vector<16xf32> to vector<16x1xf32>
    %153 = vector.broadcast %152 : vector<16x1xf32> to vector<16x16xf32>
    %154 = arith.subf %150, %153 : vector<16x16xf32>
    %155 = math.exp %154 : vector<16x16xf32>
    %cst_44 = arith.constant dense<0.000000e+00> : vector<16xf32>
    %156 = vector.multi_reduction <add>, %155, %cst_44 [1] : vector<16x16xf32> to vector<16xf32>
    %157 = vector.shape_cast %156 : vector<16xf32> to vector<16x1xf32>
    %158 = tpu.reciprocal %157 {approx = true} : vector<16x1xf32> -> vector<16x1xf32>
    %159 = vector.broadcast %158 : vector<16x1xf32> to vector<16x16xf32>
    %160 = arith.mulf %155, %159 : vector<16x16xf32>
    %161 = arith.truncf %160 : vector<16x16xf32> to vector<16x16xbf16>
    %cst_45 = arith.constant dense<0.000000e+00> : vector<16x4xf32>
    %162 = tpu.matmul %161, %148, %cst_45 {dimension_numbers = #tpu.dot_dimension_numbers<[1], [0], [0], [1], [0, 0, 1, 1], [], []>} : vector<16x16xbf16>, vector<16x4xbf16>, vector<16x4xf32> -> vector<16x4xf32>
    %163 = vector.extract_strided_slice %8 {offsets = [0, 28], sizes = [16, 4], strides = [1, 1]} : vector<16x32xf32> to vector<16x4xf32>
    %164 = arith.truncf %163 : vector<16x4xf32> to vector<16x4xbf16>
    %165 = vector.extract_strided_slice %15 {offsets = [0, 28], sizes = [16, 4], strides = [1, 1]} : vector<16x32xf32> to vector<16x4xf32>
    %166 = arith.truncf %165 : vector<16x4xf32> to vector<16x4xbf16>
    %167 = vector.extract_strided_slice %22 {offsets = [0, 28], sizes = [16, 4], strides = [1, 1]} : vector<16x32xf32> to vector<16x4xf32>
    %168 = arith.truncf %167 : vector<16x4xf32> to vector<16x4xbf16>
    %cst_46 = arith.constant dense<0.000000e+00> : vector<16x16xf32>
    %169 = tpu.matmul %164, %166, %cst_46 {dimension_numbers = #tpu.dot_dimension_numbers<[1], [1], [0], [0], [0, 0, 1, 0], [], []>} : vector<16x4xbf16>, vector<16x4xbf16>, vector<16x16xf32> -> vector<16x16xf32>
    %170 = arith.addf %169, %1 : vector<16x16xf32>
    %cst_47 = arith.constant dense<0xFF800000> : vector<16xf32>
    %171 = vector.multi_reduction <maximumf>, %170, %cst_47 [1] : vector<16x16xf32> to vector<16xf32>
    %172 = vector.shape_cast %171 : vector<16xf32> to vector<16x1xf32>
    %173 = vector.broadcast %172 : vector<16x1xf32> to vector<16x16xf32>
    %174 = arith.subf %170, %173 : vector<16x16xf32>
    %175 = math.exp %174 : vector<16x16xf32>
    %cst_48 = arith.constant dense<0.000000e+00> : vector<16xf32>
    %176 = vector.multi_reduction <add>, %175, %cst_48 [1] : vector<16x16xf32> to vector<16xf32>
    %177 = vector.shape_cast %176 : vector<16xf32> to vector<16x1xf32>
    %178 = tpu.reciprocal %177 {approx = true} : vector<16x1xf32> -> vector<16x1xf32>
    %179 = vector.broadcast %178 : vector<16x1xf32> to vector<16x16xf32>
    %180 = arith.mulf %175, %179 : vector<16x16xf32>
    %181 = arith.truncf %180 : vector<16x16xf32> to vector<16x16xbf16>
    %cst_49 = arith.constant dense<0.000000e+00> : vector<16x4xf32>
    %182 = tpu.matmul %181, %168, %cst_49 {dimension_numbers = #tpu.dot_dimension_numbers<[1], [0], [0], [1], [0, 0, 1, 1], [], []>} : vector<16x16xbf16>, vector<16x4xbf16>, vector<16x4xf32> -> vector<16x4xf32>
    %183 = tpu.concatenate %42, %62, %82, %102, %122, %142, %162, %182 in 1 : vector<16x4xf32>, vector<16x4xf32>, vector<16x4xf32>, vector<16x4xf32>, vector<16x4xf32>, vector<16x4xf32>, vector<16x4xf32>, vector<16x4xf32> -> vector<16x32xf32>
    %c3 = arith.constant 3 : index
    %c0_50 = arith.constant 0 : index
    %c0_51 = arith.constant 0 : index
    %184 = vector.load %arg5[%c3, %c0_50, %c0_51] : memref<24x32x32xbf16, #tpu.memory_space<vmem>>, vector<1x32x32xbf16>
    %185 = vector.shape_cast %184 : vector<1x32x32xbf16> to vector<32x32xbf16>
    %c3_52 = arith.constant 3 : index
    %c0_53 = arith.constant 0 : index
    %186 = vector.load %arg9[%c3_52, %c0_53] : memref<56x128xf32, #tpu.memory_space<vmem>>, vector<1x32xf32>
    %187 = arith.truncf %183 : vector<16x32xf32> to vector<16x32xbf16>
    %cst_54 = arith.constant dense<0.000000e+00> : vector<16x32xf32>
    %188 = tpu.matmul %187, %185, %cst_54 {dimension_numbers = #tpu.dot_dimension_numbers<[1], [0], [0], [1], [0, 0, 1, 1], [], []>} : vector<16x32xbf16>, vector<32x32xbf16>, vector<16x32xf32> -> vector<16x32xf32>
    %189 = vector.broadcast %186 : vector<1x32xf32> to vector<16x32xf32>
    %190 = arith.addf %188, %189 : vector<16x32xf32>
    %191 = arith.addf %0, %190 : vector<16x32xf32>
    %c24 = arith.constant 24 : index
    %c0_55 = arith.constant 0 : index
    %192 = vector.load %arg9[%c24, %c0_55] : memref<56x128xf32, #tpu.memory_space<vmem>>, vector<1x32xf32>
    %c34 = arith.constant 34 : index
    %c0_56 = arith.constant 0 : index
    %193 = vector.load %arg9[%c34, %c0_56] : memref<56x128xf32, #tpu.memory_space<vmem>>, vector<1x32xf32>
    %cst_57 = arith.constant dense<0.000000e+00> : vector<16xf32>
    %194 = vector.multi_reduction <add>, %191, %cst_57 [1] : vector<16x32xf32> to vector<16xf32>
    %195 = vector.shape_cast %194 : vector<16xf32> to vector<16x1xf32>
    %cst_58 = arith.constant 3.200000e+01 : f32
    %196 = vector.broadcast %cst_58 : f32 to vector<16x1xf32>
    %197 = arith.divf %195, %196 : vector<16x1xf32>
    %198 = vector.broadcast %197 : vector<16x1xf32> to vector<16x32xf32>
    %199 = arith.subf %191, %198 : vector<16x32xf32>
    %200 = arith.mulf %199, %199 : vector<16x32xf32>
    %cst_59 = arith.constant dense<0.000000e+00> : vector<16xf32>
    %201 = vector.multi_reduction <add>, %200, %cst_59 [1] : vector<16x32xf32> to vector<16xf32>
    %202 = vector.shape_cast %201 : vector<16xf32> to vector<16x1xf32>
    %cst_60 = arith.constant 3.200000e+01 : f32
    %203 = vector.broadcast %cst_60 : f32 to vector<16x1xf32>
    %204 = arith.divf %202, %203 : vector<16x1xf32>
    %cst_61 = arith.constant 9.99999974E-6 : f32
    %205 = vector.broadcast %cst_61 : f32 to vector<16x1xf32>
    %206 = arith.addf %204, %205 : vector<16x1xf32>
    %207 = math.rsqrt %206 : vector<16x1xf32>
    %208 = vector.broadcast %207 : vector<16x1xf32> to vector<16x32xf32>
    %209 = arith.mulf %199, %208 : vector<16x32xf32>
    %210 = vector.broadcast %192 : vector<1x32xf32> to vector<16x32xf32>
    %211 = arith.mulf %209, %210 : vector<16x32xf32>
    %212 = vector.broadcast %193 : vector<1x32xf32> to vector<16x32xf32>
    %213 = arith.addf %211, %212 : vector<16x32xf32>
    %c0_62 = arith.constant 0 : index
    %c0_63 = arith.constant 0 : index
    %c0_64 = arith.constant 0 : index
    %214 = vector.load %arg6[%c0_62, %c0_63, %c0_64] : memref<4x32x64xbf16, #tpu.memory_space<vmem>>, vector<1x32x64xbf16>
    %215 = vector.shape_cast %214 : vector<1x32x64xbf16> to vector<32x64xbf16>
    %c44 = arith.constant 44 : index
    %c0_65 = arith.constant 0 : index
    %216 = vector.load %arg9[%c44, %c0_65] : memref<56x128xf32, #tpu.memory_space<vmem>>, vector<1x64xf32>
    %217 = arith.truncf %213 : vector<16x32xf32> to vector<16x32xbf16>
    %cst_66 = arith.constant dense<0.000000e+00> : vector<16x64xf32>
    %218 = tpu.matmul %217, %215, %cst_66 {dimension_numbers = #tpu.dot_dimension_numbers<[1], [0], [0], [1], [0, 0, 1, 1], [], []>} : vector<16x32xbf16>, vector<32x64xbf16>, vector<16x64xf32> -> vector<16x64xf32>
    %219 = vector.broadcast %216 : vector<1x64xf32> to vector<16x64xf32>
    %220 = arith.addf %218, %219 : vector<16x64xf32>
    %cst_67 = arith.constant 0.000000e+00 : f32
    %221 = vector.broadcast %cst_67 : f32 to vector<16x64xf32>
    %222 = arith.maximumf %220, %221 : vector<16x64xf32>
    %c0_68 = arith.constant 0 : index
    %c0_69 = arith.constant 0 : index
    %c0_70 = arith.constant 0 : index
    %223 = vector.load %arg7[%c0_68, %c0_69, %c0_70] : memref<4x64x32xbf16, #tpu.memory_space<vmem>>, vector<1x64x32xbf16>
    %224 = vector.shape_cast %223 : vector<1x64x32xbf16> to vector<64x32xbf16>
    %c48 = arith.constant 48 : index
    %c0_71 = arith.constant 0 : index
    %225 = vector.load %arg9[%c48, %c0_71] : memref<56x128xf32, #tpu.memory_space<vmem>>, vector<1x32xf32>
    %226 = arith.truncf %222 : vector<16x64xf32> to vector<16x64xbf16>
    %cst_72 = arith.constant dense<0.000000e+00> : vector<16x32xf32>
    %227 = tpu.matmul %226, %224, %cst_72 {dimension_numbers = #tpu.dot_dimension_numbers<[1], [0], [0], [1], [0, 0, 1, 1], [], []>} : vector<16x64xbf16>, vector<64x32xbf16>, vector<16x32xf32> -> vector<16x32xf32>
    %228 = vector.broadcast %225 : vector<1x32xf32> to vector<16x32xf32>
    %229 = arith.addf %227, %228 : vector<16x32xf32>
    %230 = arith.addf %213, %229 : vector<16x32xf32>
    %c25 = arith.constant 25 : index
    %c0_73 = arith.constant 0 : index
    %231 = vector.load %arg9[%c25, %c0_73] : memref<56x128xf32, #tpu.memory_space<vmem>>, vector<1x32xf32>
    %c35 = arith.constant 35 : index
    %c0_74 = arith.constant 0 : index
    %232 = vector.load %arg9[%c35, %c0_74] : memref<56x128xf32, #tpu.memory_space<vmem>>, vector<1x32xf32>
    %cst_75 = arith.constant dense<0.000000e+00> : vector<16xf32>
    %233 = vector.multi_reduction <add>, %230, %cst_75 [1] : vector<16x32xf32> to vector<16xf32>
    %234 = vector.shape_cast %233 : vector<16xf32> to vector<16x1xf32>
    %cst_76 = arith.constant 3.200000e+01 : f32
    %235 = vector.broadcast %cst_76 : f32 to vector<16x1xf32>
    %236 = arith.divf %234, %235 : vector<16x1xf32>
    %237 = vector.broadcast %236 : vector<16x1xf32> to vector<16x32xf32>
    %238 = arith.subf %230, %237 : vector<16x32xf32>
    %239 = arith.mulf %238, %238 : vector<16x32xf32>
    %cst_77 = arith.constant dense<0.000000e+00> : vector<16xf32>
    %240 = vector.multi_reduction <add>, %239, %cst_77 [1] : vector<16x32xf32> to vector<16xf32>
    %241 = vector.shape_cast %240 : vector<16xf32> to vector<16x1xf32>
    %cst_78 = arith.constant 3.200000e+01 : f32
    %242 = vector.broadcast %cst_78 : f32 to vector<16x1xf32>
    %243 = arith.divf %241, %242 : vector<16x1xf32>
    %cst_79 = arith.constant 9.99999974E-6 : f32
    %244 = vector.broadcast %cst_79 : f32 to vector<16x1xf32>
    %245 = arith.addf %243, %244 : vector<16x1xf32>
    %246 = math.rsqrt %245 : vector<16x1xf32>
    %247 = vector.broadcast %246 : vector<16x1xf32> to vector<16x32xf32>
    %248 = arith.mulf %238, %247 : vector<16x32xf32>
    %249 = vector.broadcast %231 : vector<1x32xf32> to vector<16x32xf32>
    %250 = arith.mulf %248, %249 : vector<16x32xf32>
    %251 = vector.broadcast %232 : vector<1x32xf32> to vector<16x32xf32>
    %252 = arith.addf %250, %251 : vector<16x32xf32>
    %c4 = arith.constant 4 : index
    %c0_80 = arith.constant 0 : index
    %c0_81 = arith.constant 0 : index
    %253 = vector.load %arg5[%c4, %c0_80, %c0_81] : memref<24x32x32xbf16, #tpu.memory_space<vmem>>, vector<1x32x32xbf16>
    %254 = vector.shape_cast %253 : vector<1x32x32xbf16> to vector<32x32xbf16>
    %c4_82 = arith.constant 4 : index
    %c0_83 = arith.constant 0 : index
    %255 = vector.load %arg9[%c4_82, %c0_83] : memref<56x128xf32, #tpu.memory_space<vmem>>, vector<1x32xf32>
    %256 = arith.truncf %252 : vector<16x32xf32> to vector<16x32xbf16>
    %cst_84 = arith.constant dense<0.000000e+00> : vector<16x32xf32>
    %257 = tpu.matmul %256, %254, %cst_84 {dimension_numbers = #tpu.dot_dimension_numbers<[1], [0], [0], [1], [0, 0, 1, 1], [], []>} : vector<16x32xbf16>, vector<32x32xbf16>, vector<16x32xf32> -> vector<16x32xf32>
    %258 = vector.broadcast %255 : vector<1x32xf32> to vector<16x32xf32>
    %259 = arith.addf %257, %258 : vector<16x32xf32>
    %c5 = arith.constant 5 : index
    %c0_85 = arith.constant 0 : index
    %c0_86 = arith.constant 0 : index
    %260 = vector.load %arg5[%c5, %c0_85, %c0_86] : memref<24x32x32xbf16, #tpu.memory_space<vmem>>, vector<1x32x32xbf16>
    %261 = vector.shape_cast %260 : vector<1x32x32xbf16> to vector<32x32xbf16>
    %c5_87 = arith.constant 5 : index
    %c0_88 = arith.constant 0 : index
    %262 = vector.load %arg9[%c5_87, %c0_88] : memref<56x128xf32, #tpu.memory_space<vmem>>, vector<1x32xf32>
    %263 = arith.truncf %252 : vector<16x32xf32> to vector<16x32xbf16>
    %cst_89 = arith.constant dense<0.000000e+00> : vector<16x32xf32>
    %264 = tpu.matmul %263, %261, %cst_89 {dimension_numbers = #tpu.dot_dimension_numbers<[1], [0], [0], [1], [0, 0, 1, 1], [], []>} : vector<16x32xbf16>, vector<32x32xbf16>, vector<16x32xf32> -> vector<16x32xf32>
    %265 = vector.broadcast %262 : vector<1x32xf32> to vector<16x32xf32>
    %266 = arith.addf %264, %265 : vector<16x32xf32>
    %c6 = arith.constant 6 : index
    %c0_90 = arith.constant 0 : index
    %c0_91 = arith.constant 0 : index
    %267 = vector.load %arg5[%c6, %c0_90, %c0_91] : memref<24x32x32xbf16, #tpu.memory_space<vmem>>, vector<1x32x32xbf16>
    %268 = vector.shape_cast %267 : vector<1x32x32xbf16> to vector<32x32xbf16>
    %c6_92 = arith.constant 6 : index
    %c0_93 = arith.constant 0 : index
    %269 = vector.load %arg9[%c6_92, %c0_93] : memref<56x128xf32, #tpu.memory_space<vmem>>, vector<1x32xf32>
    %270 = arith.truncf %252 : vector<16x32xf32> to vector<16x32xbf16>
    %cst_94 = arith.constant dense<0.000000e+00> : vector<16x32xf32>
    %271 = tpu.matmul %270, %268, %cst_94 {dimension_numbers = #tpu.dot_dimension_numbers<[1], [0], [0], [1], [0, 0, 1, 1], [], []>} : vector<16x32xbf16>, vector<32x32xbf16>, vector<16x32xf32> -> vector<16x32xf32>
    %272 = vector.broadcast %269 : vector<1x32xf32> to vector<16x32xf32>
    %273 = arith.addf %271, %272 : vector<16x32xf32>
    %274 = vector.extract_strided_slice %259 {offsets = [0, 0], sizes = [16, 4], strides = [1, 1]} : vector<16x32xf32> to vector<16x4xf32>
    %275 = arith.truncf %274 : vector<16x4xf32> to vector<16x4xbf16>
    %276 = vector.extract_strided_slice %266 {offsets = [0, 0], sizes = [16, 4], strides = [1, 1]} : vector<16x32xf32> to vector<16x4xf32>
    %277 = arith.truncf %276 : vector<16x4xf32> to vector<16x4xbf16>
    %278 = vector.extract_strided_slice %273 {offsets = [0, 0], sizes = [16, 4], strides = [1, 1]} : vector<16x32xf32> to vector<16x4xf32>
    %279 = arith.truncf %278 : vector<16x4xf32> to vector<16x4xbf16>
    %cst_95 = arith.constant dense<0.000000e+00> : vector<16x16xf32>
    %280 = tpu.matmul %275, %277, %cst_95 {dimension_numbers = #tpu.dot_dimension_numbers<[1], [1], [0], [0], [0, 0, 1, 0], [], []>} : vector<16x4xbf16>, vector<16x4xbf16>, vector<16x16xf32> -> vector<16x16xf32>
    %281 = arith.addf %280, %1 : vector<16x16xf32>
    %cst_96 = arith.constant dense<0xFF800000> : vector<16xf32>
    %282 = vector.multi_reduction <maximumf>, %281, %cst_96 [1] : vector<16x16xf32> to vector<16xf32>
    %283 = vector.shape_cast %282 : vector<16xf32> to vector<16x1xf32>
    %284 = vector.broadcast %283 : vector<16x1xf32> to vector<16x16xf32>
    %285 = arith.subf %281, %284 : vector<16x16xf32>
    %286 = math.exp %285 : vector<16x16xf32>
    %cst_97 = arith.constant dense<0.000000e+00> : vector<16xf32>
    %287 = vector.multi_reduction <add>, %286, %cst_97 [1] : vector<16x16xf32> to vector<16xf32>
    %288 = vector.shape_cast %287 : vector<16xf32> to vector<16x1xf32>
    %289 = tpu.reciprocal %288 {approx = true} : vector<16x1xf32> -> vector<16x1xf32>
    %290 = vector.broadcast %289 : vector<16x1xf32> to vector<16x16xf32>
    %291 = arith.mulf %286, %290 : vector<16x16xf32>
    %292 = arith.truncf %291 : vector<16x16xf32> to vector<16x16xbf16>
    %cst_98 = arith.constant dense<0.000000e+00> : vector<16x4xf32>
    %293 = tpu.matmul %292, %279, %cst_98 {dimension_numbers = #tpu.dot_dimension_numbers<[1], [0], [0], [1], [0, 0, 1, 1], [], []>} : vector<16x16xbf16>, vector<16x4xbf16>, vector<16x4xf32> -> vector<16x4xf32>
    %294 = vector.extract_strided_slice %259 {offsets = [0, 4], sizes = [16, 4], strides = [1, 1]} : vector<16x32xf32> to vector<16x4xf32>
    %295 = arith.truncf %294 : vector<16x4xf32> to vector<16x4xbf16>
    %296 = vector.extract_strided_slice %266 {offsets = [0, 4], sizes = [16, 4], strides = [1, 1]} : vector<16x32xf32> to vector<16x4xf32>
    %297 = arith.truncf %296 : vector<16x4xf32> to vector<16x4xbf16>
    %298 = vector.extract_strided_slice %273 {offsets = [0, 4], sizes = [16, 4], strides = [1, 1]} : vector<16x32xf32> to vector<16x4xf32>
    %299 = arith.truncf %298 : vector<16x4xf32> to vector<16x4xbf16>
    %cst_99 = arith.constant dense<0.000000e+00> : vector<16x16xf32>
    %300 = tpu.matmul %295, %297, %cst_99 {dimension_numbers = #tpu.dot_dimension_numbers<[1], [1], [0], [0], [0, 0, 1, 0], [], []>} : vector<16x4xbf16>, vector<16x4xbf16>, vector<16x16xf32> -> vector<16x16xf32>
    %301 = arith.addf %300, %1 : vector<16x16xf32>
    %cst_100 = arith.constant dense<0xFF800000> : vector<16xf32>
    %302 = vector.multi_reduction <maximumf>, %301, %cst_100 [1] : vector<16x16xf32> to vector<16xf32>
    %303 = vector.shape_cast %302 : vector<16xf32> to vector<16x1xf32>
    %304 = vector.broadcast %303 : vector<16x1xf32> to vector<16x16xf32>
    %305 = arith.subf %301, %304 : vector<16x16xf32>
    %306 = math.exp %305 : vector<16x16xf32>
    %cst_101 = arith.constant dense<0.000000e+00> : vector<16xf32>
    %307 = vector.multi_reduction <add>, %306, %cst_101 [1] : vector<16x16xf32> to vector<16xf32>
    %308 = vector.shape_cast %307 : vector<16xf32> to vector<16x1xf32>
    %309 = tpu.reciprocal %308 {approx = true} : vector<16x1xf32> -> vector<16x1xf32>
    %310 = vector.broadcast %309 : vector<16x1xf32> to vector<16x16xf32>
    %311 = arith.mulf %306, %310 : vector<16x16xf32>
    %312 = arith.truncf %311 : vector<16x16xf32> to vector<16x16xbf16>
    %cst_102 = arith.constant dense<0.000000e+00> : vector<16x4xf32>
    %313 = tpu.matmul %312, %299, %cst_102 {dimension_numbers = #tpu.dot_dimension_numbers<[1], [0], [0], [1], [0, 0, 1, 1], [], []>} : vector<16x16xbf16>, vector<16x4xbf16>, vector<16x4xf32> -> vector<16x4xf32>
    %314 = vector.extract_strided_slice %259 {offsets = [0, 8], sizes = [16, 4], strides = [1, 1]} : vector<16x32xf32> to vector<16x4xf32>
    %315 = arith.truncf %314 : vector<16x4xf32> to vector<16x4xbf16>
    %316 = vector.extract_strided_slice %266 {offsets = [0, 8], sizes = [16, 4], strides = [1, 1]} : vector<16x32xf32> to vector<16x4xf32>
    %317 = arith.truncf %316 : vector<16x4xf32> to vector<16x4xbf16>
    %318 = vector.extract_strided_slice %273 {offsets = [0, 8], sizes = [16, 4], strides = [1, 1]} : vector<16x32xf32> to vector<16x4xf32>
    %319 = arith.truncf %318 : vector<16x4xf32> to vector<16x4xbf16>
    %cst_103 = arith.constant dense<0.000000e+00> : vector<16x16xf32>
    %320 = tpu.matmul %315, %317, %cst_103 {dimension_numbers = #tpu.dot_dimension_numbers<[1], [1], [0], [0], [0, 0, 1, 0], [], []>} : vector<16x4xbf16>, vector<16x4xbf16>, vector<16x16xf32> -> vector<16x16xf32>
    %321 = arith.addf %320, %1 : vector<16x16xf32>
    %cst_104 = arith.constant dense<0xFF800000> : vector<16xf32>
    %322 = vector.multi_reduction <maximumf>, %321, %cst_104 [1] : vector<16x16xf32> to vector<16xf32>
    %323 = vector.shape_cast %322 : vector<16xf32> to vector<16x1xf32>
    %324 = vector.broadcast %323 : vector<16x1xf32> to vector<16x16xf32>
    %325 = arith.subf %321, %324 : vector<16x16xf32>
    %326 = math.exp %325 : vector<16x16xf32>
    %cst_105 = arith.constant dense<0.000000e+00> : vector<16xf32>
    %327 = vector.multi_reduction <add>, %326, %cst_105 [1] : vector<16x16xf32> to vector<16xf32>
    %328 = vector.shape_cast %327 : vector<16xf32> to vector<16x1xf32>
    %329 = tpu.reciprocal %328 {approx = true} : vector<16x1xf32> -> vector<16x1xf32>
    %330 = vector.broadcast %329 : vector<16x1xf32> to vector<16x16xf32>
    %331 = arith.mulf %326, %330 : vector<16x16xf32>
    %332 = arith.truncf %331 : vector<16x16xf32> to vector<16x16xbf16>
    %cst_106 = arith.constant dense<0.000000e+00> : vector<16x4xf32>
    %333 = tpu.matmul %332, %319, %cst_106 {dimension_numbers = #tpu.dot_dimension_numbers<[1], [0], [0], [1], [0, 0, 1, 1], [], []>} : vector<16x16xbf16>, vector<16x4xbf16>, vector<16x4xf32> -> vector<16x4xf32>
    %334 = vector.extract_strided_slice %259 {offsets = [0, 12], sizes = [16, 4], strides = [1, 1]} : vector<16x32xf32> to vector<16x4xf32>
    %335 = arith.truncf %334 : vector<16x4xf32> to vector<16x4xbf16>
    %336 = vector.extract_strided_slice %266 {offsets = [0, 12], sizes = [16, 4], strides = [1, 1]} : vector<16x32xf32> to vector<16x4xf32>
    %337 = arith.truncf %336 : vector<16x4xf32> to vector<16x4xbf16>
    %338 = vector.extract_strided_slice %273 {offsets = [0, 12], sizes = [16, 4], strides = [1, 1]} : vector<16x32xf32> to vector<16x4xf32>
    %339 = arith.truncf %338 : vector<16x4xf32> to vector<16x4xbf16>
    %cst_107 = arith.constant dense<0.000000e+00> : vector<16x16xf32>
    %340 = tpu.matmul %335, %337, %cst_107 {dimension_numbers = #tpu.dot_dimension_numbers<[1], [1], [0], [0], [0, 0, 1, 0], [], []>} : vector<16x4xbf16>, vector<16x4xbf16>, vector<16x16xf32> -> vector<16x16xf32>
    %341 = arith.addf %340, %1 : vector<16x16xf32>
    %cst_108 = arith.constant dense<0xFF800000> : vector<16xf32>
    %342 = vector.multi_reduction <maximumf>, %341, %cst_108 [1] : vector<16x16xf32> to vector<16xf32>
    %343 = vector.shape_cast %342 : vector<16xf32> to vector<16x1xf32>
    %344 = vector.broadcast %343 : vector<16x1xf32> to vector<16x16xf32>
    %345 = arith.subf %341, %344 : vector<16x16xf32>
    %346 = math.exp %345 : vector<16x16xf32>
    %cst_109 = arith.constant dense<0.000000e+00> : vector<16xf32>
    %347 = vector.multi_reduction <add>, %346, %cst_109 [1] : vector<16x16xf32> to vector<16xf32>
    %348 = vector.shape_cast %347 : vector<16xf32> to vector<16x1xf32>
    %349 = tpu.reciprocal %348 {approx = true} : vector<16x1xf32> -> vector<16x1xf32>
    %350 = vector.broadcast %349 : vector<16x1xf32> to vector<16x16xf32>
    %351 = arith.mulf %346, %350 : vector<16x16xf32>
    %352 = arith.truncf %351 : vector<16x16xf32> to vector<16x16xbf16>
    %cst_110 = arith.constant dense<0.000000e+00> : vector<16x4xf32>
    %353 = tpu.matmul %352, %339, %cst_110 {dimension_numbers = #tpu.dot_dimension_numbers<[1], [0], [0], [1], [0, 0, 1, 1], [], []>} : vector<16x16xbf16>, vector<16x4xbf16>, vector<16x4xf32> -> vector<16x4xf32>
    %354 = vector.extract_strided_slice %259 {offsets = [0, 16], sizes = [16, 4], strides = [1, 1]} : vector<16x32xf32> to vector<16x4xf32>
    %355 = arith.truncf %354 : vector<16x4xf32> to vector<16x4xbf16>
    %356 = vector.extract_strided_slice %266 {offsets = [0, 16], sizes = [16, 4], strides = [1, 1]} : vector<16x32xf32> to vector<16x4xf32>
    %357 = arith.truncf %356 : vector<16x4xf32> to vector<16x4xbf16>
    %358 = vector.extract_strided_slice %273 {offsets = [0, 16], sizes = [16, 4], strides = [1, 1]} : vector<16x32xf32> to vector<16x4xf32>
    %359 = arith.truncf %358 : vector<16x4xf32> to vector<16x4xbf16>
    %cst_111 = arith.constant dense<0.000000e+00> : vector<16x16xf32>
    %360 = tpu.matmul %355, %357, %cst_111 {dimension_numbers = #tpu.dot_dimension_numbers<[1], [1], [0], [0], [0, 0, 1, 0], [], []>} : vector<16x4xbf16>, vector<16x4xbf16>, vector<16x16xf32> -> vector<16x16xf32>
    %361 = arith.addf %360, %1 : vector<16x16xf32>
    %cst_112 = arith.constant dense<0xFF800000> : vector<16xf32>
    %362 = vector.multi_reduction <maximumf>, %361, %cst_112 [1] : vector<16x16xf32> to vector<16xf32>
    %363 = vector.shape_cast %362 : vector<16xf32> to vector<16x1xf32>
    %364 = vector.broadcast %363 : vector<16x1xf32> to vector<16x16xf32>
    %365 = arith.subf %361, %364 : vector<16x16xf32>
    %366 = math.exp %365 : vector<16x16xf32>
    %cst_113 = arith.constant dense<0.000000e+00> : vector<16xf32>
    %367 = vector.multi_reduction <add>, %366, %cst_113 [1] : vector<16x16xf32> to vector<16xf32>
    %368 = vector.shape_cast %367 : vector<16xf32> to vector<16x1xf32>
    %369 = tpu.reciprocal %368 {approx = true} : vector<16x1xf32> -> vector<16x1xf32>
    %370 = vector.broadcast %369 : vector<16x1xf32> to vector<16x16xf32>
    %371 = arith.mulf %366, %370 : vector<16x16xf32>
    %372 = arith.truncf %371 : vector<16x16xf32> to vector<16x16xbf16>
    %cst_114 = arith.constant dense<0.000000e+00> : vector<16x4xf32>
    %373 = tpu.matmul %372, %359, %cst_114 {dimension_numbers = #tpu.dot_dimension_numbers<[1], [0], [0], [1], [0, 0, 1, 1], [], []>} : vector<16x16xbf16>, vector<16x4xbf16>, vector<16x4xf32> -> vector<16x4xf32>
    %374 = vector.extract_strided_slice %259 {offsets = [0, 20], sizes = [16, 4], strides = [1, 1]} : vector<16x32xf32> to vector<16x4xf32>
    %375 = arith.truncf %374 : vector<16x4xf32> to vector<16x4xbf16>
    %376 = vector.extract_strided_slice %266 {offsets = [0, 20], sizes = [16, 4], strides = [1, 1]} : vector<16x32xf32> to vector<16x4xf32>
    %377 = arith.truncf %376 : vector<16x4xf32> to vector<16x4xbf16>
    %378 = vector.extract_strided_slice %273 {offsets = [0, 20], sizes = [16, 4], strides = [1, 1]} : vector<16x32xf32> to vector<16x4xf32>
    %379 = arith.truncf %378 : vector<16x4xf32> to vector<16x4xbf16>
    %cst_115 = arith.constant dense<0.000000e+00> : vector<16x16xf32>
    %380 = tpu.matmul %375, %377, %cst_115 {dimension_numbers = #tpu.dot_dimension_numbers<[1], [1], [0], [0], [0, 0, 1, 0], [], []>} : vector<16x4xbf16>, vector<16x4xbf16>, vector<16x16xf32> -> vector<16x16xf32>
    %381 = arith.addf %380, %1 : vector<16x16xf32>
    %cst_116 = arith.constant dense<0xFF800000> : vector<16xf32>
    %382 = vector.multi_reduction <maximumf>, %381, %cst_116 [1] : vector<16x16xf32> to vector<16xf32>
    %383 = vector.shape_cast %382 : vector<16xf32> to vector<16x1xf32>
    %384 = vector.broadcast %383 : vector<16x1xf32> to vector<16x16xf32>
    %385 = arith.subf %381, %384 : vector<16x16xf32>
    %386 = math.exp %385 : vector<16x16xf32>
    %cst_117 = arith.constant dense<0.000000e+00> : vector<16xf32>
    %387 = vector.multi_reduction <add>, %386, %cst_117 [1] : vector<16x16xf32> to vector<16xf32>
    %388 = vector.shape_cast %387 : vector<16xf32> to vector<16x1xf32>
    %389 = tpu.reciprocal %388 {approx = true} : vector<16x1xf32> -> vector<16x1xf32>
    %390 = vector.broadcast %389 : vector<16x1xf32> to vector<16x16xf32>
    %391 = arith.mulf %386, %390 : vector<16x16xf32>
    %392 = arith.truncf %391 : vector<16x16xf32> to vector<16x16xbf16>
    %cst_118 = arith.constant dense<0.000000e+00> : vector<16x4xf32>
    %393 = tpu.matmul %392, %379, %cst_118 {dimension_numbers = #tpu.dot_dimension_numbers<[1], [0], [0], [1], [0, 0, 1, 1], [], []>} : vector<16x16xbf16>, vector<16x4xbf16>, vector<16x4xf32> -> vector<16x4xf32>
    %394 = vector.extract_strided_slice %259 {offsets = [0, 24], sizes = [16, 4], strides = [1, 1]} : vector<16x32xf32> to vector<16x4xf32>
    %395 = arith.truncf %394 : vector<16x4xf32> to vector<16x4xbf16>
    %396 = vector.extract_strided_slice %266 {offsets = [0, 24], sizes = [16, 4], strides = [1, 1]} : vector<16x32xf32> to vector<16x4xf32>
    %397 = arith.truncf %396 : vector<16x4xf32> to vector<16x4xbf16>
    %398 = vector.extract_strided_slice %273 {offsets = [0, 24], sizes = [16, 4], strides = [1, 1]} : vector<16x32xf32> to vector<16x4xf32>
    %399 = arith.truncf %398 : vector<16x4xf32> to vector<16x4xbf16>
    %cst_119 = arith.constant dense<0.000000e+00> : vector<16x16xf32>
    %400 = tpu.matmul %395, %397, %cst_119 {dimension_numbers = #tpu.dot_dimension_numbers<[1], [1], [0], [0], [0, 0, 1, 0], [], []>} : vector<16x4xbf16>, vector<16x4xbf16>, vector<16x16xf32> -> vector<16x16xf32>
    %401 = arith.addf %400, %1 : vector<16x16xf32>
    %cst_120 = arith.constant dense<0xFF800000> : vector<16xf32>
    %402 = vector.multi_reduction <maximumf>, %401, %cst_120 [1] : vector<16x16xf32> to vector<16xf32>
    %403 = vector.shape_cast %402 : vector<16xf32> to vector<16x1xf32>
    %404 = vector.broadcast %403 : vector<16x1xf32> to vector<16x16xf32>
    %405 = arith.subf %401, %404 : vector<16x16xf32>
    %406 = math.exp %405 : vector<16x16xf32>
    %cst_121 = arith.constant dense<0.000000e+00> : vector<16xf32>
    %407 = vector.multi_reduction <add>, %406, %cst_121 [1] : vector<16x16xf32> to vector<16xf32>
    %408 = vector.shape_cast %407 : vector<16xf32> to vector<16x1xf32>
    %409 = tpu.reciprocal %408 {approx = true} : vector<16x1xf32> -> vector<16x1xf32>
    %410 = vector.broadcast %409 : vector<16x1xf32> to vector<16x16xf32>
    %411 = arith.mulf %406, %410 : vector<16x16xf32>
    %412 = arith.truncf %411 : vector<16x16xf32> to vector<16x16xbf16>
    %cst_122 = arith.constant dense<0.000000e+00> : vector<16x4xf32>
    %413 = tpu.matmul %412, %399, %cst_122 {dimension_numbers = #tpu.dot_dimension_numbers<[1], [0], [0], [1], [0, 0, 1, 1], [], []>} : vector<16x16xbf16>, vector<16x4xbf16>, vector<16x4xf32> -> vector<16x4xf32>
    %414 = vector.extract_strided_slice %259 {offsets = [0, 28], sizes = [16, 4], strides = [1, 1]} : vector<16x32xf32> to vector<16x4xf32>
    %415 = arith.truncf %414 : vector<16x4xf32> to vector<16x4xbf16>
    %416 = vector.extract_strided_slice %266 {offsets = [0, 28], sizes = [16, 4], strides = [1, 1]} : vector<16x32xf32> to vector<16x4xf32>
    %417 = arith.truncf %416 : vector<16x4xf32> to vector<16x4xbf16>
    %418 = vector.extract_strided_slice %273 {offsets = [0, 28], sizes = [16, 4], strides = [1, 1]} : vector<16x32xf32> to vector<16x4xf32>
    %419 = arith.truncf %418 : vector<16x4xf32> to vector<16x4xbf16>
    %cst_123 = arith.constant dense<0.000000e+00> : vector<16x16xf32>
    %420 = tpu.matmul %415, %417, %cst_123 {dimension_numbers = #tpu.dot_dimension_numbers<[1], [1], [0], [0], [0, 0, 1, 0], [], []>} : vector<16x4xbf16>, vector<16x4xbf16>, vector<16x16xf32> -> vector<16x16xf32>
    %421 = arith.addf %420, %1 : vector<16x16xf32>
    %cst_124 = arith.constant dense<0xFF800000> : vector<16xf32>
    %422 = vector.multi_reduction <maximumf>, %421, %cst_124 [1] : vector<16x16xf32> to vector<16xf32>
    %423 = vector.shape_cast %422 : vector<16xf32> to vector<16x1xf32>
    %424 = vector.broadcast %423 : vector<16x1xf32> to vector<16x16xf32>
    %425 = arith.subf %421, %424 : vector<16x16xf32>
    %426 = math.exp %425 : vector<16x16xf32>
    %cst_125 = arith.constant dense<0.000000e+00> : vector<16xf32>
    %427 = vector.multi_reduction <add>, %426, %cst_125 [1] : vector<16x16xf32> to vector<16xf32>
    %428 = vector.shape_cast %427 : vector<16xf32> to vector<16x1xf32>
    %429 = tpu.reciprocal %428 {approx = true} : vector<16x1xf32> -> vector<16x1xf32>
    %430 = vector.broadcast %429 : vector<16x1xf32> to vector<16x16xf32>
    %431 = arith.mulf %426, %430 : vector<16x16xf32>
    %432 = arith.truncf %431 : vector<16x16xf32> to vector<16x16xbf16>
    %cst_126 = arith.constant dense<0.000000e+00> : vector<16x4xf32>
    %433 = tpu.matmul %432, %419, %cst_126 {dimension_numbers = #tpu.dot_dimension_numbers<[1], [0], [0], [1], [0, 0, 1, 1], [], []>} : vector<16x16xbf16>, vector<16x4xbf16>, vector<16x4xf32> -> vector<16x4xf32>
    %434 = tpu.concatenate %293, %313, %333, %353, %373, %393, %413, %433 in 1 : vector<16x4xf32>, vector<16x4xf32>, vector<16x4xf32>, vector<16x4xf32>, vector<16x4xf32>, vector<16x4xf32>, vector<16x4xf32>, vector<16x4xf32> -> vector<16x32xf32>
    %c7 = arith.constant 7 : index
    %c0_127 = arith.constant 0 : index
    %c0_128 = arith.constant 0 : index
    %435 = vector.load %arg5[%c7, %c0_127, %c0_128] : memref<24x32x32xbf16, #tpu.memory_space<vmem>>, vector<1x32x32xbf16>
    %436 = vector.shape_cast %435 : vector<1x32x32xbf16> to vector<32x32xbf16>
    %c7_129 = arith.constant 7 : index
    %c0_130 = arith.constant 0 : index
    %437 = vector.load %arg9[%c7_129, %c0_130] : memref<56x128xf32, #tpu.memory_space<vmem>>, vector<1x32xf32>
    %438 = arith.truncf %434 : vector<16x32xf32> to vector<16x32xbf16>
    %cst_131 = arith.constant dense<0.000000e+00> : vector<16x32xf32>
    %439 = tpu.matmul %438, %436, %cst_131 {dimension_numbers = #tpu.dot_dimension_numbers<[1], [0], [0], [1], [0, 0, 1, 1], [], []>} : vector<16x32xbf16>, vector<32x32xbf16>, vector<16x32xf32> -> vector<16x32xf32>
    %440 = vector.broadcast %437 : vector<1x32xf32> to vector<16x32xf32>
    %441 = arith.addf %439, %440 : vector<16x32xf32>
    %442 = arith.addf %252, %441 : vector<16x32xf32>
    %c26 = arith.constant 26 : index
    %c0_132 = arith.constant 0 : index
    %443 = vector.load %arg9[%c26, %c0_132] : memref<56x128xf32, #tpu.memory_space<vmem>>, vector<1x32xf32>
    %c36 = arith.constant 36 : index
    %c0_133 = arith.constant 0 : index
    %444 = vector.load %arg9[%c36, %c0_133] : memref<56x128xf32, #tpu.memory_space<vmem>>, vector<1x32xf32>
    %cst_134 = arith.constant dense<0.000000e+00> : vector<16xf32>
    %445 = vector.multi_reduction <add>, %442, %cst_134 [1] : vector<16x32xf32> to vector<16xf32>
    %446 = vector.shape_cast %445 : vector<16xf32> to vector<16x1xf32>
    %cst_135 = arith.constant 3.200000e+01 : f32
    %447 = vector.broadcast %cst_135 : f32 to vector<16x1xf32>
    %448 = arith.divf %446, %447 : vector<16x1xf32>
    %449 = vector.broadcast %448 : vector<16x1xf32> to vector<16x32xf32>
    %450 = arith.subf %442, %449 : vector<16x32xf32>
    %451 = arith.mulf %450, %450 : vector<16x32xf32>
    %cst_136 = arith.constant dense<0.000000e+00> : vector<16xf32>
    %452 = vector.multi_reduction <add>, %451, %cst_136 [1] : vector<16x32xf32> to vector<16xf32>
    %453 = vector.shape_cast %452 : vector<16xf32> to vector<16x1xf32>
    %cst_137 = arith.constant 3.200000e+01 : f32
    %454 = vector.broadcast %cst_137 : f32 to vector<16x1xf32>
    %455 = arith.divf %453, %454 : vector<16x1xf32>
    %cst_138 = arith.constant 9.99999974E-6 : f32
    %456 = vector.broadcast %cst_138 : f32 to vector<16x1xf32>
    %457 = arith.addf %455, %456 : vector<16x1xf32>
    %458 = math.rsqrt %457 : vector<16x1xf32>
    %459 = vector.broadcast %458 : vector<16x1xf32> to vector<16x32xf32>
    %460 = arith.mulf %450, %459 : vector<16x32xf32>
    %461 = vector.broadcast %443 : vector<1x32xf32> to vector<16x32xf32>
    %462 = arith.mulf %460, %461 : vector<16x32xf32>
    %463 = vector.broadcast %444 : vector<1x32xf32> to vector<16x32xf32>
    %464 = arith.addf %462, %463 : vector<16x32xf32>
    %c1_139 = arith.constant 1 : index
    %c0_140 = arith.constant 0 : index
    %c0_141 = arith.constant 0 : index
    %465 = vector.load %arg6[%c1_139, %c0_140, %c0_141] : memref<4x32x64xbf16, #tpu.memory_space<vmem>>, vector<1x32x64xbf16>
    %466 = vector.shape_cast %465 : vector<1x32x64xbf16> to vector<32x64xbf16>
    %c45 = arith.constant 45 : index
    %c0_142 = arith.constant 0 : index
    %467 = vector.load %arg9[%c45, %c0_142] : memref<56x128xf32, #tpu.memory_space<vmem>>, vector<1x64xf32>
    %468 = arith.truncf %464 : vector<16x32xf32> to vector<16x32xbf16>
    %cst_143 = arith.constant dense<0.000000e+00> : vector<16x64xf32>
    %469 = tpu.matmul %468, %466, %cst_143 {dimension_numbers = #tpu.dot_dimension_numbers<[1], [0], [0], [1], [0, 0, 1, 1], [], []>} : vector<16x32xbf16>, vector<32x64xbf16>, vector<16x64xf32> -> vector<16x64xf32>
    %470 = vector.broadcast %467 : vector<1x64xf32> to vector<16x64xf32>
    %471 = arith.addf %469, %470 : vector<16x64xf32>
    %cst_144 = arith.constant 0.000000e+00 : f32
    %472 = vector.broadcast %cst_144 : f32 to vector<16x64xf32>
    %473 = arith.maximumf %471, %472 : vector<16x64xf32>
    %c1_145 = arith.constant 1 : index
    %c0_146 = arith.constant 0 : index
    %c0_147 = arith.constant 0 : index
    %474 = vector.load %arg7[%c1_145, %c0_146, %c0_147] : memref<4x64x32xbf16, #tpu.memory_space<vmem>>, vector<1x64x32xbf16>
    %475 = vector.shape_cast %474 : vector<1x64x32xbf16> to vector<64x32xbf16>
    %c49 = arith.constant 49 : index
    %c0_148 = arith.constant 0 : index
    %476 = vector.load %arg9[%c49, %c0_148] : memref<56x128xf32, #tpu.memory_space<vmem>>, vector<1x32xf32>
    %477 = arith.truncf %473 : vector<16x64xf32> to vector<16x64xbf16>
    %cst_149 = arith.constant dense<0.000000e+00> : vector<16x32xf32>
    %478 = tpu.matmul %477, %475, %cst_149 {dimension_numbers = #tpu.dot_dimension_numbers<[1], [0], [0], [1], [0, 0, 1, 1], [], []>} : vector<16x64xbf16>, vector<64x32xbf16>, vector<16x32xf32> -> vector<16x32xf32>
    %479 = vector.broadcast %476 : vector<1x32xf32> to vector<16x32xf32>
    %480 = arith.addf %478, %479 : vector<16x32xf32>
    %481 = arith.addf %464, %480 : vector<16x32xf32>
    %c27 = arith.constant 27 : index
    %c0_150 = arith.constant 0 : index
    %482 = vector.load %arg9[%c27, %c0_150] : memref<56x128xf32, #tpu.memory_space<vmem>>, vector<1x32xf32>
    %c37 = arith.constant 37 : index
    %c0_151 = arith.constant 0 : index
    %483 = vector.load %arg9[%c37, %c0_151] : memref<56x128xf32, #tpu.memory_space<vmem>>, vector<1x32xf32>
    %cst_152 = arith.constant dense<0.000000e+00> : vector<16xf32>
    %484 = vector.multi_reduction <add>, %481, %cst_152 [1] : vector<16x32xf32> to vector<16xf32>
    %485 = vector.shape_cast %484 : vector<16xf32> to vector<16x1xf32>
    %cst_153 = arith.constant 3.200000e+01 : f32
    %486 = vector.broadcast %cst_153 : f32 to vector<16x1xf32>
    %487 = arith.divf %485, %486 : vector<16x1xf32>
    %488 = vector.broadcast %487 : vector<16x1xf32> to vector<16x32xf32>
    %489 = arith.subf %481, %488 : vector<16x32xf32>
    %490 = arith.mulf %489, %489 : vector<16x32xf32>
    %cst_154 = arith.constant dense<0.000000e+00> : vector<16xf32>
    %491 = vector.multi_reduction <add>, %490, %cst_154 [1] : vector<16x32xf32> to vector<16xf32>
    %492 = vector.shape_cast %491 : vector<16xf32> to vector<16x1xf32>
    %cst_155 = arith.constant 3.200000e+01 : f32
    %493 = vector.broadcast %cst_155 : f32 to vector<16x1xf32>
    %494 = arith.divf %492, %493 : vector<16x1xf32>
    %cst_156 = arith.constant 9.99999974E-6 : f32
    %495 = vector.broadcast %cst_156 : f32 to vector<16x1xf32>
    %496 = arith.addf %494, %495 : vector<16x1xf32>
    %497 = math.rsqrt %496 : vector<16x1xf32>
    %498 = vector.broadcast %497 : vector<16x1xf32> to vector<16x32xf32>
    %499 = arith.mulf %489, %498 : vector<16x32xf32>
    %500 = vector.broadcast %482 : vector<1x32xf32> to vector<16x32xf32>
    %501 = arith.mulf %499, %500 : vector<16x32xf32>
    %502 = vector.broadcast %483 : vector<1x32xf32> to vector<16x32xf32>
    %503 = arith.addf %501, %502 : vector<16x32xf32>
    %c0_157 = arith.constant 0 : index
    %c0_158 = arith.constant 0 : index
    %504 = vector.load %arg1[%c0_157, %c0_158] : memref<16x32xf32, #tpu.memory_space<vmem>>, vector<16x32xf32>
    %c0_159 = arith.constant 0 : index
    %c0_160 = arith.constant 0 : index
    %505 = vector.load %arg3[%c0_159, %c0_160] : memref<16x16xf32, #tpu.memory_space<vmem>>, vector<16x16xf32>
    %c0_161 = arith.constant 0 : index
    %c0_162 = arith.constant 0 : index
    %506 = vector.load %arg4[%c0_161, %c0_162] : memref<16x16xf32, #tpu.memory_space<vmem>>, vector<16x16xf32>
    %c8 = arith.constant 8 : index
    %c0_163 = arith.constant 0 : index
    %c0_164 = arith.constant 0 : index
    %507 = vector.load %arg5[%c8, %c0_163, %c0_164] : memref<24x32x32xbf16, #tpu.memory_space<vmem>>, vector<1x32x32xbf16>
    %508 = vector.shape_cast %507 : vector<1x32x32xbf16> to vector<32x32xbf16>
    %c8_165 = arith.constant 8 : index
    %c0_166 = arith.constant 0 : index
    %509 = vector.load %arg9[%c8_165, %c0_166] : memref<56x128xf32, #tpu.memory_space<vmem>>, vector<1x32xf32>
    %510 = arith.truncf %504 : vector<16x32xf32> to vector<16x32xbf16>
    %cst_167 = arith.constant dense<0.000000e+00> : vector<16x32xf32>
    %511 = tpu.matmul %510, %508, %cst_167 {dimension_numbers = #tpu.dot_dimension_numbers<[1], [0], [0], [1], [0, 0, 1, 1], [], []>} : vector<16x32xbf16>, vector<32x32xbf16>, vector<16x32xf32> -> vector<16x32xf32>
    %512 = vector.broadcast %509 : vector<1x32xf32> to vector<16x32xf32>
    %513 = arith.addf %511, %512 : vector<16x32xf32>
    %c9 = arith.constant 9 : index
    %c0_168 = arith.constant 0 : index
    %c0_169 = arith.constant 0 : index
    %514 = vector.load %arg5[%c9, %c0_168, %c0_169] : memref<24x32x32xbf16, #tpu.memory_space<vmem>>, vector<1x32x32xbf16>
    %515 = vector.shape_cast %514 : vector<1x32x32xbf16> to vector<32x32xbf16>
    %c9_170 = arith.constant 9 : index
    %c0_171 = arith.constant 0 : index
    %516 = vector.load %arg9[%c9_170, %c0_171] : memref<56x128xf32, #tpu.memory_space<vmem>>, vector<1x32xf32>
    %517 = arith.truncf %504 : vector<16x32xf32> to vector<16x32xbf16>
    %cst_172 = arith.constant dense<0.000000e+00> : vector<16x32xf32>
    %518 = tpu.matmul %517, %515, %cst_172 {dimension_numbers = #tpu.dot_dimension_numbers<[1], [0], [0], [1], [0, 0, 1, 1], [], []>} : vector<16x32xbf16>, vector<32x32xbf16>, vector<16x32xf32> -> vector<16x32xf32>
    %519 = vector.broadcast %516 : vector<1x32xf32> to vector<16x32xf32>
    %520 = arith.addf %518, %519 : vector<16x32xf32>
    %c10 = arith.constant 10 : index
    %c0_173 = arith.constant 0 : index
    %c0_174 = arith.constant 0 : index
    %521 = vector.load %arg5[%c10, %c0_173, %c0_174] : memref<24x32x32xbf16, #tpu.memory_space<vmem>>, vector<1x32x32xbf16>
    %522 = vector.shape_cast %521 : vector<1x32x32xbf16> to vector<32x32xbf16>
    %c10_175 = arith.constant 10 : index
    %c0_176 = arith.constant 0 : index
    %523 = vector.load %arg9[%c10_175, %c0_176] : memref<56x128xf32, #tpu.memory_space<vmem>>, vector<1x32xf32>
    %524 = arith.truncf %504 : vector<16x32xf32> to vector<16x32xbf16>
    %cst_177 = arith.constant dense<0.000000e+00> : vector<16x32xf32>
    %525 = tpu.matmul %524, %522, %cst_177 {dimension_numbers = #tpu.dot_dimension_numbers<[1], [0], [0], [1], [0, 0, 1, 1], [], []>} : vector<16x32xbf16>, vector<32x32xbf16>, vector<16x32xf32> -> vector<16x32xf32>
    %526 = vector.broadcast %523 : vector<1x32xf32> to vector<16x32xf32>
    %527 = arith.addf %525, %526 : vector<16x32xf32>
    %528 = vector.extract_strided_slice %513 {offsets = [0, 0], sizes = [16, 4], strides = [1, 1]} : vector<16x32xf32> to vector<16x4xf32>
    %529 = arith.truncf %528 : vector<16x4xf32> to vector<16x4xbf16>
    %530 = vector.extract_strided_slice %520 {offsets = [0, 0], sizes = [16, 4], strides = [1, 1]} : vector<16x32xf32> to vector<16x4xf32>
    %531 = arith.truncf %530 : vector<16x4xf32> to vector<16x4xbf16>
    %532 = vector.extract_strided_slice %527 {offsets = [0, 0], sizes = [16, 4], strides = [1, 1]} : vector<16x32xf32> to vector<16x4xf32>
    %533 = arith.truncf %532 : vector<16x4xf32> to vector<16x4xbf16>
    %cst_178 = arith.constant dense<0.000000e+00> : vector<16x16xf32>
    %534 = tpu.matmul %529, %531, %cst_178 {dimension_numbers = #tpu.dot_dimension_numbers<[1], [1], [0], [0], [0, 0, 1, 0], [], []>} : vector<16x4xbf16>, vector<16x4xbf16>, vector<16x16xf32> -> vector<16x16xf32>
    %535 = arith.addf %534, %505 : vector<16x16xf32>
    %cst_179 = arith.constant dense<0xFF800000> : vector<16xf32>
    %536 = vector.multi_reduction <maximumf>, %535, %cst_179 [1] : vector<16x16xf32> to vector<16xf32>
    %537 = vector.shape_cast %536 : vector<16xf32> to vector<16x1xf32>
    %538 = vector.broadcast %537 : vector<16x1xf32> to vector<16x16xf32>
    %539 = arith.subf %535, %538 : vector<16x16xf32>
    %540 = math.exp %539 : vector<16x16xf32>
    %cst_180 = arith.constant dense<0.000000e+00> : vector<16xf32>
    %541 = vector.multi_reduction <add>, %540, %cst_180 [1] : vector<16x16xf32> to vector<16xf32>
    %542 = vector.shape_cast %541 : vector<16xf32> to vector<16x1xf32>
    %543 = tpu.reciprocal %542 {approx = true} : vector<16x1xf32> -> vector<16x1xf32>
    %544 = vector.broadcast %543 : vector<16x1xf32> to vector<16x16xf32>
    %545 = arith.mulf %540, %544 : vector<16x16xf32>
    %546 = arith.truncf %545 : vector<16x16xf32> to vector<16x16xbf16>
    %cst_181 = arith.constant dense<0.000000e+00> : vector<16x4xf32>
    %547 = tpu.matmul %546, %533, %cst_181 {dimension_numbers = #tpu.dot_dimension_numbers<[1], [0], [0], [1], [0, 0, 1, 1], [], []>} : vector<16x16xbf16>, vector<16x4xbf16>, vector<16x4xf32> -> vector<16x4xf32>
    %548 = vector.extract_strided_slice %513 {offsets = [0, 4], sizes = [16, 4], strides = [1, 1]} : vector<16x32xf32> to vector<16x4xf32>
    %549 = arith.truncf %548 : vector<16x4xf32> to vector<16x4xbf16>
    %550 = vector.extract_strided_slice %520 {offsets = [0, 4], sizes = [16, 4], strides = [1, 1]} : vector<16x32xf32> to vector<16x4xf32>
    %551 = arith.truncf %550 : vector<16x4xf32> to vector<16x4xbf16>
    %552 = vector.extract_strided_slice %527 {offsets = [0, 4], sizes = [16, 4], strides = [1, 1]} : vector<16x32xf32> to vector<16x4xf32>
    %553 = arith.truncf %552 : vector<16x4xf32> to vector<16x4xbf16>
    %cst_182 = arith.constant dense<0.000000e+00> : vector<16x16xf32>
    %554 = tpu.matmul %549, %551, %cst_182 {dimension_numbers = #tpu.dot_dimension_numbers<[1], [1], [0], [0], [0, 0, 1, 0], [], []>} : vector<16x4xbf16>, vector<16x4xbf16>, vector<16x16xf32> -> vector<16x16xf32>
    %555 = arith.addf %554, %505 : vector<16x16xf32>
    %cst_183 = arith.constant dense<0xFF800000> : vector<16xf32>
    %556 = vector.multi_reduction <maximumf>, %555, %cst_183 [1] : vector<16x16xf32> to vector<16xf32>
    %557 = vector.shape_cast %556 : vector<16xf32> to vector<16x1xf32>
    %558 = vector.broadcast %557 : vector<16x1xf32> to vector<16x16xf32>
    %559 = arith.subf %555, %558 : vector<16x16xf32>
    %560 = math.exp %559 : vector<16x16xf32>
    %cst_184 = arith.constant dense<0.000000e+00> : vector<16xf32>
    %561 = vector.multi_reduction <add>, %560, %cst_184 [1] : vector<16x16xf32> to vector<16xf32>
    %562 = vector.shape_cast %561 : vector<16xf32> to vector<16x1xf32>
    %563 = tpu.reciprocal %562 {approx = true} : vector<16x1xf32> -> vector<16x1xf32>
    %564 = vector.broadcast %563 : vector<16x1xf32> to vector<16x16xf32>
    %565 = arith.mulf %560, %564 : vector<16x16xf32>
    %566 = arith.truncf %565 : vector<16x16xf32> to vector<16x16xbf16>
    %cst_185 = arith.constant dense<0.000000e+00> : vector<16x4xf32>
    %567 = tpu.matmul %566, %553, %cst_185 {dimension_numbers = #tpu.dot_dimension_numbers<[1], [0], [0], [1], [0, 0, 1, 1], [], []>} : vector<16x16xbf16>, vector<16x4xbf16>, vector<16x4xf32> -> vector<16x4xf32>
    %568 = vector.extract_strided_slice %513 {offsets = [0, 8], sizes = [16, 4], strides = [1, 1]} : vector<16x32xf32> to vector<16x4xf32>
    %569 = arith.truncf %568 : vector<16x4xf32> to vector<16x4xbf16>
    %570 = vector.extract_strided_slice %520 {offsets = [0, 8], sizes = [16, 4], strides = [1, 1]} : vector<16x32xf32> to vector<16x4xf32>
    %571 = arith.truncf %570 : vector<16x4xf32> to vector<16x4xbf16>
    %572 = vector.extract_strided_slice %527 {offsets = [0, 8], sizes = [16, 4], strides = [1, 1]} : vector<16x32xf32> to vector<16x4xf32>
    %573 = arith.truncf %572 : vector<16x4xf32> to vector<16x4xbf16>
    %cst_186 = arith.constant dense<0.000000e+00> : vector<16x16xf32>
    %574 = tpu.matmul %569, %571, %cst_186 {dimension_numbers = #tpu.dot_dimension_numbers<[1], [1], [0], [0], [0, 0, 1, 0], [], []>} : vector<16x4xbf16>, vector<16x4xbf16>, vector<16x16xf32> -> vector<16x16xf32>
    %575 = arith.addf %574, %505 : vector<16x16xf32>
    %cst_187 = arith.constant dense<0xFF800000> : vector<16xf32>
    %576 = vector.multi_reduction <maximumf>, %575, %cst_187 [1] : vector<16x16xf32> to vector<16xf32>
    %577 = vector.shape_cast %576 : vector<16xf32> to vector<16x1xf32>
    %578 = vector.broadcast %577 : vector<16x1xf32> to vector<16x16xf32>
    %579 = arith.subf %575, %578 : vector<16x16xf32>
    %580 = math.exp %579 : vector<16x16xf32>
    %cst_188 = arith.constant dense<0.000000e+00> : vector<16xf32>
    %581 = vector.multi_reduction <add>, %580, %cst_188 [1] : vector<16x16xf32> to vector<16xf32>
    %582 = vector.shape_cast %581 : vector<16xf32> to vector<16x1xf32>
    %583 = tpu.reciprocal %582 {approx = true} : vector<16x1xf32> -> vector<16x1xf32>
    %584 = vector.broadcast %583 : vector<16x1xf32> to vector<16x16xf32>
    %585 = arith.mulf %580, %584 : vector<16x16xf32>
    %586 = arith.truncf %585 : vector<16x16xf32> to vector<16x16xbf16>
    %cst_189 = arith.constant dense<0.000000e+00> : vector<16x4xf32>
    %587 = tpu.matmul %586, %573, %cst_189 {dimension_numbers = #tpu.dot_dimension_numbers<[1], [0], [0], [1], [0, 0, 1, 1], [], []>} : vector<16x16xbf16>, vector<16x4xbf16>, vector<16x4xf32> -> vector<16x4xf32>
    %588 = vector.extract_strided_slice %513 {offsets = [0, 12], sizes = [16, 4], strides = [1, 1]} : vector<16x32xf32> to vector<16x4xf32>
    %589 = arith.truncf %588 : vector<16x4xf32> to vector<16x4xbf16>
    %590 = vector.extract_strided_slice %520 {offsets = [0, 12], sizes = [16, 4], strides = [1, 1]} : vector<16x32xf32> to vector<16x4xf32>
    %591 = arith.truncf %590 : vector<16x4xf32> to vector<16x4xbf16>
    %592 = vector.extract_strided_slice %527 {offsets = [0, 12], sizes = [16, 4], strides = [1, 1]} : vector<16x32xf32> to vector<16x4xf32>
    %593 = arith.truncf %592 : vector<16x4xf32> to vector<16x4xbf16>
    %cst_190 = arith.constant dense<0.000000e+00> : vector<16x16xf32>
    %594 = tpu.matmul %589, %591, %cst_190 {dimension_numbers = #tpu.dot_dimension_numbers<[1], [1], [0], [0], [0, 0, 1, 0], [], []>} : vector<16x4xbf16>, vector<16x4xbf16>, vector<16x16xf32> -> vector<16x16xf32>
    %595 = arith.addf %594, %505 : vector<16x16xf32>
    %cst_191 = arith.constant dense<0xFF800000> : vector<16xf32>
    %596 = vector.multi_reduction <maximumf>, %595, %cst_191 [1] : vector<16x16xf32> to vector<16xf32>
    %597 = vector.shape_cast %596 : vector<16xf32> to vector<16x1xf32>
    %598 = vector.broadcast %597 : vector<16x1xf32> to vector<16x16xf32>
    %599 = arith.subf %595, %598 : vector<16x16xf32>
    %600 = math.exp %599 : vector<16x16xf32>
    %cst_192 = arith.constant dense<0.000000e+00> : vector<16xf32>
    %601 = vector.multi_reduction <add>, %600, %cst_192 [1] : vector<16x16xf32> to vector<16xf32>
    %602 = vector.shape_cast %601 : vector<16xf32> to vector<16x1xf32>
    %603 = tpu.reciprocal %602 {approx = true} : vector<16x1xf32> -> vector<16x1xf32>
    %604 = vector.broadcast %603 : vector<16x1xf32> to vector<16x16xf32>
    %605 = arith.mulf %600, %604 : vector<16x16xf32>
    %606 = arith.truncf %605 : vector<16x16xf32> to vector<16x16xbf16>
    %cst_193 = arith.constant dense<0.000000e+00> : vector<16x4xf32>
    %607 = tpu.matmul %606, %593, %cst_193 {dimension_numbers = #tpu.dot_dimension_numbers<[1], [0], [0], [1], [0, 0, 1, 1], [], []>} : vector<16x16xbf16>, vector<16x4xbf16>, vector<16x4xf32> -> vector<16x4xf32>
    %608 = vector.extract_strided_slice %513 {offsets = [0, 16], sizes = [16, 4], strides = [1, 1]} : vector<16x32xf32> to vector<16x4xf32>
    %609 = arith.truncf %608 : vector<16x4xf32> to vector<16x4xbf16>
    %610 = vector.extract_strided_slice %520 {offsets = [0, 16], sizes = [16, 4], strides = [1, 1]} : vector<16x32xf32> to vector<16x4xf32>
    %611 = arith.truncf %610 : vector<16x4xf32> to vector<16x4xbf16>
    %612 = vector.extract_strided_slice %527 {offsets = [0, 16], sizes = [16, 4], strides = [1, 1]} : vector<16x32xf32> to vector<16x4xf32>
    %613 = arith.truncf %612 : vector<16x4xf32> to vector<16x4xbf16>
    %cst_194 = arith.constant dense<0.000000e+00> : vector<16x16xf32>
    %614 = tpu.matmul %609, %611, %cst_194 {dimension_numbers = #tpu.dot_dimension_numbers<[1], [1], [0], [0], [0, 0, 1, 0], [], []>} : vector<16x4xbf16>, vector<16x4xbf16>, vector<16x16xf32> -> vector<16x16xf32>
    %615 = arith.addf %614, %505 : vector<16x16xf32>
    %cst_195 = arith.constant dense<0xFF800000> : vector<16xf32>
    %616 = vector.multi_reduction <maximumf>, %615, %cst_195 [1] : vector<16x16xf32> to vector<16xf32>
    %617 = vector.shape_cast %616 : vector<16xf32> to vector<16x1xf32>
    %618 = vector.broadcast %617 : vector<16x1xf32> to vector<16x16xf32>
    %619 = arith.subf %615, %618 : vector<16x16xf32>
    %620 = math.exp %619 : vector<16x16xf32>
    %cst_196 = arith.constant dense<0.000000e+00> : vector<16xf32>
    %621 = vector.multi_reduction <add>, %620, %cst_196 [1] : vector<16x16xf32> to vector<16xf32>
    %622 = vector.shape_cast %621 : vector<16xf32> to vector<16x1xf32>
    %623 = tpu.reciprocal %622 {approx = true} : vector<16x1xf32> -> vector<16x1xf32>
    %624 = vector.broadcast %623 : vector<16x1xf32> to vector<16x16xf32>
    %625 = arith.mulf %620, %624 : vector<16x16xf32>
    %626 = arith.truncf %625 : vector<16x16xf32> to vector<16x16xbf16>
    %cst_197 = arith.constant dense<0.000000e+00> : vector<16x4xf32>
    %627 = tpu.matmul %626, %613, %cst_197 {dimension_numbers = #tpu.dot_dimension_numbers<[1], [0], [0], [1], [0, 0, 1, 1], [], []>} : vector<16x16xbf16>, vector<16x4xbf16>, vector<16x4xf32> -> vector<16x4xf32>
    %628 = vector.extract_strided_slice %513 {offsets = [0, 20], sizes = [16, 4], strides = [1, 1]} : vector<16x32xf32> to vector<16x4xf32>
    %629 = arith.truncf %628 : vector<16x4xf32> to vector<16x4xbf16>
    %630 = vector.extract_strided_slice %520 {offsets = [0, 20], sizes = [16, 4], strides = [1, 1]} : vector<16x32xf32> to vector<16x4xf32>
    %631 = arith.truncf %630 : vector<16x4xf32> to vector<16x4xbf16>
    %632 = vector.extract_strided_slice %527 {offsets = [0, 20], sizes = [16, 4], strides = [1, 1]} : vector<16x32xf32> to vector<16x4xf32>
    %633 = arith.truncf %632 : vector<16x4xf32> to vector<16x4xbf16>
    %cst_198 = arith.constant dense<0.000000e+00> : vector<16x16xf32>
    %634 = tpu.matmul %629, %631, %cst_198 {dimension_numbers = #tpu.dot_dimension_numbers<[1], [1], [0], [0], [0, 0, 1, 0], [], []>} : vector<16x4xbf16>, vector<16x4xbf16>, vector<16x16xf32> -> vector<16x16xf32>
    %635 = arith.addf %634, %505 : vector<16x16xf32>
    %cst_199 = arith.constant dense<0xFF800000> : vector<16xf32>
    %636 = vector.multi_reduction <maximumf>, %635, %cst_199 [1] : vector<16x16xf32> to vector<16xf32>
    %637 = vector.shape_cast %636 : vector<16xf32> to vector<16x1xf32>
    %638 = vector.broadcast %637 : vector<16x1xf32> to vector<16x16xf32>
    %639 = arith.subf %635, %638 : vector<16x16xf32>
    %640 = math.exp %639 : vector<16x16xf32>
    %cst_200 = arith.constant dense<0.000000e+00> : vector<16xf32>
    %641 = vector.multi_reduction <add>, %640, %cst_200 [1] : vector<16x16xf32> to vector<16xf32>
    %642 = vector.shape_cast %641 : vector<16xf32> to vector<16x1xf32>
    %643 = tpu.reciprocal %642 {approx = true} : vector<16x1xf32> -> vector<16x1xf32>
    %644 = vector.broadcast %643 : vector<16x1xf32> to vector<16x16xf32>
    %645 = arith.mulf %640, %644 : vector<16x16xf32>
    %646 = arith.truncf %645 : vector<16x16xf32> to vector<16x16xbf16>
    %cst_201 = arith.constant dense<0.000000e+00> : vector<16x4xf32>
    %647 = tpu.matmul %646, %633, %cst_201 {dimension_numbers = #tpu.dot_dimension_numbers<[1], [0], [0], [1], [0, 0, 1, 1], [], []>} : vector<16x16xbf16>, vector<16x4xbf16>, vector<16x4xf32> -> vector<16x4xf32>
    %648 = vector.extract_strided_slice %513 {offsets = [0, 24], sizes = [16, 4], strides = [1, 1]} : vector<16x32xf32> to vector<16x4xf32>
    %649 = arith.truncf %648 : vector<16x4xf32> to vector<16x4xbf16>
    %650 = vector.extract_strided_slice %520 {offsets = [0, 24], sizes = [16, 4], strides = [1, 1]} : vector<16x32xf32> to vector<16x4xf32>
    %651 = arith.truncf %650 : vector<16x4xf32> to vector<16x4xbf16>
    %652 = vector.extract_strided_slice %527 {offsets = [0, 24], sizes = [16, 4], strides = [1, 1]} : vector<16x32xf32> to vector<16x4xf32>
    %653 = arith.truncf %652 : vector<16x4xf32> to vector<16x4xbf16>
    %cst_202 = arith.constant dense<0.000000e+00> : vector<16x16xf32>
    %654 = tpu.matmul %649, %651, %cst_202 {dimension_numbers = #tpu.dot_dimension_numbers<[1], [1], [0], [0], [0, 0, 1, 0], [], []>} : vector<16x4xbf16>, vector<16x4xbf16>, vector<16x16xf32> -> vector<16x16xf32>
    %655 = arith.addf %654, %505 : vector<16x16xf32>
    %cst_203 = arith.constant dense<0xFF800000> : vector<16xf32>
    %656 = vector.multi_reduction <maximumf>, %655, %cst_203 [1] : vector<16x16xf32> to vector<16xf32>
    %657 = vector.shape_cast %656 : vector<16xf32> to vector<16x1xf32>
    %658 = vector.broadcast %657 : vector<16x1xf32> to vector<16x16xf32>
    %659 = arith.subf %655, %658 : vector<16x16xf32>
    %660 = math.exp %659 : vector<16x16xf32>
    %cst_204 = arith.constant dense<0.000000e+00> : vector<16xf32>
    %661 = vector.multi_reduction <add>, %660, %cst_204 [1] : vector<16x16xf32> to vector<16xf32>
    %662 = vector.shape_cast %661 : vector<16xf32> to vector<16x1xf32>
    %663 = tpu.reciprocal %662 {approx = true} : vector<16x1xf32> -> vector<16x1xf32>
    %664 = vector.broadcast %663 : vector<16x1xf32> to vector<16x16xf32>
    %665 = arith.mulf %660, %664 : vector<16x16xf32>
    %666 = arith.truncf %665 : vector<16x16xf32> to vector<16x16xbf16>
    %cst_205 = arith.constant dense<0.000000e+00> : vector<16x4xf32>
    %667 = tpu.matmul %666, %653, %cst_205 {dimension_numbers = #tpu.dot_dimension_numbers<[1], [0], [0], [1], [0, 0, 1, 1], [], []>} : vector<16x16xbf16>, vector<16x4xbf16>, vector<16x4xf32> -> vector<16x4xf32>
    %668 = vector.extract_strided_slice %513 {offsets = [0, 28], sizes = [16, 4], strides = [1, 1]} : vector<16x32xf32> to vector<16x4xf32>
    %669 = arith.truncf %668 : vector<16x4xf32> to vector<16x4xbf16>
    %670 = vector.extract_strided_slice %520 {offsets = [0, 28], sizes = [16, 4], strides = [1, 1]} : vector<16x32xf32> to vector<16x4xf32>
    %671 = arith.truncf %670 : vector<16x4xf32> to vector<16x4xbf16>
    %672 = vector.extract_strided_slice %527 {offsets = [0, 28], sizes = [16, 4], strides = [1, 1]} : vector<16x32xf32> to vector<16x4xf32>
    %673 = arith.truncf %672 : vector<16x4xf32> to vector<16x4xbf16>
    %cst_206 = arith.constant dense<0.000000e+00> : vector<16x16xf32>
    %674 = tpu.matmul %669, %671, %cst_206 {dimension_numbers = #tpu.dot_dimension_numbers<[1], [1], [0], [0], [0, 0, 1, 0], [], []>} : vector<16x4xbf16>, vector<16x4xbf16>, vector<16x16xf32> -> vector<16x16xf32>
    %675 = arith.addf %674, %505 : vector<16x16xf32>
    %cst_207 = arith.constant dense<0xFF800000> : vector<16xf32>
    %676 = vector.multi_reduction <maximumf>, %675, %cst_207 [1] : vector<16x16xf32> to vector<16xf32>
    %677 = vector.shape_cast %676 : vector<16xf32> to vector<16x1xf32>
    %678 = vector.broadcast %677 : vector<16x1xf32> to vector<16x16xf32>
    %679 = arith.subf %675, %678 : vector<16x16xf32>
    %680 = math.exp %679 : vector<16x16xf32>
    %cst_208 = arith.constant dense<0.000000e+00> : vector<16xf32>
    %681 = vector.multi_reduction <add>, %680, %cst_208 [1] : vector<16x16xf32> to vector<16xf32>
    %682 = vector.shape_cast %681 : vector<16xf32> to vector<16x1xf32>
    %683 = tpu.reciprocal %682 {approx = true} : vector<16x1xf32> -> vector<16x1xf32>
    %684 = vector.broadcast %683 : vector<16x1xf32> to vector<16x16xf32>
    %685 = arith.mulf %680, %684 : vector<16x16xf32>
    %686 = arith.truncf %685 : vector<16x16xf32> to vector<16x16xbf16>
    %cst_209 = arith.constant dense<0.000000e+00> : vector<16x4xf32>
    %687 = tpu.matmul %686, %673, %cst_209 {dimension_numbers = #tpu.dot_dimension_numbers<[1], [0], [0], [1], [0, 0, 1, 1], [], []>} : vector<16x16xbf16>, vector<16x4xbf16>, vector<16x4xf32> -> vector<16x4xf32>
    %688 = tpu.concatenate %547, %567, %587, %607, %627, %647, %667, %687 in 1 : vector<16x4xf32>, vector<16x4xf32>, vector<16x4xf32>, vector<16x4xf32>, vector<16x4xf32>, vector<16x4xf32>, vector<16x4xf32>, vector<16x4xf32> -> vector<16x32xf32>
    %c11 = arith.constant 11 : index
    %c0_210 = arith.constant 0 : index
    %c0_211 = arith.constant 0 : index
    %689 = vector.load %arg5[%c11, %c0_210, %c0_211] : memref<24x32x32xbf16, #tpu.memory_space<vmem>>, vector<1x32x32xbf16>
    %690 = vector.shape_cast %689 : vector<1x32x32xbf16> to vector<32x32xbf16>
    %c11_212 = arith.constant 11 : index
    %c0_213 = arith.constant 0 : index
    %691 = vector.load %arg9[%c11_212, %c0_213] : memref<56x128xf32, #tpu.memory_space<vmem>>, vector<1x32xf32>
    %692 = arith.truncf %688 : vector<16x32xf32> to vector<16x32xbf16>
    %cst_214 = arith.constant dense<0.000000e+00> : vector<16x32xf32>
    %693 = tpu.matmul %692, %690, %cst_214 {dimension_numbers = #tpu.dot_dimension_numbers<[1], [0], [0], [1], [0, 0, 1, 1], [], []>} : vector<16x32xbf16>, vector<32x32xbf16>, vector<16x32xf32> -> vector<16x32xf32>
    %694 = vector.broadcast %691 : vector<1x32xf32> to vector<16x32xf32>
    %695 = arith.addf %693, %694 : vector<16x32xf32>
    %696 = arith.addf %504, %695 : vector<16x32xf32>
    %c28 = arith.constant 28 : index
    %c0_215 = arith.constant 0 : index
    %697 = vector.load %arg9[%c28, %c0_215] : memref<56x128xf32, #tpu.memory_space<vmem>>, vector<1x32xf32>
    %c38 = arith.constant 38 : index
    %c0_216 = arith.constant 0 : index
    %698 = vector.load %arg9[%c38, %c0_216] : memref<56x128xf32, #tpu.memory_space<vmem>>, vector<1x32xf32>
    %cst_217 = arith.constant dense<0.000000e+00> : vector<16xf32>
    %699 = vector.multi_reduction <add>, %696, %cst_217 [1] : vector<16x32xf32> to vector<16xf32>
    %700 = vector.shape_cast %699 : vector<16xf32> to vector<16x1xf32>
    %cst_218 = arith.constant 3.200000e+01 : f32
    %701 = vector.broadcast %cst_218 : f32 to vector<16x1xf32>
    %702 = arith.divf %700, %701 : vector<16x1xf32>
    %703 = vector.broadcast %702 : vector<16x1xf32> to vector<16x32xf32>
    %704 = arith.subf %696, %703 : vector<16x32xf32>
    %705 = arith.mulf %704, %704 : vector<16x32xf32>
    %cst_219 = arith.constant dense<0.000000e+00> : vector<16xf32>
    %706 = vector.multi_reduction <add>, %705, %cst_219 [1] : vector<16x32xf32> to vector<16xf32>
    %707 = vector.shape_cast %706 : vector<16xf32> to vector<16x1xf32>
    %cst_220 = arith.constant 3.200000e+01 : f32
    %708 = vector.broadcast %cst_220 : f32 to vector<16x1xf32>
    %709 = arith.divf %707, %708 : vector<16x1xf32>
    %cst_221 = arith.constant 9.99999974E-6 : f32
    %710 = vector.broadcast %cst_221 : f32 to vector<16x1xf32>
    %711 = arith.addf %709, %710 : vector<16x1xf32>
    %712 = math.rsqrt %711 : vector<16x1xf32>
    %713 = vector.broadcast %712 : vector<16x1xf32> to vector<16x32xf32>
    %714 = arith.mulf %704, %713 : vector<16x32xf32>
    %715 = vector.broadcast %697 : vector<1x32xf32> to vector<16x32xf32>
    %716 = arith.mulf %714, %715 : vector<16x32xf32>
    %717 = vector.broadcast %698 : vector<1x32xf32> to vector<16x32xf32>
    %718 = arith.addf %716, %717 : vector<16x32xf32>
    %c16 = arith.constant 16 : index
    %c0_222 = arith.constant 0 : index
    %c0_223 = arith.constant 0 : index
    %719 = vector.load %arg5[%c16, %c0_222, %c0_223] : memref<24x32x32xbf16, #tpu.memory_space<vmem>>, vector<1x32x32xbf16>
    %720 = vector.shape_cast %719 : vector<1x32x32xbf16> to vector<32x32xbf16>
    %c16_224 = arith.constant 16 : index
    %c0_225 = arith.constant 0 : index
    %721 = vector.load %arg9[%c16_224, %c0_225] : memref<56x128xf32, #tpu.memory_space<vmem>>, vector<1x32xf32>
    %722 = arith.truncf %718 : vector<16x32xf32> to vector<16x32xbf16>
    %cst_226 = arith.constant dense<0.000000e+00> : vector<16x32xf32>
    %723 = tpu.matmul %722, %720, %cst_226 {dimension_numbers = #tpu.dot_dimension_numbers<[1], [0], [0], [1], [0, 0, 1, 1], [], []>} : vector<16x32xbf16>, vector<32x32xbf16>, vector<16x32xf32> -> vector<16x32xf32>
    %724 = vector.broadcast %721 : vector<1x32xf32> to vector<16x32xf32>
    %725 = arith.addf %723, %724 : vector<16x32xf32>
    %c17 = arith.constant 17 : index
    %c0_227 = arith.constant 0 : index
    %c0_228 = arith.constant 0 : index
    %726 = vector.load %arg5[%c17, %c0_227, %c0_228] : memref<24x32x32xbf16, #tpu.memory_space<vmem>>, vector<1x32x32xbf16>
    %727 = vector.shape_cast %726 : vector<1x32x32xbf16> to vector<32x32xbf16>
    %c17_229 = arith.constant 17 : index
    %c0_230 = arith.constant 0 : index
    %728 = vector.load %arg9[%c17_229, %c0_230] : memref<56x128xf32, #tpu.memory_space<vmem>>, vector<1x32xf32>
    %729 = arith.truncf %503 : vector<16x32xf32> to vector<16x32xbf16>
    %cst_231 = arith.constant dense<0.000000e+00> : vector<16x32xf32>
    %730 = tpu.matmul %729, %727, %cst_231 {dimension_numbers = #tpu.dot_dimension_numbers<[1], [0], [0], [1], [0, 0, 1, 1], [], []>} : vector<16x32xbf16>, vector<32x32xbf16>, vector<16x32xf32> -> vector<16x32xf32>
    %731 = vector.broadcast %728 : vector<1x32xf32> to vector<16x32xf32>
    %732 = arith.addf %730, %731 : vector<16x32xf32>
    %c18 = arith.constant 18 : index
    %c0_232 = arith.constant 0 : index
    %c0_233 = arith.constant 0 : index
    %733 = vector.load %arg5[%c18, %c0_232, %c0_233] : memref<24x32x32xbf16, #tpu.memory_space<vmem>>, vector<1x32x32xbf16>
    %734 = vector.shape_cast %733 : vector<1x32x32xbf16> to vector<32x32xbf16>
    %c18_234 = arith.constant 18 : index
    %c0_235 = arith.constant 0 : index
    %735 = vector.load %arg9[%c18_234, %c0_235] : memref<56x128xf32, #tpu.memory_space<vmem>>, vector<1x32xf32>
    %736 = arith.truncf %503 : vector<16x32xf32> to vector<16x32xbf16>
    %cst_236 = arith.constant dense<0.000000e+00> : vector<16x32xf32>
    %737 = tpu.matmul %736, %734, %cst_236 {dimension_numbers = #tpu.dot_dimension_numbers<[1], [0], [0], [1], [0, 0, 1, 1], [], []>} : vector<16x32xbf16>, vector<32x32xbf16>, vector<16x32xf32> -> vector<16x32xf32>
    %738 = vector.broadcast %735 : vector<1x32xf32> to vector<16x32xf32>
    %739 = arith.addf %737, %738 : vector<16x32xf32>
    %740 = vector.extract_strided_slice %725 {offsets = [0, 0], sizes = [16, 4], strides = [1, 1]} : vector<16x32xf32> to vector<16x4xf32>
    %741 = arith.truncf %740 : vector<16x4xf32> to vector<16x4xbf16>
    %742 = vector.extract_strided_slice %732 {offsets = [0, 0], sizes = [16, 4], strides = [1, 1]} : vector<16x32xf32> to vector<16x4xf32>
    %743 = arith.truncf %742 : vector<16x4xf32> to vector<16x4xbf16>
    %744 = vector.extract_strided_slice %739 {offsets = [0, 0], sizes = [16, 4], strides = [1, 1]} : vector<16x32xf32> to vector<16x4xf32>
    %745 = arith.truncf %744 : vector<16x4xf32> to vector<16x4xbf16>
    %cst_237 = arith.constant dense<0.000000e+00> : vector<16x16xf32>
    %746 = tpu.matmul %741, %743, %cst_237 {dimension_numbers = #tpu.dot_dimension_numbers<[1], [1], [0], [0], [0, 0, 1, 0], [], []>} : vector<16x4xbf16>, vector<16x4xbf16>, vector<16x16xf32> -> vector<16x16xf32>
    %747 = arith.addf %746, %506 : vector<16x16xf32>
    %cst_238 = arith.constant dense<0xFF800000> : vector<16xf32>
    %748 = vector.multi_reduction <maximumf>, %747, %cst_238 [1] : vector<16x16xf32> to vector<16xf32>
    %749 = vector.shape_cast %748 : vector<16xf32> to vector<16x1xf32>
    %750 = vector.broadcast %749 : vector<16x1xf32> to vector<16x16xf32>
    %751 = arith.subf %747, %750 : vector<16x16xf32>
    %752 = math.exp %751 : vector<16x16xf32>
    %cst_239 = arith.constant dense<0.000000e+00> : vector<16xf32>
    %753 = vector.multi_reduction <add>, %752, %cst_239 [1] : vector<16x16xf32> to vector<16xf32>
    %754 = vector.shape_cast %753 : vector<16xf32> to vector<16x1xf32>
    %755 = tpu.reciprocal %754 {approx = true} : vector<16x1xf32> -> vector<16x1xf32>
    %756 = vector.broadcast %755 : vector<16x1xf32> to vector<16x16xf32>
    %757 = arith.mulf %752, %756 : vector<16x16xf32>
    %758 = arith.truncf %757 : vector<16x16xf32> to vector<16x16xbf16>
    %cst_240 = arith.constant dense<0.000000e+00> : vector<16x4xf32>
    %759 = tpu.matmul %758, %745, %cst_240 {dimension_numbers = #tpu.dot_dimension_numbers<[1], [0], [0], [1], [0, 0, 1, 1], [], []>} : vector<16x16xbf16>, vector<16x4xbf16>, vector<16x4xf32> -> vector<16x4xf32>
    %760 = vector.extract_strided_slice %725 {offsets = [0, 4], sizes = [16, 4], strides = [1, 1]} : vector<16x32xf32> to vector<16x4xf32>
    %761 = arith.truncf %760 : vector<16x4xf32> to vector<16x4xbf16>
    %762 = vector.extract_strided_slice %732 {offsets = [0, 4], sizes = [16, 4], strides = [1, 1]} : vector<16x32xf32> to vector<16x4xf32>
    %763 = arith.truncf %762 : vector<16x4xf32> to vector<16x4xbf16>
    %764 = vector.extract_strided_slice %739 {offsets = [0, 4], sizes = [16, 4], strides = [1, 1]} : vector<16x32xf32> to vector<16x4xf32>
    %765 = arith.truncf %764 : vector<16x4xf32> to vector<16x4xbf16>
    %cst_241 = arith.constant dense<0.000000e+00> : vector<16x16xf32>
    %766 = tpu.matmul %761, %763, %cst_241 {dimension_numbers = #tpu.dot_dimension_numbers<[1], [1], [0], [0], [0, 0, 1, 0], [], []>} : vector<16x4xbf16>, vector<16x4xbf16>, vector<16x16xf32> -> vector<16x16xf32>
    %767 = arith.addf %766, %506 : vector<16x16xf32>
    %cst_242 = arith.constant dense<0xFF800000> : vector<16xf32>
    %768 = vector.multi_reduction <maximumf>, %767, %cst_242 [1] : vector<16x16xf32> to vector<16xf32>
    %769 = vector.shape_cast %768 : vector<16xf32> to vector<16x1xf32>
    %770 = vector.broadcast %769 : vector<16x1xf32> to vector<16x16xf32>
    %771 = arith.subf %767, %770 : vector<16x16xf32>
    %772 = math.exp %771 : vector<16x16xf32>
    %cst_243 = arith.constant dense<0.000000e+00> : vector<16xf32>
    %773 = vector.multi_reduction <add>, %772, %cst_243 [1] : vector<16x16xf32> to vector<16xf32>
    %774 = vector.shape_cast %773 : vector<16xf32> to vector<16x1xf32>
    %775 = tpu.reciprocal %774 {approx = true} : vector<16x1xf32> -> vector<16x1xf32>
    %776 = vector.broadcast %775 : vector<16x1xf32> to vector<16x16xf32>
    %777 = arith.mulf %772, %776 : vector<16x16xf32>
    %778 = arith.truncf %777 : vector<16x16xf32> to vector<16x16xbf16>
    %cst_244 = arith.constant dense<0.000000e+00> : vector<16x4xf32>
    %779 = tpu.matmul %778, %765, %cst_244 {dimension_numbers = #tpu.dot_dimension_numbers<[1], [0], [0], [1], [0, 0, 1, 1], [], []>} : vector<16x16xbf16>, vector<16x4xbf16>, vector<16x4xf32> -> vector<16x4xf32>
    %780 = vector.extract_strided_slice %725 {offsets = [0, 8], sizes = [16, 4], strides = [1, 1]} : vector<16x32xf32> to vector<16x4xf32>
    %781 = arith.truncf %780 : vector<16x4xf32> to vector<16x4xbf16>
    %782 = vector.extract_strided_slice %732 {offsets = [0, 8], sizes = [16, 4], strides = [1, 1]} : vector<16x32xf32> to vector<16x4xf32>
    %783 = arith.truncf %782 : vector<16x4xf32> to vector<16x4xbf16>
    %784 = vector.extract_strided_slice %739 {offsets = [0, 8], sizes = [16, 4], strides = [1, 1]} : vector<16x32xf32> to vector<16x4xf32>
    %785 = arith.truncf %784 : vector<16x4xf32> to vector<16x4xbf16>
    %cst_245 = arith.constant dense<0.000000e+00> : vector<16x16xf32>
    %786 = tpu.matmul %781, %783, %cst_245 {dimension_numbers = #tpu.dot_dimension_numbers<[1], [1], [0], [0], [0, 0, 1, 0], [], []>} : vector<16x4xbf16>, vector<16x4xbf16>, vector<16x16xf32> -> vector<16x16xf32>
    %787 = arith.addf %786, %506 : vector<16x16xf32>
    %cst_246 = arith.constant dense<0xFF800000> : vector<16xf32>
    %788 = vector.multi_reduction <maximumf>, %787, %cst_246 [1] : vector<16x16xf32> to vector<16xf32>
    %789 = vector.shape_cast %788 : vector<16xf32> to vector<16x1xf32>
    %790 = vector.broadcast %789 : vector<16x1xf32> to vector<16x16xf32>
    %791 = arith.subf %787, %790 : vector<16x16xf32>
    %792 = math.exp %791 : vector<16x16xf32>
    %cst_247 = arith.constant dense<0.000000e+00> : vector<16xf32>
    %793 = vector.multi_reduction <add>, %792, %cst_247 [1] : vector<16x16xf32> to vector<16xf32>
    %794 = vector.shape_cast %793 : vector<16xf32> to vector<16x1xf32>
    %795 = tpu.reciprocal %794 {approx = true} : vector<16x1xf32> -> vector<16x1xf32>
    %796 = vector.broadcast %795 : vector<16x1xf32> to vector<16x16xf32>
    %797 = arith.mulf %792, %796 : vector<16x16xf32>
    %798 = arith.truncf %797 : vector<16x16xf32> to vector<16x16xbf16>
    %cst_248 = arith.constant dense<0.000000e+00> : vector<16x4xf32>
    %799 = tpu.matmul %798, %785, %cst_248 {dimension_numbers = #tpu.dot_dimension_numbers<[1], [0], [0], [1], [0, 0, 1, 1], [], []>} : vector<16x16xbf16>, vector<16x4xbf16>, vector<16x4xf32> -> vector<16x4xf32>
    %800 = vector.extract_strided_slice %725 {offsets = [0, 12], sizes = [16, 4], strides = [1, 1]} : vector<16x32xf32> to vector<16x4xf32>
    %801 = arith.truncf %800 : vector<16x4xf32> to vector<16x4xbf16>
    %802 = vector.extract_strided_slice %732 {offsets = [0, 12], sizes = [16, 4], strides = [1, 1]} : vector<16x32xf32> to vector<16x4xf32>
    %803 = arith.truncf %802 : vector<16x4xf32> to vector<16x4xbf16>
    %804 = vector.extract_strided_slice %739 {offsets = [0, 12], sizes = [16, 4], strides = [1, 1]} : vector<16x32xf32> to vector<16x4xf32>
    %805 = arith.truncf %804 : vector<16x4xf32> to vector<16x4xbf16>
    %cst_249 = arith.constant dense<0.000000e+00> : vector<16x16xf32>
    %806 = tpu.matmul %801, %803, %cst_249 {dimension_numbers = #tpu.dot_dimension_numbers<[1], [1], [0], [0], [0, 0, 1, 0], [], []>} : vector<16x4xbf16>, vector<16x4xbf16>, vector<16x16xf32> -> vector<16x16xf32>
    %807 = arith.addf %806, %506 : vector<16x16xf32>
    %cst_250 = arith.constant dense<0xFF800000> : vector<16xf32>
    %808 = vector.multi_reduction <maximumf>, %807, %cst_250 [1] : vector<16x16xf32> to vector<16xf32>
    %809 = vector.shape_cast %808 : vector<16xf32> to vector<16x1xf32>
    %810 = vector.broadcast %809 : vector<16x1xf32> to vector<16x16xf32>
    %811 = arith.subf %807, %810 : vector<16x16xf32>
    %812 = math.exp %811 : vector<16x16xf32>
    %cst_251 = arith.constant dense<0.000000e+00> : vector<16xf32>
    %813 = vector.multi_reduction <add>, %812, %cst_251 [1] : vector<16x16xf32> to vector<16xf32>
    %814 = vector.shape_cast %813 : vector<16xf32> to vector<16x1xf32>
    %815 = tpu.reciprocal %814 {approx = true} : vector<16x1xf32> -> vector<16x1xf32>
    %816 = vector.broadcast %815 : vector<16x1xf32> to vector<16x16xf32>
    %817 = arith.mulf %812, %816 : vector<16x16xf32>
    %818 = arith.truncf %817 : vector<16x16xf32> to vector<16x16xbf16>
    %cst_252 = arith.constant dense<0.000000e+00> : vector<16x4xf32>
    %819 = tpu.matmul %818, %805, %cst_252 {dimension_numbers = #tpu.dot_dimension_numbers<[1], [0], [0], [1], [0, 0, 1, 1], [], []>} : vector<16x16xbf16>, vector<16x4xbf16>, vector<16x4xf32> -> vector<16x4xf32>
    %820 = vector.extract_strided_slice %725 {offsets = [0, 16], sizes = [16, 4], strides = [1, 1]} : vector<16x32xf32> to vector<16x4xf32>
    %821 = arith.truncf %820 : vector<16x4xf32> to vector<16x4xbf16>
    %822 = vector.extract_strided_slice %732 {offsets = [0, 16], sizes = [16, 4], strides = [1, 1]} : vector<16x32xf32> to vector<16x4xf32>
    %823 = arith.truncf %822 : vector<16x4xf32> to vector<16x4xbf16>
    %824 = vector.extract_strided_slice %739 {offsets = [0, 16], sizes = [16, 4], strides = [1, 1]} : vector<16x32xf32> to vector<16x4xf32>
    %825 = arith.truncf %824 : vector<16x4xf32> to vector<16x4xbf16>
    %cst_253 = arith.constant dense<0.000000e+00> : vector<16x16xf32>
    %826 = tpu.matmul %821, %823, %cst_253 {dimension_numbers = #tpu.dot_dimension_numbers<[1], [1], [0], [0], [0, 0, 1, 0], [], []>} : vector<16x4xbf16>, vector<16x4xbf16>, vector<16x16xf32> -> vector<16x16xf32>
    %827 = arith.addf %826, %506 : vector<16x16xf32>
    %cst_254 = arith.constant dense<0xFF800000> : vector<16xf32>
    %828 = vector.multi_reduction <maximumf>, %827, %cst_254 [1] : vector<16x16xf32> to vector<16xf32>
    %829 = vector.shape_cast %828 : vector<16xf32> to vector<16x1xf32>
    %830 = vector.broadcast %829 : vector<16x1xf32> to vector<16x16xf32>
    %831 = arith.subf %827, %830 : vector<16x16xf32>
    %832 = math.exp %831 : vector<16x16xf32>
    %cst_255 = arith.constant dense<0.000000e+00> : vector<16xf32>
    %833 = vector.multi_reduction <add>, %832, %cst_255 [1] : vector<16x16xf32> to vector<16xf32>
    %834 = vector.shape_cast %833 : vector<16xf32> to vector<16x1xf32>
    %835 = tpu.reciprocal %834 {approx = true} : vector<16x1xf32> -> vector<16x1xf32>
    %836 = vector.broadcast %835 : vector<16x1xf32> to vector<16x16xf32>
    %837 = arith.mulf %832, %836 : vector<16x16xf32>
    %838 = arith.truncf %837 : vector<16x16xf32> to vector<16x16xbf16>
    %cst_256 = arith.constant dense<0.000000e+00> : vector<16x4xf32>
    %839 = tpu.matmul %838, %825, %cst_256 {dimension_numbers = #tpu.dot_dimension_numbers<[1], [0], [0], [1], [0, 0, 1, 1], [], []>} : vector<16x16xbf16>, vector<16x4xbf16>, vector<16x4xf32> -> vector<16x4xf32>
    %840 = vector.extract_strided_slice %725 {offsets = [0, 20], sizes = [16, 4], strides = [1, 1]} : vector<16x32xf32> to vector<16x4xf32>
    %841 = arith.truncf %840 : vector<16x4xf32> to vector<16x4xbf16>
    %842 = vector.extract_strided_slice %732 {offsets = [0, 20], sizes = [16, 4], strides = [1, 1]} : vector<16x32xf32> to vector<16x4xf32>
    %843 = arith.truncf %842 : vector<16x4xf32> to vector<16x4xbf16>
    %844 = vector.extract_strided_slice %739 {offsets = [0, 20], sizes = [16, 4], strides = [1, 1]} : vector<16x32xf32> to vector<16x4xf32>
    %845 = arith.truncf %844 : vector<16x4xf32> to vector<16x4xbf16>
    %cst_257 = arith.constant dense<0.000000e+00> : vector<16x16xf32>
    %846 = tpu.matmul %841, %843, %cst_257 {dimension_numbers = #tpu.dot_dimension_numbers<[1], [1], [0], [0], [0, 0, 1, 0], [], []>} : vector<16x4xbf16>, vector<16x4xbf16>, vector<16x16xf32> -> vector<16x16xf32>
    %847 = arith.addf %846, %506 : vector<16x16xf32>
    %cst_258 = arith.constant dense<0xFF800000> : vector<16xf32>
    %848 = vector.multi_reduction <maximumf>, %847, %cst_258 [1] : vector<16x16xf32> to vector<16xf32>
    %849 = vector.shape_cast %848 : vector<16xf32> to vector<16x1xf32>
    %850 = vector.broadcast %849 : vector<16x1xf32> to vector<16x16xf32>
    %851 = arith.subf %847, %850 : vector<16x16xf32>
    %852 = math.exp %851 : vector<16x16xf32>
    %cst_259 = arith.constant dense<0.000000e+00> : vector<16xf32>
    %853 = vector.multi_reduction <add>, %852, %cst_259 [1] : vector<16x16xf32> to vector<16xf32>
    %854 = vector.shape_cast %853 : vector<16xf32> to vector<16x1xf32>
    %855 = tpu.reciprocal %854 {approx = true} : vector<16x1xf32> -> vector<16x1xf32>
    %856 = vector.broadcast %855 : vector<16x1xf32> to vector<16x16xf32>
    %857 = arith.mulf %852, %856 : vector<16x16xf32>
    %858 = arith.truncf %857 : vector<16x16xf32> to vector<16x16xbf16>
    %cst_260 = arith.constant dense<0.000000e+00> : vector<16x4xf32>
    %859 = tpu.matmul %858, %845, %cst_260 {dimension_numbers = #tpu.dot_dimension_numbers<[1], [0], [0], [1], [0, 0, 1, 1], [], []>} : vector<16x16xbf16>, vector<16x4xbf16>, vector<16x4xf32> -> vector<16x4xf32>
    %860 = vector.extract_strided_slice %725 {offsets = [0, 24], sizes = [16, 4], strides = [1, 1]} : vector<16x32xf32> to vector<16x4xf32>
    %861 = arith.truncf %860 : vector<16x4xf32> to vector<16x4xbf16>
    %862 = vector.extract_strided_slice %732 {offsets = [0, 24], sizes = [16, 4], strides = [1, 1]} : vector<16x32xf32> to vector<16x4xf32>
    %863 = arith.truncf %862 : vector<16x4xf32> to vector<16x4xbf16>
    %864 = vector.extract_strided_slice %739 {offsets = [0, 24], sizes = [16, 4], strides = [1, 1]} : vector<16x32xf32> to vector<16x4xf32>
    %865 = arith.truncf %864 : vector<16x4xf32> to vector<16x4xbf16>
    %cst_261 = arith.constant dense<0.000000e+00> : vector<16x16xf32>
    %866 = tpu.matmul %861, %863, %cst_261 {dimension_numbers = #tpu.dot_dimension_numbers<[1], [1], [0], [0], [0, 0, 1, 0], [], []>} : vector<16x4xbf16>, vector<16x4xbf16>, vector<16x16xf32> -> vector<16x16xf32>
    %867 = arith.addf %866, %506 : vector<16x16xf32>
    %cst_262 = arith.constant dense<0xFF800000> : vector<16xf32>
    %868 = vector.multi_reduction <maximumf>, %867, %cst_262 [1] : vector<16x16xf32> to vector<16xf32>
    %869 = vector.shape_cast %868 : vector<16xf32> to vector<16x1xf32>
    %870 = vector.broadcast %869 : vector<16x1xf32> to vector<16x16xf32>
    %871 = arith.subf %867, %870 : vector<16x16xf32>
    %872 = math.exp %871 : vector<16x16xf32>
    %cst_263 = arith.constant dense<0.000000e+00> : vector<16xf32>
    %873 = vector.multi_reduction <add>, %872, %cst_263 [1] : vector<16x16xf32> to vector<16xf32>
    %874 = vector.shape_cast %873 : vector<16xf32> to vector<16x1xf32>
    %875 = tpu.reciprocal %874 {approx = true} : vector<16x1xf32> -> vector<16x1xf32>
    %876 = vector.broadcast %875 : vector<16x1xf32> to vector<16x16xf32>
    %877 = arith.mulf %872, %876 : vector<16x16xf32>
    %878 = arith.truncf %877 : vector<16x16xf32> to vector<16x16xbf16>
    %cst_264 = arith.constant dense<0.000000e+00> : vector<16x4xf32>
    %879 = tpu.matmul %878, %865, %cst_264 {dimension_numbers = #tpu.dot_dimension_numbers<[1], [0], [0], [1], [0, 0, 1, 1], [], []>} : vector<16x16xbf16>, vector<16x4xbf16>, vector<16x4xf32> -> vector<16x4xf32>
    %880 = vector.extract_strided_slice %725 {offsets = [0, 28], sizes = [16, 4], strides = [1, 1]} : vector<16x32xf32> to vector<16x4xf32>
    %881 = arith.truncf %880 : vector<16x4xf32> to vector<16x4xbf16>
    %882 = vector.extract_strided_slice %732 {offsets = [0, 28], sizes = [16, 4], strides = [1, 1]} : vector<16x32xf32> to vector<16x4xf32>
    %883 = arith.truncf %882 : vector<16x4xf32> to vector<16x4xbf16>
    %884 = vector.extract_strided_slice %739 {offsets = [0, 28], sizes = [16, 4], strides = [1, 1]} : vector<16x32xf32> to vector<16x4xf32>
    %885 = arith.truncf %884 : vector<16x4xf32> to vector<16x4xbf16>
    %cst_265 = arith.constant dense<0.000000e+00> : vector<16x16xf32>
    %886 = tpu.matmul %881, %883, %cst_265 {dimension_numbers = #tpu.dot_dimension_numbers<[1], [1], [0], [0], [0, 0, 1, 0], [], []>} : vector<16x4xbf16>, vector<16x4xbf16>, vector<16x16xf32> -> vector<16x16xf32>
    %887 = arith.addf %886, %506 : vector<16x16xf32>
    %cst_266 = arith.constant dense<0xFF800000> : vector<16xf32>
    %888 = vector.multi_reduction <maximumf>, %887, %cst_266 [1] : vector<16x16xf32> to vector<16xf32>
    %889 = vector.shape_cast %888 : vector<16xf32> to vector<16x1xf32>
    %890 = vector.broadcast %889 : vector<16x1xf32> to vector<16x16xf32>
    %891 = arith.subf %887, %890 : vector<16x16xf32>
    %892 = math.exp %891 : vector<16x16xf32>
    %cst_267 = arith.constant dense<0.000000e+00> : vector<16xf32>
    %893 = vector.multi_reduction <add>, %892, %cst_267 [1] : vector<16x16xf32> to vector<16xf32>
    %894 = vector.shape_cast %893 : vector<16xf32> to vector<16x1xf32>
    %895 = tpu.reciprocal %894 {approx = true} : vector<16x1xf32> -> vector<16x1xf32>
    %896 = vector.broadcast %895 : vector<16x1xf32> to vector<16x16xf32>
    %897 = arith.mulf %892, %896 : vector<16x16xf32>
    %898 = arith.truncf %897 : vector<16x16xf32> to vector<16x16xbf16>
    %cst_268 = arith.constant dense<0.000000e+00> : vector<16x4xf32>
    %899 = tpu.matmul %898, %885, %cst_268 {dimension_numbers = #tpu.dot_dimension_numbers<[1], [0], [0], [1], [0, 0, 1, 1], [], []>} : vector<16x16xbf16>, vector<16x4xbf16>, vector<16x4xf32> -> vector<16x4xf32>
    %900 = tpu.concatenate %759, %779, %799, %819, %839, %859, %879, %899 in 1 : vector<16x4xf32>, vector<16x4xf32>, vector<16x4xf32>, vector<16x4xf32>, vector<16x4xf32>, vector<16x4xf32>, vector<16x4xf32>, vector<16x4xf32> -> vector<16x32xf32>
    %c19 = arith.constant 19 : index
    %c0_269 = arith.constant 0 : index
    %c0_270 = arith.constant 0 : index
    %901 = vector.load %arg5[%c19, %c0_269, %c0_270] : memref<24x32x32xbf16, #tpu.memory_space<vmem>>, vector<1x32x32xbf16>
    %902 = vector.shape_cast %901 : vector<1x32x32xbf16> to vector<32x32xbf16>
    %c19_271 = arith.constant 19 : index
    %c0_272 = arith.constant 0 : index
    %903 = vector.load %arg9[%c19_271, %c0_272] : memref<56x128xf32, #tpu.memory_space<vmem>>, vector<1x32xf32>
    %904 = arith.truncf %900 : vector<16x32xf32> to vector<16x32xbf16>
    %cst_273 = arith.constant dense<0.000000e+00> : vector<16x32xf32>
    %905 = tpu.matmul %904, %902, %cst_273 {dimension_numbers = #tpu.dot_dimension_numbers<[1], [0], [0], [1], [0, 0, 1, 1], [], []>} : vector<16x32xbf16>, vector<32x32xbf16>, vector<16x32xf32> -> vector<16x32xf32>
    %906 = vector.broadcast %903 : vector<1x32xf32> to vector<16x32xf32>
    %907 = arith.addf %905, %906 : vector<16x32xf32>
    %908 = arith.addf %718, %907 : vector<16x32xf32>
    %c29 = arith.constant 29 : index
    %c0_274 = arith.constant 0 : index
    %909 = vector.load %arg9[%c29, %c0_274] : memref<56x128xf32, #tpu.memory_space<vmem>>, vector<1x32xf32>
    %c39 = arith.constant 39 : index
    %c0_275 = arith.constant 0 : index
    %910 = vector.load %arg9[%c39, %c0_275] : memref<56x128xf32, #tpu.memory_space<vmem>>, vector<1x32xf32>
    %cst_276 = arith.constant dense<0.000000e+00> : vector<16xf32>
    %911 = vector.multi_reduction <add>, %908, %cst_276 [1] : vector<16x32xf32> to vector<16xf32>
    %912 = vector.shape_cast %911 : vector<16xf32> to vector<16x1xf32>
    %cst_277 = arith.constant 3.200000e+01 : f32
    %913 = vector.broadcast %cst_277 : f32 to vector<16x1xf32>
    %914 = arith.divf %912, %913 : vector<16x1xf32>
    %915 = vector.broadcast %914 : vector<16x1xf32> to vector<16x32xf32>
    %916 = arith.subf %908, %915 : vector<16x32xf32>
    %917 = arith.mulf %916, %916 : vector<16x32xf32>
    %cst_278 = arith.constant dense<0.000000e+00> : vector<16xf32>
    %918 = vector.multi_reduction <add>, %917, %cst_278 [1] : vector<16x32xf32> to vector<16xf32>
    %919 = vector.shape_cast %918 : vector<16xf32> to vector<16x1xf32>
    %cst_279 = arith.constant 3.200000e+01 : f32
    %920 = vector.broadcast %cst_279 : f32 to vector<16x1xf32>
    %921 = arith.divf %919, %920 : vector<16x1xf32>
    %cst_280 = arith.constant 9.99999974E-6 : f32
    %922 = vector.broadcast %cst_280 : f32 to vector<16x1xf32>
    %923 = arith.addf %921, %922 : vector<16x1xf32>
    %924 = math.rsqrt %923 : vector<16x1xf32>
    %925 = vector.broadcast %924 : vector<16x1xf32> to vector<16x32xf32>
    %926 = arith.mulf %916, %925 : vector<16x32xf32>
    %927 = vector.broadcast %909 : vector<1x32xf32> to vector<16x32xf32>
    %928 = arith.mulf %926, %927 : vector<16x32xf32>
    %929 = vector.broadcast %910 : vector<1x32xf32> to vector<16x32xf32>
    %930 = arith.addf %928, %929 : vector<16x32xf32>
    %c2_281 = arith.constant 2 : index
    %c0_282 = arith.constant 0 : index
    %c0_283 = arith.constant 0 : index
    %931 = vector.load %arg6[%c2_281, %c0_282, %c0_283] : memref<4x32x64xbf16, #tpu.memory_space<vmem>>, vector<1x32x64xbf16>
    %932 = vector.shape_cast %931 : vector<1x32x64xbf16> to vector<32x64xbf16>
    %c46 = arith.constant 46 : index
    %c0_284 = arith.constant 0 : index
    %933 = vector.load %arg9[%c46, %c0_284] : memref<56x128xf32, #tpu.memory_space<vmem>>, vector<1x64xf32>
    %934 = arith.truncf %930 : vector<16x32xf32> to vector<16x32xbf16>
    %cst_285 = arith.constant dense<0.000000e+00> : vector<16x64xf32>
    %935 = tpu.matmul %934, %932, %cst_285 {dimension_numbers = #tpu.dot_dimension_numbers<[1], [0], [0], [1], [0, 0, 1, 1], [], []>} : vector<16x32xbf16>, vector<32x64xbf16>, vector<16x64xf32> -> vector<16x64xf32>
    %936 = vector.broadcast %933 : vector<1x64xf32> to vector<16x64xf32>
    %937 = arith.addf %935, %936 : vector<16x64xf32>
    %cst_286 = arith.constant 0.000000e+00 : f32
    %938 = vector.broadcast %cst_286 : f32 to vector<16x64xf32>
    %939 = arith.maximumf %937, %938 : vector<16x64xf32>
    %c2_287 = arith.constant 2 : index
    %c0_288 = arith.constant 0 : index
    %c0_289 = arith.constant 0 : index
    %940 = vector.load %arg7[%c2_287, %c0_288, %c0_289] : memref<4x64x32xbf16, #tpu.memory_space<vmem>>, vector<1x64x32xbf16>
    %941 = vector.shape_cast %940 : vector<1x64x32xbf16> to vector<64x32xbf16>
    %c50 = arith.constant 50 : index
    %c0_290 = arith.constant 0 : index
    %942 = vector.load %arg9[%c50, %c0_290] : memref<56x128xf32, #tpu.memory_space<vmem>>, vector<1x32xf32>
    %943 = arith.truncf %939 : vector<16x64xf32> to vector<16x64xbf16>
    %cst_291 = arith.constant dense<0.000000e+00> : vector<16x32xf32>
    %944 = tpu.matmul %943, %941, %cst_291 {dimension_numbers = #tpu.dot_dimension_numbers<[1], [0], [0], [1], [0, 0, 1, 1], [], []>} : vector<16x64xbf16>, vector<64x32xbf16>, vector<16x32xf32> -> vector<16x32xf32>
    %945 = vector.broadcast %942 : vector<1x32xf32> to vector<16x32xf32>
    %946 = arith.addf %944, %945 : vector<16x32xf32>
    %947 = arith.addf %930, %946 : vector<16x32xf32>
    %c30 = arith.constant 30 : index
    %c0_292 = arith.constant 0 : index
    %948 = vector.load %arg9[%c30, %c0_292] : memref<56x128xf32, #tpu.memory_space<vmem>>, vector<1x32xf32>
    %c40 = arith.constant 40 : index
    %c0_293 = arith.constant 0 : index
    %949 = vector.load %arg9[%c40, %c0_293] : memref<56x128xf32, #tpu.memory_space<vmem>>, vector<1x32xf32>
    %cst_294 = arith.constant dense<0.000000e+00> : vector<16xf32>
    %950 = vector.multi_reduction <add>, %947, %cst_294 [1] : vector<16x32xf32> to vector<16xf32>
    %951 = vector.shape_cast %950 : vector<16xf32> to vector<16x1xf32>
    %cst_295 = arith.constant 3.200000e+01 : f32
    %952 = vector.broadcast %cst_295 : f32 to vector<16x1xf32>
    %953 = arith.divf %951, %952 : vector<16x1xf32>
    %954 = vector.broadcast %953 : vector<16x1xf32> to vector<16x32xf32>
    %955 = arith.subf %947, %954 : vector<16x32xf32>
    %956 = arith.mulf %955, %955 : vector<16x32xf32>
    %cst_296 = arith.constant dense<0.000000e+00> : vector<16xf32>
    %957 = vector.multi_reduction <add>, %956, %cst_296 [1] : vector<16x32xf32> to vector<16xf32>
    %958 = vector.shape_cast %957 : vector<16xf32> to vector<16x1xf32>
    %cst_297 = arith.constant 3.200000e+01 : f32
    %959 = vector.broadcast %cst_297 : f32 to vector<16x1xf32>
    %960 = arith.divf %958, %959 : vector<16x1xf32>
    %cst_298 = arith.constant 9.99999974E-6 : f32
    %961 = vector.broadcast %cst_298 : f32 to vector<16x1xf32>
    %962 = arith.addf %960, %961 : vector<16x1xf32>
    %963 = math.rsqrt %962 : vector<16x1xf32>
    %964 = vector.broadcast %963 : vector<16x1xf32> to vector<16x32xf32>
    %965 = arith.mulf %955, %964 : vector<16x32xf32>
    %966 = vector.broadcast %948 : vector<1x32xf32> to vector<16x32xf32>
    %967 = arith.mulf %965, %966 : vector<16x32xf32>
    %968 = vector.broadcast %949 : vector<1x32xf32> to vector<16x32xf32>
    %969 = arith.addf %967, %968 : vector<16x32xf32>
    %c12 = arith.constant 12 : index
    %c0_299 = arith.constant 0 : index
    %c0_300 = arith.constant 0 : index
    %970 = vector.load %arg5[%c12, %c0_299, %c0_300] : memref<24x32x32xbf16, #tpu.memory_space<vmem>>, vector<1x32x32xbf16>
    %971 = vector.shape_cast %970 : vector<1x32x32xbf16> to vector<32x32xbf16>
    %c12_301 = arith.constant 12 : index
    %c0_302 = arith.constant 0 : index
    %972 = vector.load %arg9[%c12_301, %c0_302] : memref<56x128xf32, #tpu.memory_space<vmem>>, vector<1x32xf32>
    %973 = arith.truncf %969 : vector<16x32xf32> to vector<16x32xbf16>
    %cst_303 = arith.constant dense<0.000000e+00> : vector<16x32xf32>
    %974 = tpu.matmul %973, %971, %cst_303 {dimension_numbers = #tpu.dot_dimension_numbers<[1], [0], [0], [1], [0, 0, 1, 1], [], []>} : vector<16x32xbf16>, vector<32x32xbf16>, vector<16x32xf32> -> vector<16x32xf32>
    %975 = vector.broadcast %972 : vector<1x32xf32> to vector<16x32xf32>
    %976 = arith.addf %974, %975 : vector<16x32xf32>
    %c13 = arith.constant 13 : index
    %c0_304 = arith.constant 0 : index
    %c0_305 = arith.constant 0 : index
    %977 = vector.load %arg5[%c13, %c0_304, %c0_305] : memref<24x32x32xbf16, #tpu.memory_space<vmem>>, vector<1x32x32xbf16>
    %978 = vector.shape_cast %977 : vector<1x32x32xbf16> to vector<32x32xbf16>
    %c13_306 = arith.constant 13 : index
    %c0_307 = arith.constant 0 : index
    %979 = vector.load %arg9[%c13_306, %c0_307] : memref<56x128xf32, #tpu.memory_space<vmem>>, vector<1x32xf32>
    %980 = arith.truncf %969 : vector<16x32xf32> to vector<16x32xbf16>
    %cst_308 = arith.constant dense<0.000000e+00> : vector<16x32xf32>
    %981 = tpu.matmul %980, %978, %cst_308 {dimension_numbers = #tpu.dot_dimension_numbers<[1], [0], [0], [1], [0, 0, 1, 1], [], []>} : vector<16x32xbf16>, vector<32x32xbf16>, vector<16x32xf32> -> vector<16x32xf32>
    %982 = vector.broadcast %979 : vector<1x32xf32> to vector<16x32xf32>
    %983 = arith.addf %981, %982 : vector<16x32xf32>
    %c14 = arith.constant 14 : index
    %c0_309 = arith.constant 0 : index
    %c0_310 = arith.constant 0 : index
    %984 = vector.load %arg5[%c14, %c0_309, %c0_310] : memref<24x32x32xbf16, #tpu.memory_space<vmem>>, vector<1x32x32xbf16>
    %985 = vector.shape_cast %984 : vector<1x32x32xbf16> to vector<32x32xbf16>
    %c14_311 = arith.constant 14 : index
    %c0_312 = arith.constant 0 : index
    %986 = vector.load %arg9[%c14_311, %c0_312] : memref<56x128xf32, #tpu.memory_space<vmem>>, vector<1x32xf32>
    %987 = arith.truncf %969 : vector<16x32xf32> to vector<16x32xbf16>
    %cst_313 = arith.constant dense<0.000000e+00> : vector<16x32xf32>
    %988 = tpu.matmul %987, %985, %cst_313 {dimension_numbers = #tpu.dot_dimension_numbers<[1], [0], [0], [1], [0, 0, 1, 1], [], []>} : vector<16x32xbf16>, vector<32x32xbf16>, vector<16x32xf32> -> vector<16x32xf32>
    %989 = vector.broadcast %986 : vector<1x32xf32> to vector<16x32xf32>
    %990 = arith.addf %988, %989 : vector<16x32xf32>
    %991 = vector.extract_strided_slice %976 {offsets = [0, 0], sizes = [16, 4], strides = [1, 1]} : vector<16x32xf32> to vector<16x4xf32>
    %992 = arith.truncf %991 : vector<16x4xf32> to vector<16x4xbf16>
    %993 = vector.extract_strided_slice %983 {offsets = [0, 0], sizes = [16, 4], strides = [1, 1]} : vector<16x32xf32> to vector<16x4xf32>
    %994 = arith.truncf %993 : vector<16x4xf32> to vector<16x4xbf16>
    %995 = vector.extract_strided_slice %990 {offsets = [0, 0], sizes = [16, 4], strides = [1, 1]} : vector<16x32xf32> to vector<16x4xf32>
    %996 = arith.truncf %995 : vector<16x4xf32> to vector<16x4xbf16>
    %cst_314 = arith.constant dense<0.000000e+00> : vector<16x16xf32>
    %997 = tpu.matmul %992, %994, %cst_314 {dimension_numbers = #tpu.dot_dimension_numbers<[1], [1], [0], [0], [0, 0, 1, 0], [], []>} : vector<16x4xbf16>, vector<16x4xbf16>, vector<16x16xf32> -> vector<16x16xf32>
    %998 = arith.addf %997, %505 : vector<16x16xf32>
    %cst_315 = arith.constant dense<0xFF800000> : vector<16xf32>
    %999 = vector.multi_reduction <maximumf>, %998, %cst_315 [1] : vector<16x16xf32> to vector<16xf32>
    %1000 = vector.shape_cast %999 : vector<16xf32> to vector<16x1xf32>
    %1001 = vector.broadcast %1000 : vector<16x1xf32> to vector<16x16xf32>
    %1002 = arith.subf %998, %1001 : vector<16x16xf32>
    %1003 = math.exp %1002 : vector<16x16xf32>
    %cst_316 = arith.constant dense<0.000000e+00> : vector<16xf32>
    %1004 = vector.multi_reduction <add>, %1003, %cst_316 [1] : vector<16x16xf32> to vector<16xf32>
    %1005 = vector.shape_cast %1004 : vector<16xf32> to vector<16x1xf32>
    %1006 = tpu.reciprocal %1005 {approx = true} : vector<16x1xf32> -> vector<16x1xf32>
    %1007 = vector.broadcast %1006 : vector<16x1xf32> to vector<16x16xf32>
    %1008 = arith.mulf %1003, %1007 : vector<16x16xf32>
    %1009 = arith.truncf %1008 : vector<16x16xf32> to vector<16x16xbf16>
    %cst_317 = arith.constant dense<0.000000e+00> : vector<16x4xf32>
    %1010 = tpu.matmul %1009, %996, %cst_317 {dimension_numbers = #tpu.dot_dimension_numbers<[1], [0], [0], [1], [0, 0, 1, 1], [], []>} : vector<16x16xbf16>, vector<16x4xbf16>, vector<16x4xf32> -> vector<16x4xf32>
    %1011 = vector.extract_strided_slice %976 {offsets = [0, 4], sizes = [16, 4], strides = [1, 1]} : vector<16x32xf32> to vector<16x4xf32>
    %1012 = arith.truncf %1011 : vector<16x4xf32> to vector<16x4xbf16>
    %1013 = vector.extract_strided_slice %983 {offsets = [0, 4], sizes = [16, 4], strides = [1, 1]} : vector<16x32xf32> to vector<16x4xf32>
    %1014 = arith.truncf %1013 : vector<16x4xf32> to vector<16x4xbf16>
    %1015 = vector.extract_strided_slice %990 {offsets = [0, 4], sizes = [16, 4], strides = [1, 1]} : vector<16x32xf32> to vector<16x4xf32>
    %1016 = arith.truncf %1015 : vector<16x4xf32> to vector<16x4xbf16>
    %cst_318 = arith.constant dense<0.000000e+00> : vector<16x16xf32>
    %1017 = tpu.matmul %1012, %1014, %cst_318 {dimension_numbers = #tpu.dot_dimension_numbers<[1], [1], [0], [0], [0, 0, 1, 0], [], []>} : vector<16x4xbf16>, vector<16x4xbf16>, vector<16x16xf32> -> vector<16x16xf32>
    %1018 = arith.addf %1017, %505 : vector<16x16xf32>
    %cst_319 = arith.constant dense<0xFF800000> : vector<16xf32>
    %1019 = vector.multi_reduction <maximumf>, %1018, %cst_319 [1] : vector<16x16xf32> to vector<16xf32>
    %1020 = vector.shape_cast %1019 : vector<16xf32> to vector<16x1xf32>
    %1021 = vector.broadcast %1020 : vector<16x1xf32> to vector<16x16xf32>
    %1022 = arith.subf %1018, %1021 : vector<16x16xf32>
    %1023 = math.exp %1022 : vector<16x16xf32>
    %cst_320 = arith.constant dense<0.000000e+00> : vector<16xf32>
    %1024 = vector.multi_reduction <add>, %1023, %cst_320 [1] : vector<16x16xf32> to vector<16xf32>
    %1025 = vector.shape_cast %1024 : vector<16xf32> to vector<16x1xf32>
    %1026 = tpu.reciprocal %1025 {approx = true} : vector<16x1xf32> -> vector<16x1xf32>
    %1027 = vector.broadcast %1026 : vector<16x1xf32> to vector<16x16xf32>
    %1028 = arith.mulf %1023, %1027 : vector<16x16xf32>
    %1029 = arith.truncf %1028 : vector<16x16xf32> to vector<16x16xbf16>
    %cst_321 = arith.constant dense<0.000000e+00> : vector<16x4xf32>
    %1030 = tpu.matmul %1029, %1016, %cst_321 {dimension_numbers = #tpu.dot_dimension_numbers<[1], [0], [0], [1], [0, 0, 1, 1], [], []>} : vector<16x16xbf16>, vector<16x4xbf16>, vector<16x4xf32> -> vector<16x4xf32>
    %1031 = vector.extract_strided_slice %976 {offsets = [0, 8], sizes = [16, 4], strides = [1, 1]} : vector<16x32xf32> to vector<16x4xf32>
    %1032 = arith.truncf %1031 : vector<16x4xf32> to vector<16x4xbf16>
    %1033 = vector.extract_strided_slice %983 {offsets = [0, 8], sizes = [16, 4], strides = [1, 1]} : vector<16x32xf32> to vector<16x4xf32>
    %1034 = arith.truncf %1033 : vector<16x4xf32> to vector<16x4xbf16>
    %1035 = vector.extract_strided_slice %990 {offsets = [0, 8], sizes = [16, 4], strides = [1, 1]} : vector<16x32xf32> to vector<16x4xf32>
    %1036 = arith.truncf %1035 : vector<16x4xf32> to vector<16x4xbf16>
    %cst_322 = arith.constant dense<0.000000e+00> : vector<16x16xf32>
    %1037 = tpu.matmul %1032, %1034, %cst_322 {dimension_numbers = #tpu.dot_dimension_numbers<[1], [1], [0], [0], [0, 0, 1, 0], [], []>} : vector<16x4xbf16>, vector<16x4xbf16>, vector<16x16xf32> -> vector<16x16xf32>
    %1038 = arith.addf %1037, %505 : vector<16x16xf32>
    %cst_323 = arith.constant dense<0xFF800000> : vector<16xf32>
    %1039 = vector.multi_reduction <maximumf>, %1038, %cst_323 [1] : vector<16x16xf32> to vector<16xf32>
    %1040 = vector.shape_cast %1039 : vector<16xf32> to vector<16x1xf32>
    %1041 = vector.broadcast %1040 : vector<16x1xf32> to vector<16x16xf32>
    %1042 = arith.subf %1038, %1041 : vector<16x16xf32>
    %1043 = math.exp %1042 : vector<16x16xf32>
    %cst_324 = arith.constant dense<0.000000e+00> : vector<16xf32>
    %1044 = vector.multi_reduction <add>, %1043, %cst_324 [1] : vector<16x16xf32> to vector<16xf32>
    %1045 = vector.shape_cast %1044 : vector<16xf32> to vector<16x1xf32>
    %1046 = tpu.reciprocal %1045 {approx = true} : vector<16x1xf32> -> vector<16x1xf32>
    %1047 = vector.broadcast %1046 : vector<16x1xf32> to vector<16x16xf32>
    %1048 = arith.mulf %1043, %1047 : vector<16x16xf32>
    %1049 = arith.truncf %1048 : vector<16x16xf32> to vector<16x16xbf16>
    %cst_325 = arith.constant dense<0.000000e+00> : vector<16x4xf32>
    %1050 = tpu.matmul %1049, %1036, %cst_325 {dimension_numbers = #tpu.dot_dimension_numbers<[1], [0], [0], [1], [0, 0, 1, 1], [], []>} : vector<16x16xbf16>, vector<16x4xbf16>, vector<16x4xf32> -> vector<16x4xf32>
    %1051 = vector.extract_strided_slice %976 {offsets = [0, 12], sizes = [16, 4], strides = [1, 1]} : vector<16x32xf32> to vector<16x4xf32>
    %1052 = arith.truncf %1051 : vector<16x4xf32> to vector<16x4xbf16>
    %1053 = vector.extract_strided_slice %983 {offsets = [0, 12], sizes = [16, 4], strides = [1, 1]} : vector<16x32xf32> to vector<16x4xf32>
    %1054 = arith.truncf %1053 : vector<16x4xf32> to vector<16x4xbf16>
    %1055 = vector.extract_strided_slice %990 {offsets = [0, 12], sizes = [16, 4], strides = [1, 1]} : vector<16x32xf32> to vector<16x4xf32>
    %1056 = arith.truncf %1055 : vector<16x4xf32> to vector<16x4xbf16>
    %cst_326 = arith.constant dense<0.000000e+00> : vector<16x16xf32>
    %1057 = tpu.matmul %1052, %1054, %cst_326 {dimension_numbers = #tpu.dot_dimension_numbers<[1], [1], [0], [0], [0, 0, 1, 0], [], []>} : vector<16x4xbf16>, vector<16x4xbf16>, vector<16x16xf32> -> vector<16x16xf32>
    %1058 = arith.addf %1057, %505 : vector<16x16xf32>
    %cst_327 = arith.constant dense<0xFF800000> : vector<16xf32>
    %1059 = vector.multi_reduction <maximumf>, %1058, %cst_327 [1] : vector<16x16xf32> to vector<16xf32>
    %1060 = vector.shape_cast %1059 : vector<16xf32> to vector<16x1xf32>
    %1061 = vector.broadcast %1060 : vector<16x1xf32> to vector<16x16xf32>
    %1062 = arith.subf %1058, %1061 : vector<16x16xf32>
    %1063 = math.exp %1062 : vector<16x16xf32>
    %cst_328 = arith.constant dense<0.000000e+00> : vector<16xf32>
    %1064 = vector.multi_reduction <add>, %1063, %cst_328 [1] : vector<16x16xf32> to vector<16xf32>
    %1065 = vector.shape_cast %1064 : vector<16xf32> to vector<16x1xf32>
    %1066 = tpu.reciprocal %1065 {approx = true} : vector<16x1xf32> -> vector<16x1xf32>
    %1067 = vector.broadcast %1066 : vector<16x1xf32> to vector<16x16xf32>
    %1068 = arith.mulf %1063, %1067 : vector<16x16xf32>
    %1069 = arith.truncf %1068 : vector<16x16xf32> to vector<16x16xbf16>
    %cst_329 = arith.constant dense<0.000000e+00> : vector<16x4xf32>
    %1070 = tpu.matmul %1069, %1056, %cst_329 {dimension_numbers = #tpu.dot_dimension_numbers<[1], [0], [0], [1], [0, 0, 1, 1], [], []>} : vector<16x16xbf16>, vector<16x4xbf16>, vector<16x4xf32> -> vector<16x4xf32>
    %1071 = vector.extract_strided_slice %976 {offsets = [0, 16], sizes = [16, 4], strides = [1, 1]} : vector<16x32xf32> to vector<16x4xf32>
    %1072 = arith.truncf %1071 : vector<16x4xf32> to vector<16x4xbf16>
    %1073 = vector.extract_strided_slice %983 {offsets = [0, 16], sizes = [16, 4], strides = [1, 1]} : vector<16x32xf32> to vector<16x4xf32>
    %1074 = arith.truncf %1073 : vector<16x4xf32> to vector<16x4xbf16>
    %1075 = vector.extract_strided_slice %990 {offsets = [0, 16], sizes = [16, 4], strides = [1, 1]} : vector<16x32xf32> to vector<16x4xf32>
    %1076 = arith.truncf %1075 : vector<16x4xf32> to vector<16x4xbf16>
    %cst_330 = arith.constant dense<0.000000e+00> : vector<16x16xf32>
    %1077 = tpu.matmul %1072, %1074, %cst_330 {dimension_numbers = #tpu.dot_dimension_numbers<[1], [1], [0], [0], [0, 0, 1, 0], [], []>} : vector<16x4xbf16>, vector<16x4xbf16>, vector<16x16xf32> -> vector<16x16xf32>
    %1078 = arith.addf %1077, %505 : vector<16x16xf32>
    %cst_331 = arith.constant dense<0xFF800000> : vector<16xf32>
    %1079 = vector.multi_reduction <maximumf>, %1078, %cst_331 [1] : vector<16x16xf32> to vector<16xf32>
    %1080 = vector.shape_cast %1079 : vector<16xf32> to vector<16x1xf32>
    %1081 = vector.broadcast %1080 : vector<16x1xf32> to vector<16x16xf32>
    %1082 = arith.subf %1078, %1081 : vector<16x16xf32>
    %1083 = math.exp %1082 : vector<16x16xf32>
    %cst_332 = arith.constant dense<0.000000e+00> : vector<16xf32>
    %1084 = vector.multi_reduction <add>, %1083, %cst_332 [1] : vector<16x16xf32> to vector<16xf32>
    %1085 = vector.shape_cast %1084 : vector<16xf32> to vector<16x1xf32>
    %1086 = tpu.reciprocal %1085 {approx = true} : vector<16x1xf32> -> vector<16x1xf32>
    %1087 = vector.broadcast %1086 : vector<16x1xf32> to vector<16x16xf32>
    %1088 = arith.mulf %1083, %1087 : vector<16x16xf32>
    %1089 = arith.truncf %1088 : vector<16x16xf32> to vector<16x16xbf16>
    %cst_333 = arith.constant dense<0.000000e+00> : vector<16x4xf32>
    %1090 = tpu.matmul %1089, %1076, %cst_333 {dimension_numbers = #tpu.dot_dimension_numbers<[1], [0], [0], [1], [0, 0, 1, 1], [], []>} : vector<16x16xbf16>, vector<16x4xbf16>, vector<16x4xf32> -> vector<16x4xf32>
    %1091 = vector.extract_strided_slice %976 {offsets = [0, 20], sizes = [16, 4], strides = [1, 1]} : vector<16x32xf32> to vector<16x4xf32>
    %1092 = arith.truncf %1091 : vector<16x4xf32> to vector<16x4xbf16>
    %1093 = vector.extract_strided_slice %983 {offsets = [0, 20], sizes = [16, 4], strides = [1, 1]} : vector<16x32xf32> to vector<16x4xf32>
    %1094 = arith.truncf %1093 : vector<16x4xf32> to vector<16x4xbf16>
    %1095 = vector.extract_strided_slice %990 {offsets = [0, 20], sizes = [16, 4], strides = [1, 1]} : vector<16x32xf32> to vector<16x4xf32>
    %1096 = arith.truncf %1095 : vector<16x4xf32> to vector<16x4xbf16>
    %cst_334 = arith.constant dense<0.000000e+00> : vector<16x16xf32>
    %1097 = tpu.matmul %1092, %1094, %cst_334 {dimension_numbers = #tpu.dot_dimension_numbers<[1], [1], [0], [0], [0, 0, 1, 0], [], []>} : vector<16x4xbf16>, vector<16x4xbf16>, vector<16x16xf32> -> vector<16x16xf32>
    %1098 = arith.addf %1097, %505 : vector<16x16xf32>
    %cst_335 = arith.constant dense<0xFF800000> : vector<16xf32>
    %1099 = vector.multi_reduction <maximumf>, %1098, %cst_335 [1] : vector<16x16xf32> to vector<16xf32>
    %1100 = vector.shape_cast %1099 : vector<16xf32> to vector<16x1xf32>
    %1101 = vector.broadcast %1100 : vector<16x1xf32> to vector<16x16xf32>
    %1102 = arith.subf %1098, %1101 : vector<16x16xf32>
    %1103 = math.exp %1102 : vector<16x16xf32>
    %cst_336 = arith.constant dense<0.000000e+00> : vector<16xf32>
    %1104 = vector.multi_reduction <add>, %1103, %cst_336 [1] : vector<16x16xf32> to vector<16xf32>
    %1105 = vector.shape_cast %1104 : vector<16xf32> to vector<16x1xf32>
    %1106 = tpu.reciprocal %1105 {approx = true} : vector<16x1xf32> -> vector<16x1xf32>
    %1107 = vector.broadcast %1106 : vector<16x1xf32> to vector<16x16xf32>
    %1108 = arith.mulf %1103, %1107 : vector<16x16xf32>
    %1109 = arith.truncf %1108 : vector<16x16xf32> to vector<16x16xbf16>
    %cst_337 = arith.constant dense<0.000000e+00> : vector<16x4xf32>
    %1110 = tpu.matmul %1109, %1096, %cst_337 {dimension_numbers = #tpu.dot_dimension_numbers<[1], [0], [0], [1], [0, 0, 1, 1], [], []>} : vector<16x16xbf16>, vector<16x4xbf16>, vector<16x4xf32> -> vector<16x4xf32>
    %1111 = vector.extract_strided_slice %976 {offsets = [0, 24], sizes = [16, 4], strides = [1, 1]} : vector<16x32xf32> to vector<16x4xf32>
    %1112 = arith.truncf %1111 : vector<16x4xf32> to vector<16x4xbf16>
    %1113 = vector.extract_strided_slice %983 {offsets = [0, 24], sizes = [16, 4], strides = [1, 1]} : vector<16x32xf32> to vector<16x4xf32>
    %1114 = arith.truncf %1113 : vector<16x4xf32> to vector<16x4xbf16>
    %1115 = vector.extract_strided_slice %990 {offsets = [0, 24], sizes = [16, 4], strides = [1, 1]} : vector<16x32xf32> to vector<16x4xf32>
    %1116 = arith.truncf %1115 : vector<16x4xf32> to vector<16x4xbf16>
    %cst_338 = arith.constant dense<0.000000e+00> : vector<16x16xf32>
    %1117 = tpu.matmul %1112, %1114, %cst_338 {dimension_numbers = #tpu.dot_dimension_numbers<[1], [1], [0], [0], [0, 0, 1, 0], [], []>} : vector<16x4xbf16>, vector<16x4xbf16>, vector<16x16xf32> -> vector<16x16xf32>
    %1118 = arith.addf %1117, %505 : vector<16x16xf32>
    %cst_339 = arith.constant dense<0xFF800000> : vector<16xf32>
    %1119 = vector.multi_reduction <maximumf>, %1118, %cst_339 [1] : vector<16x16xf32> to vector<16xf32>
    %1120 = vector.shape_cast %1119 : vector<16xf32> to vector<16x1xf32>
    %1121 = vector.broadcast %1120 : vector<16x1xf32> to vector<16x16xf32>
    %1122 = arith.subf %1118, %1121 : vector<16x16xf32>
    %1123 = math.exp %1122 : vector<16x16xf32>
    %cst_340 = arith.constant dense<0.000000e+00> : vector<16xf32>
    %1124 = vector.multi_reduction <add>, %1123, %cst_340 [1] : vector<16x16xf32> to vector<16xf32>
    %1125 = vector.shape_cast %1124 : vector<16xf32> to vector<16x1xf32>
    %1126 = tpu.reciprocal %1125 {approx = true} : vector<16x1xf32> -> vector<16x1xf32>
    %1127 = vector.broadcast %1126 : vector<16x1xf32> to vector<16x16xf32>
    %1128 = arith.mulf %1123, %1127 : vector<16x16xf32>
    %1129 = arith.truncf %1128 : vector<16x16xf32> to vector<16x16xbf16>
    %cst_341 = arith.constant dense<0.000000e+00> : vector<16x4xf32>
    %1130 = tpu.matmul %1129, %1116, %cst_341 {dimension_numbers = #tpu.dot_dimension_numbers<[1], [0], [0], [1], [0, 0, 1, 1], [], []>} : vector<16x16xbf16>, vector<16x4xbf16>, vector<16x4xf32> -> vector<16x4xf32>
    %1131 = vector.extract_strided_slice %976 {offsets = [0, 28], sizes = [16, 4], strides = [1, 1]} : vector<16x32xf32> to vector<16x4xf32>
    %1132 = arith.truncf %1131 : vector<16x4xf32> to vector<16x4xbf16>
    %1133 = vector.extract_strided_slice %983 {offsets = [0, 28], sizes = [16, 4], strides = [1, 1]} : vector<16x32xf32> to vector<16x4xf32>
    %1134 = arith.truncf %1133 : vector<16x4xf32> to vector<16x4xbf16>
    %1135 = vector.extract_strided_slice %990 {offsets = [0, 28], sizes = [16, 4], strides = [1, 1]} : vector<16x32xf32> to vector<16x4xf32>
    %1136 = arith.truncf %1135 : vector<16x4xf32> to vector<16x4xbf16>
    %cst_342 = arith.constant dense<0.000000e+00> : vector<16x16xf32>
    %1137 = tpu.matmul %1132, %1134, %cst_342 {dimension_numbers = #tpu.dot_dimension_numbers<[1], [1], [0], [0], [0, 0, 1, 0], [], []>} : vector<16x4xbf16>, vector<16x4xbf16>, vector<16x16xf32> -> vector<16x16xf32>
    %1138 = arith.addf %1137, %505 : vector<16x16xf32>
    %cst_343 = arith.constant dense<0xFF800000> : vector<16xf32>
    %1139 = vector.multi_reduction <maximumf>, %1138, %cst_343 [1] : vector<16x16xf32> to vector<16xf32>
    %1140 = vector.shape_cast %1139 : vector<16xf32> to vector<16x1xf32>
    %1141 = vector.broadcast %1140 : vector<16x1xf32> to vector<16x16xf32>
    %1142 = arith.subf %1138, %1141 : vector<16x16xf32>
    %1143 = math.exp %1142 : vector<16x16xf32>
    %cst_344 = arith.constant dense<0.000000e+00> : vector<16xf32>
    %1144 = vector.multi_reduction <add>, %1143, %cst_344 [1] : vector<16x16xf32> to vector<16xf32>
    %1145 = vector.shape_cast %1144 : vector<16xf32> to vector<16x1xf32>
    %1146 = tpu.reciprocal %1145 {approx = true} : vector<16x1xf32> -> vector<16x1xf32>
    %1147 = vector.broadcast %1146 : vector<16x1xf32> to vector<16x16xf32>
    %1148 = arith.mulf %1143, %1147 : vector<16x16xf32>
    %1149 = arith.truncf %1148 : vector<16x16xf32> to vector<16x16xbf16>
    %cst_345 = arith.constant dense<0.000000e+00> : vector<16x4xf32>
    %1150 = tpu.matmul %1149, %1136, %cst_345 {dimension_numbers = #tpu.dot_dimension_numbers<[1], [0], [0], [1], [0, 0, 1, 1], [], []>} : vector<16x16xbf16>, vector<16x4xbf16>, vector<16x4xf32> -> vector<16x4xf32>
    %1151 = tpu.concatenate %1010, %1030, %1050, %1070, %1090, %1110, %1130, %1150 in 1 : vector<16x4xf32>, vector<16x4xf32>, vector<16x4xf32>, vector<16x4xf32>, vector<16x4xf32>, vector<16x4xf32>, vector<16x4xf32>, vector<16x4xf32> -> vector<16x32xf32>
    %c15 = arith.constant 15 : index
    %c0_346 = arith.constant 0 : index
    %c0_347 = arith.constant 0 : index
    %1152 = vector.load %arg5[%c15, %c0_346, %c0_347] : memref<24x32x32xbf16, #tpu.memory_space<vmem>>, vector<1x32x32xbf16>
    %1153 = vector.shape_cast %1152 : vector<1x32x32xbf16> to vector<32x32xbf16>
    %c15_348 = arith.constant 15 : index
    %c0_349 = arith.constant 0 : index
    %1154 = vector.load %arg9[%c15_348, %c0_349] : memref<56x128xf32, #tpu.memory_space<vmem>>, vector<1x32xf32>
    %1155 = arith.truncf %1151 : vector<16x32xf32> to vector<16x32xbf16>
    %cst_350 = arith.constant dense<0.000000e+00> : vector<16x32xf32>
    %1156 = tpu.matmul %1155, %1153, %cst_350 {dimension_numbers = #tpu.dot_dimension_numbers<[1], [0], [0], [1], [0, 0, 1, 1], [], []>} : vector<16x32xbf16>, vector<32x32xbf16>, vector<16x32xf32> -> vector<16x32xf32>
    %1157 = vector.broadcast %1154 : vector<1x32xf32> to vector<16x32xf32>
    %1158 = arith.addf %1156, %1157 : vector<16x32xf32>
    %1159 = arith.addf %969, %1158 : vector<16x32xf32>
    %c31 = arith.constant 31 : index
    %c0_351 = arith.constant 0 : index
    %1160 = vector.load %arg9[%c31, %c0_351] : memref<56x128xf32, #tpu.memory_space<vmem>>, vector<1x32xf32>
    %c41 = arith.constant 41 : index
    %c0_352 = arith.constant 0 : index
    %1161 = vector.load %arg9[%c41, %c0_352] : memref<56x128xf32, #tpu.memory_space<vmem>>, vector<1x32xf32>
    %cst_353 = arith.constant dense<0.000000e+00> : vector<16xf32>
    %1162 = vector.multi_reduction <add>, %1159, %cst_353 [1] : vector<16x32xf32> to vector<16xf32>
    %1163 = vector.shape_cast %1162 : vector<16xf32> to vector<16x1xf32>
    %cst_354 = arith.constant 3.200000e+01 : f32
    %1164 = vector.broadcast %cst_354 : f32 to vector<16x1xf32>
    %1165 = arith.divf %1163, %1164 : vector<16x1xf32>
    %1166 = vector.broadcast %1165 : vector<16x1xf32> to vector<16x32xf32>
    %1167 = arith.subf %1159, %1166 : vector<16x32xf32>
    %1168 = arith.mulf %1167, %1167 : vector<16x32xf32>
    %cst_355 = arith.constant dense<0.000000e+00> : vector<16xf32>
    %1169 = vector.multi_reduction <add>, %1168, %cst_355 [1] : vector<16x32xf32> to vector<16xf32>
    %1170 = vector.shape_cast %1169 : vector<16xf32> to vector<16x1xf32>
    %cst_356 = arith.constant 3.200000e+01 : f32
    %1171 = vector.broadcast %cst_356 : f32 to vector<16x1xf32>
    %1172 = arith.divf %1170, %1171 : vector<16x1xf32>
    %cst_357 = arith.constant 9.99999974E-6 : f32
    %1173 = vector.broadcast %cst_357 : f32 to vector<16x1xf32>
    %1174 = arith.addf %1172, %1173 : vector<16x1xf32>
    %1175 = math.rsqrt %1174 : vector<16x1xf32>
    %1176 = vector.broadcast %1175 : vector<16x1xf32> to vector<16x32xf32>
    %1177 = arith.mulf %1167, %1176 : vector<16x32xf32>
    %1178 = vector.broadcast %1160 : vector<1x32xf32> to vector<16x32xf32>
    %1179 = arith.mulf %1177, %1178 : vector<16x32xf32>
    %1180 = vector.broadcast %1161 : vector<1x32xf32> to vector<16x32xf32>
    %1181 = arith.addf %1179, %1180 : vector<16x32xf32>
    %c20 = arith.constant 20 : index
    %c0_358 = arith.constant 0 : index
    %c0_359 = arith.constant 0 : index
    %1182 = vector.load %arg5[%c20, %c0_358, %c0_359] : memref<24x32x32xbf16, #tpu.memory_space<vmem>>, vector<1x32x32xbf16>
    %1183 = vector.shape_cast %1182 : vector<1x32x32xbf16> to vector<32x32xbf16>
    %c20_360 = arith.constant 20 : index
    %c0_361 = arith.constant 0 : index
    %1184 = vector.load %arg9[%c20_360, %c0_361] : memref<56x128xf32, #tpu.memory_space<vmem>>, vector<1x32xf32>
    %1185 = arith.truncf %1181 : vector<16x32xf32> to vector<16x32xbf16>
    %cst_362 = arith.constant dense<0.000000e+00> : vector<16x32xf32>
    %1186 = tpu.matmul %1185, %1183, %cst_362 {dimension_numbers = #tpu.dot_dimension_numbers<[1], [0], [0], [1], [0, 0, 1, 1], [], []>} : vector<16x32xbf16>, vector<32x32xbf16>, vector<16x32xf32> -> vector<16x32xf32>
    %1187 = vector.broadcast %1184 : vector<1x32xf32> to vector<16x32xf32>
    %1188 = arith.addf %1186, %1187 : vector<16x32xf32>
    %c21 = arith.constant 21 : index
    %c0_363 = arith.constant 0 : index
    %c0_364 = arith.constant 0 : index
    %1189 = vector.load %arg5[%c21, %c0_363, %c0_364] : memref<24x32x32xbf16, #tpu.memory_space<vmem>>, vector<1x32x32xbf16>
    %1190 = vector.shape_cast %1189 : vector<1x32x32xbf16> to vector<32x32xbf16>
    %c21_365 = arith.constant 21 : index
    %c0_366 = arith.constant 0 : index
    %1191 = vector.load %arg9[%c21_365, %c0_366] : memref<56x128xf32, #tpu.memory_space<vmem>>, vector<1x32xf32>
    %1192 = arith.truncf %503 : vector<16x32xf32> to vector<16x32xbf16>
    %cst_367 = arith.constant dense<0.000000e+00> : vector<16x32xf32>
    %1193 = tpu.matmul %1192, %1190, %cst_367 {dimension_numbers = #tpu.dot_dimension_numbers<[1], [0], [0], [1], [0, 0, 1, 1], [], []>} : vector<16x32xbf16>, vector<32x32xbf16>, vector<16x32xf32> -> vector<16x32xf32>
    %1194 = vector.broadcast %1191 : vector<1x32xf32> to vector<16x32xf32>
    %1195 = arith.addf %1193, %1194 : vector<16x32xf32>
    %c22 = arith.constant 22 : index
    %c0_368 = arith.constant 0 : index
    %c0_369 = arith.constant 0 : index
    %1196 = vector.load %arg5[%c22, %c0_368, %c0_369] : memref<24x32x32xbf16, #tpu.memory_space<vmem>>, vector<1x32x32xbf16>
    %1197 = vector.shape_cast %1196 : vector<1x32x32xbf16> to vector<32x32xbf16>
    %c22_370 = arith.constant 22 : index
    %c0_371 = arith.constant 0 : index
    %1198 = vector.load %arg9[%c22_370, %c0_371] : memref<56x128xf32, #tpu.memory_space<vmem>>, vector<1x32xf32>
    %1199 = arith.truncf %503 : vector<16x32xf32> to vector<16x32xbf16>
    %cst_372 = arith.constant dense<0.000000e+00> : vector<16x32xf32>
    %1200 = tpu.matmul %1199, %1197, %cst_372 {dimension_numbers = #tpu.dot_dimension_numbers<[1], [0], [0], [1], [0, 0, 1, 1], [], []>} : vector<16x32xbf16>, vector<32x32xbf16>, vector<16x32xf32> -> vector<16x32xf32>
    %1201 = vector.broadcast %1198 : vector<1x32xf32> to vector<16x32xf32>
    %1202 = arith.addf %1200, %1201 : vector<16x32xf32>
    %1203 = vector.extract_strided_slice %1188 {offsets = [0, 0], sizes = [16, 4], strides = [1, 1]} : vector<16x32xf32> to vector<16x4xf32>
    %1204 = arith.truncf %1203 : vector<16x4xf32> to vector<16x4xbf16>
    %1205 = vector.extract_strided_slice %1195 {offsets = [0, 0], sizes = [16, 4], strides = [1, 1]} : vector<16x32xf32> to vector<16x4xf32>
    %1206 = arith.truncf %1205 : vector<16x4xf32> to vector<16x4xbf16>
    %1207 = vector.extract_strided_slice %1202 {offsets = [0, 0], sizes = [16, 4], strides = [1, 1]} : vector<16x32xf32> to vector<16x4xf32>
    %1208 = arith.truncf %1207 : vector<16x4xf32> to vector<16x4xbf16>
    %cst_373 = arith.constant dense<0.000000e+00> : vector<16x16xf32>
    %1209 = tpu.matmul %1204, %1206, %cst_373 {dimension_numbers = #tpu.dot_dimension_numbers<[1], [1], [0], [0], [0, 0, 1, 0], [], []>} : vector<16x4xbf16>, vector<16x4xbf16>, vector<16x16xf32> -> vector<16x16xf32>
    %1210 = arith.addf %1209, %506 : vector<16x16xf32>
    %cst_374 = arith.constant dense<0xFF800000> : vector<16xf32>
    %1211 = vector.multi_reduction <maximumf>, %1210, %cst_374 [1] : vector<16x16xf32> to vector<16xf32>
    %1212 = vector.shape_cast %1211 : vector<16xf32> to vector<16x1xf32>
    %1213 = vector.broadcast %1212 : vector<16x1xf32> to vector<16x16xf32>
    %1214 = arith.subf %1210, %1213 : vector<16x16xf32>
    %1215 = math.exp %1214 : vector<16x16xf32>
    %cst_375 = arith.constant dense<0.000000e+00> : vector<16xf32>
    %1216 = vector.multi_reduction <add>, %1215, %cst_375 [1] : vector<16x16xf32> to vector<16xf32>
    %1217 = vector.shape_cast %1216 : vector<16xf32> to vector<16x1xf32>
    %1218 = tpu.reciprocal %1217 {approx = true} : vector<16x1xf32> -> vector<16x1xf32>
    %1219 = vector.broadcast %1218 : vector<16x1xf32> to vector<16x16xf32>
    %1220 = arith.mulf %1215, %1219 : vector<16x16xf32>
    %1221 = arith.truncf %1220 : vector<16x16xf32> to vector<16x16xbf16>
    %cst_376 = arith.constant dense<0.000000e+00> : vector<16x4xf32>
    %1222 = tpu.matmul %1221, %1208, %cst_376 {dimension_numbers = #tpu.dot_dimension_numbers<[1], [0], [0], [1], [0, 0, 1, 1], [], []>} : vector<16x16xbf16>, vector<16x4xbf16>, vector<16x4xf32> -> vector<16x4xf32>
    %1223 = vector.extract_strided_slice %1188 {offsets = [0, 4], sizes = [16, 4], strides = [1, 1]} : vector<16x32xf32> to vector<16x4xf32>
    %1224 = arith.truncf %1223 : vector<16x4xf32> to vector<16x4xbf16>
    %1225 = vector.extract_strided_slice %1195 {offsets = [0, 4], sizes = [16, 4], strides = [1, 1]} : vector<16x32xf32> to vector<16x4xf32>
    %1226 = arith.truncf %1225 : vector<16x4xf32> to vector<16x4xbf16>
    %1227 = vector.extract_strided_slice %1202 {offsets = [0, 4], sizes = [16, 4], strides = [1, 1]} : vector<16x32xf32> to vector<16x4xf32>
    %1228 = arith.truncf %1227 : vector<16x4xf32> to vector<16x4xbf16>
    %cst_377 = arith.constant dense<0.000000e+00> : vector<16x16xf32>
    %1229 = tpu.matmul %1224, %1226, %cst_377 {dimension_numbers = #tpu.dot_dimension_numbers<[1], [1], [0], [0], [0, 0, 1, 0], [], []>} : vector<16x4xbf16>, vector<16x4xbf16>, vector<16x16xf32> -> vector<16x16xf32>
    %1230 = arith.addf %1229, %506 : vector<16x16xf32>
    %cst_378 = arith.constant dense<0xFF800000> : vector<16xf32>
    %1231 = vector.multi_reduction <maximumf>, %1230, %cst_378 [1] : vector<16x16xf32> to vector<16xf32>
    %1232 = vector.shape_cast %1231 : vector<16xf32> to vector<16x1xf32>
    %1233 = vector.broadcast %1232 : vector<16x1xf32> to vector<16x16xf32>
    %1234 = arith.subf %1230, %1233 : vector<16x16xf32>
    %1235 = math.exp %1234 : vector<16x16xf32>
    %cst_379 = arith.constant dense<0.000000e+00> : vector<16xf32>
    %1236 = vector.multi_reduction <add>, %1235, %cst_379 [1] : vector<16x16xf32> to vector<16xf32>
    %1237 = vector.shape_cast %1236 : vector<16xf32> to vector<16x1xf32>
    %1238 = tpu.reciprocal %1237 {approx = true} : vector<16x1xf32> -> vector<16x1xf32>
    %1239 = vector.broadcast %1238 : vector<16x1xf32> to vector<16x16xf32>
    %1240 = arith.mulf %1235, %1239 : vector<16x16xf32>
    %1241 = arith.truncf %1240 : vector<16x16xf32> to vector<16x16xbf16>
    %cst_380 = arith.constant dense<0.000000e+00> : vector<16x4xf32>
    %1242 = tpu.matmul %1241, %1228, %cst_380 {dimension_numbers = #tpu.dot_dimension_numbers<[1], [0], [0], [1], [0, 0, 1, 1], [], []>} : vector<16x16xbf16>, vector<16x4xbf16>, vector<16x4xf32> -> vector<16x4xf32>
    %1243 = vector.extract_strided_slice %1188 {offsets = [0, 8], sizes = [16, 4], strides = [1, 1]} : vector<16x32xf32> to vector<16x4xf32>
    %1244 = arith.truncf %1243 : vector<16x4xf32> to vector<16x4xbf16>
    %1245 = vector.extract_strided_slice %1195 {offsets = [0, 8], sizes = [16, 4], strides = [1, 1]} : vector<16x32xf32> to vector<16x4xf32>
    %1246 = arith.truncf %1245 : vector<16x4xf32> to vector<16x4xbf16>
    %1247 = vector.extract_strided_slice %1202 {offsets = [0, 8], sizes = [16, 4], strides = [1, 1]} : vector<16x32xf32> to vector<16x4xf32>
    %1248 = arith.truncf %1247 : vector<16x4xf32> to vector<16x4xbf16>
    %cst_381 = arith.constant dense<0.000000e+00> : vector<16x16xf32>
    %1249 = tpu.matmul %1244, %1246, %cst_381 {dimension_numbers = #tpu.dot_dimension_numbers<[1], [1], [0], [0], [0, 0, 1, 0], [], []>} : vector<16x4xbf16>, vector<16x4xbf16>, vector<16x16xf32> -> vector<16x16xf32>
    %1250 = arith.addf %1249, %506 : vector<16x16xf32>
    %cst_382 = arith.constant dense<0xFF800000> : vector<16xf32>
    %1251 = vector.multi_reduction <maximumf>, %1250, %cst_382 [1] : vector<16x16xf32> to vector<16xf32>
    %1252 = vector.shape_cast %1251 : vector<16xf32> to vector<16x1xf32>
    %1253 = vector.broadcast %1252 : vector<16x1xf32> to vector<16x16xf32>
    %1254 = arith.subf %1250, %1253 : vector<16x16xf32>
    %1255 = math.exp %1254 : vector<16x16xf32>
    %cst_383 = arith.constant dense<0.000000e+00> : vector<16xf32>
    %1256 = vector.multi_reduction <add>, %1255, %cst_383 [1] : vector<16x16xf32> to vector<16xf32>
    %1257 = vector.shape_cast %1256 : vector<16xf32> to vector<16x1xf32>
    %1258 = tpu.reciprocal %1257 {approx = true} : vector<16x1xf32> -> vector<16x1xf32>
    %1259 = vector.broadcast %1258 : vector<16x1xf32> to vector<16x16xf32>
    %1260 = arith.mulf %1255, %1259 : vector<16x16xf32>
    %1261 = arith.truncf %1260 : vector<16x16xf32> to vector<16x16xbf16>
    %cst_384 = arith.constant dense<0.000000e+00> : vector<16x4xf32>
    %1262 = tpu.matmul %1261, %1248, %cst_384 {dimension_numbers = #tpu.dot_dimension_numbers<[1], [0], [0], [1], [0, 0, 1, 1], [], []>} : vector<16x16xbf16>, vector<16x4xbf16>, vector<16x4xf32> -> vector<16x4xf32>
    %1263 = vector.extract_strided_slice %1188 {offsets = [0, 12], sizes = [16, 4], strides = [1, 1]} : vector<16x32xf32> to vector<16x4xf32>
    %1264 = arith.truncf %1263 : vector<16x4xf32> to vector<16x4xbf16>
    %1265 = vector.extract_strided_slice %1195 {offsets = [0, 12], sizes = [16, 4], strides = [1, 1]} : vector<16x32xf32> to vector<16x4xf32>
    %1266 = arith.truncf %1265 : vector<16x4xf32> to vector<16x4xbf16>
    %1267 = vector.extract_strided_slice %1202 {offsets = [0, 12], sizes = [16, 4], strides = [1, 1]} : vector<16x32xf32> to vector<16x4xf32>
    %1268 = arith.truncf %1267 : vector<16x4xf32> to vector<16x4xbf16>
    %cst_385 = arith.constant dense<0.000000e+00> : vector<16x16xf32>
    %1269 = tpu.matmul %1264, %1266, %cst_385 {dimension_numbers = #tpu.dot_dimension_numbers<[1], [1], [0], [0], [0, 0, 1, 0], [], []>} : vector<16x4xbf16>, vector<16x4xbf16>, vector<16x16xf32> -> vector<16x16xf32>
    %1270 = arith.addf %1269, %506 : vector<16x16xf32>
    %cst_386 = arith.constant dense<0xFF800000> : vector<16xf32>
    %1271 = vector.multi_reduction <maximumf>, %1270, %cst_386 [1] : vector<16x16xf32> to vector<16xf32>
    %1272 = vector.shape_cast %1271 : vector<16xf32> to vector<16x1xf32>
    %1273 = vector.broadcast %1272 : vector<16x1xf32> to vector<16x16xf32>
    %1274 = arith.subf %1270, %1273 : vector<16x16xf32>
    %1275 = math.exp %1274 : vector<16x16xf32>
    %cst_387 = arith.constant dense<0.000000e+00> : vector<16xf32>
    %1276 = vector.multi_reduction <add>, %1275, %cst_387 [1] : vector<16x16xf32> to vector<16xf32>
    %1277 = vector.shape_cast %1276 : vector<16xf32> to vector<16x1xf32>
    %1278 = tpu.reciprocal %1277 {approx = true} : vector<16x1xf32> -> vector<16x1xf32>
    %1279 = vector.broadcast %1278 : vector<16x1xf32> to vector<16x16xf32>
    %1280 = arith.mulf %1275, %1279 : vector<16x16xf32>
    %1281 = arith.truncf %1280 : vector<16x16xf32> to vector<16x16xbf16>
    %cst_388 = arith.constant dense<0.000000e+00> : vector<16x4xf32>
    %1282 = tpu.matmul %1281, %1268, %cst_388 {dimension_numbers = #tpu.dot_dimension_numbers<[1], [0], [0], [1], [0, 0, 1, 1], [], []>} : vector<16x16xbf16>, vector<16x4xbf16>, vector<16x4xf32> -> vector<16x4xf32>
    %1283 = vector.extract_strided_slice %1188 {offsets = [0, 16], sizes = [16, 4], strides = [1, 1]} : vector<16x32xf32> to vector<16x4xf32>
    %1284 = arith.truncf %1283 : vector<16x4xf32> to vector<16x4xbf16>
    %1285 = vector.extract_strided_slice %1195 {offsets = [0, 16], sizes = [16, 4], strides = [1, 1]} : vector<16x32xf32> to vector<16x4xf32>
    %1286 = arith.truncf %1285 : vector<16x4xf32> to vector<16x4xbf16>
    %1287 = vector.extract_strided_slice %1202 {offsets = [0, 16], sizes = [16, 4], strides = [1, 1]} : vector<16x32xf32> to vector<16x4xf32>
    %1288 = arith.truncf %1287 : vector<16x4xf32> to vector<16x4xbf16>
    %cst_389 = arith.constant dense<0.000000e+00> : vector<16x16xf32>
    %1289 = tpu.matmul %1284, %1286, %cst_389 {dimension_numbers = #tpu.dot_dimension_numbers<[1], [1], [0], [0], [0, 0, 1, 0], [], []>} : vector<16x4xbf16>, vector<16x4xbf16>, vector<16x16xf32> -> vector<16x16xf32>
    %1290 = arith.addf %1289, %506 : vector<16x16xf32>
    %cst_390 = arith.constant dense<0xFF800000> : vector<16xf32>
    %1291 = vector.multi_reduction <maximumf>, %1290, %cst_390 [1] : vector<16x16xf32> to vector<16xf32>
    %1292 = vector.shape_cast %1291 : vector<16xf32> to vector<16x1xf32>
    %1293 = vector.broadcast %1292 : vector<16x1xf32> to vector<16x16xf32>
    %1294 = arith.subf %1290, %1293 : vector<16x16xf32>
    %1295 = math.exp %1294 : vector<16x16xf32>
    %cst_391 = arith.constant dense<0.000000e+00> : vector<16xf32>
    %1296 = vector.multi_reduction <add>, %1295, %cst_391 [1] : vector<16x16xf32> to vector<16xf32>
    %1297 = vector.shape_cast %1296 : vector<16xf32> to vector<16x1xf32>
    %1298 = tpu.reciprocal %1297 {approx = true} : vector<16x1xf32> -> vector<16x1xf32>
    %1299 = vector.broadcast %1298 : vector<16x1xf32> to vector<16x16xf32>
    %1300 = arith.mulf %1295, %1299 : vector<16x16xf32>
    %1301 = arith.truncf %1300 : vector<16x16xf32> to vector<16x16xbf16>
    %cst_392 = arith.constant dense<0.000000e+00> : vector<16x4xf32>
    %1302 = tpu.matmul %1301, %1288, %cst_392 {dimension_numbers = #tpu.dot_dimension_numbers<[1], [0], [0], [1], [0, 0, 1, 1], [], []>} : vector<16x16xbf16>, vector<16x4xbf16>, vector<16x4xf32> -> vector<16x4xf32>
    %1303 = vector.extract_strided_slice %1188 {offsets = [0, 20], sizes = [16, 4], strides = [1, 1]} : vector<16x32xf32> to vector<16x4xf32>
    %1304 = arith.truncf %1303 : vector<16x4xf32> to vector<16x4xbf16>
    %1305 = vector.extract_strided_slice %1195 {offsets = [0, 20], sizes = [16, 4], strides = [1, 1]} : vector<16x32xf32> to vector<16x4xf32>
    %1306 = arith.truncf %1305 : vector<16x4xf32> to vector<16x4xbf16>
    %1307 = vector.extract_strided_slice %1202 {offsets = [0, 20], sizes = [16, 4], strides = [1, 1]} : vector<16x32xf32> to vector<16x4xf32>
    %1308 = arith.truncf %1307 : vector<16x4xf32> to vector<16x4xbf16>
    %cst_393 = arith.constant dense<0.000000e+00> : vector<16x16xf32>
    %1309 = tpu.matmul %1304, %1306, %cst_393 {dimension_numbers = #tpu.dot_dimension_numbers<[1], [1], [0], [0], [0, 0, 1, 0], [], []>} : vector<16x4xbf16>, vector<16x4xbf16>, vector<16x16xf32> -> vector<16x16xf32>
    %1310 = arith.addf %1309, %506 : vector<16x16xf32>
    %cst_394 = arith.constant dense<0xFF800000> : vector<16xf32>
    %1311 = vector.multi_reduction <maximumf>, %1310, %cst_394 [1] : vector<16x16xf32> to vector<16xf32>
    %1312 = vector.shape_cast %1311 : vector<16xf32> to vector<16x1xf32>
    %1313 = vector.broadcast %1312 : vector<16x1xf32> to vector<16x16xf32>
    %1314 = arith.subf %1310, %1313 : vector<16x16xf32>
    %1315 = math.exp %1314 : vector<16x16xf32>
    %cst_395 = arith.constant dense<0.000000e+00> : vector<16xf32>
    %1316 = vector.multi_reduction <add>, %1315, %cst_395 [1] : vector<16x16xf32> to vector<16xf32>
    %1317 = vector.shape_cast %1316 : vector<16xf32> to vector<16x1xf32>
    %1318 = tpu.reciprocal %1317 {approx = true} : vector<16x1xf32> -> vector<16x1xf32>
    %1319 = vector.broadcast %1318 : vector<16x1xf32> to vector<16x16xf32>
    %1320 = arith.mulf %1315, %1319 : vector<16x16xf32>
    %1321 = arith.truncf %1320 : vector<16x16xf32> to vector<16x16xbf16>
    %cst_396 = arith.constant dense<0.000000e+00> : vector<16x4xf32>
    %1322 = tpu.matmul %1321, %1308, %cst_396 {dimension_numbers = #tpu.dot_dimension_numbers<[1], [0], [0], [1], [0, 0, 1, 1], [], []>} : vector<16x16xbf16>, vector<16x4xbf16>, vector<16x4xf32> -> vector<16x4xf32>
    %1323 = vector.extract_strided_slice %1188 {offsets = [0, 24], sizes = [16, 4], strides = [1, 1]} : vector<16x32xf32> to vector<16x4xf32>
    %1324 = arith.truncf %1323 : vector<16x4xf32> to vector<16x4xbf16>
    %1325 = vector.extract_strided_slice %1195 {offsets = [0, 24], sizes = [16, 4], strides = [1, 1]} : vector<16x32xf32> to vector<16x4xf32>
    %1326 = arith.truncf %1325 : vector<16x4xf32> to vector<16x4xbf16>
    %1327 = vector.extract_strided_slice %1202 {offsets = [0, 24], sizes = [16, 4], strides = [1, 1]} : vector<16x32xf32> to vector<16x4xf32>
    %1328 = arith.truncf %1327 : vector<16x4xf32> to vector<16x4xbf16>
    %cst_397 = arith.constant dense<0.000000e+00> : vector<16x16xf32>
    %1329 = tpu.matmul %1324, %1326, %cst_397 {dimension_numbers = #tpu.dot_dimension_numbers<[1], [1], [0], [0], [0, 0, 1, 0], [], []>} : vector<16x4xbf16>, vector<16x4xbf16>, vector<16x16xf32> -> vector<16x16xf32>
    %1330 = arith.addf %1329, %506 : vector<16x16xf32>
    %cst_398 = arith.constant dense<0xFF800000> : vector<16xf32>
    %1331 = vector.multi_reduction <maximumf>, %1330, %cst_398 [1] : vector<16x16xf32> to vector<16xf32>
    %1332 = vector.shape_cast %1331 : vector<16xf32> to vector<16x1xf32>
    %1333 = vector.broadcast %1332 : vector<16x1xf32> to vector<16x16xf32>
    %1334 = arith.subf %1330, %1333 : vector<16x16xf32>
    %1335 = math.exp %1334 : vector<16x16xf32>
    %cst_399 = arith.constant dense<0.000000e+00> : vector<16xf32>
    %1336 = vector.multi_reduction <add>, %1335, %cst_399 [1] : vector<16x16xf32> to vector<16xf32>
    %1337 = vector.shape_cast %1336 : vector<16xf32> to vector<16x1xf32>
    %1338 = tpu.reciprocal %1337 {approx = true} : vector<16x1xf32> -> vector<16x1xf32>
    %1339 = vector.broadcast %1338 : vector<16x1xf32> to vector<16x16xf32>
    %1340 = arith.mulf %1335, %1339 : vector<16x16xf32>
    %1341 = arith.truncf %1340 : vector<16x16xf32> to vector<16x16xbf16>
    %cst_400 = arith.constant dense<0.000000e+00> : vector<16x4xf32>
    %1342 = tpu.matmul %1341, %1328, %cst_400 {dimension_numbers = #tpu.dot_dimension_numbers<[1], [0], [0], [1], [0, 0, 1, 1], [], []>} : vector<16x16xbf16>, vector<16x4xbf16>, vector<16x4xf32> -> vector<16x4xf32>
    %1343 = vector.extract_strided_slice %1188 {offsets = [0, 28], sizes = [16, 4], strides = [1, 1]} : vector<16x32xf32> to vector<16x4xf32>
    %1344 = arith.truncf %1343 : vector<16x4xf32> to vector<16x4xbf16>
    %1345 = vector.extract_strided_slice %1195 {offsets = [0, 28], sizes = [16, 4], strides = [1, 1]} : vector<16x32xf32> to vector<16x4xf32>
    %1346 = arith.truncf %1345 : vector<16x4xf32> to vector<16x4xbf16>
    %1347 = vector.extract_strided_slice %1202 {offsets = [0, 28], sizes = [16, 4], strides = [1, 1]} : vector<16x32xf32> to vector<16x4xf32>
    %1348 = arith.truncf %1347 : vector<16x4xf32> to vector<16x4xbf16>
    %cst_401 = arith.constant dense<0.000000e+00> : vector<16x16xf32>
    %1349 = tpu.matmul %1344, %1346, %cst_401 {dimension_numbers = #tpu.dot_dimension_numbers<[1], [1], [0], [0], [0, 0, 1, 0], [], []>} : vector<16x4xbf16>, vector<16x4xbf16>, vector<16x16xf32> -> vector<16x16xf32>
    %1350 = arith.addf %1349, %506 : vector<16x16xf32>
    %cst_402 = arith.constant dense<0xFF800000> : vector<16xf32>
    %1351 = vector.multi_reduction <maximumf>, %1350, %cst_402 [1] : vector<16x16xf32> to vector<16xf32>
    %1352 = vector.shape_cast %1351 : vector<16xf32> to vector<16x1xf32>
    %1353 = vector.broadcast %1352 : vector<16x1xf32> to vector<16x16xf32>
    %1354 = arith.subf %1350, %1353 : vector<16x16xf32>
    %1355 = math.exp %1354 : vector<16x16xf32>
    %cst_403 = arith.constant dense<0.000000e+00> : vector<16xf32>
    %1356 = vector.multi_reduction <add>, %1355, %cst_403 [1] : vector<16x16xf32> to vector<16xf32>
    %1357 = vector.shape_cast %1356 : vector<16xf32> to vector<16x1xf32>
    %1358 = tpu.reciprocal %1357 {approx = true} : vector<16x1xf32> -> vector<16x1xf32>
    %1359 = vector.broadcast %1358 : vector<16x1xf32> to vector<16x16xf32>
    %1360 = arith.mulf %1355, %1359 : vector<16x16xf32>
    %1361 = arith.truncf %1360 : vector<16x16xf32> to vector<16x16xbf16>
    %cst_404 = arith.constant dense<0.000000e+00> : vector<16x4xf32>
    %1362 = tpu.matmul %1361, %1348, %cst_404 {dimension_numbers = #tpu.dot_dimension_numbers<[1], [0], [0], [1], [0, 0, 1, 1], [], []>} : vector<16x16xbf16>, vector<16x4xbf16>, vector<16x4xf32> -> vector<16x4xf32>
    %1363 = tpu.concatenate %1222, %1242, %1262, %1282, %1302, %1322, %1342, %1362 in 1 : vector<16x4xf32>, vector<16x4xf32>, vector<16x4xf32>, vector<16x4xf32>, vector<16x4xf32>, vector<16x4xf32>, vector<16x4xf32>, vector<16x4xf32> -> vector<16x32xf32>
    %c23 = arith.constant 23 : index
    %c0_405 = arith.constant 0 : index
    %c0_406 = arith.constant 0 : index
    %1364 = vector.load %arg5[%c23, %c0_405, %c0_406] : memref<24x32x32xbf16, #tpu.memory_space<vmem>>, vector<1x32x32xbf16>
    %1365 = vector.shape_cast %1364 : vector<1x32x32xbf16> to vector<32x32xbf16>
    %c23_407 = arith.constant 23 : index
    %c0_408 = arith.constant 0 : index
    %1366 = vector.load %arg9[%c23_407, %c0_408] : memref<56x128xf32, #tpu.memory_space<vmem>>, vector<1x32xf32>
    %1367 = arith.truncf %1363 : vector<16x32xf32> to vector<16x32xbf16>
    %cst_409 = arith.constant dense<0.000000e+00> : vector<16x32xf32>
    %1368 = tpu.matmul %1367, %1365, %cst_409 {dimension_numbers = #tpu.dot_dimension_numbers<[1], [0], [0], [1], [0, 0, 1, 1], [], []>} : vector<16x32xbf16>, vector<32x32xbf16>, vector<16x32xf32> -> vector<16x32xf32>
    %1369 = vector.broadcast %1366 : vector<1x32xf32> to vector<16x32xf32>
    %1370 = arith.addf %1368, %1369 : vector<16x32xf32>
    %1371 = arith.addf %1181, %1370 : vector<16x32xf32>
    %c32 = arith.constant 32 : index
    %c0_410 = arith.constant 0 : index
    %1372 = vector.load %arg9[%c32, %c0_410] : memref<56x128xf32, #tpu.memory_space<vmem>>, vector<1x32xf32>
    %c42 = arith.constant 42 : index
    %c0_411 = arith.constant 0 : index
    %1373 = vector.load %arg9[%c42, %c0_411] : memref<56x128xf32, #tpu.memory_space<vmem>>, vector<1x32xf32>
    %cst_412 = arith.constant dense<0.000000e+00> : vector<16xf32>
    %1374 = vector.multi_reduction <add>, %1371, %cst_412 [1] : vector<16x32xf32> to vector<16xf32>
    %1375 = vector.shape_cast %1374 : vector<16xf32> to vector<16x1xf32>
    %cst_413 = arith.constant 3.200000e+01 : f32
    %1376 = vector.broadcast %cst_413 : f32 to vector<16x1xf32>
    %1377 = arith.divf %1375, %1376 : vector<16x1xf32>
    %1378 = vector.broadcast %1377 : vector<16x1xf32> to vector<16x32xf32>
    %1379 = arith.subf %1371, %1378 : vector<16x32xf32>
    %1380 = arith.mulf %1379, %1379 : vector<16x32xf32>
    %cst_414 = arith.constant dense<0.000000e+00> : vector<16xf32>
    %1381 = vector.multi_reduction <add>, %1380, %cst_414 [1] : vector<16x32xf32> to vector<16xf32>
    %1382 = vector.shape_cast %1381 : vector<16xf32> to vector<16x1xf32>
    %cst_415 = arith.constant 3.200000e+01 : f32
    %1383 = vector.broadcast %cst_415 : f32 to vector<16x1xf32>
    %1384 = arith.divf %1382, %1383 : vector<16x1xf32>
    %cst_416 = arith.constant 9.99999974E-6 : f32
    %1385 = vector.broadcast %cst_416 : f32 to vector<16x1xf32>
    %1386 = arith.addf %1384, %1385 : vector<16x1xf32>
    %1387 = math.rsqrt %1386 : vector<16x1xf32>
    %1388 = vector.broadcast %1387 : vector<16x1xf32> to vector<16x32xf32>
    %1389 = arith.mulf %1379, %1388 : vector<16x32xf32>
    %1390 = vector.broadcast %1372 : vector<1x32xf32> to vector<16x32xf32>
    %1391 = arith.mulf %1389, %1390 : vector<16x32xf32>
    %1392 = vector.broadcast %1373 : vector<1x32xf32> to vector<16x32xf32>
    %1393 = arith.addf %1391, %1392 : vector<16x32xf32>
    %c3_417 = arith.constant 3 : index
    %c0_418 = arith.constant 0 : index
    %c0_419 = arith.constant 0 : index
    %1394 = vector.load %arg6[%c3_417, %c0_418, %c0_419] : memref<4x32x64xbf16, #tpu.memory_space<vmem>>, vector<1x32x64xbf16>
    %1395 = vector.shape_cast %1394 : vector<1x32x64xbf16> to vector<32x64xbf16>
    %c47 = arith.constant 47 : index
    %c0_420 = arith.constant 0 : index
    %1396 = vector.load %arg9[%c47, %c0_420] : memref<56x128xf32, #tpu.memory_space<vmem>>, vector<1x64xf32>
    %1397 = arith.truncf %1393 : vector<16x32xf32> to vector<16x32xbf16>
    %cst_421 = arith.constant dense<0.000000e+00> : vector<16x64xf32>
    %1398 = tpu.matmul %1397, %1395, %cst_421 {dimension_numbers = #tpu.dot_dimension_numbers<[1], [0], [0], [1], [0, 0, 1, 1], [], []>} : vector<16x32xbf16>, vector<32x64xbf16>, vector<16x64xf32> -> vector<16x64xf32>
    %1399 = vector.broadcast %1396 : vector<1x64xf32> to vector<16x64xf32>
    %1400 = arith.addf %1398, %1399 : vector<16x64xf32>
    %cst_422 = arith.constant 0.000000e+00 : f32
    %1401 = vector.broadcast %cst_422 : f32 to vector<16x64xf32>
    %1402 = arith.maximumf %1400, %1401 : vector<16x64xf32>
    %c3_423 = arith.constant 3 : index
    %c0_424 = arith.constant 0 : index
    %c0_425 = arith.constant 0 : index
    %1403 = vector.load %arg7[%c3_423, %c0_424, %c0_425] : memref<4x64x32xbf16, #tpu.memory_space<vmem>>, vector<1x64x32xbf16>
    %1404 = vector.shape_cast %1403 : vector<1x64x32xbf16> to vector<64x32xbf16>
    %c51 = arith.constant 51 : index
    %c0_426 = arith.constant 0 : index
    %1405 = vector.load %arg9[%c51, %c0_426] : memref<56x128xf32, #tpu.memory_space<vmem>>, vector<1x32xf32>
    %1406 = arith.truncf %1402 : vector<16x64xf32> to vector<16x64xbf16>
    %cst_427 = arith.constant dense<0.000000e+00> : vector<16x32xf32>
    %1407 = tpu.matmul %1406, %1404, %cst_427 {dimension_numbers = #tpu.dot_dimension_numbers<[1], [0], [0], [1], [0, 0, 1, 1], [], []>} : vector<16x64xbf16>, vector<64x32xbf16>, vector<16x32xf32> -> vector<16x32xf32>
    %1408 = vector.broadcast %1405 : vector<1x32xf32> to vector<16x32xf32>
    %1409 = arith.addf %1407, %1408 : vector<16x32xf32>
    %1410 = arith.addf %1393, %1409 : vector<16x32xf32>
    %c33 = arith.constant 33 : index
    %c0_428 = arith.constant 0 : index
    %1411 = vector.load %arg9[%c33, %c0_428] : memref<56x128xf32, #tpu.memory_space<vmem>>, vector<1x32xf32>
    %c43 = arith.constant 43 : index
    %c0_429 = arith.constant 0 : index
    %1412 = vector.load %arg9[%c43, %c0_429] : memref<56x128xf32, #tpu.memory_space<vmem>>, vector<1x32xf32>
    %cst_430 = arith.constant dense<0.000000e+00> : vector<16xf32>
    %1413 = vector.multi_reduction <add>, %1410, %cst_430 [1] : vector<16x32xf32> to vector<16xf32>
    %1414 = vector.shape_cast %1413 : vector<16xf32> to vector<16x1xf32>
    %cst_431 = arith.constant 3.200000e+01 : f32
    %1415 = vector.broadcast %cst_431 : f32 to vector<16x1xf32>
    %1416 = arith.divf %1414, %1415 : vector<16x1xf32>
    %1417 = vector.broadcast %1416 : vector<16x1xf32> to vector<16x32xf32>
    %1418 = arith.subf %1410, %1417 : vector<16x32xf32>
    %1419 = arith.mulf %1418, %1418 : vector<16x32xf32>
    %cst_432 = arith.constant dense<0.000000e+00> : vector<16xf32>
    %1420 = vector.multi_reduction <add>, %1419, %cst_432 [1] : vector<16x32xf32> to vector<16xf32>
    %1421 = vector.shape_cast %1420 : vector<16xf32> to vector<16x1xf32>
    %cst_433 = arith.constant 3.200000e+01 : f32
    %1422 = vector.broadcast %cst_433 : f32 to vector<16x1xf32>
    %1423 = arith.divf %1421, %1422 : vector<16x1xf32>
    %cst_434 = arith.constant 9.99999974E-6 : f32
    %1424 = vector.broadcast %cst_434 : f32 to vector<16x1xf32>
    %1425 = arith.addf %1423, %1424 : vector<16x1xf32>
    %1426 = math.rsqrt %1425 : vector<16x1xf32>
    %1427 = vector.broadcast %1426 : vector<16x1xf32> to vector<16x32xf32>
    %1428 = arith.mulf %1418, %1427 : vector<16x32xf32>
    %1429 = vector.broadcast %1411 : vector<1x32xf32> to vector<16x32xf32>
    %1430 = arith.mulf %1428, %1429 : vector<16x32xf32>
    %1431 = vector.broadcast %1412 : vector<1x32xf32> to vector<16x32xf32>
    %1432 = arith.addf %1430, %1431 : vector<16x32xf32>
    %1433 = arith.truncf %1432 : vector<16x32xf32> to vector<16x32xbf16>
    %c0_435 = arith.constant 0 : index
    %c0_436 = arith.constant 0 : index
    %1434 = vector.load %arg8[%c0_435, %c0_436] : memref<32x128xbf16, #tpu.memory_space<vmem>>, vector<32x128xbf16>
    %cst_437 = arith.constant dense<0.000000e+00> : vector<16x128xf32>
    %1435 = tpu.matmul %1433, %1434, %cst_437 {dimension_numbers = #tpu.dot_dimension_numbers<[1], [0], [0], [1], [0, 0, 1, 1], [], []>} : vector<16x32xbf16>, vector<32x128xbf16>, vector<16x128xf32> -> vector<16x128xf32>
    %c52 = arith.constant 52 : index
    %c0_438 = arith.constant 0 : index
    %1436 = vector.load %arg9[%c52, %c0_438] : memref<56x128xf32, #tpu.memory_space<vmem>>, vector<1x128xf32>
    %1437 = vector.broadcast %1436 : vector<1x128xf32> to vector<16x128xf32>
    %1438 = arith.addf %1435, %1437 : vector<16x128xf32>
    %c0_439 = arith.constant 0 : index
    %c0_440 = arith.constant 0 : index
    %1439 = vector.load %arg10[%c0_439, %c0_440] : memref<16x128xf32, #tpu.memory_space<vmem>>, vector<16x128xf32>
    tpu.vector_store %arg10[%c0_439, %c0_440], %1438 {strides = array<i32>} : memref<16x128xf32, #tpu.memory_space<vmem>>, vector<16x128xf32>,
    return
  }
}

</mosaic_0001>

<bundles_post_ra>
// kernel: seq2seq_forward.1
= control target key start
LH: loop header
LB: loop body
LE: loop exit
PB: predicated region body
PF: predicated region fallthrough
CT: control target
= control target key end

     0   :  { %v11212_v0 = vmov 0.0   ;;  %vm11213_vm0 = vmmov 0   ;;  %vm62_vm1 = vcmask 261120   ;;  %vm236_vm2 = vcmask 31744   ;;  %s11214_s13 = smov 120   ;;  %s11215_s14 = smov 124   ;;  %s13835_s5 = inlined_call_operand.vmem [shape: bf16[24,32,32], index: 5, kind: input, shape index: {}]   ;;  %s13836_s0 = inlined_call_operand.vmem [shape: f32[16,32], index: 0, kind: input, shape index: {}]   ;;  %s13837_s9 = inlined_call_operand.vmem [shape: f32[56,128], index: 9, kind: input, shape index: {}]   ;;  %s13838_s2 = inlined_call_operand.vmem [shape: f32[16,16], index: 2, kind: input, shape index: {}]   ;;  %s13839_s6 = inlined_call_operand.vmem [shape: bf16[4,32,64], index: 6, kind: input, shape index: {}]   ;;  %s13840_s7 = inlined_call_operand.vmem [shape: bf16[4,64,32], index: 7, kind: input, shape index: {}]   ;;  %s13841_s1 = inlined_call_operand.vmem [shape: f32[16,32], index: 1, kind: input, shape index: {}]   ;;  %s13842_s3 = inlined_call_operand.vmem [shape: f32[16,16], index: 3, kind: input, shape index: {}]   ;;  %s13843_s4 = inlined_call_operand.vmem [shape: f32[16,16], index: 4, kind: input, shape index: {}]   ;;  %s13844_s8 = inlined_call_operand.vmem [shape: bf16[32,128], index: 8, kind: input, shape index: {}]   ;;  %s13845_s10 = inlined_call_operand.vmem [shape: f32[16,128], index: 10, kind: output, shape index: {}]  }
   0x1   :  { %9630 = vmatprep.subr.bf16.mxu1 %v11212_v0  ;;  %v10704_v1 = vld [vmem:[%s13835_s5 + $0x10] sm:$0xff]   ;;  %9622 = vmatprep.subr.bf16.mxu0 %v11212_v0  ;;  %v10705_v2 = vld [vmem:[%s13835_s5] sm:$0xff]   ;;  %v10706_v3 = vld [vmem:[%s13835_s5 + $0x18] sm:$0xff]   ;;  %s11216_s15 = smov 116   ;;  %s11217_s16 = smov 112   ;;  %vm284_vm3 = vcmask 130048  }
   0x2   :  { %9634 = vmatprep.mubr.msk.bf16.mxu1 %vm11213_vm0, %v11212_v0  ;;  %9626 = vmatprep.mubr.msk.bf16.mxu0 %vm11213_vm0, %v11212_v0  ;;  %v36_v4 = vld [vmem:[%s13836_s0] sm:$0xff]  ;;  %v37_v5 = vld [vmem:[%s13836_s0 + $0x8] sm:$0xff]  ;;  %s11218_s17 = smov 108   ;;  %s11219_s18 = smov 104   ;;  %vm1260_vm4 = vcmask 64512   ;;  %vm1263_vm5 = vcmask 97280  }
   0x3   :  { %9631 = vmatpush3.bf16.msra.mxu1 %v10704_v1  ;;  %9623 = vmatpush3.bf16.msra.mxu0 %v10705_v2  ;;  %v10707_v6 = vld [vmem:[%s13835_s5 + $0x8] sm:$0xff]   ;;  %v45_v7 = vpack.c.bf16 %v37_v5, %v36_v4  ;;  %v10708_v8 = vld [vmem:[%s13835_s5 + $0x20] sm:$0xff]   ;;  %s11220_s19 = smov 100   ;;  %s11221_s26 = smov 4   ;;  %vm1268_vm6 = vcmask 162816   ;;  %vm1271_vm7 = vcmask 195584  }
   0x4   :  { %9632 = vmatprep.subr.bf16.mxu1 %v11212_v0  ;;  %9624 = vmatprep.subr.bf16.mxu0 %v11212_v0  ;;  %v10709_v9 = vld [vmem:[%s13835_s5 + $0x28] sm:$0xff]   ;;  %v8939_v10 = vld [vmem:[%s13837_s9] ss:$0 sm:$0xff]  ;;  %v8947_v11 = vld [vmem:[%s13837_s9 + $0x1] ss:$0 sm:$0xff]  ;;  %s11222_s27 = smov 8  }
   0x5   :  { %v8955_v29 = vld [vmem:[%s13837_s9 + $0x2] ss:$0 sm:$0xff]  ;;  %v11403_v58 = vld [vmem:[%s13838_s2 + $0x8] sm:$0xff]  ;;  %s11223_s28 = smov 12   ;;  %s11224_s29 = smov 16   ;;  %vm1274_vm8 = vcmask 228352  }
   0x6   :  { %v11398_v56 = vld [vmem:[%s13838_s2] sm:$0xff]  ;;  %s11225_s30 = smov 20   ;;  %s11226_s22 = smov 24   ;;  %vm1493_vm9 = vcmask 523264  }
   0x7   :  { %9633 = vmatpush3.bf16.msra.mxu1 %v10706_v3  ;;  %9625 = vmatpush3.bf16.msra.mxu0 %v10707_v6  ;;  %s13846_s23 = smov 28   ;;  %s13848_s24 = smov 28  }
   0x8   :  { %9646 = vmatprep.subr.bf16.mxu1 %v11212_v0  ;;  %9638 = vmatprep.subr.bf16.mxu0 %v11212_v0 }
   0xa   :  { %9635 = vmatmul.mubr.msk.bf16.vlgmr.msra.gmra.mrb[0].mxu1 %vm62_vm1, %v45_v7  ;;  %9627 = vmatmul.mubr.msk.bf16.vlgmr.msra.gmra.mrb[0].mxu0 %vm62_vm1, %v45_v7 }
   0xb   :  { %9648 = vmatprep.mubr.msk.bf16.mxu1 %vm11213_vm0, %v11212_v0  ;;  %9642 = vmatprep.mubr.msk.bf16.mxu0 %vm11213_vm0, %v11212_v0 }
   0xc   :  { %9639 = vmatpush3.bf16.msra.mxu0 %v10708_v8 }
   0xd   :  { %9640 = vmatprep.subr.bf16.mxu0 %v11212_v0 }
  0x10   :  { %9641 = vmatpush3.bf16.msra.mxu0 %v10709_v9 }
  0x11   :  { %9652 = vmatprep.subr.bf16.mxu0 %v11212_v0 }
  0x13   :  { %9643 = vmatmul.mubr.msk.bf16.vlgmr.msra.gmra.mrb[4].mxu0 %vm62_vm1, %v45_v7 }
  0x14   :  { %9654 = vmatprep.mubr.msk.bf16.mxu0 %vm11213_vm0, %v11212_v0 }
  0xdd   :  { %v163_v12 = vpop.f32.mrb[0].mxu1  ;;  %v100_v14 = vpop.f32.mrb[0].mxu0 }
  0xde   :  { %v9636_v13 = vpop.f32.mrb[1].mxu1  ;;  %v101_v16 = vadd.f32 %v8939_v10, %v100_v14  ;;  %v9628_v17 = vpop.f32.mrb[1].mxu0  ;;  %v164_v18 = vadd.f32 %v8947_v11, %v163_v12 }
  0xdf   :  { %v166_v15 = vpop.f32.mrb[2].mxu1  ;;  %v103_v21 = vpop.f32.mrb[2].mxu0 }
  0xe0   :  { %v167_v19 = vadd.f32 %v8947_v11, %v166_v15  ;;  %v9637_v20 = vpop.f32.mrb[3].mxu1  ;;  %v104_v22 = vadd.f32 %v8939_v10, %v103_v21  ;;  %v9629_v23 = vpop.f32.mrb[3].mxu0 }
  0xe2   :  { %v234_v24 = vpack.c.bf16 %v167_v19, %v164_v18  ;;  %v233_v25 = vpack.c.bf16 %v104_v22, %v101_v16 }
  0xe4   :  { %478 = vrot.lane.b32.xlu1 %v234_v24, %s11214_s13  ;;  %356 = vrot.lane.b32.xlu0 %v234_v24, %s11215_s14  ;;  %v241_v26 = vsel %vm236_vm2, %v234_v24, 0 }
  0xe5   :  { %9647 = vmatpush3.bf16.xpose.msra.mxu1 %v241_v26 }
  0xe6   :  { %9658 = vmatprep.subr.bf16.mxu1 %v11212_v0  ;;  %v226_v30 = vpop.f32.mrb[4].mxu0 }
  0xe7   :  { %v9644_v31 = vpop.f32.mrb[5].mxu0  ;;  %v227_v32 = vadd.f32 %v8955_v29, %v226_v30 }
  0xe8   :  { %476 = vrot.lane.b32.xlu1 %v233_v25, %s11214_s13  ;;  %353 = vrot.lane.b32.xlu0 %v233_v25, %s11215_s14  ;;  %v229_v33 = vpop.f32.mrb[6].mxu0 }
  0xe9   :  { %v230_v35 = vadd.f32 %v8955_v29, %v229_v33  ;;  %v9645_v36 = vpop.f32.mrb[7].mxu0 }
  0xeb   :  { %v11358_v38 = vpack.c.bf16 %v230_v35, %v227_v32 }
  0xec   :  { %597 = vrot.lane.b32.xlu1 %v233_v25, %s11216_s15  ;;  %599 = vrot.lane.b32.xlu0 %v234_v24, %s11216_s15 }
  0xed   :  { %9649 = vmatmul.mubr.msk.bf16.vlgmr.msra.gmra.mrb[4].mxu1 %vm236_vm2, %v233_v25  ;;  %9653 = vmatpush3.bf16.msra.mxu0 %v11358_v38 }
  0xee   :  { %9660 = vmatprep.mubr.msk.bf16.mxu1 %vm11213_vm0, %v11212_v0  ;;  %9664 = vmatprep.subr.bf16.mxu0 %v11212_v0 }
  0xf0   :  { %718 = vrot.lane.b32.xlu1 %v233_v25, %s11217_s16  ;;  %720 = vrot.lane.b32.xlu0 %v234_v24, %s11217_s16 }
  0xf4   :  { %839 = vrot.lane.b32.xlu1 %v233_v25, %s11218_s17  ;;  %841 = vrot.lane.b32.xlu0 %v234_v24, %s11218_s17 }
  0xf8   :  { %960 = vrot.lane.b32.xlu1 %v233_v25, %s11219_s18  ;;  %962 = vrot.lane.b32.xlu0 %v234_v24, %s11219_s18 }
  0xfc   :  { %1081 = vrot.lane.b32.xlu1 %v233_v25, %s11220_s19  ;;  %1083 = vrot.lane.b32.xlu0 %v234_v24, %s11220_s19 }
 0x156   :  { %v357_v27 = vpop.permute.xlu0 %356  ;;  %v479_v34 = vpop.permute.xlu1 %478 }
 0x157   :  { %v362_v28 = vsel %vm236_vm2, %v357_v27, 0  ;;  %v484_v39 = vsel %vm236_vm2, %v479_v34, 0 }
 0x158   :  { %9659 = vmatpush3.bf16.xpose.msra.mxu1 %v362_v28 }
 0x159   :  { %9670 = vmatprep.subr.bf16.mxu1 %v11212_v0 }
 0x15a   :  { %v354_v37 = vpop.permute.xlu0 %353  ;;  %v477_v41 = vpop.permute.xlu1 %476 }
 0x15e   :  { %v600_v40 = vpop.permute.xlu0 %599  ;;  %v598_v44 = vpop.permute.xlu1 %597 }
 0x15f   :  { %9661 = vmatmul.mubr.msk.bf16.vlgmr.msra.gmra.mrb[8].mxu1 %vm236_vm2, %v354_v37  ;;  %v605_v42 = vsel %vm236_vm2, %v600_v40, 0 }
 0x160   :  { %9671 = vmatpush3.bf16.xpose.msra.mxu1 %v484_v39  ;;  %9672 = vmatprep.mubr.msk.bf16.mxu1 %vm11213_vm0, %v11212_v0 }
 0x161   :  { %9682 = vmatprep.subr.bf16.mxu1 %v11212_v0 }
 0x162   :  { %v721_v43 = vpop.permute.xlu0 %720  ;;  %v719_v47 = vpop.permute.xlu1 %718 }
 0x163   :  { %v726_v45 = vsel %vm236_vm2, %v721_v43, 0 }
 0x166   :  { %v842_v46 = vpop.permute.xlu0 %841  ;;  %v840_v50 = vpop.permute.xlu1 %839 }
 0x167   :  { %9673 = vmatmul.mubr.msk.bf16.vlgmr.msra.gmra.mrb[12].mxu1 %vm236_vm2, %v477_v41  ;;  %v847_v48 = vsel %vm236_vm2, %v842_v46, 0 }
 0x168   :  { %9683 = vmatpush3.bf16.xpose.msra.mxu1 %v605_v42  ;;  %9684 = vmatprep.mubr.msk.bf16.mxu1 %vm11213_vm0, %v11212_v0 }
 0x169   :  { %9694 = vmatprep.subr.bf16.mxu1 %v11212_v0 }
 0x16a   :  { %v963_v49 = vpop.permute.xlu0 %962  ;;  %v961_v53 = vpop.permute.xlu1 %960 }
 0x16b   :  { %v968_v51 = vsel %vm236_vm2, %v963_v49, 0 }
 0x16e   :  { %v1084_v52 = vpop.permute.xlu0 %1083  ;;  %v1082_v55 = vpop.permute.xlu1 %1081 }
 0x16f   :  { %9685 = vmatmul.mubr.msk.bf16.vlgmr.msra.gmra.mrb[16].mxu1 %vm236_vm2, %v598_v44  ;;  %v1089_v54 = vsel %vm236_vm2, %v1084_v52, 0 }
 0x170   :  { %9695 = vmatpush3.bf16.xpose.msra.mxu1 %v726_v45  ;;  %9696 = vmatprep.mubr.msk.bf16.mxu1 %vm11213_vm0, %v11212_v0 }
 0x171   :  { %9706 = vmatprep.subr.bf16.mxu1 %v11212_v0 }
 0x177   :  { %9697 = vmatmul.mubr.msk.bf16.vlgmr.msra.gmra.mrb[20].mxu1 %vm236_vm2, %v719_v47 }
 0x178   :  { %9707 = vmatpush3.bf16.xpose.msra.mxu1 %v847_v48  ;;  %9708 = vmatprep.mubr.msk.bf16.mxu1 %vm11213_vm0, %v11212_v0 }
 0x179   :  { %9718 = vmatprep.subr.bf16.mxu1 %v11212_v0 }
 0x17f   :  { %9709 = vmatmul.mubr.msk.bf16.vlgmr.msra.gmra.mrb[24].mxu1 %vm236_vm2, %v840_v50 }
 0x180   :  { %9719 = vmatpush3.bf16.xpose.msra.mxu1 %v968_v51  ;;  %9720 = vmatprep.mubr.msk.bf16.mxu1 %vm11213_vm0, %v11212_v0 }
 0x181   :  { %9730 = vmatprep.subr.bf16.mxu1 %v11212_v0 }
 0x187   :  { %9721 = vmatmul.mubr.msk.bf16.vlgmr.msra.gmra.mrb[28].mxu1 %vm236_vm2, %v961_v53 }
 0x188   :  { %9731 = vmatpush3.bf16.xpose.msra.mxu1 %v1089_v54  ;;  %9732 = vmatprep.mubr.msk.bf16.mxu1 %vm11213_vm0, %v11212_v0 }
 0x189   :  { %9742 = vmatprep.subr.bf16.mxu1 %v11212_v0 }
 0x18f   :  { %9733 = vmatmul.mubr.msk.bf16.vlgmr.msra.gmra.mrb[32].mxu1 %vm236_vm2, %v1082_v55 }
 0x190   :  { %9746 = vmatprep.mubr.msk.bf16.mxu1 %vm11213_vm0, %v11212_v0 }
 0x1c0   :  { %v277_v57 = vpop.f32.mrb[4].mxu1 }
 0x1c1   :  { %v278_v59 = vadd.f32 %v277_v57, %v11398_v56  ;;  %v9650_v60 = vpop.f32.mrb[5].mxu1 }
 0x1c2   :  { %v280_v61 = vpop.f32.mrb[6].mxu1 }
 0x1c3   :  { %v281_v62 = vadd.f32 %v280_v61, %v11403_v58  ;;  %v9651_v63 = vpop.f32.mrb[7].mxu1  ;;  %v285_v1 = vsel %vm284_vm3, %v278_v59, -inf }
 0x1c4   :  { %286 = vmax.xlane.f32.xlu0 %v285_v1 }
 0x1c5   :  { %v288_v2 = vsel %vm284_vm3, %v281_v62, -inf }
 0x1c6   :  { %289 = vmax.xlane.f32.xlu1 %v288_v2 }
 0x1d7   :  { %429 = vrot.lane.b32.xlu1 %v11358_v38, %s11215_s14 }
 0x232   :  { %v398_v3 = vpop.f32.mrb[8].mxu1 }
 0x233   :  { %v11412_v4 = vadd.f32 %v398_v3, %v11398_v56  ;;  %v9662_v5 = vpop.f32.mrb[9].mxu1 }
 0x234   :  { %v401_v6 = vpop.f32.mrb[10].mxu1 }
 0x235   :  { %v11415_v7 = vadd.f32 %v401_v6, %v11403_v58  ;;  %v9663_v8 = vpop.f32.mrb[11].mxu1  ;;  %v405_v9 = vsel %vm284_vm3, %v11412_v4, -inf }
 0x236   :  { %406 = vmax.xlane.f32.xlu0 %v405_v9 }
 0x237   :  { %v408_v10 = vsel %vm284_vm3, %v11415_v7, -inf }
 0x23a   :  { %409 = vmax.xlane.f32.xlu0 %v408_v10  ;;  %v520_v11 = vpop.f32.mrb[12].mxu1 }
 0x23b   :  { %v11422_v12 = vadd.f32 %v520_v11, %v11398_v56  ;;  %v9674_v13 = vpop.f32.mrb[13].mxu1 }
 0x23c   :  { %v523_v14 = vpop.f32.mrb[14].mxu1 }
 0x23d   :  { %v11425_v15 = vadd.f32 %v523_v14, %v11403_v58  ;;  %v9675_v16 = vpop.f32.mrb[15].mxu1  ;;  %v527_v17 = vsel %vm284_vm3, %v11422_v12, -inf }
 0x23e   :  { %528 = vmax.xlane.f32.xlu1 %v527_v17 }
 0x23f   :  { %v530_v18 = vsel %vm284_vm3, %v11425_v15, -inf }
 0x240   :  { %531 = vmax.xlane.f32.xlu0 %v530_v18 }
 0x242   :  { %v641_v19 = vpop.f32.mrb[16].mxu1 }
 0x243   :  { %v11432_v20 = vadd.f32 %v641_v19, %v11398_v56  ;;  %v9686_v21 = vpop.f32.mrb[17].mxu1 }
 0x244   :  { %v644_v22 = vpop.f32.mrb[18].mxu1 }
 0x245   :  { %v11435_v23 = vadd.f32 %v644_v22, %v11403_v58  ;;  %v9687_v24 = vpop.f32.mrb[19].mxu1  ;;  %v648_v25 = vsel %vm284_vm3, %v11432_v20, -inf }
 0x246   :  { %649 = vmax.xlane.f32.xlu1 %v648_v25 }
 0x247   :  { %v651_v26 = vsel %vm284_vm3, %v11435_v23, -inf }
 0x248   :  { %652 = vmax.xlane.f32.xlu0 %v651_v26 }
 0x24a   :  { %v762_v27 = vpop.f32.mrb[20].mxu1 }
 0x24b   :  { %v11442_v28 = vadd.f32 %v762_v27, %v11398_v56  ;;  %v9698_v29 = vpop.f32.mrb[21].mxu1 }
 0x24c   :  { %v765_v30 = vpop.f32.mrb[22].mxu1 }
 0x24d   :  { %v11445_v31 = vadd.f32 %v765_v30, %v11403_v58  ;;  %v9699_v32 = vpop.f32.mrb[23].mxu1  ;;  %v769_v33 = vsel %vm284_vm3, %v11442_v28, -inf }
 0x24e   :  { %770 = vmax.xlane.f32.xlu1 %v769_v33 }
 0x24f   :  { %v772_v34 = vsel %vm284_vm3, %v11445_v31, -inf }
 0x250   :  { %773 = vmax.xlane.f32.xlu0 %v772_v34 }
 0x251   :  { %v287_v35 = vpop.xlane.xlu0 %286 }
 0x252   :  { %v291_v36 = vsub.f32 %v278_v59, %v287_v35  ;;  %v883_v37 = vpop.f32.mrb[24].mxu1 }
 0x253   :  { %v290_v39 = vpop.xlane.xlu1 %289  ;;  %v11452_v40 = vadd.f32 %v883_v37, %v11398_v56  ;;  %v9710_v41 = vpop.f32.mrb[25].mxu1 }
 0x254   :  { %v293_v42 = vmul.f32 1.442695, %v291_v36  ;;  %v292_v43 = vsub.f32 %v281_v62, %v290_v39  ;;  %v886_v44 = vpop.f32.mrb[26].mxu1 }
 0x255   :  { %v11455_v45 = vadd.f32 %v886_v44, %v11403_v58  ;;  %v9711_v46 = vpop.f32.mrb[27].mxu1  ;;  %v890_v47 = vsel %vm284_vm3, %v11452_v40, -inf }
 0x256   :  { %10778 = vpow2.f32 %v293_v42  ;;  %v295_v48 = vmul.f32 1.442695, %v292_v43  ;;  %891 = vmax.xlane.f32.xlu1 %v890_v47 }
 0x257   :  { %v893_v49 = vsel %vm284_vm3, %v11455_v45, -inf  ;;  %v11494_v13 = vpop.permute.xlu1 %429 }
 0x258   :  { %10780 = vpow2.f32 %v295_v48  ;;  %894 = vmax.xlane.f32.xlu0 %v893_v49 }
 0x25a   :  { %v1004_v50 = vpop.f32.mrb[28].mxu1 }
 0x25b   :  { %v11462_v51 = vadd.f32 %v1004_v50, %v11398_v56  ;;  %v9722_v52 = vpop.f32.mrb[29].mxu1 }
 0x25c   :  { %v1007_v53 = vpop.f32.mrb[30].mxu1 }
 0x25d   :  { %v11465_v54 = vadd.f32 %v1007_v53, %v11403_v58  ;;  %v9723_v55 = vpop.f32.mrb[31].mxu1  ;;  %v1011_v57 = vsel %vm284_vm3, %v11462_v51, -inf }
 0x25e   :  { %1012 = vmax.xlane.f32.xlu1 %v1011_v57 }
 0x25f   :  { %v1014_v59 = vsel %vm284_vm3, %v11465_v54, -inf }
 0x260   :  { %v11471_v60 = vpop.eup %10778  ;;  %1015 = vmax.xlane.f32.xlu0 %v1014_v59 }
 0x261   :  { %v297_v61 = vsel %vm284_vm3, %v11471_v60, 0.0 }
 0x262   :  { %v11475_v62 = vpop.eup %10780  ;;  %v1125_v63 = vpop.f32.mrb[32].mxu1  ;;  %298 = vadd.xlane.f32.xlu1 %v297_v61 }
 0x263   :  { %v11478_v1 = vadd.f32 %v1125_v63, %v11398_v56  ;;  %v9734_v2 = vpop.f32.mrb[33].mxu1  ;;  %v300_v3 = vsel %vm284_vm3, %v11475_v62, 0.0 }
 0x264   :  { %301 = vadd.xlane.f32.xlu0 %v300_v3  ;;  %v1128_v5 = vpop.f32.mrb[34].mxu1 }
 0x265   :  { %v11483_v6 = vadd.f32 %v1128_v5, %v11403_v58  ;;  %v9735_v8 = vpop.f32.mrb[35].mxu1  ;;  %v1132_v9 = vsel %vm284_vm3, %v11478_v1, -inf }
 0x266   :  { %1133 = vmax.xlane.f32.xlu1 %v1132_v9 }
 0x267   :  { %v1135_v10 = vsel %vm284_vm3, %v11483_v6, -inf }
 0x268   :  { %1136 = vmax.xlane.f32.xlu0 %v1135_v10 }
 0x277   :  { %671 = vrot.lane.b32.xlu1 %v11358_v38, %s11216_s15 }
 0x27e   :  { %550 = vrot.lane.b32.xlu0 %v11358_v38, %s11214_s13 }
 0x2c3   :  { %v407_v56 = vpop.xlane.xlu0 %406 }
 0x2c4   :  { %v411_v11 = vsub.f32 %v11412_v4, %v407_v56 }
 0x2c6   :  { %v413_v58 = vmul.f32 1.442695, %v411_v11 }
 0x2c7   :  { %v410_v14 = vpop.xlane.xlu0 %409 }
 0x2c8   :  { %10782 = vpow2.f32 %v413_v58  ;;  %v412_v16 = vsub.f32 %v11415_v7, %v410_v14 }
 0x2ca   :  { %v415_v17 = vmul.f32 1.442695, %v412_v16 }
 0x2cb   :  { %v529_v18 = vpop.xlane.xlu1 %528 }
 0x2cc   :  { %10784 = vpow2.f32 %v415_v17  ;;  %v533_v19 = vsub.f32 %v11422_v12, %v529_v18 }
 0x2cd   :  { %v532_v21 = vpop.xlane.xlu0 %531 }
 0x2ce   :  { %v535_v22 = vmul.f32 1.442695, %v533_v19  ;;  %v534_v24 = vsub.f32 %v11425_v15, %v532_v21 }
 0x2d0   :  { %10786 = vpow2.f32 %v535_v22  ;;  %v537_v25 = vmul.f32 1.442695, %v534_v24 }
 0x2d2   :  { %v11499_v26 = vpop.eup %10782  ;;  %10788 = vpow2.f32 %v537_v25 }
 0x2d3   :  { %v650_v4 = vpop.xlane.xlu1 %649  ;;  %v417_v27 = vsel %vm284_vm3, %v11499_v26, 0.0 }
 0x2d4   :  { %v654_v7 = vsub.f32 %v11432_v20, %v650_v4  ;;  %418 = vadd.xlane.f32.xlu1 %v417_v27 }
 0x2d5   :  { %v653_v29 = vpop.xlane.xlu0 %652 }
 0x2d6   :  { %v11504_v30 = vpop.eup %10784  ;;  %v656_v12 = vmul.f32 1.442695, %v654_v7  ;;  %v655_v32 = vsub.f32 %v11435_v23, %v653_v29 }
 0x2d7   :  { %v420_v15 = vsel %vm284_vm3, %v11504_v30, 0.0 }
 0x2d8   :  { %10790 = vpow2.f32 %v656_v12  ;;  %v658_v33 = vmul.f32 1.442695, %v655_v32  ;;  %421 = vadd.xlane.f32.xlu0 %v420_v15 }
 0x2da   :  { %v11509_v34 = vpop.eup %10786  ;;  %10792 = vpow2.f32 %v658_v33 }
 0x2db   :  { %v771_v35 = vpop.xlane.xlu1 %770  ;;  %v539_v20 = vsel %vm284_vm3, %v11509_v34, 0.0 }
 0x2dc   :  { %v11513_v36 = vpop.eup %10788  ;;  %v775_v37 = vsub.f32 %v11442_v28, %v771_v35  ;;  %540 = vadd.xlane.f32.xlu1 %v539_v20 }
 0x2dd   :  { %v774_v39 = vpop.xlane.xlu0 %773  ;;  %v542_v23 = vsel %vm284_vm3, %v11513_v36, 0.0 }
 0x2de   :  { %v777_v41 = vmul.f32 1.442695, %v775_v37  ;;  %v776_v42 = vsub.f32 %v11445_v31, %v774_v39  ;;  %543 = vadd.xlane.f32.xlu0 %v542_v23 }
 0x2e0   :  { %10794 = vpow2.f32 %v777_v41  ;;  %v779_v43 = vmul.f32 1.442695, %v776_v42 }
 0x2e2   :  { %v11519_v44 = vpop.eup %10790  ;;  %10796 = vpow2.f32 %v779_v43 }
 0x2e3   :  { %v892_v46 = vpop.xlane.xlu1 %891  ;;  %v660_v47 = vsel %vm284_vm3, %v11519_v44, 0.0 }
 0x2e4   :  { %v11523_v48 = vpop.eup %10792  ;;  %v896_v28 = vsub.f32 %v11452_v40, %v892_v46  ;;  %661 = vadd.xlane.f32.xlu1 %v660_v47 }
 0x2e5   :  { %v895_v49 = vpop.xlane.xlu0 %894  ;;  %v663_v50 = vsel %vm284_vm3, %v11523_v48, 0.0 }
 0x2e6   :  { %v898_v31 = vmul.f32 1.442695, %v896_v28  ;;  %v897_v52 = vsub.f32 %v11455_v45, %v895_v49  ;;  %664 = vadd.xlane.f32.xlu0 %v663_v50 }
 0x2e8   :  { %10798 = vpow2.f32 %v898_v31  ;;  %v900_v53 = vmul.f32 1.442695, %v897_v52 }
 0x2ea   :  { %v11529_v55 = vpop.eup %10794  ;;  %10800 = vpow2.f32 %v900_v53 }
 0x2eb   :  { %v1013_v57 = vpop.xlane.xlu1 %1012  ;;  %v781_v59 = vsel %vm284_vm3, %v11529_v55, 0.0 }
 0x2ec   :  { %v11533_v61 = vpop.eup %10796  ;;  %782 = vadd.xlane.f32.xlu1 %v781_v59 }
 0x2ed   :  { %v1016_v40 = vpop.xlane.xlu0 %1015  ;;  %v784_v63 = vsel %vm284_vm3, %v11533_v61, 0.0 }
 0x2ee   :  { %v1018_v2 = vsub.f32 %v11465_v54, %v1016_v40  ;;  %785 = vadd.xlane.f32.xlu0 %v784_v63 }
 0x2ef   :  { %v299_v45 = vpop.xlane.xlu1 %298 }
 0x2f0   :  { %v1021_v3 = vmul.f32 1.442695, %v1018_v2  ;;  %10802 = vrcp.f32 %v299_v45 }
 0x2f1   :  { %v302_v5 = vpop.xlane.xlu0 %301 }
 0x2f2   :  { %v11538_v8 = vpop.eup %10798  ;;  %10804 = vpow2.f32 %v1021_v3 }
 0x2f3   :  { %10806 = vrcp.f32 %v302_v5  ;;  %v1134_v9 = vpop.xlane.xlu1 %1133  ;;  %v902_v10 = vsel %vm284_vm3, %v11538_v8, 0.0 }
 0x2f4   :  { %v11542_v56 = vpop.eup %10800  ;;  %v1138_v11 = vsub.f32 %v11478_v1, %v1134_v9  ;;  %903 = vadd.xlane.f32.xlu0 %v902_v10 }
 0x2f5   :  { %v1137_v58 = vpop.xlane.xlu0 %1136  ;;  %v905_v16 = vsel %vm284_vm3, %v11542_v56, 0.0 }
 0x2f6   :  { %v1140_v54 = vmul.f32 1.442695, %v1138_v11  ;;  %v1139_v14 = vsub.f32 %v11483_v6, %v1137_v58 }
 0x2f7   :  { %v672_v12 = vpop.permute.xlu1 %671 }
 0x2f8   :  { %10808 = vpow2.f32 %v1140_v54  ;;  %v1142_v17 = vmul.f32 1.442695, %v1139_v14  ;;  %906 = vadd.xlane.f32.xlu0 %v905_v16 }
 0x2f9   :  { %v551_v32 = vpop.permute.xlu0 %550 }
 0x2fa   :  { %10810 = vpow2.f32 %v1142_v17  ;;  %v10803_v18 = vpop.eup %10802 }
 0x2fb   :  { %v305_v22 = vmul.f32 %v10803_v18, %v11471_v60 }
 0x2fc   :  { %v11548_v19 = vpop.eup %10804 }
 0x2fd   :  { %v10807_v21 = vpop.eup %10806  ;;  %792 = vrot.lane.b32.xlu1 %v11358_v38, %s11217_s16  ;;  %v1026_v1 = vsel %vm284_vm3, %v11548_v19, 0.0 }
 0x2fe   :  { %v306_v6 = vmul.f32 %v10807_v21, %v11475_v62  ;;  %1027 = vadd.xlane.f32.xlu0 %v1026_v1  ;;  %v1017_v62 = vsub.f32 %v11462_v51, %v1013_v57 }
 0x300   :  { %v307_v24 = vpack.c.bf16 %v306_v6, %v305_v22  ;;  %v1019_v7 = vmul.f32 1.442695, %v1017_v62 }
 0x302   :  { %v11556_v25 = vpop.eup %10808  ;;  %9655 = vmatmul.mubr.msk.bf16.vlgmr.msra.gmra.mrb[8].mxu0 %vm284_vm3, %v307_v24  ;;  %10812 = vpow2.f32 %v1019_v7 }
 0x303   :  { %9665 = vmatpush3.bf16.msra.mxu0 %v11494_v13  ;;  %v1144_v4 = vsel %vm284_vm3, %v11556_v25, 0.0  ;;  %9666 = vmatprep.mubr.msk.bf16.mxu0 %vm11213_vm0, %v11212_v0 }
 0x304   :  { %v11564_v27 = vpop.eup %10810  ;;  %1145 = vadd.xlane.f32.xlu0 %v1144_v4  ;;  %9676 = vmatprep.subr.bf16.mxu0 %v11212_v0 }
 0x305   :  { %v1147_v60 = vsel %vm284_vm3, %v11564_v27, 0.0 }
 0x308   :  { %1148 = vadd.xlane.f32.xlu0 %v1147_v60 }
 0x30c   :  { %v11570_v13 = vpop.eup %10812 }
 0x30d   :  { %v1023_v29 = vsel %vm284_vm3, %v11570_v13, 0.0 }
 0x31e   :  { %913 = vrot.lane.b32.xlu0 %v11358_v38, %s11218_s17 }
 0x321   :  { %1024 = vadd.xlane.f32.xlu1 %v1023_v29 }
 0x332   :  { %1034 = vrot.lane.b32.xlu1 %v11358_v38, %s11219_s18 }
 0x336   :  { %1155 = vrot.lane.b32.xlu1 %v11358_v38, %s11220_s19 }
 0x361   :  { %v419_v51 = vpop.xlane.xlu1 %418 }
 0x362   :  { %10814 = vrcp.f32 %v419_v51 }
 0x365   :  { %v422_v15 = vpop.xlane.xlu0 %421 }
 0x366   :  { %10816 = vrcp.f32 %v422_v15 }
 0x369   :  { %v541_v33 = vpop.xlane.xlu1 %540 }
 0x36a   :  { %10818 = vrcp.f32 %v541_v33 }
 0x36b   :  { %v544_v35 = vpop.xlane.xlu0 %543 }
 0x36c   :  { %10820 = vrcp.f32 %v544_v35  ;;  %v10815_v20 = vpop.eup %10814 }
 0x36d   :  { %v425_v39 = vmul.f32 %v10815_v20, %v11499_v26 }
 0x370   :  { %v10817_v37 = vpop.eup %10816 }
 0x371   :  { %v426_v23 = vmul.f32 %v10817_v37, %v11504_v30  ;;  %v662_v41 = vpop.xlane.xlu1 %661 }
 0x372   :  { %10822 = vrcp.f32 %v662_v41 }
 0x373   :  { %v665_v42 = vpop.xlane.xlu0 %664  ;;  %v427_v38 = vpack.c.bf16 %v426_v23, %v425_v39 }
 0x374   :  { %10824 = vrcp.f32 %v665_v42  ;;  %v10819_v43 = vpop.eup %10818 }
 0x375   :  { %9667 = vmatmul.mubr.msk.bf16.vlgmr.msra.gmra.mrb[12].mxu0 %vm284_vm3, %v427_v38  ;;  %v547_v26 = vmul.f32 %v10819_v43, %v11509_v34 }
 0x376   :  { %v10821_v46 = vpop.eup %10820  ;;  %9677 = vmatpush3.bf16.msra.mxu0 %v551_v32  ;;  %9678 = vmatprep.mubr.msk.bf16.mxu0 %vm11213_vm0, %v11212_v0 }
 0x377   :  { %v548_v47 = vmul.f32 %v10821_v46, %v11513_v36  ;;  %9688 = vmatprep.subr.bf16.mxu0 %v11212_v0 }
 0x379   :  { %v783_v30 = vpop.xlane.xlu1 %782  ;;  %v549_v49 = vpack.c.bf16 %v548_v47, %v547_v26 }
 0x37a   :  { %10826 = vrcp.f32 %v783_v30 }
 0x37b   :  { %v786_v28 = vpop.xlane.xlu0 %785 }
 0x37c   :  { %10828 = vrcp.f32 %v786_v28  ;;  %v10823_v50 = vpop.eup %10822 }
 0x37d   :  { %9679 = vmatmul.mubr.msk.bf16.vlgmr.msra.gmra.mrb[16].mxu0 %vm284_vm3, %v549_v49  ;;  %v668_v36 = vmul.f32 %v10823_v50, %v11519_v44  ;;  %v793_v59 = vpop.permute.xlu1 %792 }
 0x37e   :  { %v10825_v31 = vpop.eup %10824  ;;  %9689 = vmatpush3.bf16.msra.mxu0 %v672_v12  ;;  %9690 = vmatprep.mubr.msk.bf16.mxu0 %vm11213_vm0, %v11212_v0 }
 0x37f   :  { %v669_v52 = vmul.f32 %v10825_v31, %v11523_v48  ;;  %9700 = vmatprep.subr.bf16.mxu0 %v11212_v0  ;;  %v10710_v31 = vld [vmem:[%s13835_s5 + $0x30] sm:$0xff]  }
 0x380   :  { %9743 = vmatpush3.bf16.msra.mxu1 %v10710_v31 }
 0x381   :  { %v904_v34 = vpop.xlane.xlu0 %903  ;;  %v670_v53 = vpack.c.bf16 %v669_v52, %v668_v36  ;;  %9744 = vmatprep.subr.bf16.mxu1 %v11212_v0 }
 0x384   :  { %v10827_v57 = vpop.eup %10826 }
 0x385   :  { %9691 = vmatmul.mubr.msk.bf16.vlgmr.msra.gmra.mrb[20].mxu0 %vm284_vm3, %v670_v53  ;;  %v907_v2 = vpop.xlane.xlu0 %906  ;;  %v789_v48 = vmul.f32 %v10827_v57, %v11529_v55  ;;  %v10711_v53 = vld [vmem:[%s13835_s5 + $0x38] sm:$0xff]  }
 0x386   :  { %v10829_v40 = vpop.eup %10828  ;;  %9701 = vmatpush3.bf16.msra.mxu0 %v793_v59  ;;  %9702 = vmatprep.mubr.msk.bf16.mxu0 %vm11213_vm0, %v11212_v0  ;;  %10830 = vrcp.f32 %v907_v2 }
 0x387   :  { %v790_v63 = vmul.f32 %v10829_v40, %v11533_v61  ;;  %9712 = vmatprep.subr.bf16.mxu0 %v11212_v0  ;;  %10832 = vrcp.f32 %v904_v34  ;;  %9745 = vmatpush3.bf16.msra.mxu1 %v10711_v53 }
 0x388   :  { %9758 = vmatprep.subr.bf16.mxu1 %v11212_v0 }
 0x389   :  { %v791_v44 = vpack.c.bf16 %v790_v63, %v789_v48 }
 0x38b   :  { %v1028_v45 = vpop.xlane.xlu0 %1027 }
 0x38c   :  { %10834 = vrcp.f32 %v1028_v45 }
 0x38d   :  { %9703 = vmatmul.mubr.msk.bf16.vlgmr.msra.gmra.mrb[24].mxu0 %vm284_vm3, %v791_v44 }
 0x38e   :  { %9714 = vmatprep.mubr.msk.bf16.mxu0 %vm11213_vm0, %v11212_v0 }
 0x390   :  { %v10831_v5 = vpop.eup %10830 }
 0x391   :  { %v1146_v3 = vpop.xlane.xlu0 %1145  ;;  %v10833_v10 = vpop.eup %10832  ;;  %v911_v61 = vmul.f32 %v10831_v5, %v11542_v56 }
 0x392   :  { %v910_v11 = vmul.f32 %v10833_v10, %v11538_v8 }
 0x394   :  { %v912_v55 = vpack.c.bf16 %v911_v61, %v910_v11 }
 0x395   :  { %v1149_v9 = vpop.xlane.xlu0 %1148 }
 0x396   :  { %v10835_v8 = vpop.eup %10834 }
 0x397   :  { %v1032_v16 = vmul.f32 %v10835_v8, %v11548_v19 }
 0x399   :  { %v914_v58 = vpop.permute.xlu0 %913 }
 0x39a   :  { %9713 = vmatpush3.bf16.msra.mxu0 %v914_v58 }
 0x39b   :  { %9724 = vmatprep.subr.bf16.mxu0 %v11212_v0 }
 0x39d   :  { %9715 = vmatmul.mubr.msk.bf16.vlgmr.msra.gmra.mrb[28].mxu0 %vm284_vm3, %v912_v55 }
 0x39e   :  { %9726 = vmatprep.mubr.msk.bf16.mxu0 %vm11213_vm0, %v11212_v0 }
 0x3ae   :  { %v1025_v54 = vpop.xlane.xlu1 %1024 }
 0x3af   :  { %10836 = vrcp.f32 %v1025_v54 }
 0x3b0   :  { %10838 = vrcp.f32 %v1149_v9 }
 0x3b1   :  { %10840 = vrcp.f32 %v1146_v3 }
 0x3b2   :  { %v1035_v14 = vpop.permute.xlu1 %1034 }
 0x3b3   :  { %9725 = vmatpush3.bf16.msra.mxu0 %v1035_v14 }
 0x3b4   :  { %9736 = vmatprep.subr.bf16.mxu0 %v11212_v0 }
 0x3b6   :  { %v1156_v1 = vpop.permute.xlu1 %1155 }
 0x3b9   :  { %v10837_v56 = vpop.eup %10836 }
 0x3ba   :  { %v1031_v17 = vmul.f32 %v10837_v56, %v11570_v13  ;;  %v10839_v21 = vpop.eup %10838 }
 0x3bb   :  { %v10841_v22 = vpop.eup %10840  ;;  %v1153_v6 = vmul.f32 %v10839_v21, %v11564_v27 }
 0x3bc   :  { %v1033_v18 = vpack.c.bf16 %v1032_v16, %v1031_v17  ;;  %v1152_v24 = vmul.f32 %v10841_v22, %v11556_v25 }
 0x3be   :  { %9727 = vmatmul.mubr.msk.bf16.vlgmr.msra.gmra.mrb[32].mxu0 %vm284_vm3, %v1033_v18  ;;  %v1154_v4 = vpack.c.bf16 %v1153_v6, %v1152_v24 }
 0x3bf   :  { %9737 = vmatpush3.bf16.msra.mxu0 %v1156_v1  ;;  %9738 = vmatprep.mubr.msk.bf16.mxu0 %vm11213_vm0, %v11212_v0 }
 0x3c0   :  { %9750 = vmatprep.subr.bf16.mxu0 %v11212_v0 }
 0x3c6   :  { %9739 = vmatmul.mubr.msk.bf16.vlgmr.msra.gmra.mrb[36].mxu0 %vm284_vm3, %v1154_v4 }
 0x3c7   :  { %9754 = vmatprep.mubr.msk.bf16.mxu0 %vm11213_vm0, %v11212_v0 }
 0x3d5   :  { %v11621_v19 = vpop.f32.mrb[8].mxu0 }
 0x3d6   :  { %v9656_v60 = vpop.f32.mrb[9].mxu0 }
 0x3d7   :  { %v11623_v62 = vpop.f32.mrb[10].mxu0 }
 0x3d8   :  { %v9657_v7 = vpop.f32.mrb[11].mxu0 }
 0x448   :  { %v469_v13 = vpop.f32.mrb[12].mxu0 }
 0x449   :  { %v9668_v29 = vpop.f32.mrb[13].mxu0 }
 0x44a   :  { %v472_v12 = vpop.f32.mrb[14].mxu0 }
 0x44b   :  { %v10494_v27 = vpack.i.bf16 %v472_v12, %v469_v13  ;;  %v9669_v32 = vpop.f32.mrb[15].mxu0 }
 0x44d   :  { %10495 = vrot.lane.b32.xlu1 %v10494_v27, %s11221_s26 }
 0x450   :  { %v590_v25 = vpop.f32.mrb[16].mxu0 }
 0x451   :  { %v9680_v51 = vpop.f32.mrb[17].mxu0 }
 0x452   :  { %v593_v15 = vpop.f32.mrb[18].mxu0 }
 0x453   :  { %v10499_v33 = vpack.i.bf16 %v593_v15, %v590_v25  ;;  %v9681_v35 = vpop.f32.mrb[19].mxu0 }
 0x455   :  { %10500 = vrot.lane.b32.xlu1 %v10499_v33, %s11222_s27 }
 0x458   :  { %v711_v20 = vpop.f32.mrb[20].mxu0 }
 0x459   :  { %v9692_v37 = vpop.f32.mrb[21].mxu0 }
 0x45a   :  { %v714_v39 = vpop.f32.mrb[22].mxu0 }
 0x45b   :  { %v10504_v23 = vpack.i.bf16 %v714_v39, %v711_v20  ;;  %v9693_v41 = vpop.f32.mrb[23].mxu0  ;;  %v8979_v20 = vld [vmem:[%s13837_s9 + $0x3] ss:$0 sm:$0xff] }
 0x45d   :  { %10505 = vrot.lane.b32.xlu1 %v10504_v23, %s11223_s28 }
 0x460   :  { %v832_v42 = vpop.f32.mrb[24].mxu0 }
 0x461   :  { %v9704_v38 = vpop.f32.mrb[25].mxu0 }
 0x462   :  { %v835_v43 = vpop.f32.mrb[26].mxu0 }
 0x463   :  { %v10509_v46 = vpack.i.bf16 %v835_v43, %v832_v42  ;;  %v9705_v47 = vpop.f32.mrb[27].mxu0  ;;  %v11202_v43 = vld [vmem:[%s13836_s0] sm:$0xff] }
 0x465   :  { %10510 = vrot.lane.b32.xlu0 %v10509_v46, %s11224_s29 }
 0x470   :  { %v953_v26 = vpop.f32.mrb[28].mxu0 }
 0x471   :  { %v9716_v30 = vpop.f32.mrb[29].mxu0 }
 0x472   :  { %v956_v28 = vpop.f32.mrb[30].mxu0 }
 0x473   :  { %v10514_v49 = vpack.i.bf16 %v956_v28, %v953_v26  ;;  %v9717_v50 = vpop.f32.mrb[31].mxu0  ;;  %v11203_v26 = vld [vmem:[%s13836_s0 + $0x8] sm:$0xff] }
 0x475   :  { %10515 = vrot.lane.b32.xlu1 %v10514_v49, %s11225_s30 }
 0x491   :  { %v1074_v52 = vpop.f32.mrb[32].mxu0 }
 0x492   :  { %v9728_v36 = vpop.f32.mrb[33].mxu0 }
 0x493   :  { %v1077_v34 = vpop.f32.mrb[34].mxu0 }
 0x494   :  { %v10519_v57 = vpack.i.bf16 %v1077_v34, %v1074_v52  ;;  %v9729_v59 = vpop.f32.mrb[35].mxu0 }
 0x496   :  { %10520 = vrot.lane.b32.xlu0 %v10519_v57, %s11226_s22 }
 0x499   :  { %v1195_v40 = vpop.f32.mrb[36].mxu0 }
 0x49a   :  { %v9740_v63 = vpop.f32.mrb[37].mxu0 }
 0x49b   :  { %v1198_v2 = vpop.f32.mrb[38].mxu0  ;;  %v10712_v63 = vld [vmem:[%s13839_s6] sm:$0xff]  }
 0x49c   :  { %v10524_v48 = vpack.i.bf16 %v1198_v2, %v1195_v40  ;;  %v9741_v44 = vpop.f32.mrb[39].mxu0  ;;  %9751 = vmatpush3.bf16.msra.mxu0 %v10712_v63  ;;  %v10713_v2 = vld [vmem:[%s13839_s6 + $0x8] sm:$0xff]  }
 0x49d   :  { %9752 = vmatprep.subr.bf16.mxu0 %v11212_v0  ;;  %v10715_v44 = vld [vmem:[%s13840_s7 + $0x8] sm:$0xff]  }
 0x49e   :  { %10525 = vrot.lane.b32.xlu1 %v10524_v48, %s13846_s23  ;;  %v10714_v48 = vld [vmem:[%s13840_s7] sm:$0xff]  }
 0x4a0   :  { %9753 = vmatpush3.bf16.msra.mxu0 %v10713_v2 }
 0x4a1   :  { %9770 = vmatprep.subr.bf16.mxu0 %v11212_v0 }
 0x4bf   :  { %v10496_v45 = vpop.permute.xlu1 %10495 }
 0x4c0   :  { %v10498_v10 = vunpack.i.h.bf16 %v10496_v45  ;;  %v10497_v61 = vunpack.i.l.bf16 %v10496_v45 }
 0x4c2   :  { %v1259_v17 = vsel %vm236_vm2, %v11623_v62, %v10498_v10  ;;  %v1258_v18 = vsel %vm236_vm2, %v11621_v19, %v10497_v61 }
 0x4c7   :  { %v10501_v3 = vpop.permute.xlu1 %10500 }
 0x4c8   :  { %v10503_v11 = vunpack.i.h.bf16 %v10501_v3  ;;  %v10502_v58 = vunpack.i.l.bf16 %v10501_v3 }
 0x4ca   :  { %v1262_v22 = vsel %vm1260_vm4, %v1259_v17, %v10503_v11  ;;  %v1261_v6 = vsel %vm1260_vm4, %v1258_v18, %v10502_v58 }
 0x4cf   :  { %v10506_v5 = vpop.permute.xlu1 %10505 }
 0x4d0   :  { %v10508_v54 = vunpack.i.h.bf16 %v10506_v5  ;;  %v10507_v14 = vunpack.i.l.bf16 %v10506_v5 }
 0x4d2   :  { %v1265_v60 = vsel %vm1263_vm5, %v1262_v22, %v10508_v54  ;;  %v1264_v7 = vsel %vm1263_vm5, %v1261_v6, %v10507_v14  ;;  %v10717_v22 = vld [vmem:[%s13840_s7 + $0x18] sm:$0xff]   ;;  %v8985_v6 = vld [vmem:[%s13837_s9 + $0x2c] ss:$0 sm:$0xff] }
 0x4d7   :  { %v10511_v9 = vpop.permute.xlu0 %10510 }
 0x4d8   :  { %v10513_v56 = vunpack.i.h.bf16 %v10511_v9  ;;  %v10512_v16 = vunpack.i.l.bf16 %v10511_v9 }
 0x4da   :  { %v1267_v13 = vsel %vm284_vm3, %v1265_v60, %v10513_v56  ;;  %v1266_v62 = vsel %vm284_vm3, %v1264_v7, %v10512_v16  ;;  %v8984_v56 = vld [vmem:[%s13837_s9 + $0x22] ss:$0 sm:$0xff] }
 0x4e7   :  { %v10516_v55 = vpop.permute.xlu1 %10515 }
 0x4e8   :  { %v10518_v21 = vunpack.i.h.bf16 %v10516_v55  ;;  %v10517_v1 = vunpack.i.l.bf16 %v10516_v55  ;;  %v8983_v55 = vld [vmem:[%s13837_s9 + $0x18] ss:$0 sm:$0xff] }
 0x4ea   :  { %v1270_v19 = vsel %vm1268_vm6, %v1267_v13, %v10518_v21  ;;  %v1269_v12 = vsel %vm1268_vm6, %v1266_v62, %v10517_v1  ;;  %v10716_v1 = vld [vmem:[%s13840_s7 + $0x10] sm:$0xff]  }
 0x508   :  { %v10521_v8 = vpop.permute.xlu0 %10520 }
 0x509   :  { %v10523_v24 = vunpack.i.h.bf16 %v10521_v8  ;;  %v10522_v4 = vunpack.i.l.bf16 %v10521_v8 }
 0x50b   :  { %v1273_v25 = vsel %vm1271_vm7, %v1270_v19, %v10523_v24  ;;  %v1272_v51 = vsel %vm1271_vm7, %v1269_v12, %v10522_v4 }
 0x510   :  { %v10526_v29 = vpop.permute.xlu1 %10525 }
 0x511   :  { %v10528_v27 = vunpack.i.h.bf16 %v10526_v29  ;;  %v10527_v32 = vunpack.i.l.bf16 %v10526_v29 }
 0x513   :  { %v1276_v15 = vsel %vm1274_vm8, %v1273_v25, %v10528_v27  ;;  %v1275_v33 = vsel %vm1274_vm8, %v1272_v51, %v10527_v32  ;;  %v8989_v27 = vld [vmem:[%s13837_s9 + $0x30] ss:$0 sm:$0xff] }
 0x514   :  { %v1283_v35 = vpack.c.bf16 %v1276_v15, %v1275_v33 }
 0x516   :  { %9747 = vmatmul.mubr.msk.bf16.vlgmr.msra.gmra.mrb[36].mxu1 %vm62_vm1, %v1283_v35 }
 0x517   :  { %9766 = vmatprep.mubr.msk.bf16.mxu1 %vm11213_vm0, %v11212_v0  ;;  %9759 = vmatpush3.bf16.msra.mxu1 %v10714_v48  ;;  %v8995_v48 = vld [vmem:[%s13837_s9 + $0x19] ss:$0 sm:$0xff] }
 0x518   :  { %9760 = vmatprep.subr.bf16.mxu1 %v11212_v0 }
 0x51b   :  { %9761 = vmatpush3.bf16.msra.mxu1 %v10715_v44 }
 0x51c   :  { %9762 = vmatprep.subr.bf16.mxu1 %v11212_v0 }
 0x51f   :  { %9763 = vmatpush3.bf16.msra.mxu1 %v10716_v1 }
 0x520   :  { %9764 = vmatprep.subr.bf16.mxu1 %v11212_v0 }
 0x523   :  { %9765 = vmatpush3.bf16.msra.mxu1 %v10717_v22 }
 0x524   :  { %9786 = vmatprep.subr.bf16.mxu1 %v11212_v0 }
 0x5e9   :  { %v1337_v37 = vpop.f32.mrb[36].mxu1 }
 0x5ea   :  { %v1338_v39 = vadd.f32 %v8979_v20, %v1337_v37  ;;  %v9748_v23 = vpop.f32.mrb[37].mxu1 }
 0x5eb   :  { %v1340_v41 = vpop.f32.mrb[38].mxu1 }
 0x5ec   :  { %v1341_v42 = vadd.f32 %v8979_v20, %v1340_v41  ;;  %v9749_v38 = vpop.f32.mrb[39].mxu1  ;;  %v1344_v46 = vadd.f32 %v11202_v43, %v1338_v39 }
 0x5ee   :  { %v1348_v47 = vsel %vm62_vm1, %v1344_v46, 0.0  ;;  %v1345_v30 = vadd.f32 %v11203_v26, %v1341_v42 }
 0x5ef   :  { %1349 = vadd.xlane.f32.xlu0 %v1348_v47 }
 0x5f0   :  { %v1351_v28 = vsel %vm62_vm1, %v1345_v30, 0.0 }
 0x5f1   :  { %1352 = vadd.xlane.f32.xlu1 %v1351_v28 }
 0x67c   :  { %v1350_v49 = vpop.xlane.xlu0 %1349 }
 0x67d   :  { %v1355_v50 = vmul.f32 0.03125, %v1350_v49 }
 0x67e   :  { %v1353_v31 = vpop.xlane.xlu1 %1352 }
 0x67f   :  { %v1357_v52 = vsub.f32 %v1344_v46, %v1355_v50  ;;  %v1356_v36 = vmul.f32 0.03125, %v1353_v31  ;;  %v10718_v50 = vld [vmem:[%s13835_s5 + $0x40] sm:$0xff]  }
 0x680   :  { %v10719_v31 = vld [vmem:[%s13835_s5 + $0x60] sm:$0xff]  }
 0x681   :  { %v1358_v34 = vsub.f32 %v1345_v30, %v1356_v36  ;;  %v1359_v53 = vmul.f32 %v1357_v52, %v1357_v52  ;;  %v10721_v36 = vld [vmem:[%s13835_s5 + $0x68] sm:$0xff]  }
 0x683   :  { %v1361_v57 = vsel %vm62_vm1, %v1359_v53, 0.0  ;;  %v1360_v59 = vmul.f32 %v1358_v34, %v1358_v34 }
 0x684   :  { %1362 = vadd.xlane.f32.xlu0 %v1361_v57 }
 0x685   :  { %v1364_v40 = vsel %vm62_vm1, %v1360_v59, 0.0 }
 0x688   :  { %1365 = vadd.xlane.f32.xlu0 %v1364_v40 }
 0x711   :  { %v1363_v45 = vpop.xlane.xlu0 %1362 }
 0x712   :  { %v1367_v3 = vmul.f32 0.03125, %v1363_v45 }
 0x714   :  { %v1369_v5 = vadd.f32 1e-05, %v1367_v3 }
 0x715   :  { %v1366_v9 = vpop.xlane.xlu0 %1365 }
 0x716   :  { %10842 = vrsqrt.f32 %v1369_v5  ;;  %v1368_v10 = vmul.f32 0.03125, %v1366_v9  ;;  %v8996_v9 = vld [vmem:[%s13837_s9 + $0x23] ss:$0 sm:$0xff] }
 0x718   :  { %v1370_v61 = vadd.f32 1e-05, %v1368_v10 }
 0x71a   :  { %10844 = vrsqrt.f32 %v1370_v61 }
 0x720   :  { %v10843_v11 = vpop.eup %10842 }
 0x721   :  { %v1373_v58 = vmul.f32 %v10843_v11, %v1357_v52  ;;  %v10720_v52 = vld [vmem:[%s13835_s5 + $0x48] sm:$0xff]  }
 0x723   :  { %v1379_v14 = vmul.f32 %v8983_v55, %v1373_v58  ;;  %v10722_v58 = vld [vmem:[%s13835_s5 + $0x50] sm:$0xff]  }
 0x724   :  { %v10845_v54 = vpop.eup %10844 }
 0x725   :  { %v1374_v8 = vmul.f32 %v10845_v54, %v1358_v34  ;;  %v1385_v17 = vadd.f32 %v8984_v56, %v1379_v14  ;;  %v10723_v54 = vld [vmem:[%s13835_s5 + $0x58] sm:$0xff]   ;;  %v9001_v14 = vld [vmem:[%s13837_s9 + $0x4] ss:$0 sm:$0xff] }
 0x727   :  { %v1380_v16 = vmul.f32 %v8983_v55, %v1374_v8 }
 0x729   :  { %v1386_v18 = vadd.f32 %v8984_v56, %v1380_v16  ;;  %v9017_v56 = vld [vmem:[%s13837_s9 + $0x6] ss:$0 sm:$0xff] }
 0x72b   :  { %v1392_v21 = vpack.c.bf16 %v1386_v18, %v1385_v17 }
 0x72d   :  { %9755 = vmatmul.mubr.msk.bf16.vlgmr.msra.gmra.mrb[40].mxu0 %vm62_vm1, %v1392_v21 }
 0x72e   :  { %9774 = vmatprep.mubr.msk.bf16.mxu0 %vm11213_vm0, %v11212_v0  ;;  %9771 = vmatpush3.bf16.msra.mxu0 %v10718_v50 }
 0x72f   :  { %9772 = vmatprep.subr.bf16.mxu0 %v11212_v0 }
 0x732   :  { %9773 = vmatpush3.bf16.msra.mxu0 %v10720_v52 }
 0x733   :  { %9778 = vmatprep.subr.bf16.mxu0 %v11212_v0 }
 0x800   :  { %v1446_v24 = vpop.f32.mrb[40].mxu0 }
 0x801   :  { %v1447_v4 = vadd.f32 %v8985_v6, %v1446_v24  ;;  %v9756_v60 = vpop.f32.mrb[41].mxu0 }
 0x802   :  { %v1449_v7 = vpop.f32.mrb[42].mxu0 }
 0x803   :  { %v1450_v13 = vadd.f32 %v8985_v6, %v1449_v7  ;;  %v9757_v62 = vpop.f32.mrb[43].mxu0  ;;  %v1453_v29 = vmax.f32 %v1447_v4, 0.0 }
 0x805   :  { %v1454_v19 = vmax.f32 %v1450_v13, 0.0 }
 0x807   :  { %v1464_v12 = vpack.c.bf16 %v1454_v19, %v1453_v29  ;;  %v9009_v29 = vld [vmem:[%s13837_s9 + $0x5] ss:$0 sm:$0xff] }
 0x809   :  { %9767 = vmatmul.mubr.msk.bf16.vlgmr.msra.gmra.mrb[40].mxu1 %vm1493_vm9, %v1464_v12 }
 0x80a   :  { %9790 = vmatprep.mubr.msk.bf16.mxu1 %vm11213_vm0, %v11212_v0  ;;  %9787 = vmatpush3.bf16.msra.mxu1 %v10719_v31 }
 0x80b   :  { %9788 = vmatprep.subr.bf16.mxu1 %v11212_v0 }
 0x80e   :  { %9789 = vmatpush3.bf16.msra.mxu1 %v10721_v36 }
 0x80f   :  { %9800 = vmatprep.subr.bf16.mxu1 %v11212_v0 }
 0x8dc   :  { %v1531_v32 = vpop.f32.mrb[40].mxu1 }
 0x8dd   :  { %v1532_v25 = vadd.f32 %v8989_v27, %v1531_v32  ;;  %v9768_v51 = vpop.f32.mrb[41].mxu1 }
 0x8de   :  { %v1534_v15 = vpop.f32.mrb[42].mxu1 }
 0x8df   :  { %v1535_v33 = vadd.f32 %v8989_v27, %v1534_v15  ;;  %v9769_v35 = vpop.f32.mrb[43].mxu1  ;;  %v1538_v20 = vadd.f32 %v1532_v25, %v1385_v17 }
 0x8e1   :  { %v1542_v37 = vsel %vm62_vm1, %v1538_v20, 0.0  ;;  %v1539_v39 = vadd.f32 %v1535_v33, %v1386_v18 }
 0x8e2   :  { %1543 = vadd.xlane.f32.xlu1 %v1542_v37 }
 0x8e3   :  { %v1545_v23 = vsel %vm62_vm1, %v1539_v39, 0.0 }
 0x8e4   :  { %1546 = vadd.xlane.f32.xlu0 %v1545_v23 }
 0x96f   :  { %v1544_v41 = vpop.xlane.xlu1 %1543 }
 0x970   :  { %v1548_v42 = vmul.f32 0.03125, %v1544_v41 }
 0x971   :  { %v1547_v38 = vpop.xlane.xlu0 %1546 }
 0x972   :  { %v1550_v43 = vsub.f32 %v1538_v20, %v1548_v42  ;;  %v1549_v46 = vmul.f32 0.03125, %v1547_v38 }
 0x974   :  { %v1551_v47 = vsub.f32 %v1539_v39, %v1549_v46  ;;  %v1552_v26 = vmul.f32 %v1550_v43, %v1550_v43 }
 0x976   :  { %v1554_v30 = vsel %vm62_vm1, %v1552_v26, 0.0  ;;  %v1553_v28 = vmul.f32 %v1551_v47, %v1551_v47 }
 0x977   :  { %1555 = vadd.xlane.f32.xlu1 %v1554_v30 }
 0x978   :  { %v1557_v49 = vsel %vm62_vm1, %v1553_v28, 0.0 }
 0x979   :  { %1558 = vadd.xlane.f32.xlu0 %v1557_v49 }
 0xa04   :  { %v1556_v34 = vpop.xlane.xlu1 %1555 }
 0xa05   :  { %v1560_v53 = vmul.f32 0.03125, %v1556_v34 }
 0xa06   :  { %v1559_v57 = vpop.xlane.xlu0 %1558 }
 0xa07   :  { %v1562_v59 = vadd.f32 1e-05, %v1560_v53  ;;  %v1561_v40 = vmul.f32 0.03125, %v1559_v57 }
 0xa09   :  { %10846 = vrsqrt.f32 %v1562_v59  ;;  %v1563_v63 = vadd.f32 1e-05, %v1561_v40  ;;  %v11833_v59 = vld [vmem:[%s13838_s2] sm:$0xff] }
 0xa0b   :  { %10848 = vrsqrt.f32 %v1563_v63 }
 0xa13   :  { %v10847_v2 = vpop.eup %10846 }
 0xa14   :  { %v1566_v44 = vmul.f32 %v10847_v2, %v1550_v43 }
 0xa15   :  { %v10849_v45 = vpop.eup %10848 }
 0xa16   :  { %v1572_v3 = vmul.f32 %v8995_v48, %v1566_v44  ;;  %v1567_v5 = vmul.f32 %v10849_v45, %v1551_v47 }
 0xa18   :  { %v1573_v10 = vmul.f32 %v8995_v48, %v1567_v5  ;;  %v11740_v61 = vadd.f32 %v8996_v9, %v1572_v3  ;;  %v11839_v48 = vld [vmem:[%s13838_s2 + $0x8] sm:$0xff] }
 0xa1a   :  { %v11742_v11 = vadd.f32 %v8996_v9, %v1573_v10 }
 0xa1c   :  { %v1586_v55 = vpack.c.bf16 %v11742_v11, %v11740_v61 }
 0xa1e   :  { %9775 = vmatmul.mubr.msk.bf16.vlgmr.msra.gmra.mrb[44].mxu0 %vm62_vm1, %v1586_v55  ;;  %9791 = vmatmul.mubr.msk.bf16.vlgmr.msra.gmra.mrb[44].mxu1 %vm62_vm1, %v1586_v55 }
 0xa1f   :  { %9779 = vmatpush3.bf16.msra.mxu0 %v10722_v58  ;;  %9782 = vmatprep.mubr.msk.bf16.mxu0 %vm11213_vm0, %v11212_v0 }
 0xa20   :  { %9780 = vmatprep.subr.bf16.mxu0 %v11212_v0  ;;  %9802 = vmatprep.mubr.msk.bf16.mxu1 %vm11213_vm0, %v11212_v0 }
 0xa23   :  { %9781 = vmatpush3.bf16.msra.mxu0 %v10723_v54 }
 0xa24   :  { %9794 = vmatprep.subr.bf16.mxu0 %v11212_v0 }
 0xa26   :  { %9783 = vmatmul.mubr.msk.bf16.vlgmr.msra.gmra.mrb[48].mxu0 %vm62_vm1, %v1586_v55 }
 0xa27   :  { %9796 = vmatprep.mubr.msk.bf16.mxu0 %vm11213_vm0, %v11212_v0 }
 0xaf1   :  { %v1640_v8 = vpop.f32.mrb[44].mxu0  ;;  %v1766_v16 = vpop.f32.mrb[44].mxu1 }
 0xaf2   :  { %v9776_v17 = vpop.f32.mrb[45].mxu0  ;;  %v9792_v18 = vpop.f32.mrb[45].mxu1  ;;  %v1641_v22 = vadd.f32 %v9001_v14, %v1640_v8  ;;  %v1767_v6 = vadd.f32 %v9017_v56, %v1766_v16 }
 0xaf3   :  { %v1643_v21 = vpop.f32.mrb[46].mxu0  ;;  %v1769_v1 = vpop.f32.mrb[46].mxu1 }
 0xaf4   :  { %v1644_v24 = vadd.f32 %v9001_v14, %v1643_v21  ;;  %v1770_v4 = vadd.f32 %v9017_v56, %v1769_v1  ;;  %v9777_v60 = vpop.f32.mrb[47].mxu0  ;;  %v9793_v7 = vpop.f32.mrb[47].mxu1 }
 0xaf6   :  { %v1773_v13 = vpack.c.bf16 %v1644_v24, %v1641_v22  ;;  %v11769_v62 = vpack.c.bf16 %v1770_v4, %v1767_v6 }
 0xaf8   :  { %9801 = vmatpush3.bf16.msra.mxu1 %v11769_v62  ;;  %1891 = vrot.lane.b32.xlu0 %v1773_v13, %s11215_s14 }
 0xaf9   :  { %v1703_v19 = vpop.f32.mrb[48].mxu0  ;;  %9812 = vmatprep.subr.bf16.mxu1 %v11212_v0 }
 0xafa   :  { %v9784_v12 = vpop.f32.mrb[49].mxu0  ;;  %v1704_v32 = vadd.f32 %v9009_v29, %v1703_v19 }
 0xafb   :  { %v1706_v27 = vpop.f32.mrb[50].mxu0 }
 0xafc   :  { %v1707_v25 = vadd.f32 %v9009_v29, %v1706_v27  ;;  %v9785_v51 = vpop.f32.mrb[51].mxu0 }
 0xafe   :  { %v1774_v15 = vpack.c.bf16 %v1707_v25, %v1704_v32 }
 0xb00   :  { %2137 = vrot.lane.b32.xlu0 %v1774_v15, %s11216_s15  ;;  %1894 = vrot.lane.b32.xlu1 %v1774_v15, %s11215_s14  ;;  %v1780_v33 = vsel %vm236_vm2, %v1774_v15, 0 }
 0xb01   :  { %9795 = vmatpush3.bf16.xpose.msra.mxu0 %v1780_v33 }
 0xb02   :  { %9806 = vmatprep.subr.bf16.mxu0 %v11212_v0 }
 0xb04   :  { %2258 = vrot.lane.b32.xlu0 %v1774_v15, %s11217_s16  ;;  %2016 = vrot.lane.b32.xlu1 %v1774_v15, %s11214_s13 }
 0xb08   :  { %2379 = vrot.lane.b32.xlu0 %v1774_v15, %s11218_s17  ;;  %2014 = vrot.lane.b32.xlu1 %v1773_v13, %s11214_s13 }
 0xb09   :  { %9797 = vmatmul.mubr.msk.bf16.vlgmr.msra.gmra.mrb[52].mxu0 %vm236_vm2, %v1773_v13 }
 0xb0a   :  { %9808 = vmatprep.mubr.msk.bf16.mxu0 %vm11213_vm0, %v11212_v0 }
 0xb0c   :  { %2500 = vrot.lane.b32.xlu0 %v1774_v15, %s11219_s18  ;;  %2135 = vrot.lane.b32.xlu1 %v1773_v13, %s11216_s15 }
 0xb10   :  { %2621 = vrot.lane.b32.xlu0 %v1774_v15, %s11220_s19  ;;  %2256 = vrot.lane.b32.xlu1 %v1773_v13, %s11217_s16 }
 0xb14   :  { %2377 = vrot.lane.b32.xlu1 %v1773_v13, %s11218_s17 }
 0xb18   :  { %2498 = vrot.lane.b32.xlu1 %v1773_v13, %s11219_s18 }
 0xb1c   :  { %2619 = vrot.lane.b32.xlu1 %v1773_v13, %s11220_s19 }
 0xb6a   :  { %v1892_v39 = vpop.permute.xlu0 %1891 }
 0xb72   :  { %v1895_v35 = vpop.permute.xlu1 %1894  ;;  %v2138_v41 = vpop.permute.xlu0 %2137 }
 0xb73   :  { %v1900_v20 = vsel %vm236_vm2, %v1895_v35, 0  ;;  %v2143_v38 = vsel %vm236_vm2, %v2138_v41, 0 }
 0xb74   :  { %9807 = vmatpush3.bf16.xpose.msra.mxu0 %v1900_v20 }
 0xb75   :  { %9818 = vmatprep.subr.bf16.mxu0 %v11212_v0 }
 0xb76   :  { %v2017_v37 = vpop.permute.xlu1 %2016  ;;  %v2259_v43 = vpop.permute.xlu0 %2258 }
 0xb77   :  { %v2022_v23 = vsel %vm236_vm2, %v2017_v37, 0  ;;  %v2264_v47 = vsel %vm236_vm2, %v2259_v43, 0 }
 0xb7a   :  { %v2015_v42 = vpop.permute.xlu1 %2014  ;;  %v2380_v26 = vpop.permute.xlu0 %2379 }
 0xb7b   :  { %9809 = vmatmul.mubr.msk.bf16.vlgmr.msra.gmra.mrb[56].mxu0 %vm236_vm2, %v1892_v39  ;;  %v2385_v28 = vsel %vm236_vm2, %v2380_v26, 0 }
 0xb7c   :  { %9819 = vmatpush3.bf16.xpose.msra.mxu0 %v2022_v23  ;;  %9820 = vmatprep.mubr.msk.bf16.mxu0 %vm11213_vm0, %v11212_v0 }
 0xb7d   :  { %9830 = vmatprep.subr.bf16.mxu0 %v11212_v0 }
 0xb7e   :  { %v2136_v46 = vpop.permute.xlu1 %2135  ;;  %v2501_v49 = vpop.permute.xlu0 %2500 }
 0xb7f   :  { %v2506_v31 = vsel %vm236_vm2, %v2501_v49, 0 }
 0xb82   :  { %v2257_v30 = vpop.permute.xlu1 %2256  ;;  %v2622_v52 = vpop.permute.xlu0 %2621 }
 0xb83   :  { %9821 = vmatmul.mubr.msk.bf16.vlgmr.msra.gmra.mrb[60].mxu0 %vm236_vm2, %v2015_v42  ;;  %v2627_v34 = vsel %vm236_vm2, %v2622_v52, 0 }
 0xb84   :  { %9831 = vmatpush3.bf16.xpose.msra.mxu0 %v2143_v38  ;;  %9832 = vmatprep.mubr.msk.bf16.mxu0 %vm11213_vm0, %v11212_v0 }
 0xb85   :  { %9842 = vmatprep.subr.bf16.mxu0 %v11212_v0 }
 0xb86   :  { %v2378_v50 = vpop.permute.xlu1 %2377 }
 0xb8a   :  { %v2499_v36 = vpop.permute.xlu1 %2498 }
 0xb8b   :  { %9833 = vmatmul.mubr.msk.bf16.vlgmr.msra.gmra.mrb[64].mxu0 %vm236_vm2, %v2136_v46 }
 0xb8c   :  { %9843 = vmatpush3.bf16.xpose.msra.mxu0 %v2264_v47  ;;  %9844 = vmatprep.mubr.msk.bf16.mxu0 %vm11213_vm0, %v11212_v0 }
 0xb8d   :  { %9854 = vmatprep.subr.bf16.mxu0 %v11212_v0 }
 0xb8e   :  { %v2620_v53 = vpop.permute.xlu1 %2619 }
 0xb93   :  { %9845 = vmatmul.mubr.msk.bf16.vlgmr.msra.gmra.mrb[68].mxu0 %vm236_vm2, %v2257_v30 }
 0xb94   :  { %9855 = vmatpush3.bf16.xpose.msra.mxu0 %v2385_v28  ;;  %9856 = vmatprep.mubr.msk.bf16.mxu0 %vm11213_vm0, %v11212_v0 }
 0xb95   :  { %9866 = vmatprep.subr.bf16.mxu0 %v11212_v0 }
 0xb9b   :  { %9857 = vmatmul.mubr.msk.bf16.vlgmr.msra.gmra.mrb[72].mxu0 %vm236_vm2, %v2378_v50 }
 0xb9c   :  { %9867 = vmatpush3.bf16.xpose.msra.mxu0 %v2506_v31  ;;  %9868 = vmatprep.mubr.msk.bf16.mxu0 %vm11213_vm0, %v11212_v0 }
 0xb9d   :  { %9878 = vmatprep.subr.bf16.mxu0 %v11212_v0 }
 0xba3   :  { %9869 = vmatmul.mubr.msk.bf16.vlgmr.msra.gmra.mrb[76].mxu0 %vm236_vm2, %v2499_v36 }
 0xba4   :  { %9879 = vmatpush3.bf16.xpose.msra.mxu0 %v2627_v34  ;;  %9880 = vmatprep.mubr.msk.bf16.mxu0 %vm11213_vm0, %v11212_v0 }
 0xba5   :  { %9890 = vmatprep.subr.bf16.mxu0 %v11212_v0 }
 0xbab   :  { %9881 = vmatmul.mubr.msk.bf16.vlgmr.msra.gmra.mrb[80].mxu0 %vm236_vm2, %v2620_v53 }
 0xbac   :  { %9894 = vmatprep.mubr.msk.bf16.mxu0 %vm11213_vm0, %v11212_v0 }
 0xbdc   :  { %v1816_v57 = vpop.f32.mrb[52].mxu0 }
 0xbdd   :  { %v1817_v40 = vadd.f32 %v11833_v59, %v1816_v57  ;;  %v9798_v63 = vpop.f32.mrb[53].mxu0 }
 0xbde   :  { %v1819_v2 = vpop.f32.mrb[54].mxu0 }
 0xbdf   :  { %v1820_v44 = vadd.f32 %v11839_v48, %v1819_v2  ;;  %v9799_v45 = vpop.f32.mrb[55].mxu0  ;;  %v1823_v3 = vsel %vm284_vm3, %v1817_v40, -inf }
 0xbe0   :  { %1824 = vmax.xlane.f32.xlu0 %v1823_v3 }
 0xbe1   :  { %v1826_v5 = vsel %vm284_vm3, %v1820_v44, -inf }
 0xbe2   :  { %1827 = vmax.xlane.f32.xlu1 %v1826_v5 }
 0xbf3   :  { %1967 = vrot.lane.b32.xlu1 %v11769_v62, %s11215_s14 }
 0xc4e   :  { %v1936_v9 = vpop.f32.mrb[56].mxu0 }
 0xc4f   :  { %v11847_v10 = vadd.f32 %v11833_v59, %v1936_v9  ;;  %v9810_v58 = vpop.f32.mrb[57].mxu0 }
 0xc50   :  { %v1939_v55 = vpop.f32.mrb[58].mxu0 }
 0xc51   :  { %v11850_v54 = vadd.f32 %v11839_v48, %v1939_v55  ;;  %v9811_v14 = vpop.f32.mrb[59].mxu0  ;;  %v1943_v8 = vsel %vm284_vm3, %v11847_v10, -inf }
 0xc52   :  { %1944 = vmax.xlane.f32.xlu0 %v1943_v8 }
 0xc53   :  { %v1946_v56 = vsel %vm284_vm3, %v11850_v54, -inf }
 0xc56   :  { %1947 = vmax.xlane.f32.xlu0 %v1946_v56  ;;  %v2058_v16 = vpop.f32.mrb[60].mxu0 }
 0xc57   :  { %v11857_v17 = vadd.f32 %v11833_v59, %v2058_v16  ;;  %v9822_v18 = vpop.f32.mrb[61].mxu0 }
 0xc58   :  { %v2061_v21 = vpop.f32.mrb[62].mxu0 }
 0xc59   :  { %v11860_v1 = vadd.f32 %v11839_v48, %v2061_v21  ;;  %v9823_v22 = vpop.f32.mrb[63].mxu0  ;;  %v2065_v6 = vsel %vm284_vm3, %v11857_v17, -inf }
 0xc5a   :  { %2066 = vmax.xlane.f32.xlu1 %v2065_v6 }
 0xc5b   :  { %v2068_v24 = vsel %vm284_vm3, %v11860_v1, -inf }
 0xc5c   :  { %2069 = vmax.xlane.f32.xlu0 %v2068_v24 }
 0xc5e   :  { %v2179_v4 = vpop.f32.mrb[64].mxu0 }
 0xc5f   :  { %v11867_v60 = vadd.f32 %v11833_v59, %v2179_v4  ;;  %v9834_v7 = vpop.f32.mrb[65].mxu0 }
 0xc60   :  { %v2182_v13 = vpop.f32.mrb[66].mxu0 }
 0xc61   :  { %v11870_v29 = vadd.f32 %v11839_v48, %v2182_v13  ;;  %v9835_v19 = vpop.f32.mrb[67].mxu0  ;;  %v2186_v12 = vsel %vm284_vm3, %v11867_v60, -inf }
 0xc62   :  { %2187 = vmax.xlane.f32.xlu1 %v2186_v12 }
 0xc63   :  { %v2189_v27 = vsel %vm284_vm3, %v11870_v29, -inf }
 0xc64   :  { %2190 = vmax.xlane.f32.xlu0 %v2189_v27 }
 0xc66   :  { %v2300_v32 = vpop.f32.mrb[68].mxu0 }
 0xc67   :  { %v11877_v25 = vadd.f32 %v11833_v59, %v2300_v32  ;;  %v9846_v51 = vpop.f32.mrb[69].mxu0 }
 0xc68   :  { %v2303_v15 = vpop.f32.mrb[70].mxu0 }
 0xc69   :  { %v11880_v33 = vadd.f32 %v11839_v48, %v2303_v15  ;;  %v9847_v35 = vpop.f32.mrb[71].mxu0  ;;  %v2307_v20 = vsel %vm284_vm3, %v11877_v25, -inf }
 0xc6a   :  { %2308 = vmax.xlane.f32.xlu1 %v2307_v20 }
 0xc6b   :  { %v2310_v37 = vsel %vm284_vm3, %v11880_v33, -inf }
 0xc6c   :  { %2311 = vmax.xlane.f32.xlu0 %v2310_v37 }
 0xc6d   :  { %v1825_v39 = vpop.xlane.xlu0 %1824 }
 0xc6e   :  { %v1829_v23 = vsub.f32 %v1817_v40, %v1825_v39  ;;  %v2421_v41 = vpop.f32.mrb[72].mxu0 }
 0xc6f   :  { %v1828_v42 = vpop.xlane.xlu1 %1827  ;;  %v11887_v38 = vadd.f32 %v11833_v59, %v2421_v41  ;;  %v9858_v43 = vpop.f32.mrb[73].mxu0 }
 0xc70   :  { %v1831_v46 = vmul.f32 1.442695, %v1829_v23  ;;  %v1830_v47 = vsub.f32 %v1820_v44, %v1828_v42  ;;  %v2424_v26 = vpop.f32.mrb[74].mxu0 }
 0xc71   :  { %v11890_v30 = vadd.f32 %v11839_v48, %v2424_v26  ;;  %v9859_v28 = vpop.f32.mrb[75].mxu0  ;;  %v2428_v49 = vsel %vm284_vm3, %v11887_v38, -inf }
 0xc72   :  { %10850 = vpow2.f32 %v1831_v46  ;;  %v1833_v50 = vmul.f32 1.442695, %v1830_v47  ;;  %2429 = vmax.xlane.f32.xlu1 %v2428_v49 }
 0xc73   :  { %v2431_v31 = vsel %vm284_vm3, %v11890_v30, -inf  ;;  %v11929_v22 = vpop.permute.xlu1 %1967 }
 0xc74   :  { %10852 = vpow2.f32 %v1833_v50  ;;  %2432 = vmax.xlane.f32.xlu0 %v2431_v31 }
 0xc76   :  { %v2542_v52 = vpop.f32.mrb[76].mxu0 }
 0xc77   :  { %v11897_v36 = vadd.f32 %v11833_v59, %v2542_v52  ;;  %v9870_v34 = vpop.f32.mrb[77].mxu0 }
 0xc78   :  { %v2545_v53 = vpop.f32.mrb[78].mxu0 }
 0xc79   :  { %v11900_v57 = vadd.f32 %v11839_v48, %v2545_v53  ;;  %v9871_v40 = vpop.f32.mrb[79].mxu0  ;;  %v2549_v63 = vsel %vm284_vm3, %v11897_v36, -inf }
 0xc7a   :  { %2550 = vmax.xlane.f32.xlu1 %v2549_v63 }
 0xc7b   :  { %v2552_v2 = vsel %vm284_vm3, %v11900_v57, -inf }
 0xc7c   :  { %v11906_v44 = vpop.eup %10850  ;;  %2553 = vmax.xlane.f32.xlu0 %v2552_v2 }
 0xc7d   :  { %v1835_v45 = vsel %vm284_vm3, %v11906_v44, 0.0 }
 0xc7e   :  { %v11910_v3 = vpop.eup %10852  ;;  %1836 = vadd.xlane.f32.xlu1 %v1835_v45  ;;  %v2663_v5 = vpop.f32.mrb[80].mxu0 }
 0xc7f   :  { %v11913_v9 = vadd.f32 %v11833_v59, %v2663_v5  ;;  %v9882_v58 = vpop.f32.mrb[81].mxu0  ;;  %v1838_v55 = vsel %vm284_vm3, %v11910_v3, 0.0 }
 0xc80   :  { %1839 = vadd.xlane.f32.xlu0 %v1838_v55  ;;  %v2666_v14 = vpop.f32.mrb[82].mxu0 }
 0xc81   :  { %v11918_v8 = vadd.f32 %v11839_v48, %v2666_v14  ;;  %v9883_v56 = vpop.f32.mrb[83].mxu0  ;;  %v2670_v16 = vsel %vm284_vm3, %v11913_v9, -inf }
 0xc82   :  { %2671 = vmax.xlane.f32.xlu1 %v2670_v16 }
 0xc83   :  { %v2673_v18 = vsel %vm284_vm3, %v11918_v8, -inf }
 0xc84   :  { %2674 = vmax.xlane.f32.xlu0 %v2673_v18 }
 0xc93   :  { %2209 = vrot.lane.b32.xlu1 %v11769_v62, %s11216_s15 }
 0xc9a   :  { %2088 = vrot.lane.b32.xlu0 %v11769_v62, %s11214_s13 }
 0xcdf   :  { %v1945_v59 = vpop.xlane.xlu0 %1944 }
 0xce0   :  { %v1949_v21 = vsub.f32 %v11847_v10, %v1945_v59 }
 0xce2   :  { %v1951_v48 = vmul.f32 1.442695, %v1949_v21 }
 0xce3   :  { %v1948_v6 = vpop.xlane.xlu0 %1947 }
 0xce4   :  { %10854 = vpow2.f32 %v1951_v48  ;;  %v1950_v24 = vsub.f32 %v11850_v54, %v1948_v6 }
 0xce6   :  { %v1953_v4 = vmul.f32 1.442695, %v1950_v24 }
 0xce7   :  { %v2067_v7 = vpop.xlane.xlu1 %2066 }
 0xce8   :  { %10856 = vpow2.f32 %v1953_v4  ;;  %v2071_v13 = vsub.f32 %v11857_v17, %v2067_v7 }
 0xce9   :  { %v2070_v19 = vpop.xlane.xlu0 %2069 }
 0xcea   :  { %v2073_v12 = vmul.f32 1.442695, %v2071_v13  ;;  %v2072_v27 = vsub.f32 %v11860_v1, %v2070_v19 }
 0xcec   :  { %10858 = vpow2.f32 %v2073_v12  ;;  %v2075_v32 = vmul.f32 1.442695, %v2072_v27 }
 0xcee   :  { %v11934_v51 = vpop.eup %10854  ;;  %10860 = vpow2.f32 %v2075_v32 }
 0xcef   :  { %v2188_v10 = vpop.xlane.xlu1 %2187  ;;  %v1955_v15 = vsel %vm284_vm3, %v11934_v51, 0.0 }
 0xcf0   :  { %v2192_v54 = vsub.f32 %v11867_v60, %v2188_v10  ;;  %1956 = vadd.xlane.f32.xlu1 %v1955_v15 }
 0xcf1   :  { %v2191_v35 = vpop.xlane.xlu0 %2190 }
 0xcf2   :  { %v11939_v20 = vpop.eup %10856  ;;  %v2194_v17 = vmul.f32 1.442695, %v2192_v54  ;;  %v2193_v37 = vsub.f32 %v11870_v29, %v2191_v35 }
 0xcf3   :  { %v1958_v1 = vsel %vm284_vm3, %v11939_v20, 0.0 }
 0xcf4   :  { %10862 = vpow2.f32 %v2194_v17  ;;  %v2196_v39 = vmul.f32 1.442695, %v2193_v37  ;;  %1959 = vadd.xlane.f32.xlu0 %v1958_v1 }
 0xcf6   :  { %v11944_v23 = vpop.eup %10858  ;;  %10864 = vpow2.f32 %v2196_v39 }
 0xcf7   :  { %v2309_v41 = vpop.xlane.xlu1 %2308  ;;  %v2077_v60 = vsel %vm284_vm3, %v11944_v23, 0.0 }
 0xcf8   :  { %v11948_v42 = vpop.eup %10860  ;;  %v2313_v43 = vsub.f32 %v11877_v25, %v2309_v41  ;;  %2078 = vadd.xlane.f32.xlu1 %v2077_v60 }
 0xcf9   :  { %v2312_v46 = vpop.xlane.xlu0 %2311  ;;  %v2080_v29 = vsel %vm284_vm3, %v11948_v42, 0.0 }
 0xcfa   :  { %v2315_v47 = vmul.f32 1.442695, %v2313_v43  ;;  %v2314_v26 = vsub.f32 %v11880_v33, %v2312_v46  ;;  %2081 = vadd.xlane.f32.xlu0 %v2080_v29 }
 0xcfc   :  { %10866 = vpow2.f32 %v2315_v47  ;;  %v2317_v28 = vmul.f32 1.442695, %v2314_v26 }
 0xcfe   :  { %v11954_v49 = vpop.eup %10862  ;;  %10868 = vpow2.f32 %v2317_v28 }
 0xcff   :  { %v2430_v50 = vpop.xlane.xlu1 %2429  ;;  %v2198_v31 = vsel %vm284_vm3, %v11954_v49, 0.0 }
 0xd00   :  { %v11958_v52 = vpop.eup %10864  ;;  %v2434_v25 = vsub.f32 %v11887_v38, %v2430_v50  ;;  %2199 = vadd.xlane.f32.xlu1 %v2198_v31 }
 0xd01   :  { %v2433_v34 = vpop.xlane.xlu0 %2432  ;;  %v2201_v53 = vsel %vm284_vm3, %v11958_v52, 0.0 }
 0xd02   :  { %v2436_v33 = vmul.f32 1.442695, %v2434_v25  ;;  %v2435_v40 = vsub.f32 %v11890_v30, %v2433_v34  ;;  %2202 = vadd.xlane.f32.xlu0 %v2201_v53 }
 0xd04   :  { %10870 = vpow2.f32 %v2436_v33  ;;  %v2438_v63 = vmul.f32 1.442695, %v2435_v40 }
 0xd06   :  { %v11964_v2 = vpop.eup %10866  ;;  %10872 = vpow2.f32 %v2438_v63 }
 0xd07   :  { %v2551_v45 = vpop.xlane.xlu1 %2550  ;;  %v2319_v5 = vsel %vm284_vm3, %v11964_v2, 0.0 }
 0xd08   :  { %v11968_v58 = vpop.eup %10868  ;;  %2320 = vadd.xlane.f32.xlu1 %v2319_v5 }
 0xd09   :  { %v2554_v38 = vpop.xlane.xlu0 %2553  ;;  %v2322_v55 = vsel %vm284_vm3, %v11968_v58, 0.0 }
 0xd0a   :  { %v2556_v14 = vsub.f32 %v11900_v57, %v2554_v38  ;;  %2323 = vadd.xlane.f32.xlu0 %v2322_v55 }
 0xd0b   :  { %v1837_v30 = vpop.xlane.xlu1 %1836 }
 0xd0c   :  { %v2559_v56 = vmul.f32 1.442695, %v2556_v14  ;;  %10874 = vrcp.f32 %v1837_v30 }
 0xd0d   :  { %v1840_v16 = vpop.xlane.xlu0 %1839 }
 0xd0e   :  { %v11973_v18 = vpop.eup %10870  ;;  %10876 = vpow2.f32 %v2559_v56 }
 0xd0f   :  { %10878 = vrcp.f32 %v1840_v16  ;;  %v2672_v59 = vpop.xlane.xlu1 %2671  ;;  %v2440_v21 = vsel %vm284_vm3, %v11973_v18, 0.0 }
 0xd10   :  { %v11977_v48 = vpop.eup %10872  ;;  %v2676_v6 = vsub.f32 %v11913_v9, %v2672_v59  ;;  %2441 = vadd.xlane.f32.xlu0 %v2440_v21 }
 0xd11   :  { %v2675_v24 = vpop.xlane.xlu0 %2674  ;;  %v2443_v7 = vsel %vm284_vm3, %v11977_v48, 0.0 }
 0xd12   :  { %v2678_v57 = vmul.f32 1.442695, %v2676_v6  ;;  %v2677_v4 = vsub.f32 %v11918_v8, %v2675_v24 }
 0xd13   :  { %v2210_v1 = vpop.permute.xlu1 %2209 }
 0xd14   :  { %10880 = vpow2.f32 %v2678_v57  ;;  %v2680_v13 = vmul.f32 1.442695, %v2677_v4  ;;  %2444 = vadd.xlane.f32.xlu0 %v2443_v7 }
 0xd15   :  { %v2089_v39 = vpop.permute.xlu0 %2088 }
 0xd16   :  { %10882 = vpow2.f32 %v2680_v13  ;;  %v10875_v19 = vpop.eup %10874 }
 0xd17   :  { %v1843_v32 = vmul.f32 %v10875_v19, %v11906_v44 }
 0xd18   :  { %v11983_v12 = vpop.eup %10876 }
 0xd19   :  { %v10879_v27 = vpop.eup %10878  ;;  %2330 = vrot.lane.b32.xlu1 %v11769_v62, %s11217_s16  ;;  %v2564_v9 = vsel %vm284_vm3, %v11983_v12, 0.0 }
 0xd1a   :  { %v1844_v8 = vmul.f32 %v10879_v27, %v11910_v3  ;;  %2565 = vadd.xlane.f32.xlu0 %v2564_v9  ;;  %v2555_v3 = vsub.f32 %v11897_v36, %v2551_v45 }
 0xd1c   :  { %v1845_v10 = vpack.c.bf16 %v1844_v8, %v1843_v32  ;;  %v2557_v17 = vmul.f32 1.442695, %v2555_v3 }
 0xd1e   :  { %v11991_v15 = vpop.eup %10880  ;;  %9803 = vmatmul.mubr.msk.bf16.vlgmr.msra.gmra.mrb[48].mxu1 %vm284_vm3, %v1845_v10  ;;  %10884 = vpow2.f32 %v2557_v17 }
 0xd1f   :  { %9813 = vmatpush3.bf16.msra.mxu1 %v11929_v22  ;;  %v2682_v54 = vsel %vm284_vm3, %v11991_v15, 0.0  ;;  %9814 = vmatprep.mubr.msk.bf16.mxu1 %vm11213_vm0, %v11212_v0 }
 0xd20   :  { %v11999_v35 = vpop.eup %10882  ;;  %2683 = vadd.xlane.f32.xlu0 %v2682_v54  ;;  %9824 = vmatprep.subr.bf16.mxu1 %v11212_v0 }
 0xd21   :  { %v2685_v44 = vsel %vm284_vm3, %v11999_v35, 0.0 }
 0xd24   :  { %2686 = vadd.xlane.f32.xlu0 %v2685_v44 }
 0xd28   :  { %v12005_v22 = vpop.eup %10884 }
 0xd29   :  { %v2561_v37 = vsel %vm284_vm3, %v12005_v22, 0.0 }
 0xd3a   :  { %2451 = vrot.lane.b32.xlu0 %v11769_v62, %s11218_s17 }
 0xd3d   :  { %2562 = vadd.xlane.f32.xlu1 %v2561_v37 }
 0xd4e   :  { %2572 = vrot.lane.b32.xlu1 %v11769_v62, %s11219_s18 }
 0xd52   :  { %2693 = vrot.lane.b32.xlu1 %v11769_v62, %s11220_s19 }
 0xd7d   :  { %v1957_v36 = vpop.xlane.xlu1 %1956 }
 0xd7e   :  { %10886 = vrcp.f32 %v1957_v36 }
 0xd81   :  { %v1960_v41 = vpop.xlane.xlu0 %1959 }
 0xd82   :  { %10888 = vrcp.f32 %v1960_v41 }
 0xd85   :  { %v2079_v60 = vpop.xlane.xlu1 %2078 }
 0xd86   :  { %10890 = vrcp.f32 %v2079_v60 }
 0xd87   :  { %v2082_v43 = vpop.xlane.xlu0 %2081 }
 0xd88   :  { %10892 = vrcp.f32 %v2082_v43  ;;  %v10887_v46 = vpop.eup %10886 }
 0xd89   :  { %v1963_v47 = vmul.f32 %v10887_v46, %v11934_v51 }
 0xd8c   :  { %v10889_v29 = vpop.eup %10888 }
 0xd8d   :  { %v1964_v26 = vmul.f32 %v10889_v29, %v11939_v20  ;;  %v2200_v28 = vpop.xlane.xlu1 %2199 }
 0xd8e   :  { %10894 = vrcp.f32 %v2200_v28 }
 0xd8f   :  { %v2203_v50 = vpop.xlane.xlu0 %2202  ;;  %v1965_v62 = vpack.c.bf16 %v1964_v26, %v1963_v47 }
 0xd90   :  { %10896 = vrcp.f32 %v2203_v50  ;;  %v10891_v31 = vpop.eup %10890 }
 0xd91   :  { %9815 = vmatmul.mubr.msk.bf16.vlgmr.msra.gmra.mrb[52].mxu1 %vm284_vm3, %v1965_v62  ;;  %v2085_v51 = vmul.f32 %v10891_v31, %v11944_v23 }
 0xd92   :  { %v10893_v25 = vpop.eup %10892  ;;  %9825 = vmatpush3.bf16.msra.mxu1 %v2089_v39  ;;  %9826 = vmatprep.mubr.msk.bf16.mxu1 %vm11213_vm0, %v11212_v0 }
 0xd93   :  { %v2086_v34 = vmul.f32 %v10893_v25, %v11948_v42  ;;  %9836 = vmatprep.subr.bf16.mxu1 %v11212_v0 }
 0xd95   :  { %v2321_v20 = vpop.xlane.xlu1 %2320  ;;  %v2087_v33 = vpack.c.bf16 %v2086_v34, %v2085_v51 }
 0xd96   :  { %10898 = vrcp.f32 %v2321_v20 }
 0xd97   :  { %v2324_v53 = vpop.xlane.xlu0 %2323 }
 0xd98   :  { %10900 = vrcp.f32 %v2324_v53  ;;  %v10895_v40 = vpop.eup %10894 }
 0xd99   :  { %9827 = vmatmul.mubr.msk.bf16.vlgmr.msra.gmra.mrb[56].mxu1 %vm284_vm3, %v2087_v33  ;;  %v2206_v42 = vmul.f32 %v10895_v40, %v11954_v49  ;;  %v2331_v55 = vpop.permute.xlu1 %2330 }
 0xd9a   :  { %v10897_v63 = vpop.eup %10896  ;;  %9837 = vmatpush3.bf16.msra.mxu1 %v2210_v1  ;;  %9838 = vmatprep.mubr.msk.bf16.mxu1 %vm11213_vm0, %v11212_v0 }
 0xd9b   :  { %v2207_v45 = vmul.f32 %v10897_v63, %v11958_v52  ;;  %9848 = vmatprep.subr.bf16.mxu1 %v11212_v0 }
 0xd9d   :  { %v2442_v23 = vpop.xlane.xlu0 %2441  ;;  %v2208_v5 = vpack.c.bf16 %v2207_v45, %v2206_v42  ;;  %v10724_v42 = vld [vmem:[%s13835_s5 + $0x70] sm:$0xff]  }
 0xd9e   :  { %9891 = vmatpush3.bf16.msra.mxu0 %v10724_v42 }
 0xd9f   :  { %9892 = vmatprep.subr.bf16.mxu0 %v11212_v0 }
 0xda0   :  { %v10899_v38 = vpop.eup %10898 }
 0xda1   :  { %9839 = vmatmul.mubr.msk.bf16.vlgmr.msra.gmra.mrb[60].mxu1 %vm284_vm3, %v2208_v5  ;;  %v2445_v56 = vpop.xlane.xlu0 %2444  ;;  %v2327_v52 = vmul.f32 %v10899_v38, %v11964_v2 }
 0xda2   :  { %v10901_v14 = vpop.eup %10900  ;;  %9849 = vmatpush3.bf16.msra.mxu1 %v2331_v55  ;;  %9850 = vmatprep.mubr.msk.bf16.mxu1 %vm11213_vm0, %v11212_v0  ;;  %10902 = vrcp.f32 %v2445_v56  ;;  %v10725_v55 = vld [vmem:[%s13835_s5 + $0x78] sm:$0xff]  }
 0xda3   :  { %v2328_v30 = vmul.f32 %v10901_v14, %v11968_v58  ;;  %9860 = vmatprep.subr.bf16.mxu1 %v11212_v0  ;;  %10904 = vrcp.f32 %v2442_v23  ;;  %9893 = vmatpush3.bf16.msra.mxu0 %v10725_v55 }
 0xda4   :  { %9906 = vmatprep.subr.bf16.mxu0 %v11212_v0 }
 0xda5   :  { %v2329_v49 = vpack.c.bf16 %v2328_v30, %v2327_v52 }
 0xda7   :  { %v2566_v16 = vpop.xlane.xlu0 %2565 }
 0xda8   :  { %10906 = vrcp.f32 %v2566_v16 }
 0xda9   :  { %9851 = vmatmul.mubr.msk.bf16.vlgmr.msra.gmra.mrb[64].mxu1 %vm284_vm3, %v2329_v49 }
 0xdaa   :  { %9862 = vmatprep.mubr.msk.bf16.mxu1 %vm11213_vm0, %v11212_v0 }
 0xdac   :  { %v10903_v21 = vpop.eup %10902 }
 0xdad   :  { %v2684_v59 = vpop.xlane.xlu0 %2683  ;;  %v10905_v24 = vpop.eup %10904  ;;  %v2449_v58 = vmul.f32 %v10903_v21, %v11977_v48 }
 0xdae   :  { %v2448_v57 = vmul.f32 %v10905_v24, %v11973_v18 }
 0xdb0   :  { %v2450_v2 = vpack.c.bf16 %v2449_v58, %v2448_v57 }
 0xdb1   :  { %v2687_v6 = vpop.xlane.xlu0 %2686 }
 0xdb2   :  { %v10907_v18 = vpop.eup %10906 }
 0xdb3   :  { %v2570_v19 = vmul.f32 %v10907_v18, %v11983_v12 }
 0xdb5   :  { %v2452_v4 = vpop.permute.xlu0 %2451 }
 0xdb6   :  { %9861 = vmatpush3.bf16.msra.mxu1 %v2452_v4 }
 0xdb7   :  { %9872 = vmatprep.subr.bf16.mxu1 %v11212_v0 }
 0xdb9   :  { %9863 = vmatmul.mubr.msk.bf16.vlgmr.msra.gmra.mrb[68].mxu1 %vm284_vm3, %v2450_v2 }
 0xdba   :  { %9874 = vmatprep.mubr.msk.bf16.mxu1 %vm11213_vm0, %v11212_v0 }
 0xdca   :  { %v2563_v7 = vpop.xlane.xlu1 %2562 }
 0xdcb   :  { %10908 = vrcp.f32 %v2563_v7 }
 0xdcc   :  { %10910 = vrcp.f32 %v2687_v6 }
 0xdcd   :  { %10912 = vrcp.f32 %v2684_v59 }
 0xdce   :  { %v2573_v13 = vpop.permute.xlu1 %2572 }
 0xdcf   :  { %9873 = vmatpush3.bf16.msra.mxu1 %v2573_v13 }
 0xdd0   :  { %9884 = vmatprep.subr.bf16.mxu1 %v11212_v0 }
 0xdd2   :  { %v2694_v8 = vpop.permute.xlu1 %2693 }
 0xdd5   :  { %v10909_v48 = vpop.eup %10908 }
 0xdd6   :  { %v2569_v27 = vmul.f32 %v10909_v48, %v12005_v22  ;;  %v10911_v32 = vpop.eup %10910 }
 0xdd7   :  { %v10913_v10 = vpop.eup %10912  ;;  %v2691_v54 = vmul.f32 %v10911_v32, %v11999_v35 }
 0xdd8   :  { %v2571_v9 = vpack.c.bf16 %v2570_v19, %v2569_v27  ;;  %v2690_v44 = vmul.f32 %v10913_v10, %v11991_v15 }
 0xdda   :  { %9875 = vmatmul.mubr.msk.bf16.vlgmr.msra.gmra.mrb[72].mxu1 %vm284_vm3, %v2571_v9  ;;  %v2692_v3 = vpack.c.bf16 %v2691_v54, %v2690_v44 }
 0xddb   :  { %9885 = vmatpush3.bf16.msra.mxu1 %v2694_v8  ;;  %9886 = vmatprep.mubr.msk.bf16.mxu1 %vm11213_vm0, %v11212_v0 }
 0xddc   :  { %9898 = vmatprep.subr.bf16.mxu1 %v11212_v0 }
 0xde2   :  { %9887 = vmatmul.mubr.msk.bf16.vlgmr.msra.gmra.mrb[76].mxu1 %vm284_vm3, %v2692_v3 }
 0xde3   :  { %9902 = vmatprep.mubr.msk.bf16.mxu1 %vm11213_vm0, %v11212_v0 }
 0xdf1   :  { %v12056_v12 = vpop.f32.mrb[48].mxu1 }
 0xdf2   :  { %v9804_v17 = vpop.f32.mrb[49].mxu1 }
 0xdf3   :  { %v12058_v22 = vpop.f32.mrb[50].mxu1 }
 0xdf4   :  { %v9805_v37 = vpop.f32.mrb[51].mxu1 }
 0xe64   :  { %v2007_v1 = vpop.f32.mrb[52].mxu1 }
 0xe65   :  { %v9816_v39 = vpop.f32.mrb[53].mxu1 }
 0xe66   :  { %v2010_v36 = vpop.f32.mrb[54].mxu1 }
 0xe67   :  { %v10529_v35 = vpack.i.bf16 %v2010_v36, %v2007_v1  ;;  %v9817_v41 = vpop.f32.mrb[55].mxu1 }
 0xe69   :  { %10530 = vrot.lane.b32.xlu1 %v10529_v35, %s11221_s26 }
 0xe6c   :  { %v2128_v15 = vpop.f32.mrb[56].mxu1 }
 0xe6d   :  { %v9828_v60 = vpop.f32.mrb[57].mxu1 }
 0xe6e   :  { %v2131_v43 = vpop.f32.mrb[58].mxu1 }
 0xe6f   :  { %v10534_v46 = vpack.i.bf16 %v2131_v43, %v2128_v15  ;;  %v9829_v29 = vpop.f32.mrb[59].mxu1 }
 0xe71   :  { %10535 = vrot.lane.b32.xlu1 %v10534_v46, %s11222_s27 }
 0xe74   :  { %v2249_v47 = vpop.f32.mrb[60].mxu1 }
 0xe75   :  { %v9840_v26 = vpop.f32.mrb[61].mxu1 }
 0xe76   :  { %v2252_v28 = vpop.f32.mrb[62].mxu1 }
 0xe77   :  { %v10539_v50 = vpack.i.bf16 %v2252_v28, %v2249_v47  ;;  %v9841_v62 = vpop.f32.mrb[63].mxu1  ;;  %v9041_v28 = vld [vmem:[%s13837_s9 + $0x7] ss:$0 sm:$0xff] }
 0xe79   :  { %10540 = vrot.lane.b32.xlu1 %v10539_v50, %s11223_s28 }
 0xe7c   :  { %v2370_v31 = vpop.f32.mrb[64].mxu1 }
 0xe7d   :  { %v9852_v25 = vpop.f32.mrb[65].mxu1 }
 0xe7e   :  { %v2373_v34 = vpop.f32.mrb[66].mxu1 }
 0xe7f   :  { %v10544_v51 = vpack.i.bf16 %v2373_v34, %v2370_v31  ;;  %v9853_v20 = vpop.f32.mrb[67].mxu1 }
 0xe81   :  { %10545 = vrot.lane.b32.xlu0 %v10544_v51, %s11224_s29 }
 0xe8c   :  { %v2491_v53 = vpop.f32.mrb[68].mxu1 }
 0xe8d   :  { %v9864_v33 = vpop.f32.mrb[69].mxu1 }
 0xe8e   :  { %v2494_v40 = vpop.f32.mrb[70].mxu1 }
 0xe8f   :  { %v10549_v63 = vpack.i.bf16 %v2494_v40, %v2491_v53  ;;  %v9865_v45 = vpop.f32.mrb[71].mxu1 }
 0xe91   :  { %10550 = vrot.lane.b32.xlu1 %v10549_v63, %s11225_s30 }
 0xead   :  { %v2612_v23 = vpop.f32.mrb[72].mxu1 }
 0xeae   :  { %v9876_v5 = vpop.f32.mrb[73].mxu1 }
 0xeaf   :  { %v2615_v38 = vpop.f32.mrb[74].mxu1 }
 0xeb0   :  { %v10554_v14 = vpack.i.bf16 %v2615_v38, %v2612_v23  ;;  %v9877_v30 = vpop.f32.mrb[75].mxu1 }
 0xeb2   :  { %10555 = vrot.lane.b32.xlu0 %v10554_v14, %s11226_s22 }
 0xeb5   :  { %v2733_v56 = vpop.f32.mrb[76].mxu1 }
 0xeb6   :  { %v9888_v52 = vpop.f32.mrb[77].mxu1 }
 0xeb7   :  { %v2736_v49 = vpop.f32.mrb[78].mxu1  ;;  %v10732_v52 = vld [vmem:[%s13840_s7 + $0x20] sm:$0xff]  }
 0xeb8   :  { %v10559_v16 = vpack.i.bf16 %v2736_v49, %v2733_v56  ;;  %v9889_v59 = vpop.f32.mrb[79].mxu1  ;;  %v10727_v56 = vld [vmem:[%s13839_s6 + $0x18] sm:$0xff]   ;;  %v10733_v49 = vld [vmem:[%s13840_s7 + $0x28] sm:$0xff]  }
 0xeba   :  { %10560 = vrot.lane.b32.xlu1 %v10559_v16, %s13848_s24 }
 0xedb   :  { %v10531_v21 = vpop.permute.xlu1 %10530 }
 0xedc   :  { %v10533_v57 = vunpack.i.h.bf16 %v10531_v21  ;;  %v10532_v4 = vunpack.i.l.bf16 %v10531_v21 }
 0xede   :  { %v2797_v32 = vsel %vm236_vm2, %v12058_v22, %v10533_v57  ;;  %v2796_v8 = vsel %vm236_vm2, %v12056_v12, %v10532_v4 }
 0xee3   :  { %v10536_v6 = vpop.permute.xlu1 %10535 }
 0xee4   :  { %v10538_v2 = vunpack.i.h.bf16 %v10536_v6  ;;  %v10537_v7 = vunpack.i.l.bf16 %v10536_v6 }
 0xee6   :  { %v2799_v44 = vsel %vm1260_vm4, %v2797_v32, %v10538_v2  ;;  %v2798_v3 = vsel %vm1260_vm4, %v2796_v8, %v10537_v7  ;;  %v9045_v2 = vld [vmem:[%s13837_s9 + $0x1a] ss:$0 sm:$0xff]  ;;  %v10728_v32 = vld [vmem:[%s13835_s5 + $0x80] sm:$0xff]  }
 0xeeb   :  { %v10541_v24 = vpop.permute.xlu1 %10540 }
 0xeec   :  { %v10543_v18 = vunpack.i.h.bf16 %v10541_v24  ;;  %v10542_v48 = vunpack.i.l.bf16 %v10541_v24 }
 0xeee   :  { %v2801_v1 = vsel %vm1263_vm5, %v2799_v44, %v10543_v18  ;;  %v2800_v39 = vsel %vm1263_vm5, %v2798_v3, %v10542_v48  ;;  %v9046_v48 = vld [vmem:[%s13837_s9 + $0x24] ss:$0 sm:$0xff]  ;;  %v3114_v44 = vld [vmem:[%s13841_s1 + $0x8] sm:$0xff] }
 0xef3   :  { %v10546_v58 = vpop.permute.xlu0 %10545 }
 0xef4   :  { %v10548_v27 = vunpack.i.h.bf16 %v10546_v58  ;;  %v10547_v9 = vunpack.i.l.bf16 %v10546_v58 }
 0xef6   :  { %v2803_v36 = vsel %vm284_vm3, %v2801_v1, %v10548_v27  ;;  %v2802_v35 = vsel %vm284_vm3, %v2800_v39, %v10547_v9  ;;  %v10734_v1 = vld [vmem:[%s13840_s7 + $0x30] sm:$0xff]   ;;  %v10735_v39 = vld [vmem:[%s13840_s7 + $0x38] sm:$0xff]  }
 0xf03   :  { %v10551_v13 = vpop.permute.xlu1 %10550 }
 0xf04   :  { %v10553_v10 = vunpack.i.h.bf16 %v10551_v13  ;;  %v10552_v54 = vunpack.i.l.bf16 %v10551_v13 }
 0xf06   :  { %v2804_v41 = vsel %vm1268_vm6, %v2802_v35, %v10552_v54  ;;  %v2805_v12 = vsel %vm1268_vm6, %v2803_v36, %v10553_v10  ;;  %v10729_v10 = vld [vmem:[%s13835_s5 + $0x88] sm:$0xff]   ;;  %v3113_v54 = vld [vmem:[%s13841_s1] sm:$0xff] }
 0xf07   :  { %v3125_v3 = vpack.c.bf16 %v3114_v44, %v3113_v54  ;;  %v9051_v36 = vld [vmem:[%s13837_s9 + $0x2d] ss:$0 sm:$0xff]  ;;  %v9091_v54 = vld [vmem:[%s13837_s9 + $0xa] ss:$0 sm:$0xff] }
 0xf24   :  { %v10556_v19 = vpop.permute.xlu0 %10555 }
 0xf25   :  { %v10558_v17 = vunpack.i.h.bf16 %v10556_v19  ;;  %v10557_v37 = vunpack.i.l.bf16 %v10556_v19 }
 0xf27   :  { %v2806_v43 = vsel %vm1271_vm7, %v2804_v41, %v10557_v37  ;;  %v2807_v46 = vsel %vm1271_vm7, %v2805_v12, %v10558_v17  ;;  %v10730_v17 = vld [vmem:[%s13835_s5 + $0x90] sm:$0xff]   ;;  %v10731_v37 = vld [vmem:[%s13835_s5 + $0x98] sm:$0xff]  }
 0xf2c   :  { %v10561_v22 = vpop.permute.xlu1 %10560 }
 0xf2d   :  { %v10563_v15 = vunpack.i.h.bf16 %v10561_v22  ;;  %v10562_v60 = vunpack.i.l.bf16 %v10561_v22 }
 0xf2f   :  { %v2808_v29 = vsel %vm1274_vm8, %v2806_v43, %v10562_v60  ;;  %v2809_v47 = vsel %vm1274_vm8, %v2807_v46, %v10563_v15 }
 0xf30   :  { %v2816_v26 = vpack.c.bf16 %v2809_v47, %v2808_v29  ;;  %v10736_v29 = vld [vmem:[%s13835_s5 + $0xa0] sm:$0xff]  }
 0xf32   :  { %9895 = vmatmul.mubr.msk.bf16.vlgmr.msra.gmra.mrb[84].mxu0 %vm62_vm1, %v2816_v26  ;;  %v9075_v26 = vld [vmem:[%s13837_s9 + $0x8] ss:$0 sm:$0xff] }
 0xf33   :  { %9914 = vmatprep.mubr.msk.bf16.mxu0 %vm11213_vm0, %v11212_v0  ;;  %9907 = vmatpush3.bf16.msra.mxu0 %v10732_v52 }
 0xf34   :  { %9908 = vmatprep.subr.bf16.mxu0 %v11212_v0 }
 0xf37   :  { %9909 = vmatpush3.bf16.msra.mxu0 %v10733_v49 }
 0xf38   :  { %9910 = vmatprep.subr.bf16.mxu0 %v11212_v0 }
 0xf3b   :  { %9911 = vmatpush3.bf16.msra.mxu0 %v10734_v1 }
 0xf3c   :  { %9912 = vmatprep.subr.bf16.mxu0 %v11212_v0 }
 0xf3f   :  { %9913 = vmatpush3.bf16.msra.mxu0 %v10735_v39 }
 0xf40   :  { %9934 = vmatprep.subr.bf16.mxu0 %v11212_v0 }
0x1005   :  { %v2870_v50 = vpop.f32.mrb[84].mxu0 }
0x1006   :  { %v2871_v62 = vadd.f32 %v9041_v28, %v2870_v50  ;;  %v9896_v31 = vpop.f32.mrb[85].mxu0 }
0x1007   :  { %v2873_v25 = vpop.f32.mrb[86].mxu0  ;;  %v10737_v31 = vld [vmem:[%s13835_s5 + $0xa8] sm:$0xff]  }
0x1008   :  { %v2877_v34 = vadd.f32 %v2871_v62, %v11740_v61  ;;  %v2874_v51 = vadd.f32 %v9041_v28, %v2873_v25  ;;  %v9897_v20 = vpop.f32.mrb[87].mxu0 }
0x100a   :  { %v2878_v53 = vadd.f32 %v2874_v51, %v11742_v11  ;;  %v2881_v33 = vsel %vm62_vm1, %v2877_v34, 0.0  ;;  %v10726_v11 = vld [vmem:[%s13839_s6 + $0x10] sm:$0xff]  }
0x100b   :  { %2882 = vadd.xlane.f32.xlu0 %v2881_v33  ;;  %9899 = vmatpush3.bf16.msra.mxu1 %v10726_v11 }
0x100c   :  { %v2884_v40 = vsel %vm62_vm1, %v2878_v53, 0.0  ;;  %9900 = vmatprep.subr.bf16.mxu1 %v11212_v0 }
0x100d   :  { %2885 = vadd.xlane.f32.xlu1 %v2884_v40 }
0x100f   :  { %9901 = vmatpush3.bf16.msra.mxu1 %v10727_v56 }
0x1010   :  { %9918 = vmatprep.subr.bf16.mxu1 %v11212_v0 }
0x1098   :  { %v2883_v63 = vpop.xlane.xlu0 %2882 }
0x1099   :  { %v2887_v45 = vmul.f32 0.03125, %v2883_v63 }
0x109a   :  { %v2886_v42 = vpop.xlane.xlu1 %2885 }
0x109b   :  { %v2889_v23 = vsub.f32 %v2877_v34, %v2887_v45  ;;  %v2888_v5 = vmul.f32 0.03125, %v2886_v42 }
0x109d   :  { %v2890_v38 = vsub.f32 %v2878_v53, %v2888_v5  ;;  %v2891_v55 = vmul.f32 %v2889_v23, %v2889_v23  ;;  %v9083_v53 = vld [vmem:[%s13837_s9 + $0x9] ss:$0 sm:$0xff] }
0x109f   :  { %v2893_v14 = vsel %vm62_vm1, %v2891_v55, 0.0  ;;  %v2892_v61 = vmul.f32 %v2890_v38, %v2890_v38 }
0x10a0   :  { %2894 = vadd.xlane.f32.xlu0 %v2893_v14 }
0x10a1   :  { %v2896_v30 = vsel %vm62_vm1, %v2892_v61, 0.0 }
0x10a4   :  { %2897 = vadd.xlane.f32.xlu0 %v2896_v30 }
0x112d   :  { %v2895_v16 = vpop.xlane.xlu0 %2894 }
0x112e   :  { %v2899_v59 = vmul.f32 0.03125, %v2895_v16 }
0x1130   :  { %v2901_v21 = vadd.f32 1e-05, %v2899_v59 }
0x1131   :  { %v2898_v6 = vpop.xlane.xlu0 %2897 }
0x1132   :  { %10914 = vrsqrt.f32 %v2901_v21  ;;  %v2900_v24 = vmul.f32 0.03125, %v2898_v6 }
0x1134   :  { %v2902_v58 = vadd.f32 1e-05, %v2900_v24 }
0x1136   :  { %10916 = vrsqrt.f32 %v2902_v58 }
0x113c   :  { %v10915_v57 = vpop.eup %10914 }
0x113d   :  { %v2905_v4 = vmul.f32 %v10915_v57, %v2889_v23 }
0x113f   :  { %v2911_v13 = vmul.f32 %v9045_v2, %v2905_v4 }
0x1140   :  { %v10917_v7 = vpop.eup %10916 }
0x1141   :  { %v2906_v18 = vmul.f32 %v10917_v7, %v2890_v38  ;;  %v12125_v27 = vadd.f32 %v9046_v48, %v2911_v13 }
0x1143   :  { %v2912_v19 = vmul.f32 %v9045_v2, %v2906_v18 }
0x1145   :  { %v12127_v9 = vadd.f32 %v9046_v48, %v2912_v19 }
0x1147   :  { %v2925_v8 = vpack.c.bf16 %v12127_v9, %v12125_v27 }
0x1149   :  { %9903 = vmatmul.mubr.msk.bf16.vlgmr.msra.gmra.mrb[80].mxu1 %vm62_vm1, %v2925_v8 }
0x114a   :  { %9919 = vmatpush3.bf16.msra.mxu1 %v10728_v32  ;;  %9922 = vmatprep.mubr.msk.bf16.mxu1 %vm11213_vm0, %v11212_v0 }
0x114b   :  { %9920 = vmatprep.subr.bf16.mxu1 %v11212_v0 }
0x114e   :  { %9921 = vmatpush3.bf16.msra.mxu1 %v10729_v10 }
0x114f   :  { %9926 = vmatprep.subr.bf16.mxu1 %v11212_v0 }
0x1151   :  { %9923 = vmatmul.mubr.msk.bf16.vlgmr.msra.gmra.mrb[84].mxu1 %vm62_vm1, %v3125_v3 }
0x1152   :  { %9927 = vmatpush3.bf16.msra.mxu1 %v10730_v17  ;;  %9930 = vmatprep.mubr.msk.bf16.mxu1 %vm11213_vm0, %v11212_v0 }
0x1153   :  { %9928 = vmatprep.subr.bf16.mxu1 %v11212_v0 }
0x1156   :  { %9929 = vmatpush3.bf16.msra.mxu1 %v10731_v37 }
0x1157   :  { %9942 = vmatprep.subr.bf16.mxu1 %v11212_v0 }
0x1159   :  { %9931 = vmatmul.mubr.msk.bf16.vlgmr.msra.gmra.mrb[88].mxu1 %vm62_vm1, %v3125_v3 }
0x115a   :  { %9944 = vmatprep.mubr.msk.bf16.mxu1 %vm11213_vm0, %v11212_v0 }
0x121c   :  { %v2979_v35 = vpop.f32.mrb[80].mxu1 }
0x121d   :  { %v2980_v22 = vadd.f32 %v9051_v36, %v2979_v35  ;;  %v9904_v41 = vpop.f32.mrb[81].mxu1  ;;  %v12261_v35 = vld [vmem:[%s13842_s3] sm:$0xff] }
0x121e   :  { %v2982_v12 = vpop.f32.mrb[82].mxu1  ;;  %v12266_v41 = vld [vmem:[%s13842_s3 + $0x8] sm:$0xff] }
0x121f   :  { %v2983_v15 = vadd.f32 %v9051_v36, %v2982_v12  ;;  %v9905_v60 = vpop.f32.mrb[83].mxu1  ;;  %v2986_v43 = vmax.f32 %v2980_v22, 0.0 }
0x1221   :  { %v2987_v46 = vmax.f32 %v2983_v15, 0.0 }
0x1223   :  { %v2998_v47 = vpack.c.bf16 %v2987_v46, %v2986_v43 }
0x1224   :  { %v3179_v28 = vpop.f32.mrb[84].mxu1 }
0x1225   :  { %9915 = vmatmul.mubr.msk.bf16.vlgmr.msra.gmra.mrb[88].mxu0 %vm1493_vm9, %v2998_v47  ;;  %v9924_v50 = vpop.f32.mrb[85].mxu1  ;;  %v3180_v25 = vadd.f32 %v9075_v26, %v3179_v28 }
0x1226   :  { %v3182_v62 = vpop.f32.mrb[86].mxu1  ;;  %9935 = vmatpush3.bf16.msra.mxu0 %v10736_v29  ;;  %9938 = vmatprep.mubr.msk.bf16.mxu0 %vm11213_vm0, %v11212_v0 }
0x1227   :  { %v3183_v34 = vadd.f32 %v9075_v26, %v3182_v62  ;;  %v9925_v51 = vpop.f32.mrb[87].mxu1  ;;  %9936 = vmatprep.subr.bf16.mxu0 %v11212_v0 }
0x1229   :  { %v3312_v20 = vpack.c.bf16 %v3183_v34, %v3180_v25 }
0x122a   :  { %9937 = vmatpush3.bf16.msra.mxu0 %v10737_v31 }
0x122b   :  { %3430 = vrot.lane.b32.xlu0 %v3312_v20, %s11215_s14  ;;  %9948 = vmatprep.subr.bf16.mxu0 %v11212_v0 }
0x122c   :  { %v3242_v33 = vpop.f32.mrb[88].mxu1 }
0x122d   :  { %v9932_v40 = vpop.f32.mrb[89].mxu1  ;;  %9939 = vmatmul.mubr.msk.bf16.vlgmr.msra.gmra.mrb[92].mxu0 %vm62_vm1, %v3125_v3  ;;  %v3243_v45 = vadd.f32 %v9083_v53, %v3242_v33 }
0x122e   :  { %v3245_v63 = vpop.f32.mrb[90].mxu1  ;;  %9950 = vmatprep.mubr.msk.bf16.mxu0 %vm11213_vm0, %v11212_v0 }
0x122f   :  { %v3246_v42 = vadd.f32 %v9083_v53, %v3245_v63  ;;  %v9933_v23 = vpop.f32.mrb[91].mxu1 }
0x1231   :  { %v3313_v5 = vpack.c.bf16 %v3246_v42, %v3243_v45 }
0x1233   :  { %3676 = vrot.lane.b32.xlu0 %v3313_v5, %s11216_s15  ;;  %3433 = vrot.lane.b32.xlu1 %v3313_v5, %s11215_s14  ;;  %v3319_v38 = vsel %vm236_vm2, %v3313_v5, 0 }
0x1234   :  { %9943 = vmatpush3.bf16.xpose.msra.mxu1 %v3319_v38 }
0x1235   :  { %9954 = vmatprep.subr.bf16.mxu1 %v11212_v0 }
0x1237   :  { %3797 = vrot.lane.b32.xlu0 %v3313_v5, %s11217_s16  ;;  %3555 = vrot.lane.b32.xlu1 %v3313_v5, %s11214_s13 }
0x123b   :  { %3918 = vrot.lane.b32.xlu0 %v3313_v5, %s11218_s17  ;;  %3553 = vrot.lane.b32.xlu1 %v3312_v20, %s11214_s13 }
0x123c   :  { %9945 = vmatmul.mubr.msk.bf16.vlgmr.msra.gmra.mrb[92].mxu1 %vm236_vm2, %v3312_v20 }
0x123d   :  { %9956 = vmatprep.mubr.msk.bf16.mxu1 %vm11213_vm0, %v11212_v0 }
0x123f   :  { %4039 = vrot.lane.b32.xlu0 %v3313_v5, %s11219_s18  ;;  %3674 = vrot.lane.b32.xlu1 %v3312_v20, %s11216_s15 }
0x1243   :  { %4160 = vrot.lane.b32.xlu0 %v3313_v5, %s11220_s19  ;;  %3795 = vrot.lane.b32.xlu1 %v3312_v20, %s11217_s16 }
0x1247   :  { %3916 = vrot.lane.b32.xlu1 %v3312_v20, %s11218_s17 }
0x124b   :  { %4037 = vrot.lane.b32.xlu1 %v3312_v20, %s11219_s18 }
0x124f   :  { %4158 = vrot.lane.b32.xlu1 %v3312_v20, %s11220_s19 }
0x129d   :  { %v3431_v30 = vpop.permute.xlu0 %3430 }
0x12a5   :  { %v3434_v55 = vpop.permute.xlu1 %3433  ;;  %v3677_v56 = vpop.permute.xlu0 %3676 }
0x12a6   :  { %v3439_v14 = vsel %vm236_vm2, %v3434_v55, 0  ;;  %v3682_v49 = vsel %vm236_vm2, %v3677_v56, 0 }
0x12a7   :  { %9955 = vmatpush3.bf16.xpose.msra.mxu1 %v3439_v14 }
0x12a8   :  { %9966 = vmatprep.subr.bf16.mxu1 %v11212_v0 }
0x12a9   :  { %v3556_v61 = vpop.permute.xlu1 %3555  ;;  %v3798_v16 = vpop.permute.xlu0 %3797 }
0x12aa   :  { %v3561_v11 = vsel %vm236_vm2, %v3556_v61, 0  ;;  %v3803_v21 = vsel %vm236_vm2, %v3798_v16, 0 }
0x12ad   :  { %v3554_v52 = vpop.permute.xlu1 %3553  ;;  %v3919_v6 = vpop.permute.xlu0 %3918 }
0x12ae   :  { %9957 = vmatmul.mubr.msk.bf16.vlgmr.msra.gmra.mrb[96].mxu1 %vm236_vm2, %v3431_v30  ;;  %v3924_v58 = vsel %vm236_vm2, %v3919_v6, 0 }
0x12af   :  { %9967 = vmatpush3.bf16.xpose.msra.mxu1 %v3561_v11  ;;  %9968 = vmatprep.mubr.msk.bf16.mxu1 %vm11213_vm0, %v11212_v0 }
0x12b0   :  { %9978 = vmatprep.subr.bf16.mxu1 %v11212_v0 }
0x12b1   :  { %v3675_v59 = vpop.permute.xlu1 %3674  ;;  %v4040_v57 = vpop.permute.xlu0 %4039 }
0x12b2   :  { %v4045_v2 = vsel %vm236_vm2, %v4040_v57, 0 }
0x12b5   :  { %v3796_v24 = vpop.permute.xlu1 %3795  ;;  %v4161_v7 = vpop.permute.xlu0 %4160 }
0x12b6   :  { %9969 = vmatmul.mubr.msk.bf16.vlgmr.msra.gmra.mrb[100].mxu1 %vm236_vm2, %v3554_v52  ;;  %v4166_v18 = vsel %vm236_vm2, %v4161_v7, 0 }
0x12b7   :  { %9979 = vmatpush3.bf16.xpose.msra.mxu1 %v3682_v49  ;;  %9980 = vmatprep.mubr.msk.bf16.mxu1 %vm11213_vm0, %v11212_v0 }
0x12b8   :  { %9990 = vmatprep.subr.bf16.mxu1 %v11212_v0 }
0x12b9   :  { %v3917_v4 = vpop.permute.xlu1 %3916 }
0x12bd   :  { %v4038_v13 = vpop.permute.xlu1 %4037 }
0x12be   :  { %9981 = vmatmul.mubr.msk.bf16.vlgmr.msra.gmra.mrb[104].mxu1 %vm236_vm2, %v3675_v59 }
0x12bf   :  { %9991 = vmatpush3.bf16.xpose.msra.mxu1 %v3803_v21  ;;  %9992 = vmatprep.mubr.msk.bf16.mxu1 %vm11213_vm0, %v11212_v0 }
0x12c0   :  { %10002 = vmatprep.subr.bf16.mxu1 %v11212_v0 }
0x12c1   :  { %v4159_v48 = vpop.permute.xlu1 %4158 }
0x12c6   :  { %9993 = vmatmul.mubr.msk.bf16.vlgmr.msra.gmra.mrb[108].mxu1 %vm236_vm2, %v3796_v24 }
0x12c7   :  { %10003 = vmatpush3.bf16.xpose.msra.mxu1 %v3924_v58  ;;  %10004 = vmatprep.mubr.msk.bf16.mxu1 %vm11213_vm0, %v11212_v0 }
0x12c8   :  { %10014 = vmatprep.subr.bf16.mxu1 %v11212_v0 }
0x12ce   :  { %10005 = vmatmul.mubr.msk.bf16.vlgmr.msra.gmra.mrb[112].mxu1 %vm236_vm2, %v3917_v4 }
0x12cf   :  { %10015 = vmatpush3.bf16.xpose.msra.mxu1 %v4045_v2  ;;  %10016 = vmatprep.mubr.msk.bf16.mxu1 %vm11213_vm0, %v11212_v0 }
0x12d0   :  { %10026 = vmatprep.subr.bf16.mxu1 %v11212_v0 }
0x12d6   :  { %10017 = vmatmul.mubr.msk.bf16.vlgmr.msra.gmra.mrb[116].mxu1 %vm236_vm2, %v4038_v13 }
0x12d7   :  { %10027 = vmatpush3.bf16.xpose.msra.mxu1 %v4166_v18  ;;  %10028 = vmatprep.mubr.msk.bf16.mxu1 %vm11213_vm0, %v11212_v0 }
0x12d8   :  { %10038 = vmatprep.subr.bf16.mxu1 %v11212_v0 }
0x12de   :  { %10029 = vmatmul.mubr.msk.bf16.vlgmr.msra.gmra.mrb[120].mxu1 %vm236_vm2, %v4159_v48 }
0x12df   :  { %10042 = vmatprep.mubr.msk.bf16.mxu1 %vm11213_vm0, %v11212_v0 }
0x12f8   :  { %v12247_v19 = vpop.f32.mrb[88].mxu0 }
0x12f9   :  { %v9916_v32 = vpop.f32.mrb[89].mxu0 }
0x12fa   :  { %v12249_v8 = vpop.f32.mrb[90].mxu0 }
0x12fb   :  { %v9917_v10 = vpop.f32.mrb[91].mxu0 }
0x1300   :  { %v3305_v44 = vpop.f32.mrb[92].mxu0 }
0x1301   :  { %v3306_v3 = vadd.f32 %v9091_v54, %v3305_v44  ;;  %v9940_v17 = vpop.f32.mrb[93].mxu0 }
0x1302   :  { %v3308_v37 = vpop.f32.mrb[94].mxu0 }
0x1303   :  { %v3309_v1 = vadd.f32 %v9091_v54, %v3308_v37  ;;  %v9941_v39 = vpop.f32.mrb[95].mxu0 }
0x1305   :  { %v12254_v36 = vpack.c.bf16 %v3309_v1, %v3306_v3 }
0x1307   :  { %9949 = vmatpush3.bf16.msra.mxu0 %v12254_v36 }
0x1308   :  { %9960 = vmatprep.subr.bf16.mxu0 %v11212_v0 }
0x130f   :  { %v3355_v22 = vpop.f32.mrb[92].mxu1 }
0x1310   :  { %v3356_v12 = vadd.f32 %v3355_v22, %v12261_v35  ;;  %v9946_v15 = vpop.f32.mrb[93].mxu1 }
0x1311   :  { %v3358_v60 = vpop.f32.mrb[94].mxu1 }
0x1312   :  { %v3359_v43 = vadd.f32 %v3358_v60, %v12266_v41  ;;  %v9947_v46 = vpop.f32.mrb[95].mxu1  ;;  %v3362_v29 = vsel %vm284_vm3, %v3356_v12, -inf }
0x1313   :  { %3363 = vmax.xlane.f32.xlu0 %v3362_v29 }
0x1314   :  { %v3365_v47 = vsel %vm284_vm3, %v3359_v43, -inf }
0x1315   :  { %3366 = vmax.xlane.f32.xlu1 %v3365_v47 }
0x1326   :  { %3506 = vrot.lane.b32.xlu1 %v12254_v36, %s11215_s14 }
0x1381   :  { %v3475_v26 = vpop.f32.mrb[96].mxu1 }
0x1382   :  { %v12275_v28 = vadd.f32 %v3475_v26, %v12261_v35  ;;  %v9958_v50 = vpop.f32.mrb[97].mxu1 }
0x1383   :  { %v3478_v62 = vpop.f32.mrb[98].mxu1 }
0x1384   :  { %v12278_v31 = vadd.f32 %v3478_v62, %v12266_v41  ;;  %v9959_v25 = vpop.f32.mrb[99].mxu1  ;;  %v3482_v34 = vsel %vm284_vm3, %v12275_v28, -inf }
0x1385   :  { %3483 = vmax.xlane.f32.xlu0 %v3482_v34 }
0x1386   :  { %v3485_v51 = vsel %vm284_vm3, %v12278_v31, -inf }
0x1389   :  { %3486 = vmax.xlane.f32.xlu0 %v3485_v51  ;;  %v3597_v20 = vpop.f32.mrb[100].mxu1 }
0x138a   :  { %v12285_v53 = vadd.f32 %v3597_v20, %v12261_v35  ;;  %v9970_v33 = vpop.f32.mrb[101].mxu1 }
0x138b   :  { %v3600_v40 = vpop.f32.mrb[102].mxu1 }
0x138c   :  { %v12288_v63 = vadd.f32 %v3600_v40, %v12266_v41  ;;  %v9971_v45 = vpop.f32.mrb[103].mxu1  ;;  %v3604_v42 = vsel %vm284_vm3, %v12285_v53, -inf }
0x138d   :  { %3605 = vmax.xlane.f32.xlu1 %v3604_v42 }
0x138e   :  { %v3607_v23 = vsel %vm284_vm3, %v12288_v63, -inf }
0x138f   :  { %3608 = vmax.xlane.f32.xlu0 %v3607_v23 }
0x1391   :  { %v3718_v5 = vpop.f32.mrb[104].mxu1 }
0x1392   :  { %v12295_v38 = vadd.f32 %v3718_v5, %v12261_v35  ;;  %v9982_v55 = vpop.f32.mrb[105].mxu1 }
0x1393   :  { %v3721_v14 = vpop.f32.mrb[106].mxu1 }
0x1394   :  { %v12298_v61 = vadd.f32 %v3721_v14, %v12266_v41  ;;  %v9983_v30 = vpop.f32.mrb[107].mxu1  ;;  %v3725_v11 = vsel %vm284_vm3, %v12295_v38, -inf }
0x1395   :  { %3726 = vmax.xlane.f32.xlu1 %v3725_v11 }
0x1396   :  { %v3728_v56 = vsel %vm284_vm3, %v12298_v61, -inf }
0x1397   :  { %3729 = vmax.xlane.f32.xlu0 %v3728_v56 }
0x1399   :  { %v3839_v52 = vpop.f32.mrb[108].mxu1 }
0x139a   :  { %v12305_v49 = vadd.f32 %v3839_v52, %v12261_v35  ;;  %v9994_v16 = vpop.f32.mrb[109].mxu1 }
0x139b   :  { %v3842_v59 = vpop.f32.mrb[110].mxu1 }
0x139c   :  { %v12308_v21 = vadd.f32 %v3842_v59, %v12266_v41  ;;  %v9995_v6 = vpop.f32.mrb[111].mxu1  ;;  %v3846_v24 = vsel %vm284_vm3, %v12305_v49, -inf }
0x139d   :  { %3847 = vmax.xlane.f32.xlu1 %v3846_v24 }
0x139e   :  { %v3849_v58 = vsel %vm284_vm3, %v12308_v21, -inf }
0x139f   :  { %3850 = vmax.xlane.f32.xlu0 %v3849_v58 }
0x13a0   :  { %v3364_v57 = vpop.xlane.xlu0 %3363 }
0x13a1   :  { %v3368_v4 = vsub.f32 %v3356_v12, %v3364_v57  ;;  %v3960_v2 = vpop.f32.mrb[112].mxu1 }
0x13a2   :  { %v3367_v7 = vpop.xlane.xlu1 %3366  ;;  %v12315_v13 = vadd.f32 %v3960_v2, %v12261_v35  ;;  %v10006_v18 = vpop.f32.mrb[113].mxu1 }
0x13a3   :  { %v3370_v48 = vmul.f32 1.442695, %v3368_v4  ;;  %v3369_v32 = vsub.f32 %v3359_v43, %v3367_v7  ;;  %v3963_v10 = vpop.f32.mrb[114].mxu1 }
0x13a4   :  { %v12318_v54 = vadd.f32 %v3963_v10, %v12266_v41  ;;  %v10007_v44 = vpop.f32.mrb[115].mxu1  ;;  %v3967_v3 = vsel %vm284_vm3, %v12315_v13, -inf }
0x13a5   :  { %10918 = vpow2.f32 %v3370_v48  ;;  %v3372_v17 = vmul.f32 1.442695, %v3369_v32  ;;  %3968 = vmax.xlane.f32.xlu1 %v3967_v3 }
0x13a6   :  { %v3970_v37 = vsel %vm284_vm3, %v12318_v54, -inf  ;;  %v12357_v23 = vpop.permute.xlu1 %3506 }
0x13a7   :  { %10920 = vpow2.f32 %v3372_v17  ;;  %3971 = vmax.xlane.f32.xlu0 %v3970_v37 }
0x13a9   :  { %v4081_v1 = vpop.f32.mrb[116].mxu1 }
0x13aa   :  { %v12325_v39 = vadd.f32 %v4081_v1, %v12261_v35  ;;  %v10018_v22 = vpop.f32.mrb[117].mxu1 }
0x13ab   :  { %v4084_v12 = vpop.f32.mrb[118].mxu1 }
0x13ac   :  { %v12328_v15 = vadd.f32 %v4084_v12, %v12266_v41  ;;  %v10019_v60 = vpop.f32.mrb[119].mxu1  ;;  %v4088_v43 = vsel %vm284_vm3, %v12325_v39, -inf }
0x13ad   :  { %4089 = vmax.xlane.f32.xlu1 %v4088_v43 }
0x13ae   :  { %v4091_v46 = vsel %vm284_vm3, %v12328_v15, -inf }
0x13af   :  { %v12334_v29 = vpop.eup %10918  ;;  %4092 = vmax.xlane.f32.xlu0 %v4091_v46 }
0x13b0   :  { %v3374_v47 = vsel %vm284_vm3, %v12334_v29, 0.0 }
0x13b1   :  { %v12338_v26 = vpop.eup %10920  ;;  %v4202_v50 = vpop.f32.mrb[120].mxu1  ;;  %3375 = vadd.xlane.f32.xlu1 %v3374_v47 }
0x13b2   :  { %v12341_v62 = vadd.f32 %v4202_v50, %v12261_v35  ;;  %v10030_v25 = vpop.f32.mrb[121].mxu1  ;;  %v3377_v34 = vsel %vm284_vm3, %v12338_v26, 0.0 }
0x13b3   :  { %3378 = vadd.xlane.f32.xlu0 %v3377_v34  ;;  %v4205_v51 = vpop.f32.mrb[122].mxu1 }
0x13b4   :  { %v12346_v20 = vadd.f32 %v4205_v51, %v12266_v41  ;;  %v10031_v33 = vpop.f32.mrb[123].mxu1  ;;  %v4209_v40 = vsel %vm284_vm3, %v12341_v62, -inf }
0x13b5   :  { %4210 = vmax.xlane.f32.xlu1 %v4209_v40 }
0x13b6   :  { %v4212_v45 = vsel %vm284_vm3, %v12346_v20, -inf }
0x13b7   :  { %4213 = vmax.xlane.f32.xlu0 %v4212_v45 }
0x13c6   :  { %3748 = vrot.lane.b32.xlu1 %v12254_v36, %s11216_s15 }
0x13cd   :  { %3627 = vrot.lane.b32.xlu0 %v12254_v36, %s11214_s13 }
0x1412   :  { %v3484_v35 = vpop.xlane.xlu0 %3483 }
0x1413   :  { %v3488_v42 = vsub.f32 %v12275_v28, %v3484_v35 }
0x1415   :  { %v3490_v41 = vmul.f32 1.442695, %v3488_v42 }
0x1416   :  { %v3487_v5 = vpop.xlane.xlu0 %3486 }
0x1417   :  { %10922 = vpow2.f32 %v3490_v41  ;;  %v3489_v55 = vsub.f32 %v12278_v31, %v3487_v5 }
0x1419   :  { %v3492_v14 = vmul.f32 1.442695, %v3489_v55 }
0x141a   :  { %v3606_v30 = vpop.xlane.xlu1 %3605 }
0x141b   :  { %10924 = vpow2.f32 %v3492_v14  ;;  %v3610_v11 = vsub.f32 %v12285_v53, %v3606_v30 }
0x141c   :  { %v3609_v56 = vpop.xlane.xlu0 %3608 }
0x141d   :  { %v3612_v52 = vmul.f32 1.442695, %v3610_v11  ;;  %v3611_v16 = vsub.f32 %v12288_v63, %v3609_v56 }
0x141f   :  { %10926 = vpow2.f32 %v3612_v52  ;;  %v3614_v59 = vmul.f32 1.442695, %v3611_v16 }
0x1421   :  { %v12362_v6 = vpop.eup %10922  ;;  %10928 = vpow2.f32 %v3614_v59 }
0x1422   :  { %v3727_v28 = vpop.xlane.xlu1 %3726  ;;  %v3494_v24 = vsel %vm284_vm3, %v12362_v6, 0.0 }
0x1423   :  { %v3731_v31 = vsub.f32 %v12295_v38, %v3727_v28  ;;  %3495 = vadd.xlane.f32.xlu1 %v3494_v24 }
0x1424   :  { %v3730_v58 = vpop.xlane.xlu0 %3729 }
0x1425   :  { %v12367_v57 = vpop.eup %10924  ;;  %v3733_v53 = vmul.f32 1.442695, %v3731_v31  ;;  %v3732_v4 = vsub.f32 %v12298_v61, %v3730_v58 }
0x1426   :  { %v3497_v63 = vsel %vm284_vm3, %v12367_v57, 0.0 }
0x1427   :  { %10930 = vpow2.f32 %v3733_v53  ;;  %v3735_v2 = vmul.f32 1.442695, %v3732_v4  ;;  %3498 = vadd.xlane.f32.xlu0 %v3497_v63 }
0x1429   :  { %v12372_v7 = vpop.eup %10926  ;;  %10932 = vpow2.f32 %v3735_v2 }
0x142a   :  { %v3848_v18 = vpop.xlane.xlu1 %3847  ;;  %v3616_v38 = vsel %vm284_vm3, %v12372_v7, 0.0 }
0x142b   :  { %v12376_v48 = vpop.eup %10928  ;;  %v3852_v32 = vsub.f32 %v12305_v49, %v3848_v18  ;;  %3617 = vadd.xlane.f32.xlu1 %v3616_v38 }
0x142c   :  { %v3851_v10 = vpop.xlane.xlu0 %3850  ;;  %v3619_v61 = vsel %vm284_vm3, %v12376_v48, 0.0 }
0x142d   :  { %v3854_v44 = vmul.f32 1.442695, %v3852_v32  ;;  %v3853_v3 = vsub.f32 %v12308_v21, %v3851_v10  ;;  %3620 = vadd.xlane.f32.xlu0 %v3619_v61 }
0x142f   :  { %10934 = vpow2.f32 %v3854_v44  ;;  %v3856_v17 = vmul.f32 1.442695, %v3853_v3 }
0x1431   :  { %v12382_v37 = vpop.eup %10930  ;;  %10936 = vpow2.f32 %v3856_v17 }
0x1432   :  { %v3969_v1 = vpop.xlane.xlu1 %3968  ;;  %v3737_v22 = vsel %vm284_vm3, %v12382_v37, 0.0 }
0x1433   :  { %v12386_v12 = vpop.eup %10932  ;;  %v3973_v49 = vsub.f32 %v12315_v13, %v3969_v1  ;;  %3738 = vadd.xlane.f32.xlu1 %v3737_v22 }
0x1434   :  { %v3972_v60 = vpop.xlane.xlu0 %3971  ;;  %v3740_v43 = vsel %vm284_vm3, %v12386_v12, 0.0 }
0x1435   :  { %v3975_v21 = vmul.f32 1.442695, %v3973_v49  ;;  %v3974_v46 = vsub.f32 %v12318_v54, %v3972_v60  ;;  %3741 = vadd.xlane.f32.xlu0 %v3740_v43 }
0x1437   :  { %10938 = vpow2.f32 %v3975_v21  ;;  %v3977_v47 = vmul.f32 1.442695, %v3974_v46 }
0x1439   :  { %v12392_v50 = vpop.eup %10934  ;;  %10940 = vpow2.f32 %v3977_v47 }
0x143a   :  { %v4090_v25 = vpop.xlane.xlu1 %4089  ;;  %v3858_v34 = vsel %vm284_vm3, %v12392_v50, 0.0 }
0x143b   :  { %v12396_v51 = vpop.eup %10936  ;;  %3859 = vadd.xlane.f32.xlu1 %v3858_v34 }
0x143c   :  { %v4093_v13 = vpop.xlane.xlu0 %4092  ;;  %v3861_v33 = vsel %vm284_vm3, %v12396_v51, 0.0 }
0x143d   :  { %v4095_v40 = vsub.f32 %v12328_v15, %v4093_v13  ;;  %3862 = vadd.xlane.f32.xlu0 %v3861_v33 }
0x143e   :  { %v3376_v54 = vpop.xlane.xlu1 %3375 }
0x143f   :  { %v4098_v45 = vmul.f32 1.442695, %v4095_v40  ;;  %10942 = vrcp.f32 %v3376_v54 }
0x1440   :  { %v3379_v35 = vpop.xlane.xlu0 %3378 }
0x1441   :  { %v12401_v42 = vpop.eup %10938  ;;  %10944 = vpow2.f32 %v4098_v45 }
0x1442   :  { %10946 = vrcp.f32 %v3379_v35  ;;  %v4211_v41 = vpop.xlane.xlu1 %4210  ;;  %v3979_v5 = vsel %vm284_vm3, %v12401_v42, 0.0 }
0x1443   :  { %v12405_v55 = vpop.eup %10940  ;;  %v4215_v14 = vsub.f32 %v12341_v62, %v4211_v41  ;;  %3980 = vadd.xlane.f32.xlu0 %v3979_v5 }
0x1444   :  { %v4214_v30 = vpop.xlane.xlu0 %4213  ;;  %v3982_v56 = vsel %vm284_vm3, %v12405_v55, 0.0 }
0x1445   :  { %v4217_v15 = vmul.f32 1.442695, %v4215_v14  ;;  %v4216_v11 = vsub.f32 %v12346_v20, %v4214_v30 }
0x1446   :  { %v3749_v18 = vpop.permute.xlu1 %3748 }
0x1447   :  { %10948 = vpow2.f32 %v4217_v15  ;;  %v4219_v52 = vmul.f32 1.442695, %v4216_v11  ;;  %3983 = vadd.xlane.f32.xlu0 %v3982_v56 }
0x1448   :  { %v3628_v38 = vpop.permute.xlu0 %3627 }
0x1449   :  { %10950 = vpow2.f32 %v4219_v52  ;;  %v10943_v16 = vpop.eup %10942 }
0x144a   :  { %v3382_v24 = vmul.f32 %v10943_v16, %v12334_v29 }
0x144b   :  { %v12411_v59 = vpop.eup %10944 }
0x144c   :  { %v10947_v28 = vpop.eup %10946  ;;  %3869 = vrot.lane.b32.xlu1 %v12254_v36, %s11217_s16  ;;  %v4103_v62 = vsel %vm284_vm3, %v12411_v59, 0.0 }
0x144d   :  { %v3383_v20 = vmul.f32 %v10947_v28, %v12338_v26  ;;  %4104 = vadd.xlane.f32.xlu0 %v4103_v62  ;;  %v4094_v26 = vsub.f32 %v12325_v39, %v4090_v25 }
0x144f   :  { %v3384_v31 = vpack.c.bf16 %v3383_v20, %v3382_v24  ;;  %v4096_v63 = vmul.f32 1.442695, %v4094_v26 }
0x1451   :  { %v12419_v58 = vpop.eup %10948  ;;  %9951 = vmatmul.mubr.msk.bf16.vlgmr.msra.gmra.mrb[96].mxu0 %vm284_vm3, %v3384_v31  ;;  %10952 = vpow2.f32 %v4096_v63 }
0x1452   :  { %9961 = vmatpush3.bf16.msra.mxu0 %v12357_v23  ;;  %v4221_v53 = vsel %vm284_vm3, %v12419_v58, 0.0  ;;  %9962 = vmatprep.mubr.msk.bf16.mxu0 %vm11213_vm0, %v11212_v0 }
0x1453   :  { %v12427_v4 = vpop.eup %10950  ;;  %4222 = vadd.xlane.f32.xlu0 %v4221_v53  ;;  %9972 = vmatprep.subr.bf16.mxu0 %v11212_v0 }
0x1454   :  { %v4224_v29 = vsel %vm284_vm3, %v12427_v4, 0.0 }
0x1457   :  { %4225 = vadd.xlane.f32.xlu0 %v4224_v29 }
0x145b   :  { %v12433_v23 = vpop.eup %10952 }
0x145c   :  { %v4100_v2 = vsel %vm284_vm3, %v12433_v23, 0.0 }
0x146d   :  { %3990 = vrot.lane.b32.xlu0 %v12254_v36, %s11218_s17 }
0x1470   :  { %4101 = vadd.xlane.f32.xlu1 %v4100_v2 }
0x1481   :  { %4111 = vrot.lane.b32.xlu1 %v12254_v36, %s11219_s18 }
0x1485   :  { %4232 = vrot.lane.b32.xlu1 %v12254_v36, %s11220_s19 }
0x14b0   :  { %v3496_v39 = vpop.xlane.xlu1 %3495 }
0x14b1   :  { %10954 = vrcp.f32 %v3496_v39 }
0x14b4   :  { %v3499_v32 = vpop.xlane.xlu0 %3498 }
0x14b5   :  { %10956 = vrcp.f32 %v3499_v32 }
0x14b8   :  { %v3618_v10 = vpop.xlane.xlu1 %3617 }
0x14b9   :  { %10958 = vrcp.f32 %v3618_v10 }
0x14ba   :  { %v3621_v61 = vpop.xlane.xlu0 %3620 }
0x14bb   :  { %10960 = vrcp.f32 %v3621_v61  ;;  %v10955_v44 = vpop.eup %10954 }
0x14bc   :  { %v3502_v17 = vmul.f32 %v10955_v44, %v12362_v6 }
0x14bf   :  { %v10957_v3 = vpop.eup %10956 }
0x14c0   :  { %v3503_v1 = vmul.f32 %v10957_v3, %v12367_v57  ;;  %v3739_v22 = vpop.xlane.xlu1 %3738 }
0x14c1   :  { %10962 = vrcp.f32 %v3739_v22 }
0x14c2   :  { %v3742_v49 = vpop.xlane.xlu0 %3741  ;;  %v3504_v36 = vpack.c.bf16 %v3503_v1, %v3502_v17 }
0x14c3   :  { %10964 = vrcp.f32 %v3742_v49  ;;  %v10959_v60 = vpop.eup %10958 }
0x14c4   :  { %9963 = vmatmul.mubr.msk.bf16.vlgmr.msra.gmra.mrb[100].mxu0 %vm284_vm3, %v3504_v36  ;;  %v3624_v6 = vmul.f32 %v10959_v60, %v12372_v7 }
0x14c5   :  { %v10961_v43 = vpop.eup %10960  ;;  %9973 = vmatpush3.bf16.msra.mxu0 %v3628_v38  ;;  %9974 = vmatprep.mubr.msk.bf16.mxu0 %vm11213_vm0, %v11212_v0 }
0x14c6   :  { %v3625_v21 = vmul.f32 %v10961_v43, %v12376_v48  ;;  %9984 = vmatprep.subr.bf16.mxu0 %v11212_v0 }
0x14c8   :  { %v3860_v57 = vpop.xlane.xlu1 %3859  ;;  %v3626_v47 = vpack.c.bf16 %v3625_v21, %v3624_v6 }
0x14c9   :  { %10966 = vrcp.f32 %v3860_v57 }
0x14ca   :  { %v3863_v46 = vpop.xlane.xlu0 %3862 }
0x14cb   :  { %10968 = vrcp.f32 %v3863_v46  ;;  %v10963_v25 = vpop.eup %10962 }
0x14cc   :  { %9975 = vmatmul.mubr.msk.bf16.vlgmr.msra.gmra.mrb[104].mxu0 %vm284_vm3, %v3626_v47  ;;  %v3745_v48 = vmul.f32 %v10963_v25, %v12382_v37  ;;  %v3870_v54 = vpop.permute.xlu1 %3869 }
0x14cd   :  { %v10965_v34 = vpop.eup %10964  ;;  %9985 = vmatpush3.bf16.msra.mxu0 %v3749_v18  ;;  %9986 = vmatprep.mubr.msk.bf16.mxu0 %vm11213_vm0, %v11212_v0 }
0x14ce   :  { %v3746_v13 = vmul.f32 %v10965_v34, %v12386_v12  ;;  %9996 = vmatprep.subr.bf16.mxu0 %v11212_v0 }
0x14d0   :  { %v3981_v7 = vpop.xlane.xlu0 %3980  ;;  %v3747_v33 = vpack.c.bf16 %v3746_v13, %v3745_v48 }
0x14d3   :  { %v10967_v40 = vpop.eup %10966 }
0x14d4   :  { %9987 = vmatmul.mubr.msk.bf16.vlgmr.msra.gmra.mrb[108].mxu0 %vm284_vm3, %v3747_v33  ;;  %v3984_v41 = vpop.xlane.xlu0 %3983  ;;  %v3866_v12 = vmul.f32 %v10967_v40, %v12392_v50  ;;  %v10738_v33 = vld [vmem:[%s13835_s5 + $0xb0] sm:$0xff]  }
0x14d5   :  { %v10969_v45 = vpop.eup %10968  ;;  %9997 = vmatpush3.bf16.msra.mxu0 %v3870_v54  ;;  %9998 = vmatprep.mubr.msk.bf16.mxu0 %vm11213_vm0, %v11212_v0  ;;  %10970 = vrcp.f32 %v3984_v41 }
0x14d6   :  { %v3867_v35 = vmul.f32 %v10969_v45, %v12396_v51  ;;  %10008 = vmatprep.subr.bf16.mxu0 %v11212_v0  ;;  %10972 = vrcp.f32 %v3981_v7  ;;  %10039 = vmatpush3.bf16.msra.mxu1 %v10738_v33 }
0x14d7   :  { %10040 = vmatprep.subr.bf16.mxu1 %v11212_v0 }
0x14d8   :  { %v3868_v37 = vpack.c.bf16 %v3867_v35, %v3866_v12  ;;  %v10739_v35 = vld [vmem:[%s13835_s5 + $0xb8] sm:$0xff]  }
0x14da   :  { %v4105_v5 = vpop.xlane.xlu0 %4104  ;;  %10041 = vmatpush3.bf16.msra.mxu1 %v10739_v35  ;;  %v11206_v35 = vld [vmem:[%s13841_s1] sm:$0xff] }
0x14db   :  { %10974 = vrcp.f32 %v4105_v5  ;;  %10054 = vmatprep.subr.bf16.mxu1 %v11212_v0 }
0x14dc   :  { %9999 = vmatmul.mubr.msk.bf16.vlgmr.msra.gmra.mrb[112].mxu0 %vm284_vm3, %v3868_v37 }
0x14dd   :  { %10010 = vmatprep.mubr.msk.bf16.mxu0 %vm11213_vm0, %v11212_v0 }
0x14df   :  { %v10971_v30 = vpop.eup %10970 }
0x14e0   :  { %v4223_v14 = vpop.xlane.xlu0 %4222  ;;  %v10973_v11 = vpop.eup %10972  ;;  %v3988_v51 = vmul.f32 %v10971_v30, %v12405_v55 }
0x14e1   :  { %v3987_v56 = vmul.f32 %v10973_v11, %v12401_v42  ;;  %v9063_v11 = vld [vmem:[%s13837_s9 + $0x31] ss:$0 sm:$0xff] }
0x14e3   :  { %v3989_v50 = vpack.c.bf16 %v3988_v51, %v3987_v56  ;;  %v3065_v51 = vadd.f32 %v9063_v11, %v12247_v19 }
0x14e4   :  { %v4226_v15 = vpop.xlane.xlu0 %4225 }
0x14e5   :  { %v10975_v42 = vpop.eup %10974  ;;  %v3071_v56 = vadd.f32 %v3065_v51, %v12125_v27 }
0x14e6   :  { %v4109_v62 = vmul.f32 %v10975_v42, %v12411_v59 }
0x14e8   :  { %v3991_v52 = vpop.permute.xlu0 %3990 }
0x14e9   :  { %10009 = vmatpush3.bf16.msra.mxu0 %v3991_v52  ;;  %v3075_v52 = vsel %vm62_vm1, %v3071_v56, 0.0 }
0x14ea   :  { %10020 = vmatprep.subr.bf16.mxu0 %v11212_v0 }
0x14ec   :  { %10011 = vmatmul.mubr.msk.bf16.vlgmr.msra.gmra.mrb[116].mxu0 %vm284_vm3, %v3989_v50  ;;  %v3068_v50 = vadd.f32 %v9063_v11, %v12249_v8 }
0x14ed   :  { %10022 = vmatprep.mubr.msk.bf16.mxu0 %vm11213_vm0, %v11212_v0 }
0x14fd   :  { %v4102_v16 = vpop.xlane.xlu1 %4101 }
0x14fe   :  { %10976 = vrcp.f32 %v4102_v16  ;;  %v3072_v16 = vadd.f32 %v3068_v50, %v12127_v9  ;;  %v10741_v50 = vld [vmem:[%s13835_s5 + $0x118] sm:$0xff]  }
0x14ff   :  { %10978 = vrcp.f32 %v4226_v15 }
0x1500   :  { %10980 = vrcp.f32 %v4223_v14 }
0x1501   :  { %v4112_v28 = vpop.permute.xlu1 %4111 }
0x1502   :  { %10021 = vmatpush3.bf16.msra.mxu0 %v4112_v28  ;;  %v3078_v28 = vsel %vm62_vm1, %v3072_v16, 0.0 }
0x1503   :  { %10032 = vmatprep.subr.bf16.mxu0 %v11212_v0 }
0x1505   :  { %v4233_v53 = vpop.permute.xlu1 %4232 }
0x1508   :  { %v10977_v55 = vpop.eup %10976 }
0x1509   :  { %v4108_v24 = vmul.f32 %v10977_v55, %v12433_v23  ;;  %v10979_v31 = vpop.eup %10978 }
0x150a   :  { %v10981_v29 = vpop.eup %10980  ;;  %v4230_v26 = vmul.f32 %v10979_v31, %v12427_v4 }
0x150b   :  { %v4110_v20 = vpack.c.bf16 %v4109_v62, %v4108_v24  ;;  %v4229_v63 = vmul.f32 %v10981_v29, %v12419_v58 }
0x150d   :  { %10023 = vmatmul.mubr.msk.bf16.vlgmr.msra.gmra.mrb[120].mxu0 %vm284_vm3, %v4110_v20  ;;  %v4231_v2 = vpack.c.bf16 %v4230_v26, %v4229_v63 }
0x150e   :  { %10033 = vmatpush3.bf16.msra.mxu0 %v4233_v53  ;;  %10034 = vmatprep.mubr.msk.bf16.mxu0 %vm11213_vm0, %v11212_v0 }
0x150f   :  { %10046 = vmatprep.subr.bf16.mxu0 %v11212_v0 }
0x1515   :  { %10035 = vmatmul.mubr.msk.bf16.vlgmr.msra.gmra.mrb[124].mxu0 %vm284_vm3, %v4231_v2 }
0x1516   :  { %10050 = vmatprep.mubr.msk.bf16.mxu0 %vm11213_vm0, %v11212_v0 }
0x1524   :  { %v12484_v59 = vpop.f32.mrb[96].mxu0 }
0x1525   :  { %v9952_v23 = vpop.f32.mrb[97].mxu0 }
0x1526   :  { %v12486_v18 = vpop.f32.mrb[98].mxu0 }
0x1527   :  { %v9953_v38 = vpop.f32.mrb[99].mxu0 }
0x1597   :  { %v3546_v39 = vpop.f32.mrb[100].mxu0 }
0x1598   :  { %v9964_v32 = vpop.f32.mrb[101].mxu0 }
0x1599   :  { %v3549_v10 = vpop.f32.mrb[102].mxu0 }
0x159a   :  { %v10564_v4 = vpack.i.bf16 %v3549_v10, %v3546_v39  ;;  %v9965_v61 = vpop.f32.mrb[103].mxu0 }
0x159c   :  { %10565 = vrot.lane.b32.xlu1 %v10564_v4, %s11221_s26 }
0x159f   :  { %v3667_v58 = vpop.f32.mrb[104].mxu0 }
0x15a0   :  { %v9976_v44 = vpop.f32.mrb[105].mxu0 }
0x15a1   :  { %v3670_v3 = vpop.f32.mrb[106].mxu0 }
0x15a2   :  { %v10569_v17 = vpack.i.bf16 %v3670_v3, %v3667_v58  ;;  %v9977_v1 = vpop.f32.mrb[107].mxu0 }
0x15a4   :  { %10570 = vrot.lane.b32.xlu1 %v10569_v17, %s11222_s27 }
0x15a7   :  { %v3788_v22 = vpop.f32.mrb[108].mxu0 }
0x15a8   :  { %v9988_v49 = vpop.f32.mrb[109].mxu0 }
0x15a9   :  { %v3791_v36 = vpop.f32.mrb[110].mxu0 }
0x15aa   :  { %v10574_v60 = vpack.i.bf16 %v3791_v36, %v3788_v22  ;;  %v9989_v43 = vpop.f32.mrb[111].mxu0 }
0x15ac   :  { %10575 = vrot.lane.b32.xlu1 %v10574_v60, %s11223_s28 }
0x15af   :  { %v3909_v21 = vpop.f32.mrb[112].mxu0 }
0x15b0   :  { %v10000_v6 = vpop.f32.mrb[113].mxu0 }
0x15b1   :  { %v3912_v57 = vpop.f32.mrb[114].mxu0 }
0x15b2   :  { %v10579_v46 = vpack.i.bf16 %v3912_v57, %v3909_v21  ;;  %v10001_v47 = vpop.f32.mrb[115].mxu0 }
0x15b4   :  { %10580 = vrot.lane.b32.xlu0 %v10579_v46, %s11224_s29 }
0x15bf   :  { %v4030_v25 = vpop.f32.mrb[116].mxu0 }
0x15c0   :  { %v10012_v34 = vpop.f32.mrb[117].mxu0 }
0x15c1   :  { %v4033_v13 = vpop.f32.mrb[118].mxu0 }
0x15c2   :  { %v10584_v48 = vpack.i.bf16 %v4033_v13, %v4030_v25  ;;  %v10013_v7 = vpop.f32.mrb[119].mxu0 }
0x15c4   :  { %10585 = vrot.lane.b32.xlu1 %v10584_v48, %s11225_s30  ;;  %v9115_v48 = vld [vmem:[%s13837_s9 + $0xb] ss:$0 sm:$0xff] }
0x15e0   :  { %v4151_v40 = vpop.f32.mrb[120].mxu0 }
0x15e1   :  { %v10024_v54 = vpop.f32.mrb[121].mxu0 }
0x15e2   :  { %v4154_v45 = vpop.f32.mrb[122].mxu0 }
0x15e3   :  { %v10589_v41 = vpack.i.bf16 %v4154_v45, %v4151_v40  ;;  %v10025_v12 = vpop.f32.mrb[123].mxu0 }
0x15e5   :  { %10590 = vrot.lane.b32.xlu0 %v10589_v41, %s11226_s22 }
0x15e8   :  { %v4272_v37 = vpop.f32.mrb[124].mxu0 }
0x15e9   :  { %v10036_v5 = vpop.f32.mrb[125].mxu0 }
0x15ea   :  { %v4275_v14 = vpop.f32.mrb[126].mxu0 }
0x15eb   :  { %v10594_v30 = vpack.i.bf16 %v4275_v14, %v4272_v37  ;;  %v10037_v15 = vpop.f32.mrb[127].mxu0  ;;  %v11207_v14 = vld [vmem:[%s13841_s1 + $0x8] sm:$0xff] }
0x15ed   :  { %10595 = vrot.lane.b32.xlu1 %v10594_v30, %s13848_s24 }
0x1604   :  { %3076 = vadd.xlane.f32.xlu0 %v3075_v52  ;;  %v10740_v52 = vld [vmem:[%s13835_s5 + $0x110] sm:$0xff]  }
0x160e   :  { %v10566_v42 = vpop.permute.xlu1 %10565 }
0x160f   :  { %v10568_v20 = vunpack.i.h.bf16 %v10566_v42  ;;  %v10567_v31 = vunpack.i.l.bf16 %v10566_v42 }
0x1611   :  { %3079 = vadd.xlane.f32.xlu1 %v3078_v28  ;;  %v4336_v9 = vsel %vm236_vm2, %v12486_v18, %v10568_v20  ;;  %v4335_v8 = vsel %vm236_vm2, %v12484_v59, %v10567_v31 }
0x1616   :  { %v10571_v55 = vpop.permute.xlu1 %10570 }
0x1617   :  { %v10573_v53 = vunpack.i.h.bf16 %v10571_v55  ;;  %v10572_v19 = vunpack.i.l.bf16 %v10571_v55 }
0x1619   :  { %v4338_v32 = vsel %vm1260_vm4, %v4336_v9, %v10573_v53  ;;  %v4337_v10 = vsel %vm1260_vm4, %v4335_v8, %v10572_v19 }
0x161e   :  { %v10576_v62 = vpop.permute.xlu1 %10575 }
0x161f   :  { %v10578_v27 = vunpack.i.h.bf16 %v10576_v62  ;;  %v10577_v26 = vunpack.i.l.bf16 %v10576_v62 }
0x1621   :  { %v4340_v58 = vsel %vm1263_vm5, %v4338_v32, %v10578_v27  ;;  %v4339_v44 = vsel %vm1263_vm5, %v4337_v10, %v10577_v26 }
0x1626   :  { %v10581_v24 = vpop.permute.xlu0 %10580 }
0x1627   :  { %v10583_v2 = vunpack.i.h.bf16 %v10581_v24  ;;  %v10582_v23 = vunpack.i.l.bf16 %v10581_v24 }
0x1629   :  { %v4342_v3 = vsel %vm284_vm3, %v4340_v58, %v10583_v2  ;;  %v4341_v17 = vsel %vm284_vm3, %v4339_v44, %v10582_v23 }
0x1636   :  { %v10586_v29 = vpop.permute.xlu1 %10585 }
0x1637   :  { %v10588_v38 = vunpack.i.h.bf16 %v10586_v29  ;;  %v10587_v39 = vunpack.i.l.bf16 %v10586_v29 }
0x1639   :  { %v4344_v1 = vsel %vm1268_vm6, %v4342_v3, %v10588_v38  ;;  %v4343_v59 = vsel %vm1268_vm6, %v4341_v17, %v10587_v39  ;;  %v9069_v38 = vld [vmem:[%s13837_s9 + $0x1b] ss:$0 sm:$0xff]  ;;  %v10742_v17 = vld [vmem:[%s13835_s5 + $0x100] sm:$0xff]  }
0x163a   :  { %10047 = vmatpush3.bf16.msra.mxu0 %v10742_v17 }
0x163b   :  { %10048 = vmatprep.subr.bf16.mxu0 %v11212_v0 }
0x1657   :  { %v10591_v63 = vpop.permute.xlu0 %10590 }
0x1658   :  { %v10593_v4 = vunpack.i.h.bf16 %v10591_v63  ;;  %v10592_v61 = vunpack.i.l.bf16 %v10591_v63 }
0x165a   :  { %v4346_v36 = vsel %vm1271_vm7, %v4344_v1, %v10593_v4  ;;  %v4345_v60 = vsel %vm1271_vm7, %v4343_v59, %v10592_v61  ;;  %v9070_v4 = vld [vmem:[%s13837_s9 + $0x25] ss:$0 sm:$0xff] }
0x165f   :  { %v10596_v18 = vpop.permute.xlu1 %10595 }
0x1660   :  { %v10598_v22 = vunpack.i.h.bf16 %v10596_v18  ;;  %v10597_v49 = vunpack.i.l.bf16 %v10596_v18  ;;  %v10743_v18 = vld [vmem:[%s13835_s5 + $0x108] sm:$0xff]  }
0x1661   :  { %10049 = vmatpush3.bf16.msra.mxu0 %v10743_v18 }
0x1662   :  { %v4348_v43 = vsel %vm1274_vm8, %v4346_v36, %v10598_v22  ;;  %v4347_v21 = vsel %vm1274_vm8, %v4345_v60, %v10597_v49  ;;  %10062 = vmatprep.subr.bf16.mxu0 %v11212_v0 }
0x1663   :  { %v4355_v6 = vpack.c.bf16 %v4348_v43, %v4347_v21 }
0x1665   :  { %10043 = vmatmul.mubr.msk.bf16.vlgmr.msra.gmra.mrb[124].mxu1 %vm62_vm1, %v4355_v6  ;;  %v9119_v6 = vld [vmem:[%s13837_s9 + $0x1c] ss:$0 sm:$0xff] }
0x1666   :  { %10058 = vmatprep.mubr.msk.bf16.mxu1 %vm11213_vm0, %v11212_v0  ;;  %10055 = vmatpush3.bf16.msra.mxu1 %v10740_v52 }
0x1667   :  { %10056 = vmatprep.subr.bf16.mxu1 %v11212_v0 }
0x166a   :  { %10057 = vmatpush3.bf16.msra.mxu1 %v10741_v50 }
0x166b   :  { %10070 = vmatprep.subr.bf16.mxu1 %v11212_v0 }
0x1691   :  { %v3077_v57 = vpop.xlane.xlu0 %3076 }
0x1692   :  { %v3081_v46 = vmul.f32 0.03125, %v3077_v57 }
0x1694   :  { %v3083_v47 = vsub.f32 %v3071_v56, %v3081_v46 }
0x1696   :  { %v3085_v25 = vmul.f32 %v3083_v47, %v3083_v47 }
0x1698   :  { %v3087_v34 = vsel %vm62_vm1, %v3085_v25, 0.0  ;;  %v9120_v25 = vld [vmem:[%s13837_s9 + $0x26] ss:$0 sm:$0xff] }
0x1699   :  { %3088 = vadd.xlane.f32.xlu1 %v3087_v34 }
0x169e   :  { %v3080_v13 = vpop.xlane.xlu1 %3079 }
0x169f   :  { %v3082_v33 = vmul.f32 0.03125, %v3080_v13 }
0x16a1   :  { %v3084_v5 = vsub.f32 %v3072_v16, %v3082_v33 }
0x16a3   :  { %v3086_v51 = vmul.f32 %v3084_v5, %v3084_v5 }
0x16a5   :  { %v3090_v56 = vsel %vm62_vm1, %v3086_v51, 0.0 }
0x1726   :  { %v3089_v16 = vpop.xlane.xlu1 %3088 }
0x1727   :  { %v3093_v28 = vmul.f32 0.03125, %v3089_v16 }
0x1729   :  { %v3095_v62 = vadd.f32 1e-05, %v3093_v28 }
0x172b   :  { %10982 = vrsqrt.f32 %v3095_v62  ;;  %v9141_v62 = vld [vmem:[%s13837_s9 + $0x12] ss:$0 sm:$0xff] }
0x1735   :  { %v10983_v9 = vpop.eup %10982 }
0x1736   :  { %v3099_v8 = vmul.f32 %v10983_v9, %v3083_v47 }
0x1738   :  { %v4409_v7 = vpop.f32.mrb[124].mxu1  ;;  %v3105_v32 = vmul.f32 %v9069_v38, %v3099_v8 }
0x1739   :  { %v4410_v40 = vadd.f32 %v9115_v48, %v4409_v7  ;;  %v10044_v54 = vpop.f32.mrb[125].mxu1  ;;  %v10744_v7 = vld [vmem:[%s13835_s5 + $0x120] sm:$0xff]  }
0x173a   :  { %v4412_v45 = vpop.f32.mrb[126].mxu1  ;;  %v3111_v58 = vadd.f32 %v9070_v4, %v3105_v32  ;;  %v9133_v54 = vld [vmem:[%s13837_s9 + $0x11] ss:$0 sm:$0xff] }
0x173b   :  { %v4416_v41 = vadd.f32 %v11206_v35, %v4410_v40  ;;  %v4413_v12 = vadd.f32 %v9115_v48, %v4412_v45  ;;  %v10045_v37 = vpop.f32.mrb[127].mxu1  ;;  %v10745_v40 = vld [vmem:[%s13835_s5 + $0x128] sm:$0xff]  }
0x173d   :  { %v4417_v30 = vadd.f32 %v11207_v14, %v4413_v12  ;;  %v4420_v15 = vsel %vm62_vm1, %v4416_v41, 0.0 }
0x173e   :  { %4421 = vadd.xlane.f32.xlu0 %v4420_v15  ;;  %v9125_v15 = vld [vmem:[%s13837_s9 + $0x10] ss:$0 sm:$0xff] }
0x173f   :  { %v4423_v11 = vsel %vm62_vm1, %v4417_v30, 0.0 }
0x1742   :  { %4424 = vadd.xlane.f32.xlu0 %v4423_v11 }
0x1746   :  { %3091 = vadd.xlane.f32.xlu0 %v3090_v56 }
0x17cb   :  { %v4422_v42 = vpop.xlane.xlu0 %4421 }
0x17cc   :  { %v4426_v55 = vmul.f32 0.03125, %v4422_v42 }
0x17ce   :  { %v4428_v24 = vsub.f32 %v4416_v41, %v4426_v55 }
0x17cf   :  { %v4425_v20 = vpop.xlane.xlu0 %4424 }
0x17d0   :  { %v4427_v31 = vmul.f32 0.03125, %v4425_v20  ;;  %v4430_v53 = vmul.f32 %v4428_v24, %v4428_v24 }
0x17d2   :  { %v4429_v19 = vsub.f32 %v4417_v30, %v4427_v31  ;;  %v4432_v29 = vsel %vm62_vm1, %v4430_v53, 0.0 }
0x17d3   :  { %4433 = vadd.xlane.f32.xlu1 %v4432_v29  ;;  %v3092_v27 = vpop.xlane.xlu0 %3091 }
0x17d4   :  { %v3094_v26 = vmul.f32 0.03125, %v3092_v27  ;;  %v4431_v63 = vmul.f32 %v4429_v19, %v4429_v19 }
0x17d6   :  { %v3096_v2 = vadd.f32 1e-05, %v3094_v26  ;;  %v4435_v23 = vsel %vm62_vm1, %v4431_v63, 0.0 }
0x17d7   :  { %4436 = vadd.xlane.f32.xlu0 %v4435_v23 }
0x17d8   :  { %10984 = vrsqrt.f32 %v3096_v2 }
0x17e2   :  { %v10985_v39 = vpop.eup %10984 }
0x17e3   :  { %v3100_v10 = vmul.f32 %v10985_v39, %v3084_v5 }
0x17e5   :  { %v3106_v61 = vmul.f32 %v9069_v38, %v3100_v10 }
0x17e7   :  { %v3112_v44 = vadd.f32 %v9070_v4, %v3106_v61 }
0x17e9   :  { %v12560_v3 = vpack.c.bf16 %v3112_v44, %v3111_v58 }
0x17eb   :  { %10059 = vmatmul.mubr.msk.bf16.vlgmr.msra.gmra.mrb[128].mxu1 %vm62_vm1, %v12560_v3 }
0x17ec   :  { %10072 = vmatprep.mubr.msk.bf16.mxu1 %vm11213_vm0, %v11212_v0 }
0x1860   :  { %v4434_v1 = vpop.xlane.xlu1 %4433 }
0x1861   :  { %v4438_v59 = vmul.f32 0.03125, %v4434_v1 }
0x1863   :  { %v4440_v22 = vadd.f32 1e-05, %v4438_v59 }
0x1864   :  { %v4437_v49 = vpop.xlane.xlu0 %4436 }
0x1865   :  { %10986 = vrsqrt.f32 %v4440_v22  ;;  %v4439_v36 = vmul.f32 0.03125, %v4437_v49  ;;  %v12671_v49 = vld [vmem:[%s13843_s4] sm:$0xff] }
0x1867   :  { %v4441_v60 = vadd.f32 1e-05, %v4439_v36 }
0x1869   :  { %10988 = vrsqrt.f32 %v4441_v60  ;;  %v12676_v60 = vld [vmem:[%s13843_s4 + $0x8] sm:$0xff] }
0x186f   :  { %v10987_v43 = vpop.eup %10986 }
0x1870   :  { %v4444_v21 = vmul.f32 %v10987_v43, %v4428_v24 }
0x1872   :  { %v4450_v46 = vmul.f32 %v9119_v6, %v4444_v21 }
0x1873   :  { %v10989_v57 = vpop.eup %10988 }
0x1874   :  { %v4445_v47 = vmul.f32 %v10989_v57, %v4429_v19  ;;  %v12580_v13 = vadd.f32 %v9120_v25, %v4450_v46 }
0x1876   :  { %v4451_v34 = vmul.f32 %v9119_v6, %v4445_v47 }
0x1878   :  { %v12582_v48 = vadd.f32 %v9120_v25, %v4451_v34 }
0x187a   :  { %v4464_v33 = vpack.c.bf16 %v12582_v48, %v12580_v13 }
0x187c   :  { %10051 = vmatmul.mubr.msk.bf16.vlgmr.msra.gmra.mrb[128].mxu0 %vm62_vm1, %v4464_v33 }
0x187d   :  { %10063 = vmatpush3.bf16.msra.mxu0 %v10744_v7  ;;  %10066 = vmatprep.mubr.msk.bf16.mxu0 %vm11213_vm0, %v11212_v0 }
0x187e   :  { %10064 = vmatprep.subr.bf16.mxu0 %v11212_v0 }
0x1881   :  { %10065 = vmatpush3.bf16.msra.mxu0 %v10745_v40 }
0x1882   :  { %10076 = vmatprep.subr.bf16.mxu0 %v11212_v0 }
0x1884   :  { %10067 = vmatmul.mubr.msk.bf16.vlgmr.msra.gmra.mrb[132].mxu0 %vm62_vm1, %v12560_v3 }
0x1885   :  { %10078 = vmatprep.mubr.msk.bf16.mxu0 %vm11213_vm0, %v11212_v0 }
0x18be   :  { %v4585_v45 = vpop.f32.mrb[128].mxu1 }
0x18bf   :  { %v10060_v35 = vpop.f32.mrb[129].mxu1  ;;  %v4586_v12 = vadd.f32 %v9133_v54, %v4585_v45 }
0x18c0   :  { %v4588_v41 = vpop.f32.mrb[130].mxu1 }
0x18c1   :  { %v4589_v37 = vadd.f32 %v9133_v54, %v4588_v41  ;;  %v10061_v5 = vpop.f32.mrb[131].mxu1 }
0x18c3   :  { %v4656_v14 = vpack.c.bf16 %v4589_v37, %v4586_v12 }
0x18c5   :  { %4776 = vrot.lane.b32.xlu1 %v4656_v14, %s11215_s14  ;;  %v4662_v30 = vsel %vm236_vm2, %v4656_v14, 0 }
0x18c6   :  { %10071 = vmatpush3.bf16.xpose.msra.mxu1 %v4662_v30 }
0x18c7   :  { %10082 = vmatprep.subr.bf16.mxu1 %v11212_v0 }
0x18c9   :  { %4898 = vrot.lane.b32.xlu1 %v4656_v14, %s11214_s13 }
0x1937   :  { %v4777_v28 = vpop.permute.xlu1 %4776 }
0x1938   :  { %v4782_v55 = vsel %vm236_vm2, %v4777_v28, 0 }
0x193b   :  { %v4899_v26 = vpop.permute.xlu1 %4898 }
0x193c   :  { %v4904_v2 = vsel %vm236_vm2, %v4899_v26, 0 }
0x194f   :  { %v4518_v11 = vpop.f32.mrb[128].mxu0 }
0x1950   :  { %v10052_v51 = vpop.f32.mrb[129].mxu0  ;;  %v4519_v52 = vadd.f32 %v9125_v15, %v4518_v11 }
0x1951   :  { %v4521_v56 = vpop.f32.mrb[130].mxu0 }
0x1952   :  { %v4522_v50 = vadd.f32 %v9125_v15, %v4521_v56  ;;  %v10053_v16 = vpop.f32.mrb[131].mxu0 }
0x1954   :  { %v4655_v42 = vpack.c.bf16 %v4522_v50, %v4519_v52 }
0x1956   :  { %4896 = vrot.lane.b32.xlu1 %v4655_v42, %s11214_s13  ;;  %4773 = vrot.lane.b32.xlu0 %v4655_v42, %s11215_s14 }
0x1957   :  { %10073 = vmatmul.mubr.msk.bf16.vlgmr.msra.gmra.mrb[132].mxu1 %vm236_vm2, %v4655_v42  ;;  %v4648_v24 = vpop.f32.mrb[132].mxu0 }
0x1958   :  { %10083 = vmatpush3.bf16.xpose.msra.mxu1 %v4782_v55  ;;  %v10068_v20 = vpop.f32.mrb[133].mxu0  ;;  %10084 = vmatprep.mubr.msk.bf16.mxu1 %vm11213_vm0, %v11212_v0  ;;  %v4649_v53 = vadd.f32 %v9141_v62, %v4648_v24 }
0x1959   :  { %v4651_v31 = vpop.f32.mrb[134].mxu0  ;;  %10094 = vmatprep.subr.bf16.mxu1 %v11212_v0 }
0x195a   :  { %v4652_v19 = vadd.f32 %v9141_v62, %v4651_v31  ;;  %5017 = vrot.lane.b32.xlu1 %v4655_v42, %s11216_s15  ;;  %5019 = vrot.lane.b32.xlu0 %v4656_v14, %s11216_s15  ;;  %v10069_v29 = vpop.f32.mrb[135].mxu0 }
0x195c   :  { %v12623_v27 = vpack.c.bf16 %v4652_v19, %v4649_v53 }
0x195e   :  { %5138 = vrot.lane.b32.xlu1 %v4655_v42, %s11217_s16  ;;  %5140 = vrot.lane.b32.xlu0 %v4656_v14, %s11217_s16 }
0x195f   :  { %10077 = vmatpush3.bf16.msra.mxu0 %v12623_v27 }
0x1960   :  { %10088 = vmatprep.subr.bf16.mxu0 %v11212_v0 }
0x1962   :  { %5259 = vrot.lane.b32.xlu1 %v4655_v42, %s11218_s17  ;;  %5261 = vrot.lane.b32.xlu0 %v4656_v14, %s11218_s17 }
0x1966   :  { %5380 = vrot.lane.b32.xlu1 %v4655_v42, %s11219_s18  ;;  %5382 = vrot.lane.b32.xlu0 %v4656_v14, %s11219_s18 }
0x196a   :  { %5501 = vrot.lane.b32.xlu1 %v4655_v42, %s11220_s19  ;;  %5503 = vrot.lane.b32.xlu0 %v4656_v14, %s11220_s19 }
0x19c8   :  { %v4774_v63 = vpop.permute.xlu0 %4773  ;;  %v4897_v9 = vpop.permute.xlu1 %4896 }
0x19c9   :  { %10085 = vmatmul.mubr.msk.bf16.vlgmr.msra.gmra.mrb[136].mxu1 %vm236_vm2, %v4774_v63 }
0x19ca   :  { %10095 = vmatpush3.bf16.xpose.msra.mxu1 %v4904_v2  ;;  %10096 = vmatprep.mubr.msk.bf16.mxu1 %vm11213_vm0, %v11212_v0 }
0x19cb   :  { %10106 = vmatprep.subr.bf16.mxu1 %v11212_v0 }
0x19cc   :  { %v5020_v23 = vpop.permute.xlu0 %5019  ;;  %v5018_v39 = vpop.permute.xlu1 %5017 }
0x19cd   :  { %v5025_v8 = vsel %vm236_vm2, %v5020_v23, 0 }
0x19d0   :  { %v5141_v38 = vpop.permute.xlu0 %5140  ;;  %v5139_v4 = vpop.permute.xlu1 %5138 }
0x19d1   :  { %10097 = vmatmul.mubr.msk.bf16.vlgmr.msra.gmra.mrb[140].mxu1 %vm236_vm2, %v4897_v9  ;;  %v5146_v32 = vsel %vm236_vm2, %v5141_v38, 0 }
0x19d2   :  { %10107 = vmatpush3.bf16.xpose.msra.mxu1 %v5025_v8  ;;  %10108 = vmatprep.mubr.msk.bf16.mxu1 %vm11213_vm0, %v11212_v0 }
0x19d3   :  { %10118 = vmatprep.subr.bf16.mxu1 %v11212_v0 }
0x19d4   :  { %v5262_v10 = vpop.permute.xlu0 %5261  ;;  %v5260_v44 = vpop.permute.xlu1 %5259 }
0x19d5   :  { %v5267_v61 = vsel %vm236_vm2, %v5262_v10, 0 }
0x19d8   :  { %v5383_v58 = vpop.permute.xlu0 %5382  ;;  %v5381_v1 = vpop.permute.xlu1 %5380 }
0x19d9   :  { %10109 = vmatmul.mubr.msk.bf16.vlgmr.msra.gmra.mrb[144].mxu1 %vm236_vm2, %v5018_v39  ;;  %v5388_v17 = vsel %vm236_vm2, %v5383_v58, 0 }
0x19da   :  { %10119 = vmatpush3.bf16.xpose.msra.mxu1 %v5146_v32  ;;  %10120 = vmatprep.mubr.msk.bf16.mxu1 %vm11213_vm0, %v11212_v0 }
0x19db   :  { %10130 = vmatprep.subr.bf16.mxu1 %v11212_v0 }
0x19dc   :  { %v5504_v18 = vpop.permute.xlu0 %5503  ;;  %v5502_v22 = vpop.permute.xlu1 %5501 }
0x19dd   :  { %v5509_v59 = vsel %vm236_vm2, %v5504_v18, 0 }
0x19e1   :  { %10121 = vmatmul.mubr.msk.bf16.vlgmr.msra.gmra.mrb[148].mxu1 %vm236_vm2, %v5139_v4 }
0x19e2   :  { %10131 = vmatpush3.bf16.xpose.msra.mxu1 %v5267_v61  ;;  %10132 = vmatprep.mubr.msk.bf16.mxu1 %vm11213_vm0, %v11212_v0 }
0x19e3   :  { %10142 = vmatprep.subr.bf16.mxu1 %v11212_v0 }
0x19e9   :  { %10133 = vmatmul.mubr.msk.bf16.vlgmr.msra.gmra.mrb[152].mxu1 %vm236_vm2, %v5260_v44 }
0x19ea   :  { %10143 = vmatpush3.bf16.xpose.msra.mxu1 %v5388_v17  ;;  %10144 = vmatprep.mubr.msk.bf16.mxu1 %vm11213_vm0, %v11212_v0 }
0x19eb   :  { %10154 = vmatprep.subr.bf16.mxu1 %v11212_v0 }
0x19f1   :  { %10145 = vmatmul.mubr.msk.bf16.vlgmr.msra.gmra.mrb[156].mxu1 %vm236_vm2, %v5381_v1 }
0x19f2   :  { %10155 = vmatpush3.bf16.xpose.msra.mxu1 %v5509_v59  ;;  %10156 = vmatprep.mubr.msk.bf16.mxu1 %vm11213_vm0, %v11212_v0 }
0x19f3   :  { %10166 = vmatprep.subr.bf16.mxu1 %v11212_v0 }
0x19f9   :  { %10157 = vmatmul.mubr.msk.bf16.vlgmr.msra.gmra.mrb[160].mxu1 %vm236_vm2, %v5502_v22 }
0x19fa   :  { %10170 = vmatprep.mubr.msk.bf16.mxu1 %vm11213_vm0, %v11212_v0 }
0x1a2a   :  { %v4698_v36 = vpop.f32.mrb[132].mxu1 }
0x1a2b   :  { %v4699_v43 = vadd.f32 %v4698_v36, %v12671_v49  ;;  %v10074_v21 = vpop.f32.mrb[133].mxu1 }
0x1a2c   :  { %v4701_v6 = vpop.f32.mrb[134].mxu1 }
0x1a2d   :  { %v4702_v57 = vadd.f32 %v4701_v6, %v12676_v60  ;;  %v10075_v46 = vpop.f32.mrb[135].mxu1  ;;  %v4705_v47 = vsel %vm284_vm3, %v4699_v43, -inf }
0x1a2e   :  { %4706 = vmax.xlane.f32.xlu0 %v4705_v47 }
0x1a2f   :  { %v4708_v25 = vsel %vm284_vm3, %v4702_v57, -inf }
0x1a30   :  { %4709 = vmax.xlane.f32.xlu1 %v4708_v25 }
0x1a41   :  { %4849 = vrot.lane.b32.xlu1 %v12623_v27, %s11215_s14 }
0x1a9c   :  { %v4818_v34 = vpop.f32.mrb[136].mxu1 }
0x1a9d   :  { %v12685_v7 = vadd.f32 %v4818_v34, %v12671_v49  ;;  %v10086_v33 = vpop.f32.mrb[137].mxu1 }
0x1a9e   :  { %v4821_v40 = vpop.f32.mrb[138].mxu1 }
0x1a9f   :  { %v12688_v54 = vadd.f32 %v4821_v40, %v12676_v60  ;;  %v10087_v45 = vpop.f32.mrb[139].mxu1  ;;  %v4825_v35 = vsel %vm284_vm3, %v12685_v7, -inf }
0x1aa0   :  { %4826 = vmax.xlane.f32.xlu0 %v4825_v35 }
0x1aa1   :  { %v4828_v41 = vsel %vm284_vm3, %v12688_v54, -inf }
0x1aa4   :  { %4829 = vmax.xlane.f32.xlu0 %v4828_v41  ;;  %v4940_v12 = vpop.f32.mrb[140].mxu1 }
0x1aa5   :  { %v12695_v37 = vadd.f32 %v4940_v12, %v12671_v49  ;;  %v10098_v5 = vpop.f32.mrb[141].mxu1 }
0x1aa6   :  { %v4943_v14 = vpop.f32.mrb[142].mxu1 }
0x1aa7   :  { %v12698_v30 = vadd.f32 %v4943_v14, %v12676_v60  ;;  %v10099_v15 = vpop.f32.mrb[143].mxu1  ;;  %v4947_v11 = vsel %vm284_vm3, %v12695_v37, -inf }
0x1aa8   :  { %4948 = vmax.xlane.f32.xlu1 %v4947_v11 }
0x1aa9   :  { %v4950_v51 = vsel %vm284_vm3, %v12698_v30, -inf }
0x1aaa   :  { %4951 = vmax.xlane.f32.xlu0 %v4950_v51 }
0x1aac   :  { %v5061_v56 = vpop.f32.mrb[144].mxu1 }
0x1aad   :  { %v12705_v52 = vadd.f32 %v5061_v56, %v12671_v49  ;;  %v10110_v50 = vpop.f32.mrb[145].mxu1 }
0x1aae   :  { %v5064_v16 = vpop.f32.mrb[146].mxu1 }
0x1aaf   :  { %v12708_v28 = vadd.f32 %v5064_v16, %v12676_v60  ;;  %v10111_v42 = vpop.f32.mrb[147].mxu1  ;;  %v5068_v55 = vsel %vm284_vm3, %v12705_v52, -inf }
0x1ab0   :  { %5069 = vmax.xlane.f32.xlu1 %v5068_v55 }
0x1ab1   :  { %v5071_v62 = vsel %vm284_vm3, %v12708_v28, -inf }
0x1ab2   :  { %5072 = vmax.xlane.f32.xlu0 %v5071_v62 }
0x1ab4   :  { %v5182_v24 = vpop.f32.mrb[148].mxu1 }
0x1ab5   :  { %v12715_v20 = vadd.f32 %v5182_v24, %v12671_v49  ;;  %v10122_v31 = vpop.f32.mrb[149].mxu1 }
0x1ab6   :  { %v5185_v53 = vpop.f32.mrb[150].mxu1 }
0x1ab7   :  { %v12718_v19 = vadd.f32 %v5185_v53, %v12676_v60  ;;  %v10123_v29 = vpop.f32.mrb[151].mxu1  ;;  %v5189_v26 = vsel %vm284_vm3, %v12715_v20, -inf }
0x1ab8   :  { %5190 = vmax.xlane.f32.xlu1 %v5189_v26 }
0x1ab9   :  { %v5192_v63 = vsel %vm284_vm3, %v12718_v19, -inf }
0x1aba   :  { %5193 = vmax.xlane.f32.xlu0 %v5192_v63 }
0x1abb   :  { %v4707_v2 = vpop.xlane.xlu0 %4706 }
0x1abc   :  { %v4711_v23 = vsub.f32 %v4699_v43, %v4707_v2  ;;  %v5303_v9 = vpop.f32.mrb[152].mxu1 }
0x1abd   :  { %v4710_v8 = vpop.xlane.xlu1 %4709  ;;  %v12725_v38 = vadd.f32 %v5303_v9, %v12671_v49  ;;  %v10134_v39 = vpop.f32.mrb[153].mxu1 }
0x1abe   :  { %v4713_v32 = vmul.f32 1.442695, %v4711_v23  ;;  %v4712_v10 = vsub.f32 %v4702_v57, %v4710_v8  ;;  %v5306_v4 = vpop.f32.mrb[154].mxu1 }
0x1abf   :  { %v12728_v61 = vadd.f32 %v5306_v4, %v12676_v60  ;;  %v10135_v58 = vpop.f32.mrb[155].mxu1  ;;  %v5310_v44 = vsel %vm284_vm3, %v12725_v38, -inf }
0x1ac0   :  { %10990 = vpow2.f32 %v4713_v32  ;;  %v4715_v17 = vmul.f32 1.442695, %v4712_v10  ;;  %5311 = vmax.xlane.f32.xlu1 %v5310_v44 }
0x1ac1   :  { %v5313_v18 = vsel %vm284_vm3, %v12728_v61, -inf  ;;  %v12767_v11 = vpop.permute.xlu1 %4849 }
0x1ac2   :  { %10992 = vpow2.f32 %v4715_v17  ;;  %5314 = vmax.xlane.f32.xlu0 %v5313_v18 }
0x1ac4   :  { %v5424_v1 = vpop.f32.mrb[156].mxu1 }
0x1ac5   :  { %v12735_v59 = vadd.f32 %v5424_v1, %v12671_v49  ;;  %v10146_v22 = vpop.f32.mrb[157].mxu1 }
0x1ac6   :  { %v5427_v36 = vpop.f32.mrb[158].mxu1 }
0x1ac7   :  { %v12738_v43 = vadd.f32 %v5427_v36, %v12676_v60  ;;  %v10147_v21 = vpop.f32.mrb[159].mxu1  ;;  %v5431_v6 = vsel %vm284_vm3, %v12735_v59, -inf }
0x1ac8   :  { %5432 = vmax.xlane.f32.xlu1 %v5431_v6 }
0x1ac9   :  { %v5434_v57 = vsel %vm284_vm3, %v12738_v43, -inf }
0x1aca   :  { %v12744_v46 = vpop.eup %10990  ;;  %5435 = vmax.xlane.f32.xlu0 %v5434_v57 }
0x1acb   :  { %v4717_v47 = vsel %vm284_vm3, %v12744_v46, 0.0 }
0x1acc   :  { %v12748_v25 = vpop.eup %10992  ;;  %v5545_v34 = vpop.f32.mrb[160].mxu1  ;;  %4718 = vadd.xlane.f32.xlu1 %v4717_v47 }
0x1acd   :  { %v12751_v33 = vadd.f32 %v5545_v34, %v12671_v49  ;;  %v10158_v40 = vpop.f32.mrb[161].mxu1  ;;  %v4720_v45 = vsel %vm284_vm3, %v12748_v25, 0.0 }
0x1ace   :  { %4721 = vadd.xlane.f32.xlu0 %v4720_v45  ;;  %v5548_v35 = vpop.f32.mrb[162].mxu1 }
0x1acf   :  { %v12756_v41 = vadd.f32 %v5548_v35, %v12676_v60  ;;  %v10159_v12 = vpop.f32.mrb[163].mxu1  ;;  %v5552_v5 = vsel %vm284_vm3, %v12751_v33, -inf }
0x1ad0   :  { %5553 = vmax.xlane.f32.xlu1 %v5552_v5 }
0x1ad1   :  { %v5555_v14 = vsel %vm284_vm3, %v12756_v41, -inf }
0x1ad2   :  { %5556 = vmax.xlane.f32.xlu0 %v5555_v14 }
0x1ae1   :  { %5091 = vrot.lane.b32.xlu1 %v12623_v27, %s11216_s15 }
0x1ae8   :  { %4970 = vrot.lane.b32.xlu0 %v12623_v27, %s11214_s13 }
0x1b2d   :  { %v4827_v49 = vpop.xlane.xlu0 %4826 }
0x1b2e   :  { %v4831_v15 = vsub.f32 %v12685_v7, %v4827_v49 }
0x1b30   :  { %v4833_v60 = vmul.f32 1.442695, %v4831_v15 }
0x1b31   :  { %v4830_v51 = vpop.xlane.xlu0 %4829 }
0x1b32   :  { %10994 = vpow2.f32 %v4833_v60  ;;  %v4832_v56 = vsub.f32 %v12688_v54, %v4830_v51 }
0x1b34   :  { %v4835_v50 = vmul.f32 1.442695, %v4832_v56 }
0x1b35   :  { %v4949_v16 = vpop.xlane.xlu1 %4948 }
0x1b36   :  { %10996 = vpow2.f32 %v4835_v50  ;;  %v4953_v42 = vsub.f32 %v12695_v37, %v4949_v16 }
0x1b37   :  { %v4952_v55 = vpop.xlane.xlu0 %4951 }
0x1b38   :  { %v4955_v62 = vmul.f32 1.442695, %v4953_v42  ;;  %v4954_v24 = vsub.f32 %v12698_v30, %v4952_v55 }
0x1b3a   :  { %10998 = vpow2.f32 %v4955_v62  ;;  %v4957_v31 = vmul.f32 1.442695, %v4954_v24 }
0x1b3c   :  { %v12772_v53 = vpop.eup %10994  ;;  %11000 = vpow2.f32 %v4957_v31 }
0x1b3d   :  { %v5070_v7 = vpop.xlane.xlu1 %5069  ;;  %v4837_v29 = vsel %vm284_vm3, %v12772_v53, 0.0 }
0x1b3e   :  { %v5074_v54 = vsub.f32 %v12705_v52, %v5070_v7  ;;  %4838 = vadd.xlane.f32.xlu1 %v4837_v29 }
0x1b3f   :  { %v5073_v26 = vpop.xlane.xlu0 %5072 }
0x1b40   :  { %v12777_v63 = vpop.eup %10996  ;;  %v5076_v37 = vmul.f32 1.442695, %v5074_v54  ;;  %v5075_v2 = vsub.f32 %v12708_v28, %v5073_v26 }
0x1b41   :  { %v4840_v30 = vsel %vm284_vm3, %v12777_v63, 0.0 }
0x1b42   :  { %11002 = vpow2.f32 %v5076_v37  ;;  %v5078_v23 = vmul.f32 1.442695, %v5075_v2  ;;  %4841 = vadd.xlane.f32.xlu0 %v4840_v30 }
0x1b44   :  { %v12782_v9 = vpop.eup %10998  ;;  %11004 = vpow2.f32 %v5078_v23 }
0x1b45   :  { %v5191_v8 = vpop.xlane.xlu1 %5190  ;;  %v4959_v52 = vsel %vm284_vm3, %v12782_v9, 0.0 }
0x1b46   :  { %v12786_v39 = vpop.eup %11000  ;;  %v5195_v32 = vsub.f32 %v12715_v20, %v5191_v8  ;;  %4960 = vadd.xlane.f32.xlu1 %v4959_v52 }
0x1b47   :  { %v5194_v10 = vpop.xlane.xlu0 %5193  ;;  %v4962_v28 = vsel %vm284_vm3, %v12786_v39, 0.0 }
0x1b48   :  { %v5197_v4 = vmul.f32 1.442695, %v5195_v32  ;;  %v5196_v58 = vsub.f32 %v12718_v19, %v5194_v10  ;;  %4963 = vadd.xlane.f32.xlu0 %v4962_v28 }
0x1b4a   :  { %11006 = vpow2.f32 %v5197_v4  ;;  %v5199_v44 = vmul.f32 1.442695, %v5196_v58 }
0x1b4c   :  { %v12792_v17 = vpop.eup %11002  ;;  %11008 = vpow2.f32 %v5199_v44 }
0x1b4d   :  { %v5312_v18 = vpop.xlane.xlu1 %5311  ;;  %v5080_v1 = vsel %vm284_vm3, %v12792_v17, 0.0 }
0x1b4e   :  { %v12796_v22 = vpop.eup %11004  ;;  %v5316_v20 = vsub.f32 %v12725_v38, %v5312_v18  ;;  %5081 = vadd.xlane.f32.xlu1 %v5080_v1 }
0x1b4f   :  { %v5315_v36 = vpop.xlane.xlu0 %5314  ;;  %v5083_v21 = vsel %vm284_vm3, %v12796_v22, 0.0 }
0x1b50   :  { %v5318_v19 = vmul.f32 1.442695, %v5316_v20  ;;  %v5317_v6 = vsub.f32 %v12728_v61, %v5315_v36  ;;  %5084 = vadd.xlane.f32.xlu0 %v5083_v21 }
0x1b52   :  { %11010 = vpow2.f32 %v5318_v19  ;;  %v5320_v57 = vmul.f32 1.442695, %v5317_v6 }
0x1b54   :  { %v12802_v47 = vpop.eup %11006  ;;  %11012 = vpow2.f32 %v5320_v57 }
0x1b55   :  { %v5433_v34 = vpop.xlane.xlu1 %5432  ;;  %v5201_v40 = vsel %vm284_vm3, %v12802_v47, 0.0 }
0x1b56   :  { %v12806_v45 = vpop.eup %11008  ;;  %5202 = vadd.xlane.f32.xlu1 %v5201_v40 }
0x1b57   :  { %v5436_v38 = vpop.xlane.xlu0 %5435  ;;  %v5204_v35 = vsel %vm284_vm3, %v12806_v45, 0.0 }
0x1b58   :  { %v5438_v12 = vsub.f32 %v12738_v43, %v5436_v38  ;;  %5205 = vadd.xlane.f32.xlu0 %v5204_v35 }
0x1b59   :  { %v4719_v61 = vpop.xlane.xlu1 %4718 }
0x1b5a   :  { %v5441_v5 = vmul.f32 1.442695, %v5438_v12  ;;  %11014 = vrcp.f32 %v4719_v61 }
0x1b5b   :  { %v4722_v14 = vpop.xlane.xlu0 %4721 }
0x1b5c   :  { %v12811_v49 = vpop.eup %11010  ;;  %11016 = vpow2.f32 %v5441_v5 }
0x1b5d   :  { %11018 = vrcp.f32 %v4722_v14  ;;  %v5554_v15 = vpop.xlane.xlu1 %5553  ;;  %v5322_v60 = vsel %vm284_vm3, %v12811_v49, 0.0 }
0x1b5e   :  { %v12815_v51 = vpop.eup %11012  ;;  %v5558_v56 = vsub.f32 %v12751_v33, %v5554_v15  ;;  %5323 = vadd.xlane.f32.xlu0 %v5322_v60 }
0x1b5f   :  { %v5557_v50 = vpop.xlane.xlu0 %5556  ;;  %v5325_v42 = vsel %vm284_vm3, %v12815_v51, 0.0 }
0x1b60   :  { %v5560_v43 = vmul.f32 1.442695, %v5558_v56  ;;  %v5559_v16 = vsub.f32 %v12756_v41, %v5557_v50 }
0x1b61   :  { %v5092_v23 = vpop.permute.xlu1 %5091 }
0x1b62   :  { %11020 = vpow2.f32 %v5560_v43  ;;  %v5562_v55 = vmul.f32 1.442695, %v5559_v16  ;;  %5326 = vadd.xlane.f32.xlu0 %v5325_v42 }
0x1b63   :  { %v4971_v8 = vpop.permute.xlu0 %4970 }
0x1b64   :  { %11022 = vpow2.f32 %v5562_v55  ;;  %v11015_v62 = vpop.eup %11014 }
0x1b65   :  { %v4725_v7 = vmul.f32 %v11015_v62, %v12744_v46 }
0x1b66   :  { %v12821_v24 = vpop.eup %11016 }
0x1b67   :  { %v11019_v31 = vpop.eup %11018  ;;  %5212 = vrot.lane.b32.xlu1 %v12623_v27, %s11217_s16  ;;  %v5446_v33 = vsel %vm284_vm3, %v12821_v24, 0.0 }
0x1b68   :  { %v4726_v41 = vmul.f32 %v11019_v31, %v12748_v25  ;;  %5447 = vadd.xlane.f32.xlu0 %v5446_v33  ;;  %v5437_v25 = vsub.f32 %v12735_v59, %v5433_v34 }
0x1b6a   :  { %v4727_v29 = vpack.c.bf16 %v4726_v41, %v4725_v7  ;;  %v5439_v2 = vmul.f32 1.442695, %v5437_v25 }
0x1b6c   :  { %v12829_v54 = vpop.eup %11020  ;;  %10079 = vmatmul.mubr.msk.bf16.vlgmr.msra.gmra.mrb[136].mxu0 %vm284_vm3, %v4727_v29  ;;  %11024 = vpow2.f32 %v5439_v2 }
0x1b6d   :  { %10089 = vmatpush3.bf16.msra.mxu0 %v12767_v11  ;;  %v5564_v26 = vsel %vm284_vm3, %v12829_v54, 0.0  ;;  %10090 = vmatprep.mubr.msk.bf16.mxu0 %vm11213_vm0, %v11212_v0 }
0x1b6e   :  { %v12837_v37 = vpop.eup %11022  ;;  %5565 = vadd.xlane.f32.xlu0 %v5564_v26  ;;  %10100 = vmatprep.subr.bf16.mxu0 %v11212_v0 }
0x1b6f   :  { %v5567_v46 = vsel %vm284_vm3, %v12837_v37, 0.0 }
0x1b72   :  { %5568 = vadd.xlane.f32.xlu0 %v5567_v46 }
0x1b76   :  { %v12843_v11 = vpop.eup %11024 }
0x1b77   :  { %v5443_v30 = vsel %vm284_vm3, %v12843_v11, 0.0 }
0x1b88   :  { %5333 = vrot.lane.b32.xlu0 %v12623_v27, %s11218_s17 }
0x1b8b   :  { %5444 = vadd.xlane.f32.xlu1 %v5443_v30 }
0x1b9c   :  { %5454 = vrot.lane.b32.xlu1 %v12623_v27, %s11219_s18 }
0x1ba0   :  { %5575 = vrot.lane.b32.xlu1 %v12623_v27, %s11220_s19 }
0x1bcb   :  { %v4839_v59 = vpop.xlane.xlu1 %4838 }
0x1bcc   :  { %11026 = vrcp.f32 %v4839_v59 }
0x1bcf   :  { %v4842_v52 = vpop.xlane.xlu0 %4841 }
0x1bd0   :  { %11028 = vrcp.f32 %v4842_v52 }
0x1bd3   :  { %v4961_v32 = vpop.xlane.xlu1 %4960 }
0x1bd4   :  { %11030 = vrcp.f32 %v4961_v32 }
0x1bd5   :  { %v4964_v10 = vpop.xlane.xlu0 %4963 }
0x1bd6   :  { %11032 = vrcp.f32 %v4964_v10  ;;  %v11027_v28 = vpop.eup %11026 }
0x1bd7   :  { %v4845_v58 = vmul.f32 %v11027_v28, %v12772_v53 }
0x1bda   :  { %v11029_v4 = vpop.eup %11028 }
0x1bdb   :  { %v4846_v44 = vmul.f32 %v11029_v4, %v12777_v63  ;;  %v5082_v18 = vpop.xlane.xlu1 %5081 }
0x1bdc   :  { %11034 = vrcp.f32 %v5082_v18 }
0x1bdd   :  { %v5085_v1 = vpop.xlane.xlu0 %5084  ;;  %v4847_v27 = vpack.c.bf16 %v4846_v44, %v4845_v58 }
0x1bde   :  { %11036 = vrcp.f32 %v5085_v1  ;;  %v11031_v20 = vpop.eup %11030 }
0x1bdf   :  { %10091 = vmatmul.mubr.msk.bf16.vlgmr.msra.gmra.mrb[140].mxu0 %vm284_vm3, %v4847_v27  ;;  %v4967_v53 = vmul.f32 %v11031_v20, %v12782_v9 }
0x1be0   :  { %v11033_v36 = vpop.eup %11032  ;;  %10101 = vmatpush3.bf16.msra.mxu0 %v4971_v8  ;;  %10102 = vmatprep.mubr.msk.bf16.mxu0 %vm11213_vm0, %v11212_v0 }
0x1be1   :  { %v4968_v21 = vmul.f32 %v11033_v36, %v12786_v39  ;;  %10112 = vmatprep.subr.bf16.mxu0 %v11212_v0 }
0x1be3   :  { %v5203_v63 = vpop.xlane.xlu1 %5202  ;;  %v4969_v6 = vpack.c.bf16 %v4968_v21, %v4967_v53 }
0x1be4   :  { %11038 = vrcp.f32 %v5203_v63 }
0x1be5   :  { %v5206_v19 = vpop.xlane.xlu0 %5205 }
0x1be6   :  { %11040 = vrcp.f32 %v5206_v19  ;;  %v11035_v57 = vpop.eup %11034 }
0x1be7   :  { %10103 = vmatmul.mubr.msk.bf16.vlgmr.msra.gmra.mrb[144].mxu0 %vm284_vm3, %v4969_v6  ;;  %v5088_v39 = vmul.f32 %v11035_v57, %v12792_v17  ;;  %v5213_v12 = vpop.permute.xlu1 %5212 }
0x1be8   :  { %v11037_v34 = vpop.eup %11036  ;;  %10113 = vmatpush3.bf16.msra.mxu0 %v5092_v23  ;;  %10114 = vmatprep.mubr.msk.bf16.mxu0 %vm11213_vm0, %v11212_v0 }
0x1be9   :  { %v5089_v40 = vmul.f32 %v11037_v34, %v12796_v22  ;;  %10124 = vmatprep.subr.bf16.mxu0 %v11212_v0 }
0x1beb   :  { %v5324_v9 = vpop.xlane.xlu0 %5323  ;;  %v5090_v38 = vpack.c.bf16 %v5089_v40, %v5088_v39 }
0x1bee   :  { %v11039_v35 = vpop.eup %11038 }
0x1bef   :  { %10115 = vmatmul.mubr.msk.bf16.vlgmr.msra.gmra.mrb[148].mxu0 %vm284_vm3, %v5090_v38  ;;  %v5327_v14 = vpop.xlane.xlu0 %5326  ;;  %v5209_v22 = vmul.f32 %v11039_v35, %v12802_v47 }
0x1bf0   :  { %v11041_v61 = vpop.eup %11040  ;;  %10125 = vmatpush3.bf16.msra.mxu0 %v5213_v12  ;;  %10126 = vmatprep.mubr.msk.bf16.mxu0 %vm11213_vm0, %v11212_v0  ;;  %11042 = vrcp.f32 %v5327_v14 }
0x1bf1   :  { %v5210_v5 = vmul.f32 %v11041_v61, %v12806_v45  ;;  %10136 = vmatprep.subr.bf16.mxu0 %v11212_v0  ;;  %11044 = vrcp.f32 %v5324_v9  ;;  %v10746_v9 = vld [vmem:[%s13835_s5 + $0x130] sm:$0xff]   ;;  %v10747_v61 = vld [vmem:[%s13835_s5 + $0x138] sm:$0xff]  }
0x1bf2   :  { %10167 = vmatpush3.bf16.msra.mxu1 %v10746_v9 }
0x1bf3   :  { %v5211_v17 = vpack.c.bf16 %v5210_v5, %v5209_v22  ;;  %10168 = vmatprep.subr.bf16.mxu1 %v11212_v0 }
0x1bf5   :  { %v5448_v15 = vpop.xlane.xlu0 %5447 }
0x1bf6   :  { %11046 = vrcp.f32 %v5448_v15  ;;  %10169 = vmatpush3.bf16.msra.mxu1 %v10747_v61 }
0x1bf7   :  { %10127 = vmatmul.mubr.msk.bf16.vlgmr.msra.gmra.mrb[152].mxu0 %vm284_vm3, %v5211_v17  ;;  %10182 = vmatprep.subr.bf16.mxu1 %v11212_v0 }
0x1bf8   :  { %10138 = vmatprep.mubr.msk.bf16.mxu0 %vm11213_vm0, %v11212_v0 }
0x1bfa   :  { %v11043_v56 = vpop.eup %11042 }
0x1bfb   :  { %v5566_v60 = vpop.xlane.xlu0 %5565  ;;  %v11045_v43 = vpop.eup %11044  ;;  %v5331_v45 = vmul.f32 %v11043_v56, %v12815_v51 }
0x1bfc   :  { %v5330_v16 = vmul.f32 %v11045_v43, %v12811_v49 }
0x1bfe   :  { %v5332_v47 = vpack.c.bf16 %v5331_v45, %v5330_v16 }
0x1bff   :  { %v5569_v50 = vpop.xlane.xlu0 %5568 }
0x1c00   :  { %v11047_v49 = vpop.eup %11046 }
0x1c01   :  { %v5452_v31 = vmul.f32 %v11047_v49, %v12821_v24 }
0x1c03   :  { %v5334_v42 = vpop.permute.xlu0 %5333 }
0x1c04   :  { %10137 = vmatpush3.bf16.msra.mxu0 %v5334_v42 }
0x1c05   :  { %10148 = vmatprep.subr.bf16.mxu0 %v11212_v0 }
0x1c07   :  { %10139 = vmatmul.mubr.msk.bf16.vlgmr.msra.gmra.mrb[156].mxu0 %vm284_vm3, %v5332_v47 }
0x1c08   :  { %10150 = vmatprep.mubr.msk.bf16.mxu0 %vm11213_vm0, %v11212_v0 }
0x1c18   :  { %v5445_v55 = vpop.xlane.xlu1 %5444 }
0x1c19   :  { %11048 = vrcp.f32 %v5445_v55 }
0x1c1a   :  { %11050 = vrcp.f32 %v5569_v50 }
0x1c1b   :  { %11052 = vrcp.f32 %v5566_v60 }
0x1c1c   :  { %v5455_v62 = vpop.permute.xlu1 %5454 }
0x1c1d   :  { %10149 = vmatpush3.bf16.msra.mxu0 %v5455_v62 }
0x1c1e   :  { %10160 = vmatprep.subr.bf16.mxu0 %v11212_v0 }
0x1c20   :  { %v5576_v29 = vpop.permute.xlu1 %5575 }
0x1c23   :  { %v11049_v51 = vpop.eup %11048 }
0x1c24   :  { %v5451_v33 = vmul.f32 %v11049_v51, %v12843_v11  ;;  %v11051_v41 = vpop.eup %11050 }
0x1c25   :  { %v11053_v26 = vpop.eup %11052  ;;  %v5573_v46 = vmul.f32 %v11051_v41, %v12837_v37 }
0x1c26   :  { %v5453_v7 = vpack.c.bf16 %v5452_v31, %v5451_v33  ;;  %v5572_v25 = vmul.f32 %v11053_v26, %v12829_v54 }
0x1c28   :  { %10151 = vmatmul.mubr.msk.bf16.vlgmr.msra.gmra.mrb[160].mxu0 %vm284_vm3, %v5453_v7  ;;  %v5574_v2 = vpack.c.bf16 %v5573_v46, %v5572_v25 }
0x1c29   :  { %10161 = vmatpush3.bf16.msra.mxu0 %v5576_v29  ;;  %10162 = vmatprep.mubr.msk.bf16.mxu0 %vm11213_vm0, %v11212_v0 }
0x1c2a   :  { %10174 = vmatprep.subr.bf16.mxu0 %v11212_v0 }
0x1c30   :  { %10163 = vmatmul.mubr.msk.bf16.vlgmr.msra.gmra.mrb[164].mxu0 %vm284_vm3, %v5574_v2 }
0x1c31   :  { %10178 = vmatprep.mubr.msk.bf16.mxu0 %vm11213_vm0, %v11212_v0 }
0x1c3f   :  { %v12894_v24 = vpop.f32.mrb[136].mxu0 }
0x1c40   :  { %v10080_v11 = vpop.f32.mrb[137].mxu0 }
0x1c41   :  { %v12896_v30 = vpop.f32.mrb[138].mxu0 }
0x1c42   :  { %v10081_v23 = vpop.f32.mrb[139].mxu0 }
0x1cb2   :  { %v4889_v8 = vpop.f32.mrb[140].mxu0 }
0x1cb3   :  { %v10092_v59 = vpop.f32.mrb[141].mxu0 }
0x1cb4   :  { %v4892_v52 = vpop.f32.mrb[142].mxu0 }
0x1cb5   :  { %v10599_v37 = vpack.i.bf16 %v4892_v52, %v4889_v8  ;;  %v10093_v32 = vpop.f32.mrb[143].mxu0 }
0x1cb7   :  { %10600 = vrot.lane.b32.xlu1 %v10599_v37, %s11221_s26 }
0x1cba   :  { %v5010_v54 = vpop.f32.mrb[144].mxu0 }
0x1cbb   :  { %v10104_v10 = vpop.f32.mrb[145].mxu0 }
0x1cbc   :  { %v5013_v28 = vpop.f32.mrb[146].mxu0 }
0x1cbd   :  { %v10604_v4 = vpack.i.bf16 %v5013_v28, %v5010_v54  ;;  %v10105_v58 = vpop.f32.mrb[147].mxu0 }
0x1cbf   :  { %10605 = vrot.lane.b32.xlu1 %v10604_v4, %s11222_s27 }
0x1cc2   :  { %v5131_v44 = vpop.f32.mrb[148].mxu0 }
0x1cc3   :  { %v10116_v18 = vpop.f32.mrb[149].mxu0 }
0x1cc4   :  { %v5134_v1 = vpop.f32.mrb[150].mxu0 }
0x1cc5   :  { %v10609_v27 = vpack.i.bf16 %v5134_v1, %v5131_v44  ;;  %v10117_v20 = vpop.f32.mrb[151].mxu0 }
0x1cc7   :  { %10610 = vrot.lane.b32.xlu1 %v10609_v27, %s11223_s28  ;;  %v9165_v27 = vld [vmem:[%s13837_s9 + $0x13] ss:$0 sm:$0xff] }
0x1cca   :  { %v5252_v36 = vpop.f32.mrb[152].mxu0 }
0x1ccb   :  { %v10128_v21 = vpop.f32.mrb[153].mxu0 }
0x1ccc   :  { %v5255_v53 = vpop.f32.mrb[154].mxu0 }
0x1ccd   :  { %v10614_v63 = vpack.i.bf16 %v5255_v53, %v5252_v36  ;;  %v10129_v19 = vpop.f32.mrb[155].mxu0 }
0x1ccf   :  { %10615 = vrot.lane.b32.xlu0 %v10614_v63, %s11224_s29 }
0x1cda   :  { %v5373_v6 = vpop.f32.mrb[156].mxu0 }
0x1cdb   :  { %v10140_v57 = vpop.f32.mrb[157].mxu0 }
0x1cdc   :  { %v5376_v34 = vpop.f32.mrb[158].mxu0 }
0x1cdd   :  { %v10619_v40 = vpack.i.bf16 %v5376_v34, %v5373_v6  ;;  %v10141_v39 = vpop.f32.mrb[159].mxu0 }
0x1cdf   :  { %10620 = vrot.lane.b32.xlu1 %v10619_v40, %s11225_s30 }
0x1cfb   :  { %v5494_v38 = vpop.f32.mrb[160].mxu0 }
0x1cfc   :  { %v10152_v35 = vpop.f32.mrb[161].mxu0 }
0x1cfd   :  { %v5497_v12 = vpop.f32.mrb[162].mxu0 }
0x1cfe   :  { %v10624_v5 = vpack.i.bf16 %v5497_v12, %v5494_v38  ;;  %v10153_v14 = vpop.f32.mrb[163].mxu0 }
0x1d00   :  { %10625 = vrot.lane.b32.xlu0 %v10624_v5, %s11226_s22 }
0x1d03   :  { %v5615_v22 = vpop.f32.mrb[164].mxu0 }
0x1d04   :  { %v10164_v17 = vpop.f32.mrb[165].mxu0 }
0x1d05   :  { %v5618_v15 = vpop.f32.mrb[166].mxu0  ;;  %v10749_v17 = vld [vmem:[%s13839_s6 + $0x28] sm:$0xff]  }
0x1d06   :  { %v10629_v60 = vpack.i.bf16 %v5618_v15, %v5615_v22  ;;  %v10165_v56 = vpop.f32.mrb[167].mxu0  ;;  %v10750_v15 = vld [vmem:[%s13840_s7 + $0x40] sm:$0xff]  }
0x1d08   :  { %10630 = vrot.lane.b32.xlu1 %v10629_v60, %s13848_s24  ;;  %v10751_v60 = vld [vmem:[%s13840_s7 + $0x48] sm:$0xff]  }
0x1d29   :  { %v10601_v50 = vpop.permute.xlu1 %10600 }
0x1d2a   :  { %v10603_v42 = vunpack.i.h.bf16 %v10601_v50  ;;  %v10602_v47 = vunpack.i.l.bf16 %v10601_v50 }
0x1d2c   :  { %v5679_v29 = vsel %vm236_vm2, %v12896_v30, %v10603_v42  ;;  %v5678_v26 = vsel %vm236_vm2, %v12894_v24, %v10602_v47 }
0x1d31   :  { %v10606_v43 = vpop.permute.xlu1 %10605 }
0x1d32   :  { %v10608_v55 = vunpack.i.h.bf16 %v10606_v43  ;;  %v10607_v62 = vunpack.i.l.bf16 %v10606_v43 }
0x1d34   :  { %v5681_v2 = vsel %vm1260_vm4, %v5679_v29, %v10608_v55  ;;  %v5680_v11 = vsel %vm1260_vm4, %v5678_v26, %v10607_v62  ;;  %v9169_v62 = vld [vmem:[%s13837_s9 + $0x1d] ss:$0 sm:$0xff] }
0x1d39   :  { %v10611_v45 = vpop.permute.xlu1 %10610 }
0x1d3a   :  { %v10613_v51 = vunpack.i.h.bf16 %v10611_v45  ;;  %v10612_v31 = vunpack.i.l.bf16 %v10611_v45 }
0x1d3c   :  { %v5683_v59 = vsel %vm1263_vm5, %v5681_v2, %v10613_v51  ;;  %v5682_v52 = vsel %vm1263_vm5, %v5680_v11, %v10612_v31  ;;  %v9175_v2 = vld [vmem:[%s13837_s9 + $0x2e] ss:$0 sm:$0xff] }
0x1d41   :  { %v10616_v16 = vpop.permute.xlu0 %10615 }
0x1d42   :  { %v10618_v7 = vunpack.i.h.bf16 %v10616_v16  ;;  %v10617_v41 = vunpack.i.l.bf16 %v10616_v16 }
0x1d44   :  { %v5685_v37 = vsel %vm284_vm3, %v5683_v59, %v10618_v7  ;;  %v5684_v32 = vsel %vm284_vm3, %v5682_v52, %v10617_v41 }
0x1d51   :  { %v10621_v49 = vpop.permute.xlu1 %10620 }
0x1d52   :  { %v10623_v46 = vunpack.i.h.bf16 %v10621_v49  ;;  %v10622_v25 = vunpack.i.l.bf16 %v10621_v49 }
0x1d54   :  { %v5687_v54 = vsel %vm1268_vm6, %v5685_v37, %v10623_v46  ;;  %v5686_v24 = vsel %vm1268_vm6, %v5684_v32, %v10622_v25  ;;  %v10752_v46 = vld [vmem:[%s13840_s7 + $0x50] sm:$0xff]   ;;  %v10753_v25 = vld [vmem:[%s13840_s7 + $0x58] sm:$0xff]  }
0x1d72   :  { %v10626_v33 = vpop.permute.xlu0 %10625 }
0x1d73   :  { %v10628_v23 = vunpack.i.h.bf16 %v10626_v33  ;;  %v10627_v8 = vunpack.i.l.bf16 %v10626_v33  ;;  %v9170_v33 = vld [vmem:[%s13837_s9 + $0x27] ss:$0 sm:$0xff] }
0x1d75   :  { %v5689_v4 = vsel %vm1271_vm7, %v5687_v54, %v10628_v23  ;;  %v5688_v58 = vsel %vm1271_vm7, %v5686_v24, %v10627_v8  ;;  %v9187_v24 = vld [vmem:[%s13837_s9 + $0x32] ss:$0 sm:$0xff] }
0x1d7a   :  { %v10631_v30 = vpop.permute.xlu1 %10630 }
0x1d7b   :  { %v10633_v10 = vunpack.i.h.bf16 %v10631_v30  ;;  %v10632_v28 = vunpack.i.l.bf16 %v10631_v30 }
0x1d7d   :  { %v5691_v44 = vsel %vm1274_vm8, %v5689_v4, %v10633_v10  ;;  %v5690_v18 = vsel %vm1274_vm8, %v5688_v58, %v10632_v28 }
0x1d7e   :  { %v5698_v1 = vpack.c.bf16 %v5691_v44, %v5690_v18 }
0x1d80   :  { %10171 = vmatmul.mubr.msk.bf16.vlgmr.msra.gmra.mrb[164].mxu1 %vm62_vm1, %v5698_v1 }
0x1d81   :  { %10190 = vmatprep.mubr.msk.bf16.mxu1 %vm11213_vm0, %v11212_v0  ;;  %10183 = vmatpush3.bf16.msra.mxu1 %v10750_v15 }
0x1d82   :  { %10184 = vmatprep.subr.bf16.mxu1 %v11212_v0 }
0x1d85   :  { %10185 = vmatpush3.bf16.msra.mxu1 %v10751_v60  ;;  %v9193_v60 = vld [vmem:[%s13837_s9 + $0x1e] ss:$0 sm:$0xff] }
0x1d86   :  { %10186 = vmatprep.subr.bf16.mxu1 %v11212_v0 }
0x1d89   :  { %10187 = vmatpush3.bf16.msra.mxu1 %v10752_v46 }
0x1d8a   :  { %10188 = vmatprep.subr.bf16.mxu1 %v11212_v0 }
0x1d8d   :  { %10189 = vmatpush3.bf16.msra.mxu1 %v10753_v25 }
0x1d8e   :  { %10210 = vmatprep.subr.bf16.mxu1 %v11212_v0 }
0x1e53   :  { %v5752_v20 = vpop.f32.mrb[164].mxu1 }
0x1e54   :  { %v5753_v36 = vadd.f32 %v9165_v27, %v5752_v20  ;;  %v10172_v21 = vpop.f32.mrb[165].mxu1 }
0x1e55   :  { %v5755_v53 = vpop.f32.mrb[166].mxu1 }
0x1e56   :  { %v5759_v63 = vadd.f32 %v5753_v36, %v12580_v13  ;;  %v5756_v19 = vadd.f32 %v9165_v27, %v5755_v53  ;;  %v10173_v6 = vpop.f32.mrb[167].mxu1 }
0x1e58   :  { %v5760_v57 = vadd.f32 %v5756_v19, %v12582_v48  ;;  %v5763_v34 = vsel %vm62_vm1, %v5759_v63, 0.0  ;;  %v10748_v48 = vld [vmem:[%s13839_s6 + $0x20] sm:$0xff]  }
0x1e59   :  { %5764 = vadd.xlane.f32.xlu0 %v5763_v34  ;;  %10175 = vmatpush3.bf16.msra.mxu0 %v10748_v48 }
0x1e5a   :  { %v5766_v40 = vsel %vm62_vm1, %v5760_v57, 0.0  ;;  %10176 = vmatprep.subr.bf16.mxu0 %v11212_v0 }
0x1e5b   :  { %5767 = vadd.xlane.f32.xlu1 %v5766_v40 }
0x1e5d   :  { %10177 = vmatpush3.bf16.msra.mxu0 %v10749_v17 }
0x1e5e   :  { %10194 = vmatprep.subr.bf16.mxu0 %v11212_v0 }
0x1ee6   :  { %v5765_v39 = vpop.xlane.xlu0 %5764 }
0x1ee7   :  { %v5769_v9 = vmul.f32 0.03125, %v5765_v39 }
0x1ee8   :  { %v5768_v38 = vpop.xlane.xlu1 %5767 }
0x1ee9   :  { %v5771_v35 = vsub.f32 %v5759_v63, %v5769_v9  ;;  %v5770_v12 = vmul.f32 0.03125, %v5768_v38  ;;  %v10754_v38 = vld [vmem:[%s13835_s5 + $0xc0] sm:$0xff]  }
0x1eeb   :  { %v5772_v61 = vsub.f32 %v5760_v57, %v5770_v12  ;;  %v5773_v5 = vmul.f32 %v5771_v35, %v5771_v35  ;;  %v10756_v12 = vld [vmem:[%s13835_s5 + $0xc8] sm:$0xff]  }
0x1eed   :  { %v5775_v14 = vsel %vm62_vm1, %v5773_v5, 0.0  ;;  %v5774_v13 = vmul.f32 %v5772_v61, %v5772_v61 }
0x1eee   :  { %5776 = vadd.xlane.f32.xlu0 %v5775_v14 }
0x1eef   :  { %v5778_v22 = vsel %vm62_vm1, %v5774_v13, 0.0 }
0x1ef2   :  { %5779 = vadd.xlane.f32.xlu0 %v5778_v22 }
0x1f7b   :  { %v5777_v56 = vpop.xlane.xlu0 %5776 }
0x1f7c   :  { %v5781_v50 = vmul.f32 0.03125, %v5777_v56 }
0x1f7e   :  { %v5783_v43 = vadd.f32 1e-05, %v5781_v50 }
0x1f7f   :  { %v5780_v45 = vpop.xlane.xlu0 %5779 }
0x1f80   :  { %11054 = vrsqrt.f32 %v5783_v43  ;;  %v5782_v16 = vmul.f32 0.03125, %v5780_v45 }
0x1f82   :  { %v5784_v42 = vadd.f32 1e-05, %v5782_v16  ;;  %v9194_v16 = vld [vmem:[%s13837_s9 + $0x28] ss:$0 sm:$0xff] }
0x1f84   :  { %11056 = vrsqrt.f32 %v5784_v42 }
0x1f8a   :  { %v11055_v47 = vpop.eup %11054 }
0x1f8b   :  { %v5787_v55 = vmul.f32 %v11055_v47, %v5771_v35  ;;  %v10755_v35 = vld [vmem:[%s13835_s5 + $0xe0] sm:$0xff]  }
0x1f8d   :  { %v5793_v51 = vmul.f32 %v9169_v62, %v5787_v55 }
0x1f8e   :  { %v11057_v49 = vpop.eup %11056 }
0x1f8f   :  { %v5788_v31 = vmul.f32 %v11057_v49, %v5772_v61  ;;  %v5799_v41 = vadd.f32 %v9170_v33, %v5793_v51  ;;  %v10757_v61 = vld [vmem:[%s13835_s5 + $0xe8] sm:$0xff]   ;;  %v10759_v51 = vld [vmem:[%s13835_s5 + $0xd8] sm:$0xff]  }
0x1f91   :  { %v5794_v7 = vmul.f32 %v9169_v62, %v5788_v31  ;;  %v10758_v62 = vld [vmem:[%s13835_s5 + $0xd0] sm:$0xff]   ;;  %v9199_v31 = vld [vmem:[%s13837_s9 + $0xc] ss:$0 sm:$0xff] }
0x1f93   :  { %v5800_v29 = vadd.f32 %v9170_v33, %v5794_v7  ;;  %v9215_v7 = vld [vmem:[%s13837_s9 + $0xe] ss:$0 sm:$0xff] }
0x1f95   :  { %v5807_v26 = vpack.c.bf16 %v5800_v29, %v5799_v41 }
0x1f97   :  { %10179 = vmatmul.mubr.msk.bf16.vlgmr.msra.gmra.mrb[168].mxu0 %vm62_vm1, %v5807_v26 }
0x1f98   :  { %10198 = vmatprep.mubr.msk.bf16.mxu0 %vm11213_vm0, %v11212_v0  ;;  %10195 = vmatpush3.bf16.msra.mxu0 %v10754_v38 }
0x1f99   :  { %10196 = vmatprep.subr.bf16.mxu0 %v11212_v0 }
0x1f9c   :  { %10197 = vmatpush3.bf16.msra.mxu0 %v10756_v12 }
0x1f9d   :  { %10202 = vmatprep.subr.bf16.mxu0 %v11212_v0 }
0x206a   :  { %v5861_v11 = vpop.f32.mrb[168].mxu0 }
0x206b   :  { %v5862_v23 = vadd.f32 %v9175_v2, %v5861_v11  ;;  %v10180_v8 = vpop.f32.mrb[169].mxu0 }
0x206c   :  { %v5864_v59 = vpop.f32.mrb[170].mxu0 }
0x206d   :  { %v5865_v52 = vadd.f32 %v9175_v2, %v5864_v59  ;;  %v10181_v37 = vpop.f32.mrb[171].mxu0  ;;  %v5868_v32 = vmax.f32 %v5862_v23, 0.0 }
0x206f   :  { %v5869_v30 = vmax.f32 %v5865_v52, 0.0 }
0x2071   :  { %v5880_v54 = vpack.c.bf16 %v5869_v30, %v5868_v32  ;;  %v9207_v30 = vld [vmem:[%s13837_s9 + $0xd] ss:$0 sm:$0xff] }
0x2073   :  { %10191 = vmatmul.mubr.msk.bf16.vlgmr.msra.gmra.mrb[168].mxu1 %vm1493_vm9, %v5880_v54 }
0x2074   :  { %10214 = vmatprep.mubr.msk.bf16.mxu1 %vm11213_vm0, %v11212_v0  ;;  %10211 = vmatpush3.bf16.msra.mxu1 %v10755_v35 }
0x2075   :  { %10212 = vmatprep.subr.bf16.mxu1 %v11212_v0 }
0x2078   :  { %10213 = vmatpush3.bf16.msra.mxu1 %v10757_v61 }
0x2079   :  { %10224 = vmatprep.subr.bf16.mxu1 %v11212_v0 }
0x2146   :  { %v5946_v10 = vpop.f32.mrb[168].mxu1 }
0x2147   :  { %v5947_v28 = vadd.f32 %v9187_v24, %v5946_v10  ;;  %v10192_v4 = vpop.f32.mrb[169].mxu1 }
0x2148   :  { %v5949_v58 = vpop.f32.mrb[170].mxu1 }
0x2149   :  { %v5953_v44 = vadd.f32 %v5947_v28, %v5799_v41  ;;  %v5950_v18 = vadd.f32 %v9187_v24, %v5949_v58  ;;  %v10193_v1 = vpop.f32.mrb[171].mxu1 }
0x214b   :  { %v5954_v27 = vadd.f32 %v5950_v18, %v5800_v29  ;;  %v5957_v20 = vsel %vm62_vm1, %v5953_v44, 0.0 }
0x214c   :  { %5958 = vadd.xlane.f32.xlu1 %v5957_v20 }
0x214d   :  { %v5960_v36 = vsel %vm62_vm1, %v5954_v27, 0.0 }
0x214e   :  { %5961 = vadd.xlane.f32.xlu0 %v5960_v36 }
0x21d9   :  { %v5959_v21 = vpop.xlane.xlu1 %5958 }
0x21da   :  { %v5963_v53 = vmul.f32 0.03125, %v5959_v21 }
0x21db   :  { %v5962_v63 = vpop.xlane.xlu0 %5961 }
0x21dc   :  { %v5965_v19 = vsub.f32 %v5953_v44, %v5963_v53  ;;  %v5964_v6 = vmul.f32 0.03125, %v5962_v63 }
0x21de   :  { %v5966_v57 = vsub.f32 %v5954_v27, %v5964_v6  ;;  %v5967_v34 = vmul.f32 %v5965_v19, %v5965_v19 }
0x21e0   :  { %v5969_v40 = vsel %vm62_vm1, %v5967_v34, 0.0  ;;  %v5968_v39 = vmul.f32 %v5966_v57, %v5966_v57 }
0x21e1   :  { %5970 = vadd.xlane.f32.xlu1 %v5969_v40 }
0x21e2   :  { %v5972_v9 = vsel %vm62_vm1, %v5968_v39, 0.0 }
0x21e3   :  { %5973 = vadd.xlane.f32.xlu0 %v5972_v9 }
0x226e   :  { %v5971_v5 = vpop.xlane.xlu1 %5970 }
0x226f   :  { %v5975_v14 = vmul.f32 0.03125, %v5971_v5 }
0x2270   :  { %v5974_v13 = vpop.xlane.xlu0 %5973 }
0x2271   :  { %v5977_v22 = vadd.f32 1e-05, %v5975_v14  ;;  %v5976_v48 = vmul.f32 0.03125, %v5974_v13 }
0x2273   :  { %11058 = vrsqrt.f32 %v5977_v22  ;;  %v5978_v17 = vadd.f32 1e-05, %v5976_v48  ;;  %v13102_v48 = vld [vmem:[%s13842_s3] sm:$0xff] }
0x2275   :  { %11060 = vrsqrt.f32 %v5978_v17 }
0x227d   :  { %v11059_v15 = vpop.eup %11058 }
0x227e   :  { %v5981_v56 = vmul.f32 %v11059_v15, %v5965_v19 }
0x227f   :  { %v11061_v50 = vpop.eup %11060 }
0x2280   :  { %v5987_v43 = vmul.f32 %v9193_v60, %v5981_v56  ;;  %v5982_v45 = vmul.f32 %v11061_v50, %v5966_v57  ;;  %v13108_v56 = vld [vmem:[%s13842_s3 + $0x8] sm:$0xff] }
0x2282   :  { %v5988_v42 = vmul.f32 %v9193_v60, %v5982_v45  ;;  %v13009_v47 = vadd.f32 %v9194_v16, %v5987_v43 }
0x2284   :  { %v13011_v55 = vadd.f32 %v9194_v16, %v5988_v42 }
0x2286   :  { %v6001_v49 = vpack.c.bf16 %v13011_v55, %v13009_v47 }
0x2288   :  { %10199 = vmatmul.mubr.msk.bf16.vlgmr.msra.gmra.mrb[172].mxu0 %vm62_vm1, %v6001_v49  ;;  %10215 = vmatmul.mubr.msk.bf16.vlgmr.msra.gmra.mrb[172].mxu1 %vm62_vm1, %v6001_v49 }
0x2289   :  { %10203 = vmatpush3.bf16.msra.mxu0 %v10758_v62  ;;  %10206 = vmatprep.mubr.msk.bf16.mxu0 %vm11213_vm0, %v11212_v0 }
0x228a   :  { %10204 = vmatprep.subr.bf16.mxu0 %v11212_v0  ;;  %10226 = vmatprep.mubr.msk.bf16.mxu1 %vm11213_vm0, %v11212_v0 }
0x228d   :  { %10205 = vmatpush3.bf16.msra.mxu0 %v10759_v51 }
0x228e   :  { %10218 = vmatprep.subr.bf16.mxu0 %v11212_v0 }
0x2290   :  { %10207 = vmatmul.mubr.msk.bf16.vlgmr.msra.gmra.mrb[176].mxu0 %vm62_vm1, %v6001_v49 }
0x2291   :  { %10220 = vmatprep.mubr.msk.bf16.mxu0 %vm11213_vm0, %v11212_v0 }
0x235b   :  { %v6055_v33 = vpop.f32.mrb[172].mxu0  ;;  %v6181_v41 = vpop.f32.mrb[172].mxu1 }
0x235c   :  { %v10200_v29 = vpop.f32.mrb[173].mxu0  ;;  %v10216_v26 = vpop.f32.mrb[173].mxu1  ;;  %v6056_v2 = vadd.f32 %v9199_v31, %v6055_v33  ;;  %v6182_v11 = vadd.f32 %v9215_v7, %v6181_v41 }
0x235d   :  { %v6058_v46 = vpop.f32.mrb[174].mxu0  ;;  %v6184_v25 = vpop.f32.mrb[174].mxu1 }
0x235e   :  { %v6059_v23 = vadd.f32 %v9199_v31, %v6058_v46  ;;  %v6185_v8 = vadd.f32 %v9215_v7, %v6184_v25  ;;  %v10201_v59 = vpop.f32.mrb[175].mxu0  ;;  %v10217_v52 = vpop.f32.mrb[175].mxu1 }
0x2360   :  { %v6188_v37 = vpack.c.bf16 %v6059_v23, %v6056_v2  ;;  %v13038_v32 = vpack.c.bf16 %v6185_v8, %v6182_v11 }
0x2362   :  { %10225 = vmatpush3.bf16.msra.mxu1 %v13038_v32  ;;  %6306 = vrot.lane.b32.xlu0 %v6188_v37, %s11215_s14 }
0x2363   :  { %v6118_v54 = vpop.f32.mrb[176].mxu0  ;;  %10236 = vmatprep.subr.bf16.mxu1 %v11212_v0 }
0x2364   :  { %v10208_v24 = vpop.f32.mrb[177].mxu0  ;;  %v6119_v28 = vadd.f32 %v9207_v30, %v6118_v54 }
0x2365   :  { %v6121_v10 = vpop.f32.mrb[178].mxu0 }
0x2366   :  { %v6122_v4 = vadd.f32 %v9207_v30, %v6121_v10  ;;  %v10209_v58 = vpop.f32.mrb[179].mxu0 }
0x2368   :  { %v6189_v44 = vpack.c.bf16 %v6122_v4, %v6119_v28 }
0x236a   :  { %6552 = vrot.lane.b32.xlu0 %v6189_v44, %s11216_s15  ;;  %6309 = vrot.lane.b32.xlu1 %v6189_v44, %s11215_s14  ;;  %v6195_v18 = vsel %vm236_vm2, %v6189_v44, 0 }
0x236b   :  { %10219 = vmatpush3.bf16.xpose.msra.mxu0 %v6195_v18 }
0x236c   :  { %10230 = vmatprep.subr.bf16.mxu0 %v11212_v0 }
0x236e   :  { %6673 = vrot.lane.b32.xlu0 %v6189_v44, %s11217_s16  ;;  %6431 = vrot.lane.b32.xlu1 %v6189_v44, %s11214_s13 }
0x2372   :  { %6794 = vrot.lane.b32.xlu0 %v6189_v44, %s11218_s17  ;;  %6429 = vrot.lane.b32.xlu1 %v6188_v37, %s11214_s13 }
0x2373   :  { %10221 = vmatmul.mubr.msk.bf16.vlgmr.msra.gmra.mrb[180].mxu0 %vm236_vm2, %v6188_v37 }
0x2374   :  { %10232 = vmatprep.mubr.msk.bf16.mxu0 %vm11213_vm0, %v11212_v0 }
0x2376   :  { %6915 = vrot.lane.b32.xlu0 %v6189_v44, %s11219_s18  ;;  %6550 = vrot.lane.b32.xlu1 %v6188_v37, %s11216_s15 }
0x237a   :  { %7036 = vrot.lane.b32.xlu0 %v6189_v44, %s11220_s19  ;;  %6671 = vrot.lane.b32.xlu1 %v6188_v37, %s11217_s16 }
0x237e   :  { %6792 = vrot.lane.b32.xlu1 %v6188_v37, %s11218_s17 }
0x2382   :  { %6913 = vrot.lane.b32.xlu1 %v6188_v37, %s11219_s18 }
0x2386   :  { %7034 = vrot.lane.b32.xlu1 %v6188_v37, %s11220_s19 }
0x23d4   :  { %v6307_v36 = vpop.permute.xlu0 %6306 }
0x23dc   :  { %v6310_v1 = vpop.permute.xlu1 %6309  ;;  %v6553_v53 = vpop.permute.xlu0 %6552 }
0x23dd   :  { %v6315_v27 = vsel %vm236_vm2, %v6310_v1, 0  ;;  %v6558_v19 = vsel %vm236_vm2, %v6553_v53, 0 }
0x23de   :  { %10231 = vmatpush3.bf16.xpose.msra.mxu0 %v6315_v27 }
0x23df   :  { %10242 = vmatprep.subr.bf16.mxu0 %v11212_v0 }
0x23e0   :  { %v6432_v20 = vpop.permute.xlu1 %6431  ;;  %v6674_v6 = vpop.permute.xlu0 %6673 }
0x23e1   :  { %v6437_v21 = vsel %vm236_vm2, %v6432_v20, 0  ;;  %v6679_v34 = vsel %vm236_vm2, %v6674_v6, 0 }
0x23e4   :  { %v6430_v63 = vpop.permute.xlu1 %6429  ;;  %v6795_v40 = vpop.permute.xlu0 %6794 }
0x23e5   :  { %10233 = vmatmul.mubr.msk.bf16.vlgmr.msra.gmra.mrb[184].mxu0 %vm236_vm2, %v6307_v36  ;;  %v6800_v9 = vsel %vm236_vm2, %v6795_v40, 0 }
0x23e6   :  { %10243 = vmatpush3.bf16.xpose.msra.mxu0 %v6437_v21  ;;  %10244 = vmatprep.mubr.msk.bf16.mxu0 %vm11213_vm0, %v11212_v0 }
0x23e7   :  { %10254 = vmatprep.subr.bf16.mxu0 %v11212_v0 }
0x23e8   :  { %v6551_v57 = vpop.permute.xlu1 %6550  ;;  %v6916_v38 = vpop.permute.xlu0 %6915 }
0x23e9   :  { %v6921_v12 = vsel %vm236_vm2, %v6916_v38, 0 }
0x23ec   :  { %v6672_v39 = vpop.permute.xlu1 %6671  ;;  %v7037_v61 = vpop.permute.xlu0 %7036 }
0x23ed   :  { %10245 = vmatmul.mubr.msk.bf16.vlgmr.msra.gmra.mrb[188].mxu0 %vm236_vm2, %v6430_v63  ;;  %v7042_v14 = vsel %vm236_vm2, %v7037_v61, 0 }
0x23ee   :  { %10255 = vmatpush3.bf16.xpose.msra.mxu0 %v6558_v19  ;;  %10256 = vmatprep.mubr.msk.bf16.mxu0 %vm11213_vm0, %v11212_v0 }
0x23ef   :  { %10266 = vmatprep.subr.bf16.mxu0 %v11212_v0 }
0x23f0   :  { %v6793_v35 = vpop.permute.xlu1 %6792 }
0x23f4   :  { %v6914_v5 = vpop.permute.xlu1 %6913 }
0x23f5   :  { %10257 = vmatmul.mubr.msk.bf16.vlgmr.msra.gmra.mrb[192].mxu0 %vm236_vm2, %v6551_v57 }
0x23f6   :  { %10267 = vmatpush3.bf16.xpose.msra.mxu0 %v6679_v34  ;;  %10268 = vmatprep.mubr.msk.bf16.mxu0 %vm11213_vm0, %v11212_v0 }
0x23f7   :  { %10278 = vmatprep.subr.bf16.mxu0 %v11212_v0 }
0x23f8   :  { %v7035_v13 = vpop.permute.xlu1 %7034 }
0x23fd   :  { %10269 = vmatmul.mubr.msk.bf16.vlgmr.msra.gmra.mrb[196].mxu0 %vm236_vm2, %v6672_v39 }
0x23fe   :  { %10279 = vmatpush3.bf16.xpose.msra.mxu0 %v6800_v9  ;;  %10280 = vmatprep.mubr.msk.bf16.mxu0 %vm11213_vm0, %v11212_v0 }
0x23ff   :  { %10290 = vmatprep.subr.bf16.mxu0 %v11212_v0 }
0x2405   :  { %10281 = vmatmul.mubr.msk.bf16.vlgmr.msra.gmra.mrb[200].mxu0 %vm236_vm2, %v6793_v35 }
0x2406   :  { %10291 = vmatpush3.bf16.xpose.msra.mxu0 %v6921_v12  ;;  %10292 = vmatprep.mubr.msk.bf16.mxu0 %vm11213_vm0, %v11212_v0 }
0x2407   :  { %10302 = vmatprep.subr.bf16.mxu0 %v11212_v0 }
0x240d   :  { %10293 = vmatmul.mubr.msk.bf16.vlgmr.msra.gmra.mrb[204].mxu0 %vm236_vm2, %v6914_v5 }
0x240e   :  { %10303 = vmatpush3.bf16.xpose.msra.mxu0 %v7042_v14  ;;  %10304 = vmatprep.mubr.msk.bf16.mxu0 %vm11213_vm0, %v11212_v0 }
0x240f   :  { %10314 = vmatprep.subr.bf16.mxu0 %v11212_v0 }
0x2415   :  { %10305 = vmatmul.mubr.msk.bf16.vlgmr.msra.gmra.mrb[208].mxu0 %vm236_vm2, %v7035_v13 }
0x2416   :  { %10318 = vmatprep.mubr.msk.bf16.mxu0 %vm11213_vm0, %v11212_v0 }
0x2446   :  { %v6231_v22 = vpop.f32.mrb[180].mxu0 }
0x2447   :  { %v6232_v17 = vadd.f32 %v13102_v48, %v6231_v22  ;;  %v10222_v15 = vpop.f32.mrb[181].mxu0 }
0x2448   :  { %v6234_v60 = vpop.f32.mrb[182].mxu0 }
0x2449   :  { %v6235_v50 = vadd.f32 %v13108_v56, %v6234_v60  ;;  %v10223_v43 = vpop.f32.mrb[183].mxu0  ;;  %v6238_v45 = vsel %vm284_vm3, %v6232_v17, -inf }
0x244a   :  { %6239 = vmax.xlane.f32.xlu0 %v6238_v45 }
0x244b   :  { %v6241_v16 = vsel %vm284_vm3, %v6235_v50, -inf }
0x244c   :  { %6242 = vmax.xlane.f32.xlu1 %v6241_v16 }
0x245d   :  { %6382 = vrot.lane.b32.xlu1 %v13038_v32, %s11215_s14 }
0x24b8   :  { %v6351_v42 = vpop.f32.mrb[184].mxu0 }
0x24b9   :  { %v13116_v62 = vadd.f32 %v13102_v48, %v6351_v42  ;;  %v10234_v49 = vpop.f32.mrb[185].mxu0 }
0x24ba   :  { %v6354_v51 = vpop.f32.mrb[186].mxu0 }
0x24bb   :  { %v13119_v31 = vadd.f32 %v13108_v56, %v6354_v51  ;;  %v10235_v33 = vpop.f32.mrb[187].mxu0  ;;  %v6358_v7 = vsel %vm284_vm3, %v13116_v62, -inf }
0x24bc   :  { %6359 = vmax.xlane.f32.xlu0 %v6358_v7 }
0x24bd   :  { %v6361_v41 = vsel %vm284_vm3, %v13119_v31, -inf }
0x24c0   :  { %6362 = vmax.xlane.f32.xlu0 %v6361_v41  ;;  %v6473_v29 = vpop.f32.mrb[188].mxu0 }
0x24c1   :  { %v13126_v26 = vadd.f32 %v13102_v48, %v6473_v29  ;;  %v10246_v46 = vpop.f32.mrb[189].mxu0 }
0x24c2   :  { %v6476_v25 = vpop.f32.mrb[190].mxu0 }
0x24c3   :  { %v13129_v2 = vadd.f32 %v13108_v56, %v6476_v25  ;;  %v10247_v11 = vpop.f32.mrb[191].mxu0  ;;  %v6480_v23 = vsel %vm284_vm3, %v13126_v26, -inf }
0x24c4   :  { %6481 = vmax.xlane.f32.xlu1 %v6480_v23 }
0x24c5   :  { %v6483_v8 = vsel %vm284_vm3, %v13129_v2, -inf }
0x24c6   :  { %6484 = vmax.xlane.f32.xlu0 %v6483_v8 }
0x24c8   :  { %v6594_v59 = vpop.f32.mrb[192].mxu0 }
0x24c9   :  { %v13136_v52 = vadd.f32 %v13102_v48, %v6594_v59  ;;  %v10258_v37 = vpop.f32.mrb[193].mxu0 }
0x24ca   :  { %v6597_v30 = vpop.f32.mrb[194].mxu0 }
0x24cb   :  { %v13139_v54 = vadd.f32 %v13108_v56, %v6597_v30  ;;  %v10259_v24 = vpop.f32.mrb[195].mxu0  ;;  %v6601_v10 = vsel %vm284_vm3, %v13136_v52, -inf }
0x24cc   :  { %6602 = vmax.xlane.f32.xlu1 %v6601_v10 }
0x24cd   :  { %v6604_v28 = vsel %vm284_vm3, %v13139_v54, -inf }
0x24ce   :  { %6605 = vmax.xlane.f32.xlu0 %v6604_v28 }
0x24d0   :  { %v6715_v4 = vpop.f32.mrb[196].mxu0 }
0x24d1   :  { %v13146_v58 = vadd.f32 %v13102_v48, %v6715_v4  ;;  %v10270_v44 = vpop.f32.mrb[197].mxu0 }
0x24d2   :  { %v6718_v18 = vpop.f32.mrb[198].mxu0 }
0x24d3   :  { %v13149_v1 = vadd.f32 %v13108_v56, %v6718_v18  ;;  %v10271_v27 = vpop.f32.mrb[199].mxu0  ;;  %v6722_v20 = vsel %vm284_vm3, %v13146_v58, -inf }
0x24d4   :  { %6723 = vmax.xlane.f32.xlu1 %v6722_v20 }
0x24d5   :  { %v6725_v36 = vsel %vm284_vm3, %v13149_v1, -inf }
0x24d6   :  { %6726 = vmax.xlane.f32.xlu0 %v6725_v36 }
0x24d7   :  { %v6240_v21 = vpop.xlane.xlu0 %6239 }
0x24d8   :  { %v6244_v53 = vsub.f32 %v6232_v17, %v6240_v21  ;;  %v6836_v63 = vpop.f32.mrb[200].mxu0 }
0x24d9   :  { %v6243_v19 = vpop.xlane.xlu1 %6242  ;;  %v13156_v6 = vadd.f32 %v13102_v48, %v6836_v63  ;;  %v10282_v57 = vpop.f32.mrb[201].mxu0 }
0x24da   :  { %v6246_v34 = vmul.f32 1.442695, %v6244_v53  ;;  %v6245_v40 = vsub.f32 %v6235_v50, %v6243_v19  ;;  %v6839_v39 = vpop.f32.mrb[202].mxu0 }
0x24db   :  { %v13159_v9 = vadd.f32 %v13108_v56, %v6839_v39  ;;  %v10283_v38 = vpop.f32.mrb[203].mxu0  ;;  %v6843_v35 = vsel %vm284_vm3, %v13156_v6, -inf }
0x24dc   :  { %11062 = vpow2.f32 %v6246_v34  ;;  %v6248_v12 = vmul.f32 1.442695, %v6245_v40  ;;  %6844 = vmax.xlane.f32.xlu1 %v6843_v35 }
0x24dd   :  { %v6846_v61 = vsel %vm284_vm3, %v13159_v9, -inf  ;;  %v13198_v23 = vpop.permute.xlu1 %6382 }
0x24de   :  { %11064 = vpow2.f32 %v6248_v12  ;;  %6847 = vmax.xlane.f32.xlu0 %v6846_v61 }
0x24e0   :  { %v6957_v5 = vpop.f32.mrb[204].mxu0 }
0x24e1   :  { %v13166_v14 = vadd.f32 %v13102_v48, %v6957_v5  ;;  %v10294_v13 = vpop.f32.mrb[205].mxu0 }
0x24e2   :  { %v6960_v22 = vpop.f32.mrb[206].mxu0 }
0x24e3   :  { %v13169_v17 = vadd.f32 %v13108_v56, %v6960_v22  ;;  %v10295_v15 = vpop.f32.mrb[207].mxu0  ;;  %v6964_v60 = vsel %vm284_vm3, %v13166_v14, -inf }
0x24e4   :  { %6965 = vmax.xlane.f32.xlu1 %v6964_v60 }
0x24e5   :  { %v6967_v50 = vsel %vm284_vm3, %v13169_v17, -inf }
0x24e6   :  { %v13175_v43 = vpop.eup %11062  ;;  %6968 = vmax.xlane.f32.xlu0 %v6967_v50 }
0x24e7   :  { %v6250_v45 = vsel %vm284_vm3, %v13175_v43, 0.0 }
0x24e8   :  { %v13179_v16 = vpop.eup %11064  ;;  %6251 = vadd.xlane.f32.xlu1 %v6250_v45  ;;  %v7078_v42 = vpop.f32.mrb[208].mxu0 }
0x24e9   :  { %v13182_v49 = vadd.f32 %v13102_v48, %v7078_v42  ;;  %v10306_v51 = vpop.f32.mrb[209].mxu0  ;;  %v6253_v33 = vsel %vm284_vm3, %v13179_v16, 0.0 }
0x24ea   :  { %6254 = vadd.xlane.f32.xlu0 %v6253_v33  ;;  %v7081_v7 = vpop.f32.mrb[210].mxu0 }
0x24eb   :  { %v13187_v41 = vadd.f32 %v13108_v56, %v7081_v7  ;;  %v10307_v29 = vpop.f32.mrb[211].mxu0  ;;  %v7085_v46 = vsel %vm284_vm3, %v13182_v49, -inf }
0x24ec   :  { %7086 = vmax.xlane.f32.xlu1 %v7085_v46 }
0x24ed   :  { %v7088_v25 = vsel %vm284_vm3, %v13187_v41, -inf }
0x24ee   :  { %7089 = vmax.xlane.f32.xlu0 %v7088_v25 }
0x24fd   :  { %6624 = vrot.lane.b32.xlu1 %v13038_v32, %s11216_s15 }
0x2504   :  { %6503 = vrot.lane.b32.xlu0 %v13038_v32, %s11214_s13 }
0x2549   :  { %v6360_v48 = vpop.xlane.xlu0 %6359 }
0x254a   :  { %v6364_v11 = vsub.f32 %v13116_v62, %v6360_v48 }
0x254c   :  { %v6366_v56 = vmul.f32 1.442695, %v6364_v11 }
0x254d   :  { %v6363_v8 = vpop.xlane.xlu0 %6362 }
0x254e   :  { %11066 = vpow2.f32 %v6366_v56  ;;  %v6365_v59 = vsub.f32 %v13119_v31, %v6363_v8 }
0x2550   :  { %v6368_v37 = vmul.f32 1.442695, %v6365_v59 }
0x2551   :  { %v6482_v30 = vpop.xlane.xlu1 %6481 }
0x2552   :  { %11068 = vpow2.f32 %v6368_v37  ;;  %v6486_v24 = vsub.f32 %v13126_v26, %v6482_v30 }
0x2553   :  { %v6485_v10 = vpop.xlane.xlu0 %6484 }
0x2554   :  { %v6488_v28 = vmul.f32 1.442695, %v6486_v24  ;;  %v6487_v4 = vsub.f32 %v13129_v2, %v6485_v10 }
0x2556   :  { %11070 = vpow2.f32 %v6488_v28  ;;  %v6490_v44 = vmul.f32 1.442695, %v6487_v4 }
0x2558   :  { %v13203_v18 = vpop.eup %11066  ;;  %11072 = vpow2.f32 %v6490_v44 }
0x2559   :  { %v6603_v62 = vpop.xlane.xlu1 %6602  ;;  %v6370_v27 = vsel %vm284_vm3, %v13203_v18, 0.0 }
0x255a   :  { %v6607_v31 = vsub.f32 %v13136_v52, %v6603_v62  ;;  %6371 = vadd.xlane.f32.xlu1 %v6370_v27 }
0x255b   :  { %v6606_v20 = vpop.xlane.xlu0 %6605 }
0x255c   :  { %v13208_v36 = vpop.eup %11068  ;;  %v6609_v26 = vmul.f32 1.442695, %v6607_v31  ;;  %v6608_v21 = vsub.f32 %v13139_v54, %v6606_v20 }
0x255d   :  { %v6373_v2 = vsel %vm284_vm3, %v13208_v36, 0.0 }
0x255e   :  { %11074 = vpow2.f32 %v6609_v26  ;;  %v6611_v53 = vmul.f32 1.442695, %v6608_v21  ;;  %6374 = vadd.xlane.f32.xlu0 %v6373_v2 }
0x2560   :  { %v13213_v63 = vpop.eup %11070  ;;  %11076 = vpow2.f32 %v6611_v53 }
0x2561   :  { %v6724_v19 = vpop.xlane.xlu1 %6723  ;;  %v6492_v52 = vsel %vm284_vm3, %v13213_v63, 0.0 }
0x2562   :  { %v13217_v57 = vpop.eup %11072  ;;  %v6728_v34 = vsub.f32 %v13146_v58, %v6724_v19  ;;  %6493 = vadd.xlane.f32.xlu1 %v6492_v52 }
0x2563   :  { %v6727_v40 = vpop.xlane.xlu0 %6726  ;;  %v6495_v54 = vsel %vm284_vm3, %v13217_v57, 0.0 }
0x2564   :  { %v6730_v39 = vmul.f32 1.442695, %v6728_v34  ;;  %v6729_v38 = vsub.f32 %v13149_v1, %v6727_v40  ;;  %6496 = vadd.xlane.f32.xlu0 %v6495_v54 }
0x2566   :  { %11078 = vpow2.f32 %v6730_v39  ;;  %v6732_v35 = vmul.f32 1.442695, %v6729_v38 }
0x2568   :  { %v13223_v12 = vpop.eup %11074  ;;  %11080 = vpow2.f32 %v6732_v35 }
0x2569   :  { %v6845_v61 = vpop.xlane.xlu1 %6844  ;;  %v6613_v5 = vsel %vm284_vm3, %v13223_v12, 0.0 }
0x256a   :  { %v13227_v13 = vpop.eup %11076  ;;  %v6849_v58 = vsub.f32 %v13156_v6, %v6845_v61  ;;  %6614 = vadd.xlane.f32.xlu1 %v6613_v5 }
0x256b   :  { %v6848_v22 = vpop.xlane.xlu0 %6847  ;;  %v6616_v15 = vsel %vm284_vm3, %v13227_v13, 0.0 }
0x256c   :  { %v6851_v1 = vmul.f32 1.442695, %v6849_v58  ;;  %v6850_v60 = vsub.f32 %v13159_v9, %v6848_v22  ;;  %6617 = vadd.xlane.f32.xlu0 %v6616_v15 }
0x256e   :  { %11082 = vpow2.f32 %v6851_v1  ;;  %v6853_v50 = vmul.f32 1.442695, %v6850_v60 }
0x2570   :  { %v13233_v45 = vpop.eup %11078  ;;  %11084 = vpow2.f32 %v6853_v50 }
0x2571   :  { %v6966_v42 = vpop.xlane.xlu1 %6965  ;;  %v6734_v51 = vsel %vm284_vm3, %v13233_v45, 0.0 }
0x2572   :  { %v13237_v33 = vpop.eup %11080  ;;  %6735 = vadd.xlane.f32.xlu1 %v6734_v51 }
0x2573   :  { %v6969_v6 = vpop.xlane.xlu0 %6968  ;;  %v6737_v7 = vsel %vm284_vm3, %v13237_v33, 0.0 }
0x2574   :  { %v6971_v29 = vsub.f32 %v13169_v17, %v6969_v6  ;;  %6738 = vadd.xlane.f32.xlu0 %v6737_v7 }
0x2575   :  { %v6252_v9 = vpop.xlane.xlu1 %6251 }
0x2576   :  { %v6974_v46 = vmul.f32 1.442695, %v6971_v29  ;;  %11086 = vrcp.f32 %v6252_v9 }
0x2577   :  { %v6255_v25 = vpop.xlane.xlu0 %6254 }
0x2578   :  { %v13242_v48 = vpop.eup %11082  ;;  %11088 = vpow2.f32 %v6974_v46 }
0x2579   :  { %11090 = vrcp.f32 %v6255_v25  ;;  %v7087_v11 = vpop.xlane.xlu1 %7086  ;;  %v6855_v56 = vsel %vm284_vm3, %v13242_v48, 0.0 }
0x257a   :  { %v13246_v8 = vpop.eup %11084  ;;  %v7091_v59 = vsub.f32 %v13182_v49, %v7087_v11  ;;  %6856 = vadd.xlane.f32.xlu0 %v6855_v56 }
0x257b   :  { %v7090_v37 = vpop.xlane.xlu0 %7089  ;;  %v6858_v24 = vsel %vm284_vm3, %v13246_v8, 0.0 }
0x257c   :  { %v7093_v17 = vmul.f32 1.442695, %v7091_v59  ;;  %v7092_v30 = vsub.f32 %v13187_v41, %v7090_v37 }
0x257d   :  { %v6625_v53 = vpop.permute.xlu1 %6624 }
0x257e   :  { %11092 = vpow2.f32 %v7093_v17  ;;  %v7095_v10 = vmul.f32 1.442695, %v7092_v30  ;;  %6859 = vadd.xlane.f32.xlu0 %v6858_v24 }
0x257f   :  { %v6504_v19 = vpop.permute.xlu0 %6503 }
0x2580   :  { %11094 = vpow2.f32 %v7095_v10  ;;  %v11087_v28 = vpop.eup %11086 }
0x2581   :  { %v6258_v62 = vmul.f32 %v11087_v28, %v13175_v43 }
0x2582   :  { %v13252_v4 = vpop.eup %11088 }
0x2583   :  { %v11091_v44 = vpop.eup %11090  ;;  %6745 = vrot.lane.b32.xlu1 %v13038_v32, %s11217_s16  ;;  %v6979_v49 = vsel %vm284_vm3, %v13252_v4, 0.0 }
0x2584   :  { %v6259_v41 = vmul.f32 %v11091_v44, %v13179_v16  ;;  %6980 = vadd.xlane.f32.xlu0 %v6979_v49  ;;  %v6970_v16 = vsub.f32 %v13166_v14, %v6966_v42 }
0x2586   :  { %v6260_v27 = vpack.c.bf16 %v6259_v41, %v6258_v62  ;;  %v6972_v21 = vmul.f32 1.442695, %v6970_v16 }
0x2588   :  { %v13260_v31 = vpop.eup %11092  ;;  %10227 = vmatmul.mubr.msk.bf16.vlgmr.msra.gmra.mrb[176].mxu1 %vm284_vm3, %v6260_v27  ;;  %11096 = vpow2.f32 %v6972_v21 }
0x2589   :  { %10237 = vmatpush3.bf16.msra.mxu1 %v13198_v23  ;;  %v7097_v20 = vsel %vm284_vm3, %v13260_v31, 0.0  ;;  %10238 = vmatprep.mubr.msk.bf16.mxu1 %vm11213_vm0, %v11212_v0 }
0x258a   :  { %v13268_v26 = vpop.eup %11094  ;;  %7098 = vadd.xlane.f32.xlu0 %v7097_v20  ;;  %10248 = vmatprep.subr.bf16.mxu1 %v11212_v0 }
0x258b   :  { %v7100_v43 = vsel %vm284_vm3, %v13268_v26, 0.0 }
0x258e   :  { %7101 = vadd.xlane.f32.xlu0 %v7100_v43 }
0x2592   :  { %v13274_v23 = vpop.eup %11096 }
0x2593   :  { %v6976_v2 = vsel %vm284_vm3, %v13274_v23, 0.0 }
0x25a4   :  { %6866 = vrot.lane.b32.xlu0 %v13038_v32, %s11218_s17 }
0x25a7   :  { %6977 = vadd.xlane.f32.xlu1 %v6976_v2 }
0x25b8   :  { %6987 = vrot.lane.b32.xlu1 %v13038_v32, %s11219_s18 }
0x25bc   :  { %7108 = vrot.lane.b32.xlu1 %v13038_v32, %s11220_s19 }
0x25e7   :  { %v6372_v14 = vpop.xlane.xlu1 %6371 }
0x25e8   :  { %11098 = vrcp.f32 %v6372_v14 }
0x25eb   :  { %v6375_v52 = vpop.xlane.xlu0 %6374 }
0x25ec   :  { %11100 = vrcp.f32 %v6375_v52 }
0x25ef   :  { %v6494_v34 = vpop.xlane.xlu1 %6493 }
0x25f0   :  { %11102 = vrcp.f32 %v6494_v34 }
0x25f1   :  { %v6497_v40 = vpop.xlane.xlu0 %6496 }
0x25f2   :  { %11104 = vrcp.f32 %v6497_v40  ;;  %v11099_v54 = vpop.eup %11098 }
0x25f3   :  { %v6378_v38 = vmul.f32 %v11099_v54, %v13203_v18 }
0x25f6   :  { %v11101_v39 = vpop.eup %11100 }
0x25f7   :  { %v6379_v35 = vmul.f32 %v11101_v39, %v13208_v36  ;;  %v6615_v61 = vpop.xlane.xlu1 %6614 }
0x25f8   :  { %11106 = vrcp.f32 %v6615_v61 }
0x25f9   :  { %v6618_v5 = vpop.xlane.xlu0 %6617  ;;  %v6380_v32 = vpack.c.bf16 %v6379_v35, %v6378_v38 }
0x25fa   :  { %11108 = vrcp.f32 %v6618_v5  ;;  %v11103_v58 = vpop.eup %11102 }
0x25fb   :  { %10239 = vmatmul.mubr.msk.bf16.vlgmr.msra.gmra.mrb[180].mxu1 %vm284_vm3, %v6380_v32  ;;  %v6500_v18 = vmul.f32 %v11103_v58, %v13213_v63 }
0x25fc   :  { %v11105_v22 = vpop.eup %11104  ;;  %10249 = vmatpush3.bf16.msra.mxu1 %v6504_v19  ;;  %10250 = vmatprep.mubr.msk.bf16.mxu1 %vm11213_vm0, %v11212_v0 }
0x25fd   :  { %v6501_v15 = vmul.f32 %v11105_v22, %v13217_v57  ;;  %10260 = vmatprep.subr.bf16.mxu1 %v11212_v0 }
0x25ff   :  { %v6736_v36 = vpop.xlane.xlu1 %6735  ;;  %v6502_v60 = vpack.c.bf16 %v6501_v15, %v6500_v18 }
0x2600   :  { %11110 = vrcp.f32 %v6736_v36 }
0x2601   :  { %v6739_v1 = vpop.xlane.xlu0 %6738 }
0x2602   :  { %11112 = vrcp.f32 %v6739_v1  ;;  %v11107_v50 = vpop.eup %11106 }
0x2603   :  { %10251 = vmatmul.mubr.msk.bf16.vlgmr.msra.gmra.mrb[184].mxu1 %vm284_vm3, %v6502_v60  ;;  %v6621_v57 = vmul.f32 %v11107_v50, %v13223_v12  ;;  %v6746_v29 = vpop.permute.xlu1 %6745 }
0x2604   :  { %v11109_v42 = vpop.eup %11108  ;;  %10261 = vmatpush3.bf16.msra.mxu1 %v6625_v53  ;;  %10262 = vmatprep.mubr.msk.bf16.mxu1 %vm11213_vm0, %v11212_v0 }
0x2605   :  { %v6622_v51 = vmul.f32 %v11109_v42, %v13227_v13  ;;  %10272 = vmatprep.subr.bf16.mxu1 %v11212_v0 }
0x2607   :  { %v6857_v63 = vpop.xlane.xlu0 %6856  ;;  %v6623_v6 = vpack.c.bf16 %v6622_v51, %v6621_v57 }
0x260a   :  { %v11111_v7 = vpop.eup %11110 }
0x260b   :  { %10263 = vmatmul.mubr.msk.bf16.vlgmr.msra.gmra.mrb[188].mxu1 %vm284_vm3, %v6623_v6  ;;  %v6860_v25 = vpop.xlane.xlu0 %6859  ;;  %v6742_v13 = vmul.f32 %v11111_v7, %v13233_v45 }
0x260c   :  { %v11113_v9 = vpop.eup %11112  ;;  %10273 = vmatpush3.bf16.msra.mxu1 %v6746_v29  ;;  %10274 = vmatprep.mubr.msk.bf16.mxu1 %vm11213_vm0, %v11212_v0  ;;  %11114 = vrcp.f32 %v6860_v25 }
0x260d   :  { %v6743_v46 = vmul.f32 %v11113_v9, %v13237_v33  ;;  %10284 = vmatprep.subr.bf16.mxu1 %v11212_v0  ;;  %11116 = vrcp.f32 %v6857_v63  ;;  %v10760_v63 = vld [vmem:[%s13835_s5 + $0xf0] sm:$0xff]   ;;  %v10761_v9 = vld [vmem:[%s13835_s5 + $0xf8] sm:$0xff]  }
0x260e   :  { %10315 = vmatpush3.bf16.msra.mxu0 %v10760_v63 }
0x260f   :  { %v6744_v12 = vpack.c.bf16 %v6743_v46, %v6742_v13  ;;  %10316 = vmatprep.subr.bf16.mxu0 %v11212_v0 }
0x2611   :  { %v6981_v11 = vpop.xlane.xlu0 %6980 }
0x2612   :  { %11118 = vrcp.f32 %v6981_v11  ;;  %10317 = vmatpush3.bf16.msra.mxu0 %v10761_v9 }
0x2613   :  { %10275 = vmatmul.mubr.msk.bf16.vlgmr.msra.gmra.mrb[192].mxu1 %vm284_vm3, %v6744_v12  ;;  %10330 = vmatprep.subr.bf16.mxu0 %v11212_v0 }
0x2614   :  { %10286 = vmatprep.mubr.msk.bf16.mxu1 %vm11213_vm0, %v11212_v0 }
0x2616   :  { %v11115_v59 = vpop.eup %11114 }
0x2617   :  { %v7099_v56 = vpop.xlane.xlu0 %7098  ;;  %v11117_v17 = vpop.eup %11116  ;;  %v6864_v33 = vmul.f32 %v11115_v59, %v13246_v8 }
0x2618   :  { %v6863_v30 = vmul.f32 %v11117_v17, %v13242_v48 }
0x261a   :  { %v6865_v45 = vpack.c.bf16 %v6864_v33, %v6863_v30 }
0x261b   :  { %v7102_v37 = vpop.xlane.xlu0 %7101 }
0x261c   :  { %v11119_v48 = vpop.eup %11118 }
0x261d   :  { %v6985_v44 = vmul.f32 %v11119_v48, %v13252_v4 }
0x261f   :  { %v6867_v24 = vpop.permute.xlu0 %6866 }
0x2620   :  { %10285 = vmatpush3.bf16.msra.mxu1 %v6867_v24 }
0x2621   :  { %10296 = vmatprep.subr.bf16.mxu1 %v11212_v0 }
0x2623   :  { %10287 = vmatmul.mubr.msk.bf16.vlgmr.msra.gmra.mrb[196].mxu1 %vm284_vm3, %v6865_v45 }
0x2624   :  { %10298 = vmatprep.mubr.msk.bf16.mxu1 %vm11213_vm0, %v11212_v0 }
0x2634   :  { %v6978_v10 = vpop.xlane.xlu1 %6977 }
0x2635   :  { %11120 = vrcp.f32 %v6978_v10 }
0x2636   :  { %11122 = vrcp.f32 %v7102_v37 }
0x2637   :  { %11124 = vrcp.f32 %v7099_v56 }
0x2638   :  { %v6988_v28 = vpop.permute.xlu1 %6987 }
0x2639   :  { %10297 = vmatpush3.bf16.msra.mxu1 %v6988_v28 }
0x263a   :  { %10308 = vmatprep.subr.bf16.mxu1 %v11212_v0 }
0x263c   :  { %v7109_v27 = vpop.permute.xlu1 %7108 }
0x263f   :  { %v11121_v8 = vpop.eup %11120 }
0x2640   :  { %v6984_v49 = vmul.f32 %v11121_v8, %v13274_v23  ;;  %v11123_v41 = vpop.eup %11122 }
0x2641   :  { %v11125_v20 = vpop.eup %11124  ;;  %v7106_v43 = vmul.f32 %v11123_v41, %v13268_v26 }
0x2642   :  { %v6986_v62 = vpack.c.bf16 %v6985_v44, %v6984_v49  ;;  %v7105_v16 = vmul.f32 %v11125_v20, %v13260_v31 }
0x2644   :  { %10299 = vmatmul.mubr.msk.bf16.vlgmr.msra.gmra.mrb[200].mxu1 %vm284_vm3, %v6986_v62  ;;  %v7107_v21 = vpack.c.bf16 %v7106_v43, %v7105_v16 }
0x2645   :  { %10309 = vmatpush3.bf16.msra.mxu1 %v7109_v27  ;;  %10310 = vmatprep.mubr.msk.bf16.mxu1 %vm11213_vm0, %v11212_v0 }
0x2646   :  { %10322 = vmatprep.subr.bf16.mxu1 %v11212_v0 }
0x264c   :  { %10311 = vmatmul.mubr.msk.bf16.vlgmr.msra.gmra.mrb[204].mxu1 %vm284_vm3, %v7107_v21 }
0x264d   :  { %10326 = vmatprep.mubr.msk.bf16.mxu1 %vm11213_vm0, %v11212_v0 }
0x265b   :  { %v13325_v4 = vpop.f32.mrb[176].mxu1 }
0x265c   :  { %v10228_v23 = vpop.f32.mrb[177].mxu1 }
0x265d   :  { %v13327_v2 = vpop.f32.mrb[178].mxu1 }
0x265e   :  { %v10229_v53 = vpop.f32.mrb[179].mxu1 }
0x26ce   :  { %v6422_v19 = vpop.f32.mrb[180].mxu1 }
0x26cf   :  { %v10240_v14 = vpop.f32.mrb[181].mxu1 }
0x26d0   :  { %v6425_v52 = vpop.f32.mrb[182].mxu1 }
0x26d1   :  { %v10634_v26 = vpack.i.bf16 %v6425_v52, %v6422_v19  ;;  %v10241_v34 = vpop.f32.mrb[183].mxu1 }
0x26d3   :  { %10635 = vrot.lane.b32.xlu1 %v10634_v26, %s11221_s26 }
0x26d6   :  { %v6543_v31 = vpop.f32.mrb[184].mxu1 }
0x26d7   :  { %v10252_v40 = vpop.f32.mrb[185].mxu1 }
0x26d8   :  { %v6546_v54 = vpop.f32.mrb[186].mxu1 }
0x26d9   :  { %v10639_v39 = vpack.i.bf16 %v6546_v54, %v6543_v31  ;;  %v10253_v38 = vpop.f32.mrb[187].mxu1 }
0x26db   :  { %10640 = vrot.lane.b32.xlu1 %v10639_v39, %s11222_s27 }
0x26de   :  { %v6664_v35 = vpop.f32.mrb[188].mxu1 }
0x26df   :  { %v10264_v61 = vpop.f32.mrb[189].mxu1 }
0x26e0   :  { %v6667_v5 = vpop.f32.mrb[190].mxu1 }
0x26e1   :  { %v10644_v32 = vpack.i.bf16 %v6667_v5, %v6664_v35  ;;  %v10265_v58 = vpop.f32.mrb[191].mxu1  ;;  %v10762_v5 = vld [vmem:[%s13835_s5 + $0x150] sm:$0xff]  }
0x26e2   :  { %v10763_v58 = vld [vmem:[%s13835_s5 + $0x158] sm:$0xff]  }
0x26e3   :  { %10645 = vrot.lane.b32.xlu1 %v10644_v32, %s11223_s28 }
0x26e6   :  { %v6785_v22 = vpop.f32.mrb[192].mxu1 }
0x26e7   :  { %v10276_v15 = vpop.f32.mrb[193].mxu1 }
0x26e8   :  { %v6788_v18 = vpop.f32.mrb[194].mxu1 }
0x26e9   :  { %v10649_v36 = vpack.i.bf16 %v6788_v18, %v6785_v22  ;;  %v10277_v1 = vpop.f32.mrb[195].mxu1  ;;  %v9239_v22 = vld [vmem:[%s13837_s9 + $0xf] ss:$0 sm:$0xff] }
0x26eb   :  { %10650 = vrot.lane.b32.xlu0 %v10649_v36, %s11224_s29 }
0x26f6   :  { %v6906_v60 = vpop.f32.mrb[196].mxu1 }
0x26f7   :  { %v10288_v50 = vpop.f32.mrb[197].mxu1 }
0x26f8   :  { %v6909_v42 = vpop.f32.mrb[198].mxu1 }
0x26f9   :  { %v10654_v51 = vpack.i.bf16 %v6909_v42, %v6906_v60  ;;  %v10289_v57 = vpop.f32.mrb[199].mxu1 }
0x26fb   :  { %10655 = vrot.lane.b32.xlu1 %v10654_v51, %s11225_s30 }
0x2717   :  { %v7027_v6 = vpop.f32.mrb[200].mxu1 }
0x2718   :  { %v10300_v7 = vpop.f32.mrb[201].mxu1 }
0x2719   :  { %v7030_v29 = vpop.f32.mrb[202].mxu1 }
0x271a   :  { %v10659_v46 = vpack.i.bf16 %v7030_v29, %v7027_v6  ;;  %v10301_v25 = vpop.f32.mrb[203].mxu1  ;;  %v9257_v6 = vld [vmem:[%s13837_s9 + $0x15] ss:$0 sm:$0xff] }
0x271c   :  { %10660 = vrot.lane.b32.xlu0 %v10659_v46, %s11226_s22 }
0x271f   :  { %v7148_v13 = vpop.f32.mrb[204].mxu1 }
0x2720   :  { %v10312_v12 = vpop.f32.mrb[205].mxu1 }
0x2721   :  { %v7151_v11 = vpop.f32.mrb[206].mxu1 }
0x2722   :  { %v10664_v56 = vpack.i.bf16 %v7151_v11, %v7148_v13  ;;  %v10313_v59 = vpop.f32.mrb[207].mxu1 }
0x2724   :  { %10665 = vrot.lane.b32.xlu1 %v10664_v56, %s13848_s24 }
0x2745   :  { %v10636_v37 = vpop.permute.xlu1 %10635 }
0x2746   :  { %v10638_v24 = vunpack.i.h.bf16 %v10636_v37  ;;  %v10637_v45 = vunpack.i.l.bf16 %v10636_v37 }
0x2748   :  { %v7212_v27 = vsel %vm236_vm2, %v13327_v2, %v10638_v24  ;;  %v7211_v20 = vsel %vm236_vm2, %v13325_v4, %v10637_v45 }
0x274d   :  { %v10641_v17 = vpop.permute.xlu1 %10640 }
0x274e   :  { %v10643_v10 = vunpack.i.h.bf16 %v10641_v17  ;;  %v10642_v28 = vunpack.i.l.bf16 %v10641_v17 }
0x2750   :  { %v7214_v21 = vsel %vm1260_vm4, %v7212_v27, %v10643_v10  ;;  %v7213_v23 = vsel %vm1260_vm4, %v7211_v20, %v10642_v28  ;;  %v10764_v10 = vld [vmem:[%s13835_s5 + $0x140] sm:$0xff]   ;;  %v10765_v28 = vld [vmem:[%s13835_s5 + $0x148] sm:$0xff]  }
0x2751   :  { %10323 = vmatpush3.bf16.msra.mxu1 %v10764_v10  ;;  %v13505_v10 = vld [vmem:[%s13843_s4 + $0x8] sm:$0xff] }
0x2752   :  { %10324 = vmatprep.subr.bf16.mxu1 %v11212_v0 }
0x2755   :  { %v10646_v33 = vpop.permute.xlu1 %10645  ;;  %10325 = vmatpush3.bf16.msra.mxu1 %v10765_v28 }
0x2756   :  { %v10648_v8 = vunpack.i.h.bf16 %v10646_v33  ;;  %v10647_v44 = vunpack.i.l.bf16 %v10646_v33  ;;  %10338 = vmatprep.subr.bf16.mxu1 %v11212_v0 }
0x2758   :  { %v7216_v14 = vsel %vm1263_vm5, %v7214_v21, %v10648_v8  ;;  %v7215_v52 = vsel %vm1263_vm5, %v7213_v23, %v10647_v44 }
0x275d   :  { %v10651_v30 = vpop.permute.xlu0 %10650 }
0x275e   :  { %v10653_v62 = vunpack.i.h.bf16 %v10651_v30  ;;  %v10652_v41 = vunpack.i.l.bf16 %v10651_v30 }
0x2760   :  { %v7218_v26 = vsel %vm284_vm3, %v7216_v14, %v10653_v62  ;;  %v7217_v34 = vsel %vm284_vm3, %v7215_v52, %v10652_v41 }
0x276d   :  { %v10656_v48 = vpop.permute.xlu1 %10655 }
0x276e   :  { %v10658_v43 = vunpack.i.h.bf16 %v10656_v48  ;;  %v10657_v16 = vunpack.i.l.bf16 %v10656_v48 }
0x2770   :  { %v7219_v31 = vsel %vm1268_vm6, %v7217_v34, %v10657_v16  ;;  %v7220_v4 = vsel %vm1268_vm6, %v7218_v26, %v10658_v43  ;;  %v9243_v43 = vld [vmem:[%s13837_s9 + $0x1f] ss:$0 sm:$0xff]  ;;  %v10766_v26 = vld [vmem:[%s13835_s5 + $0x160] sm:$0xff]  }
0x278e   :  { %v10661_v49 = vpop.permute.xlu0 %10660 }
0x278f   :  { %v10663_v53 = vunpack.i.h.bf16 %v10661_v49  ;;  %v10662_v19 = vunpack.i.l.bf16 %v10661_v49 }
0x2791   :  { %v7221_v39 = vsel %vm1271_vm7, %v7219_v31, %v10662_v19  ;;  %v7222_v38 = vsel %vm1271_vm7, %v7220_v4, %v10663_v53  ;;  %v9244_v53 = vld [vmem:[%s13837_s9 + $0x29] ss:$0 sm:$0xff]  ;;  %v9249_v31 = vld [vmem:[%s13837_s9 + $0x14] ss:$0 sm:$0xff] }
0x2796   :  { %v10666_v2 = vpop.permute.xlu1 %10665 }
0x2797   :  { %v10668_v40 = vunpack.i.h.bf16 %v10666_v2  ;;  %v10667_v54 = vunpack.i.l.bf16 %v10666_v2  ;;  %v10767_v2 = vld [vmem:[%s13835_s5 + $0x168] sm:$0xff]  }
0x2799   :  { %v7223_v35 = vsel %vm1274_vm8, %v7221_v39, %v10667_v54  ;;  %v7224_v61 = vsel %vm1274_vm8, %v7222_v38, %v10668_v40 }
0x279a   :  { %v7231_v32 = vpack.c.bf16 %v7224_v61, %v7223_v35 }
0x279c   :  { %10319 = vmatmul.mubr.msk.bf16.vlgmr.msra.gmra.mrb[212].mxu0 %vm62_vm1, %v7231_v32  ;;  %v9265_v32 = vld [vmem:[%s13837_s9 + $0x16] ss:$0 sm:$0xff] }
0x279d   :  { %10331 = vmatpush3.bf16.msra.mxu0 %v10762_v5  ;;  %10334 = vmatprep.mubr.msk.bf16.mxu0 %vm11213_vm0, %v11212_v0 }
0x279e   :  { %10332 = vmatprep.subr.bf16.mxu0 %v11212_v0 }
0x27a1   :  { %10333 = vmatpush3.bf16.msra.mxu0 %v10763_v58 }
0x27a2   :  { %10346 = vmatprep.subr.bf16.mxu0 %v11212_v0 }
0x27a4   :  { %10335 = vmatmul.mubr.msk.bf16.vlgmr.msra.gmra.mrb[216].mxu0 %vm62_vm1, %v12560_v3 }
0x27a5   :  { %10348 = vmatprep.mubr.msk.bf16.mxu0 %vm11213_vm0, %v11212_v0 }
0x286f   :  { %v7285_v15 = vpop.f32.mrb[212].mxu0 }
0x2870   :  { %v7286_v18 = vadd.f32 %v9239_v22, %v7285_v15  ;;  %v10320_v36 = vpop.f32.mrb[213].mxu0 }
0x2871   :  { %v7288_v1 = vpop.f32.mrb[214].mxu0 }
0x2872   :  { %v7292_v60 = vadd.f32 %v7286_v18, %v13009_v47  ;;  %v7289_v50 = vadd.f32 %v9239_v22, %v7288_v1  ;;  %v10321_v42 = vpop.f32.mrb[215].mxu0 }
0x2874   :  { %v7293_v51 = vadd.f32 %v7289_v50, %v13011_v55  ;;  %v7296_v57 = vsel %vm62_vm1, %v7292_v60, 0.0 }
0x2875   :  { %7297 = vadd.xlane.f32.xlu0 %v7296_v57 }
0x2876   :  { %v7299_v63 = vsel %vm62_vm1, %v7293_v51, 0.0 }
0x2877   :  { %7300 = vadd.xlane.f32.xlu1 %v7299_v63  ;;  %v7457_v7 = vpop.f32.mrb[216].mxu0 }
0x2878   :  { %v10336_v29 = vpop.f32.mrb[217].mxu0  ;;  %v7458_v46 = vadd.f32 %v9257_v6, %v7457_v7 }
0x2879   :  { %v7460_v9 = vpop.f32.mrb[218].mxu0 }
0x287a   :  { %v7461_v25 = vadd.f32 %v9257_v6, %v7460_v9  ;;  %v10337_v47 = vpop.f32.mrb[219].mxu0 }
0x287c   :  { %v13385_v13 = vpack.c.bf16 %v7461_v25, %v7458_v46 }
0x287e   :  { %v7534_v55 = vsel %vm236_vm2, %v13385_v13, 0 }
0x287f   :  { %10347 = vmatpush3.bf16.xpose.msra.mxu0 %v7534_v55 }
0x2880   :  { %10358 = vmatprep.subr.bf16.mxu0 %v11212_v0 }
0x2888   :  { %7648 = vrot.lane.b32.xlu1 %v13385_v13, %s11215_s14 }
0x288c   :  { %7770 = vrot.lane.b32.xlu1 %v13385_v13, %s11214_s13 }
0x2902   :  { %v7298_v12 = vpop.xlane.xlu0 %7297 }
0x2903   :  { %v7302_v11 = vmul.f32 0.03125, %v7298_v12 }
0x2904   :  { %v7301_v56 = vpop.xlane.xlu1 %7300 }
0x2905   :  { %v7304_v59 = vsub.f32 %v7292_v60, %v7302_v11  ;;  %v7303_v37 = vmul.f32 0.03125, %v7301_v56 }
0x2907   :  { %v7305_v17 = vsub.f32 %v7293_v51, %v7303_v37  ;;  %v7306_v33 = vmul.f32 %v7304_v59, %v7304_v59 }
0x2908   :  { %v7649_v61 = vpop.permute.xlu1 %7648 }
0x2909   :  { %v7308_v30 = vsel %vm62_vm1, %v7306_v33, 0.0  ;;  %v7307_v24 = vmul.f32 %v7305_v17, %v7305_v17  ;;  %v13499_v33 = vld [vmem:[%s13843_s4] sm:$0xff] }
0x290a   :  { %7309 = vadd.xlane.f32.xlu0 %v7308_v30 }
0x290b   :  { %v7311_v45 = vsel %vm62_vm1, %v7307_v24, 0.0 }
0x290c   :  { %v7771_v50 = vpop.permute.xlu1 %7770 }
0x290d   :  { %v7776_v51 = vsel %vm236_vm2, %v7771_v50, 0 }
0x290e   :  { %7312 = vadd.xlane.f32.xlu0 %v7311_v45 }
0x2997   :  { %v7310_v48 = vpop.xlane.xlu0 %7309 }
0x2998   :  { %v7314_v8 = vmul.f32 0.03125, %v7310_v48 }
0x299a   :  { %v7316_v44 = vadd.f32 1e-05, %v7314_v8 }
0x299b   :  { %v7313_v49 = vpop.xlane.xlu0 %7312 }
0x299c   :  { %11126 = vrsqrt.f32 %v7316_v44  ;;  %v7315_v62 = vmul.f32 0.03125, %v7313_v49 }
0x299e   :  { %v7317_v41 = vadd.f32 1e-05, %v7315_v62 }
0x29a0   :  { %11128 = vrsqrt.f32 %v7317_v41 }
0x29a6   :  { %v11127_v27 = vpop.eup %11126 }
0x29a7   :  { %v7320_v20 = vmul.f32 %v11127_v27, %v7304_v59 }
0x29a9   :  { %v7326_v21 = vmul.f32 %v9243_v43, %v7320_v20 }
0x29aa   :  { %v11129_v16 = vpop.eup %11128 }
0x29ab   :  { %v7321_v23 = vmul.f32 %v11129_v16, %v7305_v17  ;;  %v13410_v14 = vadd.f32 %v9244_v53, %v7326_v21 }
0x29ad   :  { %v7327_v19 = vmul.f32 %v9243_v43, %v7321_v23 }
0x29af   :  { %v13412_v52 = vadd.f32 %v9244_v53, %v7327_v19 }
0x29b1   :  { %v7340_v34 = vpack.c.bf16 %v13412_v52, %v13410_v14 }
0x29b3   :  { %10327 = vmatmul.mubr.msk.bf16.vlgmr.msra.gmra.mrb[208].mxu1 %vm62_vm1, %v7340_v34 }
0x29b4   :  { %10339 = vmatpush3.bf16.msra.mxu1 %v10766_v26  ;;  %10342 = vmatprep.mubr.msk.bf16.mxu1 %vm11213_vm0, %v11212_v0 }
0x29b5   :  { %10340 = vmatprep.subr.bf16.mxu1 %v11212_v0 }
0x29b8   :  { %10341 = vmatpush3.bf16.msra.mxu1 %v10767_v2 }
0x29b9   :  { %10352 = vmatprep.subr.bf16.mxu1 %v11212_v0 }
0x29bb   :  { %10343 = vmatmul.mubr.msk.bf16.vlgmr.msra.gmra.mrb[212].mxu1 %vm62_vm1, %v12560_v3  ;;  %v7654_v3 = vsel %vm236_vm2, %v7649_v61, 0 }
0x29bc   :  { %10354 = vmatprep.mubr.msk.bf16.mxu1 %vm11213_vm0, %v11212_v0 }
0x2a86   :  { %v7394_v4 = vpop.f32.mrb[208].mxu1 }
0x2a87   :  { %v10328_v40 = vpop.f32.mrb[209].mxu1  ;;  %v7395_v39 = vadd.f32 %v9249_v31, %v7394_v4 }
0x2a88   :  { %v7397_v54 = vpop.f32.mrb[210].mxu1 }
0x2a89   :  { %v7398_v38 = vadd.f32 %v9249_v31, %v7397_v54  ;;  %v10329_v35 = vpop.f32.mrb[211].mxu1 }
0x2a8b   :  { %v7527_v5 = vpack.c.bf16 %v7398_v38, %v7395_v39 }
0x2a8d   :  { %7645 = vrot.lane.b32.xlu0 %v7527_v5, %s11215_s14  ;;  %7768 = vrot.lane.b32.xlu1 %v7527_v5, %s11214_s13 }
0x2a8e   :  { %10349 = vmatmul.mubr.msk.bf16.vlgmr.msra.gmra.mrb[220].mxu0 %vm236_vm2, %v7527_v5  ;;  %v7520_v58 = vpop.f32.mrb[212].mxu1 }
0x2a8f   :  { %10359 = vmatpush3.bf16.xpose.msra.mxu0 %v7654_v3  ;;  %v10344_v22 = vpop.f32.mrb[213].mxu1  ;;  %10360 = vmatprep.mubr.msk.bf16.mxu0 %vm11213_vm0, %v11212_v0  ;;  %v7521_v18 = vadd.f32 %v9265_v32, %v7520_v58 }
0x2a90   :  { %v7523_v15 = vpop.f32.mrb[214].mxu1  ;;  %10370 = vmatprep.subr.bf16.mxu0 %v11212_v0 }
0x2a91   :  { %v7524_v36 = vadd.f32 %v9265_v32, %v7523_v15  ;;  %v10345_v1 = vpop.f32.mrb[215].mxu1  ;;  %7891 = vrot.lane.b32.xlu0 %v13385_v13, %s11216_s15  ;;  %7889 = vrot.lane.b32.xlu1 %v7527_v5, %s11216_s15 }
0x2a93   :  { %v13447_v60 = vpack.c.bf16 %v7524_v36, %v7521_v18 }
0x2a95   :  { %10353 = vmatpush3.bf16.msra.mxu1 %v13447_v60  ;;  %8012 = vrot.lane.b32.xlu0 %v13385_v13, %s11217_s16 }
0x2a96   :  { %8010 = vrot.lane.b32.xlu1 %v7527_v5, %s11217_s16  ;;  %10364 = vmatprep.subr.bf16.mxu1 %v11212_v0 }
0x2a99   :  { %8133 = vrot.lane.b32.xlu0 %v13385_v13, %s11218_s17 }
0x2a9a   :  { %8131 = vrot.lane.b32.xlu1 %v7527_v5, %s11218_s17 }
0x2a9d   :  { %8254 = vrot.lane.b32.xlu0 %v13385_v13, %s11219_s18 }
0x2a9e   :  { %8252 = vrot.lane.b32.xlu1 %v7527_v5, %s11219_s18 }
0x2aa1   :  { %8375 = vrot.lane.b32.xlu0 %v13385_v13, %s11220_s19 }
0x2aa2   :  { %8373 = vrot.lane.b32.xlu1 %v7527_v5, %s11220_s19 }
0x2aff   :  { %v7646_v42 = vpop.permute.xlu0 %7645  ;;  %v7769_v63 = vpop.permute.xlu1 %7768 }
0x2b00   :  { %10361 = vmatmul.mubr.msk.bf16.vlgmr.msra.gmra.mrb[224].mxu0 %vm236_vm2, %v7646_v42 }
0x2b01   :  { %10371 = vmatpush3.bf16.xpose.msra.mxu0 %v7776_v51  ;;  %10372 = vmatprep.mubr.msk.bf16.mxu0 %vm11213_vm0, %v11212_v0 }
0x2b02   :  { %10382 = vmatprep.subr.bf16.mxu0 %v11212_v0 }
0x2b03   :  { %v7892_v57 = vpop.permute.xlu0 %7891  ;;  %v7890_v29 = vpop.permute.xlu1 %7889 }
0x2b04   :  { %v7897_v6 = vsel %vm236_vm2, %v7892_v57, 0 }
0x2b07   :  { %v8013_v7 = vpop.permute.xlu0 %8012 }
0x2b08   :  { %10373 = vmatmul.mubr.msk.bf16.vlgmr.msra.gmra.mrb[228].mxu0 %vm236_vm2, %v7769_v63  ;;  %v8018_v9 = vsel %vm236_vm2, %v8013_v7, 0  ;;  %v8011_v25 = vpop.permute.xlu1 %8010 }
0x2b09   :  { %10383 = vmatpush3.bf16.xpose.msra.mxu0 %v7897_v6  ;;  %10384 = vmatprep.mubr.msk.bf16.mxu0 %vm11213_vm0, %v11212_v0 }
0x2b0a   :  { %10394 = vmatprep.subr.bf16.mxu0 %v11212_v0 }
0x2b0b   :  { %v8134_v46 = vpop.permute.xlu0 %8133 }
0x2b0c   :  { %v8139_v47 = vsel %vm236_vm2, %v8134_v46, 0  ;;  %v8132_v55 = vpop.permute.xlu1 %8131 }
0x2b0f   :  { %v8255_v13 = vpop.permute.xlu0 %8254 }
0x2b10   :  { %10385 = vmatmul.mubr.msk.bf16.vlgmr.msra.gmra.mrb[232].mxu0 %vm236_vm2, %v7890_v29  ;;  %v8260_v12 = vsel %vm236_vm2, %v8255_v13, 0  ;;  %v8253_v56 = vpop.permute.xlu1 %8252 }
0x2b11   :  { %10395 = vmatpush3.bf16.xpose.msra.mxu0 %v8018_v9  ;;  %10396 = vmatprep.mubr.msk.bf16.mxu0 %vm11213_vm0, %v11212_v0 }
0x2b12   :  { %10406 = vmatprep.subr.bf16.mxu0 %v11212_v0 }
0x2b13   :  { %v8376_v11 = vpop.permute.xlu0 %8375 }
0x2b14   :  { %v8381_v59 = vsel %vm236_vm2, %v8376_v11, 0  ;;  %v8374_v37 = vpop.permute.xlu1 %8373 }
0x2b18   :  { %10397 = vmatmul.mubr.msk.bf16.vlgmr.msra.gmra.mrb[236].mxu0 %vm236_vm2, %v8011_v25 }
0x2b19   :  { %10407 = vmatpush3.bf16.xpose.msra.mxu0 %v8139_v47  ;;  %10408 = vmatprep.mubr.msk.bf16.mxu0 %vm11213_vm0, %v11212_v0 }
0x2b1a   :  { %10418 = vmatprep.subr.bf16.mxu0 %v11212_v0 }
0x2b20   :  { %10409 = vmatmul.mubr.msk.bf16.vlgmr.msra.gmra.mrb[240].mxu0 %vm236_vm2, %v8132_v55 }
0x2b21   :  { %10419 = vmatpush3.bf16.xpose.msra.mxu0 %v8260_v12  ;;  %10420 = vmatprep.mubr.msk.bf16.mxu0 %vm11213_vm0, %v11212_v0 }
0x2b22   :  { %10430 = vmatprep.subr.bf16.mxu0 %v11212_v0 }
0x2b28   :  { %10421 = vmatmul.mubr.msk.bf16.vlgmr.msra.gmra.mrb[244].mxu0 %vm236_vm2, %v8253_v56 }
0x2b29   :  { %10431 = vmatpush3.bf16.xpose.msra.mxu0 %v8381_v59  ;;  %10432 = vmatprep.mubr.msk.bf16.mxu0 %vm11213_vm0, %v11212_v0 }
0x2b2a   :  { %10442 = vmatprep.subr.bf16.mxu0 %v11212_v0 }
0x2b30   :  { %10433 = vmatmul.mubr.msk.bf16.vlgmr.msra.gmra.mrb[248].mxu0 %vm236_vm2, %v8374_v37 }
0x2b31   :  { %10446 = vmatprep.mubr.msk.bf16.mxu0 %vm11213_vm0, %v11212_v0 }
0x2b61   :  { %v7570_v17 = vpop.f32.mrb[220].mxu0 }
0x2b62   :  { %v7571_v30 = vadd.f32 %v13499_v33, %v7570_v17  ;;  %v10350_v24 = vpop.f32.mrb[221].mxu0 }
0x2b63   :  { %v7573_v45 = vpop.f32.mrb[222].mxu0 }
0x2b64   :  { %v7574_v28 = vadd.f32 %v13505_v10, %v7573_v45  ;;  %v10351_v48 = vpop.f32.mrb[223].mxu0  ;;  %v7577_v8 = vsel %vm284_vm3, %v7571_v30, -inf }
0x2b65   :  { %7578 = vmax.xlane.f32.xlu0 %v7577_v8 }
0x2b66   :  { %v7580_v44 = vsel %vm284_vm3, %v7574_v28, -inf }
0x2b67   :  { %7581 = vmax.xlane.f32.xlu1 %v7580_v44 }
0x2b78   :  { %7721 = vrot.lane.b32.xlu1 %v13447_v60, %s11215_s14 }
0x2bd3   :  { %v7690_v49 = vpop.f32.mrb[224].mxu0 }
0x2bd4   :  { %v13513_v62 = vadd.f32 %v13499_v33, %v7690_v49  ;;  %v10362_v41 = vpop.f32.mrb[225].mxu0 }
0x2bd5   :  { %v7693_v27 = vpop.f32.mrb[226].mxu0 }
0x2bd6   :  { %v13516_v20 = vadd.f32 %v13505_v10, %v7693_v27  ;;  %v10363_v43 = vpop.f32.mrb[227].mxu0  ;;  %v7697_v16 = vsel %vm284_vm3, %v13513_v62, -inf }
0x2bd7   :  { %7698 = vmax.xlane.f32.xlu0 %v7697_v16 }
0x2bd8   :  { %v7700_v21 = vsel %vm284_vm3, %v13516_v20, -inf }
0x2bdb   :  { %7701 = vmax.xlane.f32.xlu0 %v7700_v21  ;;  %v7812_v23 = vpop.f32.mrb[228].mxu0 }
0x2bdc   :  { %v13523_v53 = vadd.f32 %v13499_v33, %v7812_v23  ;;  %v10374_v19 = vpop.f32.mrb[229].mxu0 }
0x2bdd   :  { %v7815_v26 = vpop.f32.mrb[230].mxu0 }
0x2bde   :  { %v13526_v34 = vadd.f32 %v13505_v10, %v7815_v26  ;;  %v10375_v2 = vpop.f32.mrb[231].mxu0  ;;  %v7819_v31 = vsel %vm284_vm3, %v13523_v53, -inf }
0x2bdf   :  { %7820 = vmax.xlane.f32.xlu1 %v7819_v31 }
0x2be0   :  { %v7822_v4 = vsel %vm284_vm3, %v13526_v34, -inf }
0x2be1   :  { %7823 = vmax.xlane.f32.xlu0 %v7822_v4 }
0x2be3   :  { %v7933_v40 = vpop.f32.mrb[232].mxu0 }
0x2be4   :  { %v13533_v54 = vadd.f32 %v13499_v33, %v7933_v40  ;;  %v10386_v39 = vpop.f32.mrb[233].mxu0 }
0x2be5   :  { %v7936_v38 = vpop.f32.mrb[234].mxu0 }
0x2be6   :  { %v13536_v35 = vadd.f32 %v13505_v10, %v7936_v38  ;;  %v10387_v61 = vpop.f32.mrb[235].mxu0  ;;  %v7940_v5 = vsel %vm284_vm3, %v13533_v54, -inf }
0x2be7   :  { %7941 = vmax.xlane.f32.xlu1 %v7940_v5 }
0x2be8   :  { %v7943_v3 = vsel %vm284_vm3, %v13536_v35, -inf }
0x2be9   :  { %7944 = vmax.xlane.f32.xlu0 %v7943_v3 }
0x2beb   :  { %v8054_v32 = vpop.f32.mrb[236].mxu0 }
0x2bec   :  { %v13543_v58 = vadd.f32 %v13499_v33, %v8054_v32  ;;  %v10398_v22 = vpop.f32.mrb[237].mxu0 }
0x2bed   :  { %v8057_v15 = vpop.f32.mrb[238].mxu0 }
0x2bee   :  { %v13546_v18 = vadd.f32 %v13505_v10, %v8057_v15  ;;  %v10399_v36 = vpop.f32.mrb[239].mxu0  ;;  %v8061_v1 = vsel %vm284_vm3, %v13543_v58, -inf }
0x2bef   :  { %8062 = vmax.xlane.f32.xlu1 %v8061_v1 }
0x2bf0   :  { %v8064_v50 = vsel %vm284_vm3, %v13546_v18, -inf }
0x2bf1   :  { %8065 = vmax.xlane.f32.xlu0 %v8064_v50 }
0x2bf2   :  { %v7579_v42 = vpop.xlane.xlu0 %7578 }
0x2bf3   :  { %v7583_v51 = vsub.f32 %v7571_v30, %v7579_v42  ;;  %v8175_v57 = vpop.f32.mrb[240].mxu0 }
0x2bf4   :  { %v7582_v63 = vpop.xlane.xlu1 %7581  ;;  %v13553_v6 = vadd.f32 %v13499_v33, %v8175_v57  ;;  %v10410_v7 = vpop.f32.mrb[241].mxu0 }
0x2bf5   :  { %v7585_v29 = vmul.f32 1.442695, %v7583_v51  ;;  %v7584_v9 = vsub.f32 %v7574_v28, %v7582_v63  ;;  %v8178_v46 = vpop.f32.mrb[242].mxu0 }
0x2bf6   :  { %v13556_v25 = vadd.f32 %v13505_v10, %v8178_v46  ;;  %v10411_v47 = vpop.f32.mrb[243].mxu0  ;;  %v8182_v13 = vsel %vm284_vm3, %v13553_v6, -inf }
0x2bf7   :  { %11130 = vpow2.f32 %v7585_v29  ;;  %v7587_v55 = vmul.f32 1.442695, %v7584_v9  ;;  %8183 = vmax.xlane.f32.xlu1 %v8182_v13 }
0x2bf8   :  { %v8185_v12 = vsel %vm284_vm3, %v13556_v25, -inf  ;;  %v13595_v2 = vpop.permute.xlu1 %7721 }
0x2bf9   :  { %11132 = vpow2.f32 %v7587_v55  ;;  %8186 = vmax.xlane.f32.xlu0 %v8185_v12 }
0x2bfb   :  { %v8296_v11 = vpop.f32.mrb[244].mxu0 }
0x2bfc   :  { %v13563_v56 = vadd.f32 %v13499_v33, %v8296_v11  ;;  %v10422_v59 = vpop.f32.mrb[245].mxu0 }
0x2bfd   :  { %v8299_v37 = vpop.f32.mrb[246].mxu0 }
0x2bfe   :  { %v13566_v17 = vadd.f32 %v13505_v10, %v8299_v37  ;;  %v10423_v30 = vpop.f32.mrb[247].mxu0  ;;  %v8303_v24 = vsel %vm284_vm3, %v13563_v56, -inf }
0x2bff   :  { %8304 = vmax.xlane.f32.xlu1 %v8303_v24 }
0x2c00   :  { %v8306_v45 = vsel %vm284_vm3, %v13566_v17, -inf }
0x2c01   :  { %v13572_v28 = vpop.eup %11130  ;;  %8307 = vmax.xlane.f32.xlu0 %v8306_v45 }
0x2c02   :  { %v7589_v48 = vsel %vm284_vm3, %v13572_v28, 0.0 }
0x2c03   :  { %v13576_v8 = vpop.eup %11132  ;;  %7590 = vadd.xlane.f32.xlu1 %v7589_v48  ;;  %v8417_v44 = vpop.f32.mrb[248].mxu0 }
0x2c04   :  { %v13579_v49 = vadd.f32 %v13499_v33, %v8417_v44  ;;  %v10434_v41 = vpop.f32.mrb[249].mxu0  ;;  %v7592_v27 = vsel %vm284_vm3, %v13576_v8, 0.0 }
0x2c05   :  { %7593 = vadd.xlane.f32.xlu0 %v7592_v27  ;;  %v8420_v43 = vpop.f32.mrb[250].mxu0 }
0x2c06   :  { %v13584_v16 = vadd.f32 %v13505_v10, %v8420_v43  ;;  %v10435_v21 = vpop.f32.mrb[251].mxu0  ;;  %v8424_v23 = vsel %vm284_vm3, %v13579_v49, -inf }
0x2c07   :  { %8425 = vmax.xlane.f32.xlu1 %v8424_v23 }
0x2c08   :  { %v8427_v19 = vsel %vm284_vm3, %v13584_v16, -inf }
0x2c09   :  { %8428 = vmax.xlane.f32.xlu0 %v8427_v19 }
0x2c18   :  { %7963 = vrot.lane.b32.xlu1 %v13447_v60, %s11216_s15 }
0x2c1f   :  { %7842 = vrot.lane.b32.xlu0 %v13447_v60, %s11214_s13 }
0x2c64   :  { %v7699_v33 = vpop.xlane.xlu0 %7698 }
0x2c65   :  { %v7703_v26 = vsub.f32 %v13513_v62, %v7699_v33 }
0x2c67   :  { %v7705_v10 = vmul.f32 1.442695, %v7703_v26 }
0x2c68   :  { %v7702_v31 = vpop.xlane.xlu0 %7701 }
0x2c69   :  { %11134 = vpow2.f32 %v7705_v10  ;;  %v7704_v4 = vsub.f32 %v13516_v20, %v7702_v31 }
0x2c6b   :  { %v7707_v40 = vmul.f32 1.442695, %v7704_v4 }
0x2c6c   :  { %v7821_v39 = vpop.xlane.xlu1 %7820 }
0x2c6d   :  { %11136 = vpow2.f32 %v7707_v40  ;;  %v7825_v38 = vsub.f32 %v13523_v53, %v7821_v39 }
0x2c6e   :  { %v7824_v61 = vpop.xlane.xlu0 %7823 }
0x2c6f   :  { %v7827_v5 = vmul.f32 1.442695, %v7825_v38  ;;  %v7826_v3 = vsub.f32 %v13526_v34, %v7824_v61 }
0x2c71   :  { %11138 = vpow2.f32 %v7827_v5  ;;  %v7829_v32 = vmul.f32 1.442695, %v7826_v3 }
0x2c73   :  { %v13600_v22 = vpop.eup %11134  ;;  %11140 = vpow2.f32 %v7829_v32 }
0x2c74   :  { %v7942_v62 = vpop.xlane.xlu1 %7941  ;;  %v7709_v15 = vsel %vm284_vm3, %v13600_v22, 0.0 }
0x2c75   :  { %v7946_v20 = vsub.f32 %v13533_v54, %v7942_v62  ;;  %7710 = vadd.xlane.f32.xlu1 %v7709_v15 }
0x2c76   :  { %v7945_v36 = vpop.xlane.xlu0 %7944 }
0x2c77   :  { %v13605_v1 = vpop.eup %11136  ;;  %v7948_v53 = vmul.f32 1.442695, %v7946_v20  ;;  %v7947_v50 = vsub.f32 %v13536_v35, %v7945_v36 }
0x2c78   :  { %v7712_v34 = vsel %vm284_vm3, %v13605_v1, 0.0 }
0x2c79   :  { %11142 = vpow2.f32 %v7948_v53  ;;  %v7950_v42 = vmul.f32 1.442695, %v7947_v50  ;;  %7713 = vadd.xlane.f32.xlu0 %v7712_v34 }
0x2c7b   :  { %v13610_v51 = vpop.eup %11138  ;;  %11144 = vpow2.f32 %v7950_v42 }
0x2c7c   :  { %v8063_v57 = vpop.xlane.xlu1 %8062  ;;  %v7831_v54 = vsel %vm284_vm3, %v13610_v51, 0.0 }
0x2c7d   :  { %v13614_v63 = vpop.eup %11140  ;;  %v8067_v7 = vsub.f32 %v13543_v58, %v8063_v57  ;;  %7832 = vadd.xlane.f32.xlu1 %v7831_v54 }
0x2c7e   :  { %v8066_v29 = vpop.xlane.xlu0 %8065  ;;  %v7834_v35 = vsel %vm284_vm3, %v13614_v63, 0.0 }
0x2c7f   :  { %v8069_v9 = vmul.f32 1.442695, %v8067_v7  ;;  %v8068_v46 = vsub.f32 %v13546_v18, %v8066_v29  ;;  %7835 = vadd.xlane.f32.xlu0 %v7834_v35 }
0x2c81   :  { %11146 = vpow2.f32 %v8069_v9  ;;  %v8071_v47 = vmul.f32 1.442695, %v8068_v46 }
0x2c83   :  { %v13620_v13 = vpop.eup %11142  ;;  %11148 = vpow2.f32 %v8071_v47 }
0x2c84   :  { %v8184_v55 = vpop.xlane.xlu1 %8183  ;;  %v7952_v12 = vsel %vm284_vm3, %v13620_v13, 0.0 }
0x2c85   :  { %v13624_v11 = vpop.eup %11144  ;;  %v8188_v58 = vsub.f32 %v13553_v6, %v8184_v55  ;;  %7953 = vadd.xlane.f32.xlu1 %v7952_v12 }
0x2c86   :  { %v8187_v59 = vpop.xlane.xlu0 %8186  ;;  %v7955_v37 = vsel %vm284_vm3, %v13624_v11, 0.0 }
0x2c87   :  { %v8190_v18 = vmul.f32 1.442695, %v8188_v58  ;;  %v8189_v30 = vsub.f32 %v13556_v25, %v8187_v59  ;;  %7956 = vadd.xlane.f32.xlu0 %v7955_v37 }
0x2c89   :  { %11150 = vpow2.f32 %v8190_v18  ;;  %v8192_v24 = vmul.f32 1.442695, %v8189_v30 }
0x2c8b   :  { %v13630_v45 = vpop.eup %11146  ;;  %11152 = vpow2.f32 %v8192_v24 }
0x2c8c   :  { %v8305_v48 = vpop.xlane.xlu1 %8304  ;;  %v8073_v44 = vsel %vm284_vm3, %v13630_v45, 0.0 }
0x2c8d   :  { %v13634_v41 = vpop.eup %11148  ;;  %8074 = vadd.xlane.f32.xlu1 %v8073_v44 }
0x2c8e   :  { %v8308_v6 = vpop.xlane.xlu0 %8307  ;;  %v8076_v27 = vsel %vm284_vm3, %v13634_v41, 0.0 }
0x2c8f   :  { %v8310_v43 = vsub.f32 %v13566_v17, %v8308_v6  ;;  %8077 = vadd.xlane.f32.xlu0 %v8076_v27 }
0x2c90   :  { %v7591_v25 = vpop.xlane.xlu1 %7590 }
0x2c91   :  { %v8313_v21 = vmul.f32 1.442695, %v8310_v43  ;;  %11154 = vrcp.f32 %v7591_v25 }
0x2c92   :  { %v7594_v23 = vpop.xlane.xlu0 %7593 }
0x2c93   :  { %v13639_v19 = vpop.eup %11150  ;;  %11156 = vpow2.f32 %v8313_v21 }
0x2c94   :  { %11158 = vrcp.f32 %v7594_v23  ;;  %v8426_v33 = vpop.xlane.xlu1 %8425  ;;  %v8194_v26 = vsel %vm284_vm3, %v13639_v19, 0.0 }
0x2c95   :  { %v13643_v10 = vpop.eup %11152  ;;  %v8430_v31 = vsub.f32 %v13579_v49, %v8426_v33  ;;  %8195 = vadd.xlane.f32.xlu0 %v8194_v26 }
0x2c96   :  { %v8429_v4 = vpop.xlane.xlu0 %8428  ;;  %v8197_v39 = vsel %vm284_vm3, %v13643_v10, 0.0 }
0x2c97   :  { %v8432_v17 = vmul.f32 1.442695, %v8430_v31  ;;  %v8431_v40 = vsub.f32 %v13584_v16, %v8429_v4 }
0x2c98   :  { %v7964_v34 = vpop.permute.xlu1 %7963 }
0x2c99   :  { %11160 = vpow2.f32 %v8432_v17  ;;  %v8434_v38 = vmul.f32 1.442695, %v8431_v40  ;;  %8198 = vadd.xlane.f32.xlu0 %v8197_v39 }
0x2c9a   :  { %v7843_v42 = vpop.permute.xlu0 %7842 }
0x2c9b   :  { %11162 = vpow2.f32 %v8434_v38  ;;  %v11155_v61 = vpop.eup %11154 }
0x2c9c   :  { %v7597_v32 = vmul.f32 %v11155_v61, %v13572_v28 }
0x2c9d   :  { %v13649_v5 = vpop.eup %11156 }
0x2c9e   :  { %v11159_v3 = vpop.eup %11158  ;;  %8084 = vrot.lane.b32.xlu1 %v13447_v60, %s11217_s16  ;;  %v8318_v49 = vsel %vm284_vm3, %v13649_v5, 0.0 }
0x2c9f   :  { %v7598_v16 = vmul.f32 %v11159_v3, %v13576_v8  ;;  %8319 = vadd.xlane.f32.xlu0 %v8318_v49  ;;  %v8309_v8 = vsub.f32 %v13563_v56, %v8305_v48 }
0x2ca1   :  { %v7599_v62 = vpack.c.bf16 %v7598_v16, %v7597_v32  ;;  %v8311_v53 = vmul.f32 1.442695, %v8309_v8 }
0x2ca3   :  { %v13657_v15 = vpop.eup %11160  ;;  %10355 = vmatmul.mubr.msk.bf16.vlgmr.msra.gmra.mrb[216].mxu1 %vm284_vm3, %v7599_v62  ;;  %11164 = vpow2.f32 %v8311_v53 }
0x2ca4   :  { %10365 = vmatpush3.bf16.msra.mxu1 %v13595_v2  ;;  %v8436_v20 = vsel %vm284_vm3, %v13657_v15, 0.0  ;;  %10366 = vmatprep.mubr.msk.bf16.mxu1 %vm11213_vm0, %v11212_v0 }
0x2ca5   :  { %v13665_v36 = vpop.eup %11162  ;;  %8437 = vadd.xlane.f32.xlu0 %v8436_v20  ;;  %10376 = vmatprep.subr.bf16.mxu1 %v11212_v0 }
0x2ca6   :  { %v8439_v28 = vsel %vm284_vm3, %v13665_v36, 0.0 }
0x2ca9   :  { %8440 = vadd.xlane.f32.xlu0 %v8439_v28 }
0x2cad   :  { %v13671_v2 = vpop.eup %11164 }
0x2cae   :  { %v8315_v50 = vsel %vm284_vm3, %v13671_v2, 0.0 }
0x2cbf   :  { %8205 = vrot.lane.b32.xlu0 %v13447_v60, %s11218_s17 }
0x2cc2   :  { %8316 = vadd.xlane.f32.xlu1 %v8315_v50 }
0x2cd3   :  { %8326 = vrot.lane.b32.xlu1 %v13447_v60, %s11219_s18 }
0x2cd7   :  { %8447 = vrot.lane.b32.xlu1 %v13447_v60, %s11220_s19 }
0x2d02   :  { %v7711_v56 = vpop.xlane.xlu1 %7710 }
0x2d03   :  { %11166 = vrcp.f32 %v7711_v56 }
0x2d06   :  { %v7714_v57 = vpop.xlane.xlu0 %7713 }
0x2d07   :  { %11168 = vrcp.f32 %v7714_v57 }
0x2d0a   :  { %v7833_v54 = vpop.xlane.xlu1 %7832 }
0x2d0b   :  { %11170 = vrcp.f32 %v7833_v54 }
0x2d0c   :  { %v7836_v7 = vpop.xlane.xlu0 %7835 }
0x2d0d   :  { %11172 = vrcp.f32 %v7836_v7  ;;  %v11167_v29 = vpop.eup %11166 }
0x2d0e   :  { %v7717_v9 = vmul.f32 %v11167_v29, %v13600_v22 }
0x2d11   :  { %v11169_v35 = vpop.eup %11168 }
0x2d12   :  { %v7718_v46 = vmul.f32 %v11169_v35, %v13605_v1  ;;  %v7954_v47 = vpop.xlane.xlu1 %7953 }
0x2d13   :  { %11174 = vrcp.f32 %v7954_v47 }
0x2d14   :  { %v7957_v55 = vpop.xlane.xlu0 %7956  ;;  %v7719_v60 = vpack.c.bf16 %v7718_v46, %v7717_v9 }
0x2d15   :  { %11176 = vrcp.f32 %v7957_v55  ;;  %v11171_v12 = vpop.eup %11170 }
0x2d16   :  { %10367 = vmatmul.mubr.msk.bf16.vlgmr.msra.gmra.mrb[220].mxu1 %vm284_vm3, %v7719_v60  ;;  %v7839_v22 = vmul.f32 %v11171_v12, %v13610_v51 }
0x2d17   :  { %v11173_v58 = vpop.eup %11172  ;;  %10377 = vmatpush3.bf16.msra.mxu1 %v7843_v42  ;;  %10378 = vmatprep.mubr.msk.bf16.mxu1 %vm11213_vm0, %v11212_v0 }
0x2d18   :  { %v7840_v59 = vmul.f32 %v11173_v58, %v13614_v63  ;;  %10388 = vmatprep.subr.bf16.mxu1 %v11212_v0 }
0x2d1a   :  { %v8075_v1 = vpop.xlane.xlu1 %8074  ;;  %v7841_v18 = vpack.c.bf16 %v7840_v59, %v7839_v22 }
0x2d1b   :  { %11178 = vrcp.f32 %v8075_v1 }
0x2d1c   :  { %v8078_v37 = vpop.xlane.xlu0 %8077 }
0x2d1d   :  { %11180 = vrcp.f32 %v8078_v37  ;;  %v11175_v30 = vpop.eup %11174 }
0x2d1e   :  { %10379 = vmatmul.mubr.msk.bf16.vlgmr.msra.gmra.mrb[224].mxu1 %vm284_vm3, %v7841_v18  ;;  %v7960_v63 = vmul.f32 %v11175_v30, %v13620_v13  ;;  %v8085_v27 = vpop.permute.xlu1 %8084 }
0x2d1f   :  { %v11177_v24 = vpop.eup %11176  ;;  %10389 = vmatpush3.bf16.msra.mxu1 %v7964_v34  ;;  %10390 = vmatprep.mubr.msk.bf16.mxu1 %vm11213_vm0, %v11212_v0 }
0x2d20   :  { %v7961_v48 = vmul.f32 %v11177_v24, %v13624_v11  ;;  %10400 = vmatprep.subr.bf16.mxu1 %v11212_v0 }
0x2d22   :  { %v8196_v51 = vpop.xlane.xlu0 %8195  ;;  %v7962_v44 = vpack.c.bf16 %v7961_v48, %v7960_v63  ;;  %v10768_v63 = vld [vmem:[%s13835_s5 + $0x170] sm:$0xff]  }
0x2d23   :  { %10443 = vmatpush3.bf16.msra.mxu0 %v10768_v63 }
0x2d24   :  { %10444 = vmatprep.subr.bf16.mxu0 %v11212_v0 }
0x2d25   :  { %v11179_v6 = vpop.eup %11178 }
0x2d26   :  { %10391 = vmatmul.mubr.msk.bf16.vlgmr.msra.gmra.mrb[228].mxu1 %vm284_vm3, %v7962_v44  ;;  %v8199_v21 = vpop.xlane.xlu0 %8198  ;;  %v8081_v11 = vmul.f32 %v11179_v6, %v13630_v45 }
0x2d27   :  { %v11181_v43 = vpop.eup %11180  ;;  %10401 = vmatpush3.bf16.msra.mxu1 %v8085_v27  ;;  %10402 = vmatprep.mubr.msk.bf16.mxu1 %vm11213_vm0, %v11212_v0  ;;  %11182 = vrcp.f32 %v8199_v21  ;;  %v10769_v27 = vld [vmem:[%s13835_s5 + $0x178] sm:$0xff]  }
0x2d28   :  { %v8082_v25 = vmul.f32 %v11181_v43, %v13634_v41  ;;  %10412 = vmatprep.subr.bf16.mxu1 %v11212_v0  ;;  %11184 = vrcp.f32 %v8196_v51  ;;  %10445 = vmatpush3.bf16.msra.mxu0 %v10769_v27 }
0x2d29   :  { %10458 = vmatprep.subr.bf16.mxu0 %v11212_v0 }
0x2d2a   :  { %v8083_v13 = vpack.c.bf16 %v8082_v25, %v8081_v11 }
0x2d2c   :  { %v8320_v23 = vpop.xlane.xlu0 %8319 }
0x2d2d   :  { %11186 = vrcp.f32 %v8320_v23 }
0x2d2e   :  { %10403 = vmatmul.mubr.msk.bf16.vlgmr.msra.gmra.mrb[232].mxu1 %vm284_vm3, %v8083_v13 }
0x2d2f   :  { %10414 = vmatprep.mubr.msk.bf16.mxu1 %vm11213_vm0, %v11212_v0 }
0x2d31   :  { %v11183_v26 = vpop.eup %11182 }
0x2d32   :  { %v8438_v33 = vpop.xlane.xlu0 %8437  ;;  %v11185_v4 = vpop.eup %11184  ;;  %v8203_v41 = vmul.f32 %v11183_v26, %v13643_v10 }
0x2d33   :  { %v8202_v17 = vmul.f32 %v11185_v4, %v13639_v19 }
0x2d35   :  { %v8204_v45 = vpack.c.bf16 %v8203_v41, %v8202_v17 }
0x2d36   :  { %v8441_v31 = vpop.xlane.xlu0 %8440 }
0x2d37   :  { %v11187_v19 = vpop.eup %11186 }
0x2d38   :  { %v8324_v61 = vmul.f32 %v11187_v19, %v13649_v5 }
0x2d3a   :  { %v8206_v40 = vpop.permute.xlu0 %8205 }
0x2d3b   :  { %10413 = vmatpush3.bf16.msra.mxu1 %v8206_v40 }
0x2d3c   :  { %10424 = vmatprep.subr.bf16.mxu1 %v11212_v0 }
0x2d3e   :  { %10415 = vmatmul.mubr.msk.bf16.vlgmr.msra.gmra.mrb[236].mxu1 %vm284_vm3, %v8204_v45 }
0x2d3f   :  { %10426 = vmatprep.mubr.msk.bf16.mxu1 %vm11213_vm0, %v11212_v0 }
0x2d4f   :  { %v8317_v39 = vpop.xlane.xlu1 %8316 }
0x2d50   :  { %11188 = vrcp.f32 %v8317_v39 }
0x2d51   :  { %11190 = vrcp.f32 %v8441_v31 }
0x2d52   :  { %11192 = vrcp.f32 %v8438_v33 }
0x2d53   :  { %v8327_v38 = vpop.permute.xlu1 %8326 }
0x2d54   :  { %10425 = vmatpush3.bf16.msra.mxu1 %v8327_v38 }
0x2d55   :  { %10436 = vmatprep.subr.bf16.mxu1 %v11212_v0 }
0x2d57   :  { %v8448_v16 = vpop.permute.xlu1 %8447 }
0x2d5a   :  { %v11189_v10 = vpop.eup %11188 }
0x2d5b   :  { %v8323_v3 = vmul.f32 %v11189_v10, %v13671_v2  ;;  %v11191_v32 = vpop.eup %11190 }
0x2d5c   :  { %v11193_v62 = vpop.eup %11192  ;;  %v8445_v20 = vmul.f32 %v11191_v32, %v13665_v36 }
0x2d5d   :  { %v8325_v49 = vpack.c.bf16 %v8324_v61, %v8323_v3  ;;  %v8444_v28 = vmul.f32 %v11193_v62, %v13657_v15 }
0x2d5f   :  { %10427 = vmatmul.mubr.msk.bf16.vlgmr.msra.gmra.mrb[240].mxu1 %vm284_vm3, %v8325_v49  ;;  %v8446_v8 = vpack.c.bf16 %v8445_v20, %v8444_v28 }
0x2d60   :  { %10437 = vmatpush3.bf16.msra.mxu1 %v8448_v16  ;;  %10438 = vmatprep.mubr.msk.bf16.mxu1 %vm11213_vm0, %v11212_v0 }
0x2d61   :  { %10450 = vmatprep.subr.bf16.mxu1 %v11212_v0 }
0x2d67   :  { %10439 = vmatmul.mubr.msk.bf16.vlgmr.msra.gmra.mrb[244].mxu1 %vm284_vm3, %v8446_v8 }
0x2d68   :  { %10454 = vmatprep.mubr.msk.bf16.mxu1 %vm11213_vm0, %v11212_v0 }
0x2d76   :  { %v13722_v5 = vpop.f32.mrb[216].mxu1 }
0x2d77   :  { %v10356_v53 = vpop.f32.mrb[217].mxu1 }
0x2d78   :  { %v13724_v2 = vpop.f32.mrb[218].mxu1 }
0x2d79   :  { %v10357_v50 = vpop.f32.mrb[219].mxu1 }
0x2de9   :  { %v7761_v34 = vpop.f32.mrb[220].mxu1 }
0x2dea   :  { %v10368_v42 = vpop.f32.mrb[221].mxu1 }
0x2deb   :  { %v7764_v56 = vpop.f32.mrb[222].mxu1 }
0x2dec   :  { %v10669_v36 = vpack.i.bf16 %v7764_v56, %v7761_v34  ;;  %v10369_v57 = vpop.f32.mrb[223].mxu1 }
0x2dee   :  { %10670 = vrot.lane.b32.xlu1 %v10669_v36, %s11221_s26 }
0x2df1   :  { %v7882_v15 = vpop.f32.mrb[224].mxu1 }
0x2df2   :  { %v10380_v54 = vpop.f32.mrb[225].mxu1 }
0x2df3   :  { %v7885_v7 = vpop.f32.mrb[226].mxu1 }
0x2df4   :  { %v10674_v29 = vpack.i.bf16 %v7885_v7, %v7882_v15  ;;  %v10381_v35 = vpop.f32.mrb[227].mxu1 }
0x2df6   :  { %10675 = vrot.lane.b32.xlu1 %v10674_v29, %s11222_s27 }
0x2df9   :  { %v8003_v9 = vpop.f32.mrb[228].mxu1 }
0x2dfa   :  { %v10392_v46 = vpop.f32.mrb[229].mxu1 }
0x2dfb   :  { %v8006_v47 = vpop.f32.mrb[230].mxu1 }
0x2dfc   :  { %v10679_v55 = vpack.i.bf16 %v8006_v47, %v8003_v9  ;;  %v10393_v60 = vpop.f32.mrb[231].mxu1  ;;  %v9289_v47 = vld [vmem:[%s13837_s9 + $0x17] ss:$0 sm:$0xff] }
0x2dfe   :  { %10680 = vrot.lane.b32.xlu1 %v10679_v55, %s11223_s28 }
0x2e01   :  { %v8124_v12 = vpop.f32.mrb[232].mxu1 }
0x2e02   :  { %v10404_v58 = vpop.f32.mrb[233].mxu1 }
0x2e03   :  { %v8127_v59 = vpop.f32.mrb[234].mxu1 }
0x2e04   :  { %v10684_v22 = vpack.i.bf16 %v8127_v59, %v8124_v12  ;;  %v10405_v1 = vpop.f32.mrb[235].mxu1 }
0x2e06   :  { %10685 = vrot.lane.b32.xlu0 %v10684_v22, %s11224_s29 }
0x2e11   :  { %v8245_v37 = vpop.f32.mrb[236].mxu1 }
0x2e12   :  { %v10416_v18 = vpop.f32.mrb[237].mxu1 }
0x2e13   :  { %v8248_v30 = vpop.f32.mrb[238].mxu1 }
0x2e14   :  { %v10689_v24 = vpack.i.bf16 %v8248_v30, %v8245_v37  ;;  %v10417_v48 = vpop.f32.mrb[239].mxu1 }
0x2e16   :  { %10690 = vrot.lane.b32.xlu1 %v10689_v24, %s11225_s30 }
0x2e32   :  { %v8366_v51 = vpop.f32.mrb[240].mxu1 }
0x2e33   :  { %v10428_v44 = vpop.f32.mrb[241].mxu1 }
0x2e34   :  { %v8369_v6 = vpop.f32.mrb[242].mxu1 }
0x2e35   :  { %v10694_v43 = vpack.i.bf16 %v8369_v6, %v8366_v51  ;;  %v10429_v25 = vpop.f32.mrb[243].mxu1 }
0x2e37   :  { %10695 = vrot.lane.b32.xlu0 %v10694_v43, %s11226_s22 }
0x2e3a   :  { %v8487_v21 = vpop.f32.mrb[244].mxu1 }
0x2e3b   :  { %v10440_v11 = vpop.f32.mrb[245].mxu1 }
0x2e3c   :  { %v8490_v13 = vpop.f32.mrb[246].mxu1  ;;  %v10772_v11 = vld [vmem:[%s13840_s7 + $0x60] sm:$0xff]  }
0x2e3d   :  { %v10699_v23 = vpack.i.bf16 %v8490_v13, %v8487_v21  ;;  %v10441_v33 = vpop.f32.mrb[247].mxu1  ;;  %v10771_v21 = vld [vmem:[%s13839_s6 + $0x38] sm:$0xff]   ;;  %v10773_v13 = vld [vmem:[%s13840_s7 + $0x68] sm:$0xff]  }
0x2e3f   :  { %10700 = vrot.lane.b32.xlu1 %v10699_v23, %s13848_s24 }
0x2e60   :  { %v10671_v26 = vpop.permute.xlu1 %10670 }
0x2e61   :  { %v10673_v17 = vunpack.i.h.bf16 %v10671_v26  ;;  %v10672_v40 = vunpack.i.l.bf16 %v10671_v26 }
0x2e63   :  { %v8551_v32 = vsel %vm236_vm2, %v13724_v2, %v10673_v17  ;;  %v8550_v16 = vsel %vm236_vm2, %v13722_v5, %v10672_v40 }
0x2e68   :  { %v10676_v31 = vpop.permute.xlu1 %10675 }
0x2e69   :  { %v10678_v45 = vunpack.i.h.bf16 %v10676_v31  ;;  %v10677_v39 = vunpack.i.l.bf16 %v10676_v31 }
0x2e6b   :  { %v8553_v28 = vsel %vm1260_vm4, %v8551_v32, %v10678_v45  ;;  %v8552_v8 = vsel %vm1260_vm4, %v8550_v16, %v10677_v39  ;;  %v9293_v45 = vld [vmem:[%s13837_s9 + $0x20] ss:$0 sm:$0xff]  ;;  %v10774_v16 = vld [vmem:[%s13840_s7 + $0x70] sm:$0xff]  }
0x2e70   :  { %v10681_v4 = vpop.permute.xlu1 %10680 }
0x2e71   :  { %v10683_v19 = vunpack.i.h.bf16 %v10681_v4  ;;  %v10682_v10 = vunpack.i.l.bf16 %v10681_v4 }
0x2e73   :  { %v8555_v34 = vsel %vm1263_vm5, %v8553_v28, %v10683_v19  ;;  %v8554_v42 = vsel %vm1263_vm5, %v8552_v8, %v10682_v10  ;;  %v9294_v10 = vld [vmem:[%s13837_s9 + $0x2a] ss:$0 sm:$0xff] }
0x2e78   :  { %v10686_v41 = vpop.permute.xlu0 %10685 }
0x2e79   :  { %v10688_v3 = vunpack.i.h.bf16 %v10686_v41  ;;  %v10687_v49 = vunpack.i.l.bf16 %v10686_v41 }
0x2e7b   :  { %v8557_v56 = vsel %vm284_vm3, %v8555_v34, %v10688_v3  ;;  %v8556_v36 = vsel %vm284_vm3, %v8554_v42, %v10687_v49 }
0x2e88   :  { %v10691_v38 = vpop.permute.xlu1 %10690 }
0x2e89   :  { %v10693_v62 = vunpack.i.h.bf16 %v10691_v38  ;;  %v10692_v20 = vunpack.i.l.bf16 %v10691_v38 }
0x2e8b   :  { %v8558_v57 = vsel %vm1268_vm6, %v8556_v36, %v10692_v20  ;;  %v8559_v5 = vsel %vm1268_vm6, %v8557_v56, %v10693_v62  ;;  %v10775_v62 = vld [vmem:[%s13840_s7 + $0x78] sm:$0xff]   ;;  %v9299_v20 = vld [vmem:[%s13837_s9 + $0x2f] ss:$0 sm:$0xff] }
0x2ea9   :  { %v10696_v61 = vpop.permute.xlu0 %10695 }
0x2eaa   :  { %v10698_v53 = vunpack.i.h.bf16 %v10696_v61  ;;  %v10697_v50 = vunpack.i.l.bf16 %v10696_v61 }
0x2eac   :  { %v8560_v7 = vsel %vm1271_vm7, %v8558_v57, %v10697_v50  ;;  %v8561_v29 = vsel %vm1271_vm7, %v8559_v5, %v10698_v53  ;;  %v9311_v57 = vld [vmem:[%s13837_s9 + $0x33] ss:$0 sm:$0xff] }
0x2eb1   :  { %v10701_v2 = vpop.permute.xlu1 %10700 }
0x2eb2   :  { %v10703_v15 = vunpack.i.h.bf16 %v10701_v2  ;;  %v10702_v54 = vunpack.i.l.bf16 %v10701_v2 }
0x2eb4   :  { %v8562_v35 = vsel %vm1274_vm8, %v8560_v7, %v10702_v54  ;;  %v8563_v9 = vsel %vm1274_vm8, %v8561_v29, %v10703_v15 }
0x2eb5   :  { %v8570_v46 = vpack.c.bf16 %v8563_v9, %v8562_v35 }
0x2eb7   :  { %10447 = vmatmul.mubr.msk.bf16.vlgmr.msra.gmra.mrb[252].mxu0 %vm62_vm1, %v8570_v46 }
0x2eb8   :  { %10466 = vmatprep.mubr.msk.bf16.mxu0 %vm11213_vm0, %v11212_v0  ;;  %10459 = vmatpush3.bf16.msra.mxu0 %v10772_v11 }
0x2eb9   :  { %10460 = vmatprep.subr.bf16.mxu0 %v11212_v0 }
0x2ebc   :  { %10461 = vmatpush3.bf16.msra.mxu0 %v10773_v13 }
0x2ebd   :  { %10462 = vmatprep.subr.bf16.mxu0 %v11212_v0 }
0x2ec0   :  { %10463 = vmatpush3.bf16.msra.mxu0 %v10774_v16 }
0x2ec1   :  { %10464 = vmatprep.subr.bf16.mxu0 %v11212_v0 }
0x2ec4   :  { %10465 = vmatpush3.bf16.msra.mxu0 %v10775_v62 }
0x2f8a   :  { %v8624_v55 = vpop.f32.mrb[252].mxu0 }
0x2f8b   :  { %v8625_v60 = vadd.f32 %v9289_v47, %v8624_v55  ;;  %v10448_v12 = vpop.f32.mrb[253].mxu0 }
0x2f8c   :  { %v8627_v58 = vpop.f32.mrb[254].mxu0 }
0x2f8d   :  { %v8631_v59 = vadd.f32 %v8625_v60, %v13410_v14  ;;  %v8628_v22 = vadd.f32 %v9289_v47, %v8627_v58  ;;  %v10449_v1 = vpop.f32.mrb[255].mxu0 }
0x2f8f   :  { %v8632_v37 = vadd.f32 %v8628_v22, %v13412_v52  ;;  %v8635_v18 = vsel %vm62_vm1, %v8631_v59, 0.0  ;;  %v10770_v52 = vld [vmem:[%s13839_s6 + $0x30] sm:$0xff]  }
0x2f90   :  { %8636 = vadd.xlane.f32.xlu0 %v8635_v18  ;;  %10451 = vmatpush3.bf16.msra.mxu1 %v10770_v52  ;;  %v9317_v52 = vld [vmem:[%s13837_s9 + $0x21] ss:$0 sm:$0xff] }
0x2f91   :  { %v8638_v30 = vsel %vm62_vm1, %v8632_v37, 0.0  ;;  %10452 = vmatprep.subr.bf16.mxu1 %v11212_v0 }
0x2f92   :  { %8639 = vadd.xlane.f32.xlu1 %v8638_v30 }
0x2f94   :  { %10453 = vmatpush3.bf16.msra.mxu1 %v10771_v21 }
0x2f95   :  { %10470 = vmatprep.subr.bf16.mxu1 %v11212_v0 }
0x301d   :  { %v8637_v24 = vpop.xlane.xlu0 %8636 }
0x301e   :  { %v8641_v48 = vmul.f32 0.03125, %v8637_v24 }
0x301f   :  { %v8640_v63 = vpop.xlane.xlu1 %8639 }
0x3020   :  { %v8643_v51 = vsub.f32 %v8631_v59, %v8641_v48  ;;  %v8642_v44 = vmul.f32 0.03125, %v8640_v63  ;;  %v10776_v48 = vld [vmem:[%s13844_s8] sm:$0xff]   ;;  %v10777_v63 = vld [vmem:[%s13844_s8 + $0x8] sm:$0xff]  }
0x3022   :  { %v8644_v6 = vsub.f32 %v8632_v37, %v8642_v44  ;;  %v8645_v27 = vmul.f32 %v8643_v51, %v8643_v51 }
0x3024   :  { %v8647_v43 = vsel %vm62_vm1, %v8645_v27, 0.0  ;;  %v8646_v14 = vmul.f32 %v8644_v6, %v8644_v6 }
0x3025   :  { %8648 = vadd.xlane.f32.xlu0 %v8647_v43 }
0x3026   :  { %v8650_v25 = vsel %vm62_vm1, %v8646_v14, 0.0 }
0x3029   :  { %8651 = vadd.xlane.f32.xlu0 %v8650_v25 }
0x30b2   :  { %v8649_v23 = vpop.xlane.xlu0 %8648 }
0x30b3   :  { %v8653_v33 = vmul.f32 0.03125, %v8649_v23 }
0x30b5   :  { %v8655_v26 = vadd.f32 1e-05, %v8653_v33 }
0x30b6   :  { %v8652_v31 = vpop.xlane.xlu0 %8651 }
0x30b7   :  { %11194 = vrsqrt.f32 %v8655_v26  ;;  %v8654_v4 = vmul.f32 0.03125, %v8652_v31 }
0x30b9   :  { %v8656_v41 = vadd.f32 1e-05, %v8654_v4 }
0x30bb   :  { %11196 = vrsqrt.f32 %v8656_v41  ;;  %v9319_v41 = vld [vmem:[%s13837_s9 + $0x34] ss:$0 sm:$0xff] }
0x30c1   :  { %v11195_v17 = vpop.eup %11194 }
0x30c2   :  { %v8659_v40 = vmul.f32 %v11195_v17, %v8643_v51 }
0x30c4   :  { %v8665_v38 = vmul.f32 %v9293_v45, %v8659_v40 }
0x30c5   :  { %v11197_v39 = vpop.eup %11196 }
0x30c6   :  { %v8660_v19 = vmul.f32 %v11197_v39, %v8644_v6  ;;  %v8671_v3 = vadd.f32 %v9294_v10, %v8665_v38 }
0x30c8   :  { %v8666_v61 = vmul.f32 %v9293_v45, %v8660_v19 }
0x30ca   :  { %v8672_v49 = vadd.f32 %v9294_v10, %v8666_v61 }
0x30cc   :  { %v8679_v32 = vpack.c.bf16 %v8672_v49, %v8671_v3 }
0x30ce   :  { %10455 = vmatmul.mubr.msk.bf16.vlgmr.msra.gmra.mrb[248].mxu1 %vm62_vm1, %v8679_v32 }
0x30cf   :  { %10474 = vmatprep.mubr.msk.bf16.mxu1 %vm11213_vm0, %v11212_v0  ;;  %10471 = vmatpush3.bf16.msra.mxu1 %v10776_v48 }
0x30d0   :  { %10472 = vmatprep.subr.bf16.mxu1 %v11212_v0  ;;  %v9318_v0 = vld [vmem:[%s13837_s9 + $0x2b] ss:$0 sm:$0xff] }
0x30d3   :  { %10473 = vmatpush3.bf16.msra.mxu1 %v10777_v63 }
0x31a1   :  { %v8733_v28 = vpop.f32.mrb[248].mxu1 }
0x31a2   :  { %v8734_v8 = vadd.f32 %v9299_v20, %v8733_v28  ;;  %v10456_v53 = vpop.f32.mrb[249].mxu1 }
0x31a3   :  { %v8736_v50 = vpop.f32.mrb[250].mxu1 }
0x31a4   :  { %v8737_v34 = vadd.f32 %v9299_v20, %v8736_v50  ;;  %v10457_v42 = vpop.f32.mrb[251].mxu1  ;;  %v8740_v56 = vmax.f32 %v8734_v8, 0.0 }
0x31a6   :  { %v8741_v36 = vmax.f32 %v8737_v34, 0.0 }
0x31a8   :  { %v8752_v2 = vpack.c.bf16 %v8741_v36, %v8740_v56 }
0x31aa   :  { %10467 = vmatmul.mubr.msk.bf16.vlgmr.msra.gmra.mrb[0].mxu0 %vm1493_vm9, %v8752_v2 }
0x327d   :  { %v8818_v5 = vpop.f32.mrb[0].mxu0 }
0x327e   :  { %v8819_v15 = vadd.f32 %v9311_v57, %v8818_v5  ;;  %v10468_v54 = vpop.f32.mrb[1].mxu0 }
0x327f   :  { %v8821_v7 = vpop.f32.mrb[2].mxu0 }
0x3280   :  { %v8825_v29 = vadd.f32 %v8819_v15, %v8671_v3  ;;  %v8822_v35 = vadd.f32 %v9311_v57, %v8821_v7  ;;  %v10469_v9 = vpop.f32.mrb[3].mxu0 }
0x3282   :  { %v8826_v46 = vadd.f32 %v8822_v35, %v8672_v49  ;;  %v8829_v47 = vsel %vm62_vm1, %v8825_v29, 0.0 }
0x3283   :  { %8830 = vadd.xlane.f32.xlu1 %v8829_v47 }
0x3284   :  { %v8832_v55 = vsel %vm62_vm1, %v8826_v46, 0.0 }
0x3285   :  { %8833 = vadd.xlane.f32.xlu0 %v8832_v55 }
0x3310   :  { %v8831_v60 = vpop.xlane.xlu1 %8830 }
0x3311   :  { %v8835_v12 = vmul.f32 0.03125, %v8831_v60 }
0x3312   :  { %v8834_v58 = vpop.xlane.xlu0 %8833 }
0x3313   :  { %v8837_v59 = vsub.f32 %v8825_v29, %v8835_v12  ;;  %v8836_v22 = vmul.f32 0.03125, %v8834_v58 }
0x3315   :  { %v8838_v1 = vsub.f32 %v8826_v46, %v8836_v22  ;;  %v8839_v37 = vmul.f32 %v8837_v59, %v8837_v59 }
0x3317   :  { %v8841_v18 = vsel %vm62_vm1, %v8839_v37, 0.0  ;;  %v8840_v30 = vmul.f32 %v8838_v1, %v8838_v1 }
0x3318   :  { %8842 = vadd.xlane.f32.xlu1 %v8841_v18 }
0x3319   :  { %v8844_v24 = vsel %vm62_vm1, %v8840_v30, 0.0 }
0x331a   :  { %8845 = vadd.xlane.f32.xlu0 %v8844_v24 }
0x33a5   :  { %v8843_v51 = vpop.xlane.xlu1 %8842 }
0x33a6   :  { %v8847_v44 = vmul.f32 0.03125, %v8843_v51 }
0x33a7   :  { %v8846_v6 = vpop.xlane.xlu0 %8845 }
0x33a8   :  { %v8849_v27 = vadd.f32 1e-05, %v8847_v44  ;;  %v8848_v43 = vmul.f32 0.03125, %v8846_v6 }
0x33aa   :  { %11198 = vrsqrt.f32 %v8849_v27  ;;  %v8850_v14 = vadd.f32 1e-05, %v8848_v43 }
0x33ac   :  { %11200 = vrsqrt.f32 %v8850_v14 }
0x33b4   :  { %v11199_v25 = vpop.eup %11198 }
0x33b5   :  { %v8853_v21 = vmul.f32 %v11199_v25, %v8837_v59 }
0x33b6   :  { %v11201_v11 = vpop.eup %11200 }
0x33b7   :  { %v8859_v13 = vmul.f32 %v9317_v52, %v8853_v21  ;;  %v8854_v23 = vmul.f32 %v11201_v11, %v8838_v1 }
0x33b9   :  { %v8860_v33 = vmul.f32 %v9317_v52, %v8854_v23  ;;  %v8865_v26 = vadd.f32 %v9318_v0, %v8859_v13 }
0x33bb   :  { %v8866_v31 = vadd.f32 %v9318_v0, %v8860_v33 }
0x33bd   :  { %v8867_v4 = vpack.c.bf16 %v8866_v31, %v8865_v26 }
0x33bf   :  { %10475 = vmatmul.mubr.msk.bf16.vlgmr.msra.gmra.mrb[252].mxu1 %vm62_vm1, %v8867_v4 }
0x3492   :  { %v8926_v17 = vpop.f32.mrb[252].mxu1 }
0x3493   :  { %v8927_v40 = vadd.f32 %v9319_v41, %v8926_v17  ;;  %v10476_v45 = vpop.f32.mrb[253].mxu1 }
0x3494   :  { %v8929_v39 = vpop.f32.mrb[254].mxu1 }
0x3495   :  { %8933 = vst [vmem:[%s13845_s10] sm:$0xff] %v8927_v40  ;;  %v8930_v38 = vadd.f32 %v9319_v41, %v8929_v39  ;;  %v10477_v19 = vpop.f32.mrb[255].mxu1 }
0x3497   :  { %8934 = vst [vmem:[%s13845_s10 + $0x8] sm:$0xff] %v8930_v38 }

</bundles_post_ra>
